<compile_context>
chip_gen: v6e
topology: v6e:2x2x1
jax: 0.10.0
libtpu: 0.0.40
codegen_flags: <defaults>
</compile_context>

<pallas_src>
import functools
import math

import jax
import jax.numpy as jnp
import numpy as np
from jax.experimental import pallas as pl
from jax.experimental.pallas import tpu as pltpu

EPS = 1e-5  # torch BatchNorm2d default eps

_COMPILER_PARAMS = pltpu.CompilerParams(
    dimension_semantics=("arbitrary",),          # blocks carry state -> sequential
    vmem_limit_bytes=48 * 1024 * 1024,           # actual use ~12 MB; well under v7x's 64 MiB/TC
)


def _geometry(s, c, pad):
    """Aligned layout of the circularly padded activation scratch.

    Core region: rows [row0, row0+s) (row0 multiple of 8), lanes [lane0, lane0+s*c)
    (lane0 multiple of 128).  Total allocation rounded up to (8, 128)."""
    row0 = ((pad + 7) // 8) * 8
    rows_total = ((row0 + s + pad + 7) // 8) * 8
    lane0 = ((pad * c + 127) // 128) * 128
    lanes_total = ((lane0 + s * c + pad * c + 127) // 128) * 128
    return row0, rows_total, lane0, lanes_total


def _channel_pool(v, group, ngroups):
    """v: (1, ngroups*group) f32 in merged (position, channel) lane order.  Ring-sum the
    ngroups lanes sharing the same within-group offset and broadcast the per-channel result
    to every lane.  Correct only because ngroups*group equals v's lane extent."""
    assert v.shape[-1] == group * ngroups
    if ngroups & (ngroups - 1) == 0:             # log2 doubling tree: 4 rolls for 16 groups
        out = v
        shift = group
        while shift < group * ngroups:
            out = out + pltpu.roll(out, shift=shift, axis=1)
            shift *= 2
        return out
    out = v                                       # fallback: linear ring sum
    for t in range(1, ngroups):
        out = out + pltpu.roll(v, shift=t * group, axis=1)
    return out


# ---------------- fused Pallas kernel (one grid step == one residual block) ----------------

def _fused_kernel(xm_ref, w0_ref, b0_ref, toep_ref, cb_ref, g_ref, bt_ref,
                  w1_ref, b1_ref, w2_ref, b2_ref, o_ref,
                  h_ref, hp_ref, lhs_ref,
                  *, bsz, s, c, k, pad, row0, lane0, lanes_total):
    blk = pl.program_id(0)
    last = pl.num_programs(0) - 1
    n = bsz * s * s                    # BatchNorm population count (B*H*W)
    sc = s * c                         # merged (x, channel) lane width
    pc = pad * c
    bf = jnp.bfloat16

    # Block 0: zero the aligned pad scratch once (dead lanes must stay 0, not stale VMEM)
    # and lift the input with fc0 (Linear(3 -> width) as a merged block-diagonal matmul).
    @pl.when(blk == 0)
    def _init():
        hp_ref[...] = jnp.zeros_like(hp_ref)
        h0 = jnp.dot(xm_ref[...].astype(bf), w0_ref[...],
                     preferred_element_type=jnp.float32) + b0_ref[...]
        h_ref[...] = h0

    hb = h_ref[...].reshape(bsz, s, sc).astype(bf)                     # (B, S, S*C) bf16

    # Circular pad into the (8,128)-aligned bf16 scratch (core store is fully aligned).
    hp_ref[:, row0:row0 + s, lane0:lane0 + sc] = hb
    hp_ref[:, row0 - pad:row0, lane0:lane0 + sc] = hb[:, s - pad:, :]
    hp_ref[:, row0 + s:row0 + s + pad, lane0:lane0 + sc] = hb[:, :pad, :]
    hp_ref[:, :, lane0 - pc:lane0] = hp_ref[:, :, lane0 + sc - pc:lane0 + sc]
    hp_ref[:, :, lane0 + sc:lane0 + sc + pc] = hp_ref[:, :, lane0:lane0 + pc]

    # Stage the 13 row bands contiguously so the circular conv is ONE MXU matmul
    # (K accumulates inside the MXU; a single result drain instead of 13).
    for ky in range(k):
        lhs_ref[:, ky * lanes_total:(ky + 1) * lanes_total] = hp_ref[
            :, row0 - pad + ky:row0 - pad + ky + s, :].reshape(bsz * s, lanes_total)

    # x1 + x2 (1x1 conv folded into the center tap) + bias, f32 accumulate.
    acc = jnp.dot(lhs_ref[...], toep_ref[...],
                  preferred_element_type=jnp.float32) + cb_ref[...]    # (B*S, S*C) f32

    # BatchNorm2d, training-mode forward: exact per-channel stats over all B*S*S elements.
    colsum = jnp.sum(acc, axis=0, keepdims=True)                       # (1, S*C)
    mean = _channel_pool(colsum, c, s) * (1.0 / n)
    cen = acc - mean
    colsq = jnp.sum(cen * cen, axis=0, keepdims=True)
    var = _channel_pool(colsq, c, s) * (1.0 / n)                       # biased variance
    z = cen * jax.lax.rsqrt(var + EPS) * g_ref[...] + bt_ref[...]

    # Blocks 0..2: ReLU and carry to the next grid step.
    @pl.when(blk < last)
    def _carry():
        h_ref[...] = jnp.maximum(z, 0.0)

    # Block 3: projection head fc1 + ReLU + fc2 (merged block-diagonal) and output store.
    @pl.when(blk == last)
    def _head():
        h1 = jnp.dot(z.astype(bf), w1_ref[...],
                     preferred_element_type=jnp.float32) + b1_ref[...]   # (B*S, S*128)
        h1 = jnp.maximum(h1, 0.0)
        y = jnp.dot(h1.astype(bf), w2_ref[...],
                    preferred_element_type=jnp.float32) + b2_ref[...]    # (B*S, S)
        o_ref[...] = y.astype(o_ref.dtype)


# ---------------- host-side parameter packing (NumPy, one-time) ----------------

def pack_params(params, width, modes1, s):
    """Repack natural PyTorch-style parameters into the merged-lane operands the fused kernel
    consumes.  Matmul weights -> bf16; biases / BN affine stay f32.  The 1x1 Conv1d is folded
    into the circular conv's center tap, and the block-Toeplitz slabs are zero-padded to the
    aligned 512-lane band layout."""
    k = modes1 + 1
    pad = 6
    c = width
    assert pad <= s, "circular pad must not exceed the spatial size"
    row0, rows_total, lane0, lanes_total = _geometry(s, c, pad)
    lorig = lane0 - pad * c            # lane of padded x-position 0, channel 0

    def np32(a):
        return np.asarray(a, np.float32)

    def block_diag(w, groups):
        w = np32(w)
        a, b = w.shape
        out = np.zeros((groups * a, groups * b), np.float32)
        for g in range(groups):
            out[g * a:(g + 1) * a, g * b:(g + 1) * b] = w
        return out

    def tile_cols(v, groups):
        return np.tile(np32(v), (1, groups))

    # Fold Conv1d(width, width, 1) into the (ky=pad, kx=pad) tap of the circular conv (f32).
    wc = np32(params["conv_w"]).copy()                   # (4, k, k, cin, cout)
    wc[:, pad, pad, :, :] += np32(params["w_w"])         # w_w: (4, cin, cout)

    # Block-Toeplitz slabs in the aligned band layout, one (lanes_total, S*C) slab per
    # (layer, ky):  slab[lorig + (xo+kx)*c + ci, xo*c + co] = wc[layer, ky, kx, ci, co].
    slab = np.zeros((4, k, lanes_total, s, c), np.float32)
    for xo in range(s):
        for kx in range(k):
            l0 = lorig + (xo + kx) * c
            slab[:, :, l0:l0 + c, xo, :] = wc[:, :, kx, :, :]
    conv_toep = slab.reshape(4, k * lanes_total, s * c)

    def stack4(fn, key):
        return np.stack([fn(np32(params[key])[i], s) for i in range(4)])

    return {
        "fc0_wbd": jnp.asarray(block_diag(params["fc0_w"], s), jnp.bfloat16),
        "fc0_bm": jnp.asarray(tile_cols(params["fc0_b"], s), jnp.float32),
        "conv_toep": jnp.asarray(conv_toep, jnp.bfloat16),               # (4, 13*512, S*C)
        "conv_bm": jnp.asarray(stack4(tile_cols, "w_b"), jnp.float32),   # (4, 1, S*C)
        "bn_gm": jnp.asarray(stack4(tile_cols, "bn_g"), jnp.float32),
        "bn_bm": jnp.asarray(stack4(tile_cols, "bn_b"), jnp.float32),
        "fc1_wbd": jnp.asarray(block_diag(params["fc1_w"], s), jnp.bfloat16),
        "fc1_bm": jnp.asarray(tile_cols(params["fc1_b"], s), jnp.float32),
        "fc2_wbd": jnp.asarray(block_diag(params["fc2_w"], s), jnp.bfloat16),
        "fc2_b": jnp.asarray(params["fc2_b"], jnp.float32),
    }


# ---------------- forward wrapper ----------------

def simple_block_2d(x, packed, width, modes1):
    b, s, s2, cin = x.shape
    assert s == s2
    k = modes1 + 1
    pad = 6                                    # module hardcodes padding=6
    c = width
    row0, rows_total, lane0, lanes_total = _geometry(s, c, pad)
    xm = x.reshape(b * s, s * cin)             # merged rows = (batch, dim1), lanes = (dim2, ch)

    def full(a):
        nd = a.ndim
        return pl.BlockSpec(tuple(a.shape), lambda i, _nd=nd: (0,) * _nd)

    def per_layer(a):                          # leading dim = layer, indexed by the grid step
        nz = a.ndim - 1
        return pl.BlockSpec((None,) + tuple(a.shape[1:]),
                            lambda i, _nz=nz: (i,) + (0,) * _nz)

    args = (xm, packed["fc0_wbd"], packed["fc0_bm"], packed["conv_toep"],
            packed["conv_bm"], packed["bn_gm"], packed["bn_bm"],
            packed["fc1_wbd"], packed["fc1_bm"], packed["fc2_wbd"], packed["fc2_b"])
    in_specs = [full(xm), full(packed["fc0_wbd"]), full(packed["fc0_bm"]),
                per_layer(packed["conv_toep"]), per_layer(packed["conv_bm"]),
                per_layer(packed["bn_gm"]), per_layer(packed["bn_bm"]),
                full(packed["fc1_wbd"]), full(packed["fc1_bm"]),
                full(packed["fc2_wbd"]), full(packed["fc2_b"])]

    out = pl.pallas_call(
        functools.partial(_fused_kernel, bsz=b, s=s, c=c, k=k, pad=pad,
                          row0=row0, lane0=lane0, lanes_total=lanes_total),
        out_shape=jax.ShapeDtypeStruct((b * s, s), jnp.float32),
        grid=(4,),                                               # one grid step per residual block
        in_specs=in_specs,
        out_specs=pl.BlockSpec((b * s, s), lambda i: (0, 0)),
        scratch_shapes=[
            pltpu.VMEM((b * s, s * c), jnp.float32),             # activation carry across blocks
            pltpu.VMEM((b, rows_total, lanes_total), jnp.bfloat16),   # aligned circular-pad scratch
            pltpu.VMEM((b * s, k * lanes_total), jnp.bfloat16),  # staged conv LHS (13 bands)
        ],
        compiler_params=_COMPILER_PARAMS,
    )(*args)
    return out.reshape(b, s, s, 1)


# ---------------- parameters (deterministic, torch-style fan-in uniform) ----------------

def init_params(key, width, modes1):
    k = modes1 + 1

    def uniform(kk, shape, fan_in):
        bound = 1.0 / math.sqrt(fan_in)
        return jax.random.uniform(kk, shape, jnp.float32, -bound, bound)

    keys = iter(jax.random.split(key, 12))
    p = {}
    p["fc0_w"] = uniform(next(keys), (3, width), 3)                    # Linear(3, width)
    p["fc0_b"] = uniform(next(keys), (1, width), 3)
    # Conv2d(width, width, k, padding=6, circular, bias=False): (layer, ky, kx, cin, cout)
    p["conv_w"] = uniform(next(keys), (4, k, k, width, width), width * k * k)
    # Conv1d(width, width, 1): pointwise linear + bias
    p["w_w"] = uniform(next(keys), (4, width, width), width)
    p["w_b"] = uniform(next(keys), (4, 1, width), width)
    # BatchNorm2d affine params (torch defaults)
    p["bn_g"] = jnp.ones((4, 1, width), jnp.float32)
    p["bn_b"] = jnp.zeros((4, 1, width), jnp.float32)
    p["fc1_w"] = uniform(next(keys), (width, 128), width)              # Linear(width, 128)
    p["fc1_b"] = uniform(next(keys), (1, 128), width)
    p["fc2_w"] = uniform(next(keys), (128, 1), 128)                    # Linear(128, 1)
    p["fc2_b"] = uniform(next(keys), (1, 1), 128)
    return p


# ---------------- pure-JAX reference (faithful structure: separate conv / 1x1 / BN) ----------------

def reference_forward(x, params, width, modes1):
    k = modes1 + 1
    pad = 6
    b, s, _, cin = x.shape
    n = b * s * s
    bf = jnp.bfloat16
    xf = x.reshape(n, cin)
    h = jnp.dot(xf.astype(bf), params["fc0_w"].astype(bf),
                preferred_element_type=jnp.float32) + params["fc0_b"]
    for i in range(4):
        hs = h.astype(bf).reshape(b, s, s, width)
        hp = jnp.pad(hs, ((0, 0), (pad, pad), (pad, pad), (0, 0)), mode="wrap")
        cols = [hp[:, ky:ky + s, kx:kx + s, :] for ky in range(k) for kx in range(k)]
        patches = jnp.concatenate(cols, axis=-1).reshape(n, k * k * width)
        wflat = params["conv_w"][i].reshape(k * k * width, width).astype(bf)
        x1 = jnp.dot(patches, wflat, preferred_element_type=jnp.float32)
        x2 = jnp.dot(h.astype(bf), params["w_w"][i].astype(bf),
                     preferred_element_type=jnp.float32) + params["w_b"][i]
        z = x1 + x2
        mean = jnp.mean(z, axis=0, keepdims=True)
        var = jnp.mean(jnp.square(z - mean), axis=0, keepdims=True)     # biased variance
        z = (z - mean) * jax.lax.rsqrt(var + EPS) * params["bn_g"][i] + params["bn_b"][i]
        if i < 3:
            z = jnp.maximum(z, 0.0)
        h = z
    h1 = jnp.dot(h.astype(bf), params["fc1_w"].astype(bf),
                 preferred_element_type=jnp.float32) + params["fc1_b"]
    h1 = jnp.maximum(h1, 0.0)
    y = jnp.dot(h1.astype(bf), params["fc2_w"].astype(bf),
                preferred_element_type=jnp.float32) + params["fc2_b"]
    return y.reshape(b, s, s, 1)


if __name__ == "__main__":
    B, S = 2, 16
    MODES1 = MODES2 = 12   # kernel_size 13, padding 6 -> shape preserving (needed for x1+x2)
    WIDTH = 16

    key = jax.random.PRNGKey(0)
    pkey, xkey = jax.random.split(key)
    params = init_params(pkey, WIDTH, MODES1)
    packed = pack_params(params, WIDTH, MODES1, S)
    # input: (batchsize, x=s, y=s, c=3) — (a(x,y), x, y)
    x = jax.random.normal(xkey, (B, S, S, 3), jnp.float32)

    fwd = jax.jit(functools.partial(simple_block_2d, width=WIDTH, modes1=MODES1))
    out = jax.block_until_ready(fwd(x, packed))
    assert out.shape == (B, S, S, 1), out.shape

    ref_fn = jax.jit(functools.partial(reference_forward, width=WIDTH, modes1=MODES1))
    ref = jax.block_until_ready(ref_fn(x, params))
    err = float(jnp.max(jnp.abs(out - ref)))
    # Tolerance covers bf16 matmul rounding plus the (kernel-only) bf16 rounding of the
    # 1x1-conv weight folded into the conv center tap.
    if not np.isfinite(err) or err > 2e-2:
        raise AssertionError(f"mismatch vs pure-JAX reference: max abs err = {err}")

    print("KERNEL_OK")
</pallas_src>

<mosaic_0001>
module attributes {stable_mosaic.version = 11 : i64} {
  func.func @_fused_kernel(%arg0: i32, %arg1: memref<32x48xf32, #tpu.memory_space<vmem>>, %arg2: memref<48x256xbf16, #tpu.memory_space<vmem>>, %arg3: memref<1x256xf32, #tpu.memory_space<vmem>>, %arg4: memref<1x6656x256xbf16, #tpu.memory_space<vmem>>, %arg5: memref<1x1x256xf32, #tpu.memory_space<vmem>>, %arg6: memref<1x1x256xf32, #tpu.memory_space<vmem>>, %arg7: memref<1x1x256xf32, #tpu.memory_space<vmem>>, %arg8: memref<256x2048xbf16, #tpu.memory_space<vmem>>, %arg9: memref<1x2048xf32, #tpu.memory_space<vmem>>, %arg10: memref<2048x16xbf16, #tpu.memory_space<vmem>>, %arg11: memref<1x1xf32, #tpu.memory_space<vmem>>, %arg12: memref<32x16xf32, #tpu.memory_space<vmem>>, %arg13: memref<32x256xf32, #tpu.memory_space<vmem>>, %arg14: memref<2x32x512xbf16, #tpu.memory_space<vmem>>, %arg15: memref<32x6656xbf16, #tpu.memory_space<vmem>>) attributes {dimension_semantics = [#tpu.dimension_semantics<arbitrary>], iteration_bounds = array<i64: 4>, scalar_prefetch = 0 : i64, scratch_operands = 3 : i64, tpu.core_type = #tpu.core_type<tc>, window_params = [{pipeline_mode = #tpu.pipeline_mode<synchronous>, transform_indices = @transform_0, window_bounds = array<i64: 32, 48>}, {pipeline_mode = #tpu.pipeline_mode<synchronous>, transform_indices = @transform_1, window_bounds = array<i64: 48, 256>}, {pipeline_mode = #tpu.pipeline_mode<synchronous>, transform_indices = @transform_2, window_bounds = array<i64: 1, 256>}, {transform_indices = @transform_3, window_bounds = array<i64: 1, 6656, 256>}, {transform_indices = @transform_4, window_bounds = array<i64: 1, 1, 256>}, {transform_indices = @transform_5, window_bounds = array<i64: 1, 1, 256>}, {transform_indices = @transform_6, window_bounds = array<i64: 1, 1, 256>}, {pipeline_mode = #tpu.pipeline_mode<synchronous>, transform_indices = @transform_7, window_bounds = array<i64: 256, 2048>}, {pipeline_mode = #tpu.pipeline_mode<synchronous>, transform_indices = @transform_8, window_bounds = array<i64: 1, 2048>}, {pipeline_mode = #tpu.pipeline_mode<synchronous>, transform_indices = @transform_9, window_bounds = array<i64: 2048, 16>}, {pipeline_mode = #tpu.pipeline_mode<synchronous>, transform_indices = @transform_10, window_bounds = array<i64: 1, 1>}, {pipeline_mode = #tpu.pipeline_mode<synchronous>, transform_indices = @transform_11, window_bounds = array<i64: 32, 16>}]} {
    %c0_i32 = arith.constant 0 : i32
    %0 = arith.cmpi eq, %arg0, %c0_i32 : i32
    %1 = arith.extui %0 : i1 to i32
    %c0_i32_0 = arith.constant 0 : i32
    %2 = arith.cmpi ne, %1, %c0_i32_0 : i32
    scf.if %2 {
      %cst_84 = arith.constant 0.000000e+00 : bf16
      %108 = vector.broadcast %cst_84 : bf16 to vector<2x32x512xbf16>
      %c0_85 = arith.constant 0 : index
      %c0_86 = arith.constant 0 : index
      %c0_87 = arith.constant 0 : index
      %109 = vector.load %arg14[%c0_85, %c0_86, %c0_87] : memref<2x32x512xbf16, #tpu.memory_space<vmem>>, vector<2x32x512xbf16>
      tpu.vector_store %arg14[%c0_85, %c0_86, %c0_87], %108 {strides = array<i32>} : memref<2x32x512xbf16, #tpu.memory_space<vmem>>, vector<2x32x512xbf16>,
      %c0_88 = arith.constant 0 : index
      %c0_89 = arith.constant 0 : index
      %110 = vector.load %arg1[%c0_88, %c0_89] : memref<32x48xf32, #tpu.memory_space<vmem>>, vector<32x48xf32>
      %111 = arith.truncf %110 : vector<32x48xf32> to vector<32x48xbf16>
      %c0_90 = arith.constant 0 : index
      %c0_91 = arith.constant 0 : index
      %112 = vector.load %arg2[%c0_90, %c0_91] : memref<48x256xbf16, #tpu.memory_space<vmem>>, vector<48x256xbf16>
      %cst_92 = arith.constant dense<0.000000e+00> : vector<32x256xf32>
      %113 = tpu.matmul %111, %112, %cst_92 {dimension_numbers = #tpu.dot_dimension_numbers<[1], [0], [0], [1], [0, 0, 1, 1], [], []>} : vector<32x48xbf16>, vector<48x256xbf16>, vector<32x256xf32> -> vector<32x256xf32>
      %c0_93 = arith.constant 0 : index
      %c0_94 = arith.constant 0 : index
      %114 = vector.load %arg3[%c0_93, %c0_94] : memref<1x256xf32, #tpu.memory_space<vmem>>, vector<1x256xf32>
      %115 = vector.broadcast %114 : vector<1x256xf32> to vector<32x256xf32>
      %116 = arith.addf %113, %115 : vector<32x256xf32>
      %c0_95 = arith.constant 0 : index
      %c0_96 = arith.constant 0 : index
      %117 = vector.load %arg13[%c0_95, %c0_96] : memref<32x256xf32, #tpu.memory_space<vmem>>, vector<32x256xf32>
      tpu.vector_store %arg13[%c0_95, %c0_96], %116 {strides = array<i32>} : memref<32x256xf32, #tpu.memory_space<vmem>>, vector<32x256xf32>,
    } else {
    }
    %c0 = arith.constant 0 : index
    %c0_1 = arith.constant 0 : index
    %3 = vector.load %arg13[%c0, %c0_1] : memref<32x256xf32, #tpu.memory_space<vmem>>, vector<32x256xf32>
    %4 = vector.shape_cast %3 : vector<32x256xf32> to vector<2x16x256xf32>
    %5 = arith.truncf %4 : vector<2x16x256xf32> to vector<2x16x256xbf16>
    %c0_2 = arith.constant 0 : index
    %c8 = arith.constant 8 : index
    %c128 = arith.constant 128 : index
    %6 = vector.load %arg14[%c0_2, %c8, %c128] : memref<2x32x512xbf16, #tpu.memory_space<vmem>>, vector<2x16x256xbf16>
    tpu.vector_store %arg14[%c0_2, %c8, %c128], %5 {strides = array<i32>} : memref<2x32x512xbf16, #tpu.memory_space<vmem>>, vector<2x16x256xbf16>,
    %7 = vector.extract_strided_slice %5 {offsets = [0, 10, 0], sizes = [2, 6, 256], strides = [1, 1, 1]} : vector<2x16x256xbf16> to vector<2x6x256xbf16>
    %c0_3 = arith.constant 0 : index
    %c2 = arith.constant 2 : index
    %c128_4 = arith.constant 128 : index
    %8 = vector.load %arg14[%c0_3, %c2, %c128_4] : memref<2x32x512xbf16, #tpu.memory_space<vmem>>, vector<2x6x256xbf16>
    tpu.vector_store %arg14[%c0_3, %c2, %c128_4], %7 {strides = array<i32>} : memref<2x32x512xbf16, #tpu.memory_space<vmem>>, vector<2x6x256xbf16>,
    %9 = vector.extract_strided_slice %5 {offsets = [0, 0, 0], sizes = [2, 6, 256], strides = [1, 1, 1]} : vector<2x16x256xbf16> to vector<2x6x256xbf16>
    %c0_5 = arith.constant 0 : index
    %c24 = arith.constant 24 : index
    %c128_6 = arith.constant 128 : index
    %10 = vector.load %arg14[%c0_5, %c24, %c128_6] : memref<2x32x512xbf16, #tpu.memory_space<vmem>>, vector<2x6x256xbf16>
    tpu.vector_store %arg14[%c0_5, %c24, %c128_6], %9 {strides = array<i32>} : memref<2x32x512xbf16, #tpu.memory_space<vmem>>, vector<2x6x256xbf16>,
    %c0_7 = arith.constant 0 : index
    %c0_8 = arith.constant 0 : index
    %c288 = arith.constant 288 : index
    %11 = vector.load %arg14[%c0_7, %c0_8, %c288] : memref<2x32x512xbf16, #tpu.memory_space<vmem>>, vector<2x32x96xbf16>
    %c0_9 = arith.constant 0 : index
    %c0_10 = arith.constant 0 : index
    %c32 = arith.constant 32 : index
    %12 = vector.load %arg14[%c0_9, %c0_10, %c32] : memref<2x32x512xbf16, #tpu.memory_space<vmem>>, vector<2x32x96xbf16>
    tpu.vector_store %arg14[%c0_9, %c0_10, %c32], %11 {strides = array<i32>} : memref<2x32x512xbf16, #tpu.memory_space<vmem>>, vector<2x32x96xbf16>,
    %c0_11 = arith.constant 0 : index
    %c0_12 = arith.constant 0 : index
    %c128_13 = arith.constant 128 : index
    %13 = vector.load %arg14[%c0_11, %c0_12, %c128_13] : memref<2x32x512xbf16, #tpu.memory_space<vmem>>, vector<2x32x96xbf16>
    %c0_14 = arith.constant 0 : index
    %c0_15 = arith.constant 0 : index
    %c384 = arith.constant 384 : index
    %14 = vector.load %arg14[%c0_14, %c0_15, %c384] : memref<2x32x512xbf16, #tpu.memory_space<vmem>>, vector<2x32x96xbf16>
    tpu.vector_store %arg14[%c0_14, %c0_15, %c384], %13 {strides = array<i32>} : memref<2x32x512xbf16, #tpu.memory_space<vmem>>, vector<2x32x96xbf16>,
    %c0_16 = arith.constant 0 : index
    %c2_17 = arith.constant 2 : index
    %c0_18 = arith.constant 0 : index
    %15 = vector.load %arg14[%c0_16, %c2_17, %c0_18] : memref<2x32x512xbf16, #tpu.memory_space<vmem>>, vector<2x16x512xbf16>
    %16 = vector.shape_cast %15 : vector<2x16x512xbf16> to vector<32x512xbf16>
    %c0_19 = arith.constant 0 : index
    %c0_20 = arith.constant 0 : index
    %17 = vector.load %arg15[%c0_19, %c0_20] : memref<32x6656xbf16, #tpu.memory_space<vmem>>, vector<32x512xbf16>
    tpu.vector_store %arg15[%c0_19, %c0_20], %16 {strides = array<i32>} : memref<32x6656xbf16, #tpu.memory_space<vmem>>, vector<32x512xbf16>,
    %c0_21 = arith.constant 0 : index
    %c3 = arith.constant 3 : index
    %c0_22 = arith.constant 0 : index
    %18 = vector.load %arg14[%c0_21, %c3, %c0_22] : memref<2x32x512xbf16, #tpu.memory_space<vmem>>, vector<2x16x512xbf16>
    %19 = vector.shape_cast %18 : vector<2x16x512xbf16> to vector<32x512xbf16>
    %c0_23 = arith.constant 0 : index
    %c512 = arith.constant 512 : index
    %20 = vector.load %arg15[%c0_23, %c512] : memref<32x6656xbf16, #tpu.memory_space<vmem>>, vector<32x512xbf16>
    tpu.vector_store %arg15[%c0_23, %c512], %19 {strides = array<i32>} : memref<32x6656xbf16, #tpu.memory_space<vmem>>, vector<32x512xbf16>,
    %c0_24 = arith.constant 0 : index
    %c4 = arith.constant 4 : index
    %c0_25 = arith.constant 0 : index
    %21 = vector.load %arg14[%c0_24, %c4, %c0_25] : memref<2x32x512xbf16, #tpu.memory_space<vmem>>, vector<2x16x512xbf16>
    %22 = vector.shape_cast %21 : vector<2x16x512xbf16> to vector<32x512xbf16>
    %c0_26 = arith.constant 0 : index
    %c1024 = arith.constant 1024 : index
    %23 = vector.load %arg15[%c0_26, %c1024] : memref<32x6656xbf16, #tpu.memory_space<vmem>>, vector<32x512xbf16>
    tpu.vector_store %arg15[%c0_26, %c1024], %22 {strides = array<i32>} : memref<32x6656xbf16, #tpu.memory_space<vmem>>, vector<32x512xbf16>,
    %c0_27 = arith.constant 0 : index
    %c5 = arith.constant 5 : index
    %c0_28 = arith.constant 0 : index
    %24 = vector.load %arg14[%c0_27, %c5, %c0_28] : memref<2x32x512xbf16, #tpu.memory_space<vmem>>, vector<2x16x512xbf16>
    %25 = vector.shape_cast %24 : vector<2x16x512xbf16> to vector<32x512xbf16>
    %c0_29 = arith.constant 0 : index
    %c1536 = arith.constant 1536 : index
    %26 = vector.load %arg15[%c0_29, %c1536] : memref<32x6656xbf16, #tpu.memory_space<vmem>>, vector<32x512xbf16>
    tpu.vector_store %arg15[%c0_29, %c1536], %25 {strides = array<i32>} : memref<32x6656xbf16, #tpu.memory_space<vmem>>, vector<32x512xbf16>,
    %c0_30 = arith.constant 0 : index
    %c6 = arith.constant 6 : index
    %c0_31 = arith.constant 0 : index
    %27 = vector.load %arg14[%c0_30, %c6, %c0_31] : memref<2x32x512xbf16, #tpu.memory_space<vmem>>, vector<2x16x512xbf16>
    %28 = vector.shape_cast %27 : vector<2x16x512xbf16> to vector<32x512xbf16>
    %c0_32 = arith.constant 0 : index
    %c2048 = arith.constant 2048 : index
    %29 = vector.load %arg15[%c0_32, %c2048] : memref<32x6656xbf16, #tpu.memory_space<vmem>>, vector<32x512xbf16>
    tpu.vector_store %arg15[%c0_32, %c2048], %28 {strides = array<i32>} : memref<32x6656xbf16, #tpu.memory_space<vmem>>, vector<32x512xbf16>,
    %c0_33 = arith.constant 0 : index
    %c7 = arith.constant 7 : index
    %c0_34 = arith.constant 0 : index
    %30 = vector.load %arg14[%c0_33, %c7, %c0_34] : memref<2x32x512xbf16, #tpu.memory_space<vmem>>, vector<2x16x512xbf16>
    %31 = vector.shape_cast %30 : vector<2x16x512xbf16> to vector<32x512xbf16>
    %c0_35 = arith.constant 0 : index
    %c2560 = arith.constant 2560 : index
    %32 = vector.load %arg15[%c0_35, %c2560] : memref<32x6656xbf16, #tpu.memory_space<vmem>>, vector<32x512xbf16>
    tpu.vector_store %arg15[%c0_35, %c2560], %31 {strides = array<i32>} : memref<32x6656xbf16, #tpu.memory_space<vmem>>, vector<32x512xbf16>,
    %c0_36 = arith.constant 0 : index
    %c8_37 = arith.constant 8 : index
    %c0_38 = arith.constant 0 : index
    %33 = vector.load %arg14[%c0_36, %c8_37, %c0_38] : memref<2x32x512xbf16, #tpu.memory_space<vmem>>, vector<2x16x512xbf16>
    %34 = vector.shape_cast %33 : vector<2x16x512xbf16> to vector<32x512xbf16>
    %c0_39 = arith.constant 0 : index
    %c3072 = arith.constant 3072 : index
    %35 = vector.load %arg15[%c0_39, %c3072] : memref<32x6656xbf16, #tpu.memory_space<vmem>>, vector<32x512xbf16>
    tpu.vector_store %arg15[%c0_39, %c3072], %34 {strides = array<i32>} : memref<32x6656xbf16, #tpu.memory_space<vmem>>, vector<32x512xbf16>,
    %c0_40 = arith.constant 0 : index
    %c9 = arith.constant 9 : index
    %c0_41 = arith.constant 0 : index
    %36 = vector.load %arg14[%c0_40, %c9, %c0_41] : memref<2x32x512xbf16, #tpu.memory_space<vmem>>, vector<2x16x512xbf16>
    %37 = vector.shape_cast %36 : vector<2x16x512xbf16> to vector<32x512xbf16>
    %c0_42 = arith.constant 0 : index
    %c3584 = arith.constant 3584 : index
    %38 = vector.load %arg15[%c0_42, %c3584] : memref<32x6656xbf16, #tpu.memory_space<vmem>>, vector<32x512xbf16>
    tpu.vector_store %arg15[%c0_42, %c3584], %37 {strides = array<i32>} : memref<32x6656xbf16, #tpu.memory_space<vmem>>, vector<32x512xbf16>,
    %c0_43 = arith.constant 0 : index
    %c10 = arith.constant 10 : index
    %c0_44 = arith.constant 0 : index
    %39 = vector.load %arg14[%c0_43, %c10, %c0_44] : memref<2x32x512xbf16, #tpu.memory_space<vmem>>, vector<2x16x512xbf16>
    %40 = vector.shape_cast %39 : vector<2x16x512xbf16> to vector<32x512xbf16>
    %c0_45 = arith.constant 0 : index
    %c4096 = arith.constant 4096 : index
    %41 = vector.load %arg15[%c0_45, %c4096] : memref<32x6656xbf16, #tpu.memory_space<vmem>>, vector<32x512xbf16>
    tpu.vector_store %arg15[%c0_45, %c4096], %40 {strides = array<i32>} : memref<32x6656xbf16, #tpu.memory_space<vmem>>, vector<32x512xbf16>,
    %c0_46 = arith.constant 0 : index
    %c11 = arith.constant 11 : index
    %c0_47 = arith.constant 0 : index
    %42 = vector.load %arg14[%c0_46, %c11, %c0_47] : memref<2x32x512xbf16, #tpu.memory_space<vmem>>, vector<2x16x512xbf16>
    %43 = vector.shape_cast %42 : vector<2x16x512xbf16> to vector<32x512xbf16>
    %c0_48 = arith.constant 0 : index
    %c4608 = arith.constant 4608 : index
    %44 = vector.load %arg15[%c0_48, %c4608] : memref<32x6656xbf16, #tpu.memory_space<vmem>>, vector<32x512xbf16>
    tpu.vector_store %arg15[%c0_48, %c4608], %43 {strides = array<i32>} : memref<32x6656xbf16, #tpu.memory_space<vmem>>, vector<32x512xbf16>,
    %c0_49 = arith.constant 0 : index
    %c12 = arith.constant 12 : index
    %c0_50 = arith.constant 0 : index
    %45 = vector.load %arg14[%c0_49, %c12, %c0_50] : memref<2x32x512xbf16, #tpu.memory_space<vmem>>, vector<2x16x512xbf16>
    %46 = vector.shape_cast %45 : vector<2x16x512xbf16> to vector<32x512xbf16>
    %c0_51 = arith.constant 0 : index
    %c5120 = arith.constant 5120 : index
    %47 = vector.load %arg15[%c0_51, %c5120] : memref<32x6656xbf16, #tpu.memory_space<vmem>>, vector<32x512xbf16>
    tpu.vector_store %arg15[%c0_51, %c5120], %46 {strides = array<i32>} : memref<32x6656xbf16, #tpu.memory_space<vmem>>, vector<32x512xbf16>,
    %c0_52 = arith.constant 0 : index
    %c13 = arith.constant 13 : index
    %c0_53 = arith.constant 0 : index
    %48 = vector.load %arg14[%c0_52, %c13, %c0_53] : memref<2x32x512xbf16, #tpu.memory_space<vmem>>, vector<2x16x512xbf16>
    %49 = vector.shape_cast %48 : vector<2x16x512xbf16> to vector<32x512xbf16>
    %c0_54 = arith.constant 0 : index
    %c5632 = arith.constant 5632 : index
    %50 = vector.load %arg15[%c0_54, %c5632] : memref<32x6656xbf16, #tpu.memory_space<vmem>>, vector<32x512xbf16>
    tpu.vector_store %arg15[%c0_54, %c5632], %49 {strides = array<i32>} : memref<32x6656xbf16, #tpu.memory_space<vmem>>, vector<32x512xbf16>,
    %c0_55 = arith.constant 0 : index
    %c14 = arith.constant 14 : index
    %c0_56 = arith.constant 0 : index
    %51 = vector.load %arg14[%c0_55, %c14, %c0_56] : memref<2x32x512xbf16, #tpu.memory_space<vmem>>, vector<2x16x512xbf16>
    %52 = vector.shape_cast %51 : vector<2x16x512xbf16> to vector<32x512xbf16>
    %c0_57 = arith.constant 0 : index
    %c6144 = arith.constant 6144 : index
    %53 = vector.load %arg15[%c0_57, %c6144] : memref<32x6656xbf16, #tpu.memory_space<vmem>>, vector<32x512xbf16>
    tpu.vector_store %arg15[%c0_57, %c6144], %52 {strides = array<i32>} : memref<32x6656xbf16, #tpu.memory_space<vmem>>, vector<32x512xbf16>,
    %c0_58 = arith.constant 0 : index
    %c0_59 = arith.constant 0 : index
    %54 = vector.load %arg15[%c0_58, %c0_59] : memref<32x6656xbf16, #tpu.memory_space<vmem>>, vector<32x6656xbf16>
    %c0_60 = arith.constant 0 : index
    %c0_61 = arith.constant 0 : index
    %c0_62 = arith.constant 0 : index
    %55 = vector.load %arg4[%c0_60, %c0_61, %c0_62] : memref<1x6656x256xbf16, #tpu.memory_space<vmem>>, vector<1x6656x256xbf16>
    %56 = vector.shape_cast %55 : vector<1x6656x256xbf16> to vector<6656x256xbf16>
    %cst = arith.constant dense<0.000000e+00> : vector<32x256xf32>
    %57 = tpu.matmul %54, %56, %cst {dimension_numbers = #tpu.dot_dimension_numbers<[1], [0], [0], [1], [0, 0, 1, 1], [], []>} : vector<32x6656xbf16>, vector<6656x256xbf16>, vector<32x256xf32> -> vector<32x256xf32>
    %c0_63 = arith.constant 0 : index
    %c0_64 = arith.constant 0 : index
    %c0_65 = arith.constant 0 : index
    %58 = vector.load %arg5[%c0_63, %c0_64, %c0_65] : memref<1x1x256xf32, #tpu.memory_space<vmem>>, vector<1x1x256xf32>
    %59 = vector.shape_cast %58 : vector<1x1x256xf32> to vector<1x256xf32>
    %60 = vector.broadcast %59 : vector<1x256xf32> to vector<32x256xf32>
    %61 = arith.addf %57, %60 : vector<32x256xf32>
    %cst_66 = arith.constant dense<0.000000e+00> : vector<256xf32>
    %62 = vector.multi_reduction <add>, %61, %cst_66 [0] : vector<32x256xf32> to vector<256xf32>
    %63 = vector.shape_cast %62 : vector<256xf32> to vector<1x256xf32>
    %c16_i32 = arith.constant 16 : i32
    %64 = tpu.dynamic_rotate %63 by %c16_i32 dim 1 : vector<1x256xf32>, i32 -> vector<1x256xf32>
    %65 = arith.addf %63, %64 : vector<1x256xf32>
    %c32_i32 = arith.constant 32 : i32
    %66 = tpu.dynamic_rotate %65 by %c32_i32 dim 1 : vector<1x256xf32>, i32 -> vector<1x256xf32>
    %67 = arith.addf %65, %66 : vector<1x256xf32>
    %c64_i32 = arith.constant 64 : i32
    %68 = tpu.dynamic_rotate %67 by %c64_i32 dim 1 : vector<1x256xf32>, i32 -> vector<1x256xf32>
    %69 = arith.addf %67, %68 : vector<1x256xf32>
    %c128_i32 = arith.constant 128 : i32
    %70 = tpu.dynamic_rotate %69 by %c128_i32 dim 1 : vector<1x256xf32>, i32 -> vector<1x256xf32>
    %71 = arith.addf %69, %70 : vector<1x256xf32>
    %cst_67 = arith.constant 0.001953125 : f32
    %72 = vector.broadcast %cst_67 : f32 to vector<1x256xf32>
    %73 = arith.mulf %71, %72 : vector<1x256xf32>
    %74 = vector.broadcast %73 : vector<1x256xf32> to vector<32x256xf32>
    %75 = arith.subf %61, %74 : vector<32x256xf32>
    %76 = arith.mulf %75, %75 : vector<32x256xf32>
    %cst_68 = arith.constant dense<0.000000e+00> : vector<256xf32>
    %77 = vector.multi_reduction <add>, %76, %cst_68 [0] : vector<32x256xf32> to vector<256xf32>
    %78 = vector.shape_cast %77 : vector<256xf32> to vector<1x256xf32>
    %c16_i32_69 = arith.constant 16 : i32
    %79 = tpu.dynamic_rotate %78 by %c16_i32_69 dim 1 : vector<1x256xf32>, i32 -> vector<1x256xf32>
    %80 = arith.addf %78, %79 : vector<1x256xf32>
    %c32_i32_70 = arith.constant 32 : i32
    %81 = tpu.dynamic_rotate %80 by %c32_i32_70 dim 1 : vector<1x256xf32>, i32 -> vector<1x256xf32>
    %82 = arith.addf %80, %81 : vector<1x256xf32>
    %c64_i32_71 = arith.constant 64 : i32
    %83 = tpu.dynamic_rotate %82 by %c64_i32_71 dim 1 : vector<1x256xf32>, i32 -> vector<1x256xf32>
    %84 = arith.addf %82, %83 : vector<1x256xf32>
    %c128_i32_72 = arith.constant 128 : i32
    %85 = tpu.dynamic_rotate %84 by %c128_i32_72 dim 1 : vector<1x256xf32>, i32 -> vector<1x256xf32>
    %86 = arith.addf %84, %85 : vector<1x256xf32>
    %cst_73 = arith.constant 0.001953125 : f32
    %87 = vector.broadcast %cst_73 : f32 to vector<1x256xf32>
    %88 = arith.mulf %86, %87 : vector<1x256xf32>
    %cst_74 = arith.constant 9.99999974E-6 : f32
    %89 = vector.broadcast %cst_74 : f32 to vector<1x256xf32>
    %90 = arith.addf %88, %89 : vector<1x256xf32>
    %91 = math.rsqrt %90 : vector<1x256xf32>
    %92 = vector.broadcast %91 : vector<1x256xf32> to vector<32x256xf32>
    %93 = arith.mulf %75, %92 : vector<32x256xf32>
    %c0_75 = arith.constant 0 : index
    %c0_76 = arith.constant 0 : index
    %c0_77 = arith.constant 0 : index
    %94 = vector.load %arg6[%c0_75, %c0_76, %c0_77] : memref<1x1x256xf32, #tpu.memory_space<vmem>>, vector<1x1x256xf32>
    %95 = vector.shape_cast %94 : vector<1x1x256xf32> to vector<1x256xf32>
    %96 = vector.broadcast %95 : vector<1x256xf32> to vector<32x256xf32>
    %97 = arith.mulf %93, %96 : vector<32x256xf32>
    %c0_78 = arith.constant 0 : index
    %c0_79 = arith.constant 0 : index
    %c0_80 = arith.constant 0 : index
    %98 = vector.load %arg7[%c0_78, %c0_79, %c0_80] : memref<1x1x256xf32, #tpu.memory_space<vmem>>, vector<1x1x256xf32>
    %99 = vector.shape_cast %98 : vector<1x1x256xf32> to vector<1x256xf32>
    %100 = vector.broadcast %99 : vector<1x256xf32> to vector<32x256xf32>
    %101 = arith.addf %97, %100 : vector<32x256xf32>
    %c3_i32 = arith.constant 3 : i32
    %102 = arith.cmpi slt, %arg0, %c3_i32 : i32
    %103 = arith.extui %102 : i1 to i32
    %c0_i32_81 = arith.constant 0 : i32
    %104 = arith.cmpi ne, %103, %c0_i32_81 : i32
    scf.if %104 {
      %cst_84 = arith.constant 0.000000e+00 : f32
      %108 = vector.broadcast %cst_84 : f32 to vector<32x256xf32>
      %109 = arith.maximumf %101, %108 : vector<32x256xf32>
      %c0_85 = arith.constant 0 : index
      %c0_86 = arith.constant 0 : index
      %110 = vector.load %arg13[%c0_85, %c0_86] : memref<32x256xf32, #tpu.memory_space<vmem>>, vector<32x256xf32>
      tpu.vector_store %arg13[%c0_85, %c0_86], %109 {strides = array<i32>} : memref<32x256xf32, #tpu.memory_space<vmem>>, vector<32x256xf32>,
    } else {
    }
    %c3_i32_82 = arith.constant 3 : i32
    %105 = arith.cmpi eq, %arg0, %c3_i32_82 : i32
    %106 = arith.extui %105 : i1 to i32
    %c0_i32_83 = arith.constant 0 : i32
    %107 = arith.cmpi ne, %106, %c0_i32_83 : i32
    scf.if %107 {
      %108 = arith.truncf %101 : vector<32x256xf32> to vector<32x256xbf16>
      %c0_84 = arith.constant 0 : index
      %c0_85 = arith.constant 0 : index
      %109 = vector.load %arg8[%c0_84, %c0_85] : memref<256x2048xbf16, #tpu.memory_space<vmem>>, vector<256x2048xbf16>
      %cst_86 = arith.constant dense<0.000000e+00> : vector<32x2048xf32>
      %110 = tpu.matmul %108, %109, %cst_86 {dimension_numbers = #tpu.dot_dimension_numbers<[1], [0], [0], [1], [0, 0, 1, 1], [], []>} : vector<32x256xbf16>, vector<256x2048xbf16>, vector<32x2048xf32> -> vector<32x2048xf32>
      %c0_87 = arith.constant 0 : index
      %c0_88 = arith.constant 0 : index
      %111 = vector.load %arg9[%c0_87, %c0_88] : memref<1x2048xf32, #tpu.memory_space<vmem>>, vector<1x2048xf32>
      %112 = vector.broadcast %111 : vector<1x2048xf32> to vector<32x2048xf32>
      %113 = arith.addf %110, %112 : vector<32x2048xf32>
      %cst_89 = arith.constant 0.000000e+00 : f32
      %114 = vector.broadcast %cst_89 : f32 to vector<32x2048xf32>
      %115 = arith.maximumf %113, %114 : vector<32x2048xf32>
      %116 = arith.truncf %115 : vector<32x2048xf32> to vector<32x2048xbf16>
      %c0_90 = arith.constant 0 : index
      %c0_91 = arith.constant 0 : index
      %117 = vector.load %arg10[%c0_90, %c0_91] : memref<2048x16xbf16, #tpu.memory_space<vmem>>, vector<2048x16xbf16>
      %cst_92 = arith.constant dense<0.000000e+00> : vector<32x16xf32>
      %118 = tpu.matmul %116, %117, %cst_92 {dimension_numbers = #tpu.dot_dimension_numbers<[1], [0], [0], [1], [0, 0, 1, 1], [], []>} : vector<32x2048xbf16>, vector<2048x16xbf16>, vector<32x16xf32> -> vector<32x16xf32>
      %c0_93 = arith.constant 0 : index
      %c0_94 = arith.constant 0 : index
      %119 = vector.load %arg11[%c0_93, %c0_94] : memref<1x1xf32, #tpu.memory_space<vmem>>, vector<1x1xf32>
      %120 = vector.broadcast %119 : vector<1x1xf32> to vector<32x16xf32>
      %121 = arith.addf %118, %120 : vector<32x16xf32>
      %c0_95 = arith.constant 0 : index
      %c0_96 = arith.constant 0 : index
      %122 = vector.load %arg12[%c0_95, %c0_96] : memref<32x16xf32, #tpu.memory_space<vmem>>, vector<32x16xf32>
      tpu.vector_store %arg12[%c0_95, %c0_96], %121 {strides = array<i32>} : memref<32x16xf32, #tpu.memory_space<vmem>>, vector<32x16xf32>,
    } else {
    }
    return
  }
  func.func @transform_0(%arg0: i32) -> (i32, i32) {
    %c0_i32 = arith.constant 0 : i32
    %c0_i32_0 = arith.constant 0 : i32
    %c0_i32_1 = arith.constant 0 : i32
    return %c0_i32, %c0_i32_0 : i32, i32
  }
  func.func @transform_1(%arg0: i32) -> (i32, i32) {
    %c0_i32 = arith.constant 0 : i32
    %c0_i32_0 = arith.constant 0 : i32
    %c0_i32_1 = arith.constant 0 : i32
    return %c0_i32, %c0_i32_0 : i32, i32
  }
  func.func @transform_2(%arg0: i32) -> (i32, i32) {
    %c0_i32 = arith.constant 0 : i32
    %c0_i32_0 = arith.constant 0 : i32
    %c0_i32_1 = arith.constant 0 : i32
    return %c0_i32, %c0_i32_0 : i32, i32
  }
  func.func @transform_3(%arg0: i32) -> (i32, i32, i32) {
    %c0_i32 = arith.constant 0 : i32
    %c0_i32_0 = arith.constant 0 : i32
    %c0_i32_1 = arith.constant 0 : i32
    return %arg0, %c0_i32, %c0_i32_0 : i32, i32, i32
  }
  func.func @transform_4(%arg0: i32) -> (i32, i32, i32) {
    %c0_i32 = arith.constant 0 : i32
    %c0_i32_0 = arith.constant 0 : i32
    %c0_i32_1 = arith.constant 0 : i32
    return %arg0, %c0_i32, %c0_i32_0 : i32, i32, i32
  }
  func.func @transform_5(%arg0: i32) -> (i32, i32, i32) {
    %c0_i32 = arith.constant 0 : i32
    %c0_i32_0 = arith.constant 0 : i32
    %c0_i32_1 = arith.constant 0 : i32
    return %arg0, %c0_i32, %c0_i32_0 : i32, i32, i32
  }
  func.func @transform_6(%arg0: i32) -> (i32, i32, i32) {
    %c0_i32 = arith.constant 0 : i32
    %c0_i32_0 = arith.constant 0 : i32
    %c0_i32_1 = arith.constant 0 : i32
    return %arg0, %c0_i32, %c0_i32_0 : i32, i32, i32
  }
  func.func @transform_7(%arg0: i32) -> (i32, i32) {
    %c0_i32 = arith.constant 0 : i32
    %c0_i32_0 = arith.constant 0 : i32
    %c0_i32_1 = arith.constant 0 : i32
    return %c0_i32, %c0_i32_0 : i32, i32
  }
  func.func @transform_8(%arg0: i32) -> (i32, i32) {
    %c0_i32 = arith.constant 0 : i32
    %c0_i32_0 = arith.constant 0 : i32
    %c0_i32_1 = arith.constant 0 : i32
    return %c0_i32, %c0_i32_0 : i32, i32
  }
  func.func @transform_9(%arg0: i32) -> (i32, i32) {
    %c0_i32 = arith.constant 0 : i32
    %c0_i32_0 = arith.constant 0 : i32
    %c0_i32_1 = arith.constant 0 : i32
    return %c0_i32, %c0_i32_0 : i32, i32
  }
  func.func @transform_10(%arg0: i32) -> (i32, i32) {
    %c0_i32 = arith.constant 0 : i32
    %c0_i32_0 = arith.constant 0 : i32
    %c0_i32_1 = arith.constant 0 : i32
    return %c0_i32, %c0_i32_0 : i32, i32
  }
  func.func @transform_11(%arg0: i32) -> (i32, i32) {
    %c0_i32 = arith.constant 0 : i32
    %c0_i32_0 = arith.constant 0 : i32
    %c0_i32_1 = arith.constant 0 : i32
    return %c0_i32, %c0_i32_0 : i32, i32
  }
}

</mosaic_0001>

<bundles_post_ra>
// kernel: simple_block_2d.1
= control target key start
LH: loop header
LB: loop body
LE: loop exit
PB: predicated region body
PF: predicated region fallthrough
CT: control target
= control target key end

     0   :  { %s19305_s0 = inlined_call_operand.vmem [shape: f32[32,48], index: 0, kind: input, shape index: {}]   ;;  %s19306_s1 = inlined_call_operand.hbm [shape: bf16[48,256], index: 1, kind: input, shape index: {}]   ;;  %s19307_s2 = inlined_call_operand.hbm [shape: f32[1,256], index: 2, kind: input, shape index: {}]   ;;  %s19308_s3 = inlined_call_operand.hbm [shape: bf16[4,6656,256], index: 3, kind: input, shape index: {}]   ;;  %s19309_s4 = inlined_call_operand.hbm [shape: f32[4,1,256], index: 4, kind: input, shape index: {}]   ;;  %s19310_s5 = inlined_call_operand.hbm [shape: f32[4,1,256], index: 5, kind: input, shape index: {}]   ;;  %s19311_s6 = inlined_call_operand.hbm [shape: f32[4,1,256], index: 6, kind: input, shape index: {}]   ;;  %s19312_s7 = inlined_call_operand.hbm [shape: bf16[256,2048], index: 7, kind: input, shape index: {}]   ;;  %s19313_s8 = inlined_call_operand.hbm [shape: f32[1,2048], index: 8, kind: input, shape index: {}]   ;;  %s19314_s9 = inlined_call_operand.vmem [shape: bf16[2048,16], index: 9, kind: input, shape index: {}]   ;;  %s19315_s10 = inlined_call_operand.<no memory space> [shape: f32[1,1], index: 10, kind: input, shape index: {}]   ;;  %s19316_s11 = inlined_call_operand.hbm [shape: f32[32,16], index: 11, kind: output, shape index: {}]  }
   0x1   :  { %19339 = sst [smem:[#allocation45_spill]] %s19306_s1  ;;  %v16_v0 = vstv %s19315_s10 }
   0x2   :  { %19340 = sst [smem:[#allocation46_spill]] %s19308_s3  ;;  %17 = vst [vmem:[#allocation5] sm:$0x1] %v16_v0 }
   0x3   :  { %19341 = sst [smem:[#allocation47_spill]] %s19314_s9 }
   0x4   :  { %19342 = sst [smem:[#allocation48_spill]] %s19316_s11 }
   0x5   :  { %18 = vsyncpa [#allocation7], 0 }
   0x6   :  { %19 = vsyncpa [#allocation10], 0 }
   0x7   :  { %20 = vsyncpa [#allocation17], 0 }
   0x8   :  { %21 = vsyncpa [#allocation8], 0  ;;  %s16466_s19 = smov 0   ;;  %s16468_s20 = smov 0  }
   0x9   :  { %s16470_s21 = smov 0   ;;  %s16472_s22 = smov 0  }
   0xa LB: > { %19343 = sst [smem:[#allocation25_spill]] %s16377_s21  ;;  %s16485_s10 = sadd.s32 4294967295, %s16381_s22   ;;  %s16381_s22 = sphi %s16472_s22, %s19424_s22   ;;  %s16377_s21 = sphi %s16470_s21, %s19426_s21   ;;  %s16373_s20 = sphi %s16468_s20, %s19428_s20   ;;  %s16369_s19 = sphi %s16466_s19, %s19427_s19  }
   0xb   : > { %p110_p0 = scmp.ne.s32.totalorder %s16373_s20, %s16369_s19  ;;  %p19321_p1 = scmp.eq.s32.totalorder %s16485_s10, 0 }
   0xc   : > { %p12944_p2 = scmp.ge.s32.totalorder %s16381_s22, 1  ;;  %p304_p3 = scmp.lt.s32.totalorder %s16381_s22, 5 }
   0xd   : > { %p16494_p5 = por %p19321_p1, %p110_p0  ;;  %s16383_s25 = smov [#allocation6]  }
   0xe   : > { %p16498_p6 = pnand %p12944_p2, %p304_p3  ;;  %s319_s26 = sshll.u32 %s16383_s25, 4  ;;  %s320_s26 = int_to_ptr.vmem [resolvable:$true] %s319_s26 }
   0xf   : > { %s19344_s23 = scalar_select %p16494_p5, 1, 0 }
  0x10   : > { %s19345_s24 = scalar_select %p16498_p6, 1, 0 }
  0x11   : > { %p14604_p7 = pneg %p16498_p6  ;;  %s16511_s28 = sadd.s32 1, %s16381_s22  }
  0x12   : > { %19347 = sst [smem:[#allocation26_spill]] %s16511_s28  ;;  %s97_s29 = sadd.s32 1, %s16377_s21 }
  0x13   : > { %p16506_p8 = pnand %p14604_p7, %p19321_p1  ;;  %s94_s30 = ssub.s32 %s16381_s22, %s16511_s28 }
  0x14   : > { %s16098_s12 = scalar_lea.vmem %s320_s26, 768  ;;  %p16106_p13 = scmp.lt.s32.totalorder %s320_s26, %s320_s26 }
  0x15   : > { %s19346_s27 = scalar_select %p16506_p8, 1, 0 }
  0x16   : > { %p19322_p9 = pneg %p16506_p8  ;;  %p16099_p10 = scmp.ne.s32.totalorder %s320_s26, %s16098_s12 }
  0x17   : > { %p16107_p0 = scmp.lt.s32.totalorder %s16098_s12, %s16098_s12 }
  0x18   : > { %p16101_p11 = pnand %p16099_p10, %p19322_p9 }
  0x19   : > { %p16108_p2 = por %p16107_p0, %p16106_p13 }
  0x1a   : > { %p16102_p12 = pneg %p16101_p11 }
  0x1c   : > { %p16109_p3 = pnand %p16108_p2, %p16102_p12 }
  0x1e   : > { %16112 = shalt.err (!%p16109_p3)
}
  0x1f   : > { %s19319_s13 = smov 128   ;;  %s19320_s14 = smov 8  }
  0x20   : > { %s19348_s1 = sld [smem:[#allocation45_spill]]  ;;  %p95_p7 = scmp.eq.s32.totalorder %s94_s30, 0 }
  0x21   : > { %p104_p10 = scmp.ne.s32.totalorder %s16377_s21, %s16373_s20  ;;  %p105_p11 = scmp.eq.s32.totalorder %s16381_s22, 0 }
  0x22   : > { %p14634_p12 = scmp.lt.s32.totalorder %s16381_s22, 4  ;;  %s374_s18 = sand.u32 1, %s16381_s22  }
  0x23   : > { %s16534_s17 = scalar_select %p95_p7, %s16377_s21, %s97_s29  }
  0x24   : > { %p106_p13 = por %p105_p11, %p104_p10  ;;  %s376_s19 = sand.u32 1, %s16377_s21  }
  0x25   : > { %19349 = sst [smem:[#allocation27_spill]] %s16534_s17  ;;  %s14573_s25 = smul.u32 6656, %s376_s19 }
  0x26   : > { %14607 = dma.hbm_to_vmem [thread:$0]  (!%p16506_p8), %s19348_s1, 768, %s320_s26, [#allocation7], %s19319_s13, %s19319_s13, %s19320_s14  }
  0x27   : > { %p16538_p0 = pnand %p14634_p12, %p106_p13  ;;  %s14574_s28 = smul.u32 106496, %s16381_s22 }
  0x28   : > { %s16543_s11 = sshll.u32 %s376_s19, 1  ;;  %s19351_s3 = sld [smem:[#allocation46_spill]] }
  0x29   : > { %s378_s29 = scalar_lea.vmem [#allocation11], %s14573_s25  ;;  %s16552_s13 = scalar_lea.sflag [#allocation7], %s374_s18 }
  0x2a   : > { %s385_s16 = sshll.u32 %s378_s29, 4  ;;  %p16558_p3 = pneg %p16538_p0  ;;  %s16550_s16 = int_to_ptr.vmem [resolvable:$true] %s385_s16 }
  0x2e   : > { %s16548_s30 = scalar_lea.hbm %s19351_s3, %s14574_s28  ;;  %s16118_s25 = scalar_lea.hbm %s19351_s3, 425984 }
  0x2f   : > { %s16113_s14 = scalar_lea.hbm %s16548_s30, 106496  ;;  %p16119_p11 = scmp.lt.s32.totalorder %s16548_s30, %s19351_s3 }
  0x30   : > { %p16114_p2 = scmp.ne.s32.totalorder %s16548_s30, %s16113_s14  ;;  %p16120_p12 = scmp.lt.s32.totalorder %s16118_s25, %s16113_s14 }
  0x32   : > { %p16116_p7 = pnand %p16558_p3, %p16114_p2  ;;  %p16121_p13 = por %p16120_p12, %p16119_p11 }
  0x34   : > { %p16117_p10 = pneg %p16116_p7 }
  0x36   : > { %p16122_p4 = pnand %p16121_p13, %p16117_p10 }
  0x38   : > { %16125 = shalt.err (!%p16122_p4)
}
  0x39   : > { %s16126_s18 = scalar_lea.vmem %s16550_s16, 106496  ;;  %s16386_s1 = smov [#allocation11]  }
  0x3a   : > { %p16127_p1 = scmp.ne.s32.totalorder %s16550_s16, %s16126_s18  ;;  %s16131_s28 = sshll.u32 %s16386_s1, 4  ;;  %s16132_s28 = int_to_ptr.vmem [resolvable:$false] %s16131_s28 }
  0x3b   : > { %s16133_s15 = scalar_lea.vmem %s16132_s28, 212992  ;;  %p16134_p9 = scmp.lt.s32.totalorder %s16550_s16, %s16132_s28 }
  0x3c   : > { %p16129_p2 = pnand %p16127_p1, %p16558_p3  ;;  %p16135_p5 = scmp.lt.s32.totalorder %s16133_s15, %s16126_s18 }
  0x3e   : > { %p16130_p7 = pneg %p16129_p2  ;;  %p16136_p6 = por %p16135_p5, %p16134_p9 }
  0x40   : > { %p16137_p8 = pnand %p16136_p6, %p16130_p7 }
  0x42   : > { %16140 = shalt.err (!%p16137_p8)
}
  0x43   : > { %s19353_s14 = smov 8   ;;  %s19354_s25 = smov 128  }
  0x44   : > { %14620 = dma.hbm_to_vmem [thread:$0]  (!%p16538_p0), %s16548_s30, 106496, %s16550_s16, %s16552_s13, %s19354_s25, %s19354_s25, %s19353_s14  }
  0x45   : > { %s16585_s1 = sshll.u32 %s16381_s22, 5  ;;  %s399_s26 = scalar_lea.vmem [#allocation12], %s16543_s11 }
  0x46   : > { %s407_s29 = sshll.u32 %s399_s26, 4  ;;  %s405_s15 = scalar_lea.hbm %s19309_s4, %s16585_s1  ;;  %s408_s29 = int_to_ptr.vmem [resolvable:$true] %s407_s29 }
  0x47   : > { %s16141_s3 = scalar_lea.hbm %s405_s15, 32  ;;  %s16146_s9 = scalar_lea.hbm %s19309_s4, 128 }
  0x48   : > { %p16142_p1 = scmp.ne.s32.totalorder %s405_s15, %s16141_s3  ;;  %p16147_p6 = scmp.lt.s32.totalorder %s405_s15, %s19309_s4 }
  0x49   : > { %p16148_p8 = scmp.lt.s32.totalorder %s16146_s9, %s16141_s3 }
  0x4a   : > { %p16144_p4 = pnand %p16142_p1, %p16558_p3 }
  0x4b   : > { %p16149_p9 = por %p16148_p8, %p16147_p6 }
  0x4c   : > { %p16145_p5 = pneg %p16144_p4 }
  0x4e   : > { %p16150_p10 = pnand %p16149_p9, %p16145_p5 }
  0x50   : > { %16153 = shalt.err (!%p16150_p10)
}
  0x51   : > { %s16154_s16 = scalar_lea.vmem %s408_s29, 32  ;;  %s16387_s14 = smov [#allocation12]  }
  0x52   : > { %p16155_p11 = scmp.ne.s32.totalorder %s408_s29, %s16154_s16  ;;  %s16159_s25 = sshll.u32 %s16387_s14, 4  ;;  %s16160_s25 = int_to_ptr.vmem [resolvable:$false] %s16159_s25 }
  0x53   : > { %s16161_s26 = scalar_lea.vmem %s16160_s25, 64  ;;  %p16162_p2 = scmp.lt.s32.totalorder %s408_s29, %s16160_s25 }
  0x54   : > { %p16157_p12 = pnand %p16155_p11, %p16558_p3  ;;  %p16163_p7 = scmp.lt.s32.totalorder %s16161_s26, %s16154_s16 }
  0x56   : > { %p16158_p13 = pneg %p16157_p12  ;;  %p16164_p1 = por %p16163_p7, %p16162_p2 }
  0x58   : > { %p16165_p4 = pnand %p16164_p1, %p16158_p13 }
  0x5a   : > { %16168 = shalt.err (!%p16165_p4)
}
  0x5b   : > { %14623 = dma.hbm_to_vmem [thread:$0]  (!%p16538_p0), %s405_s15, 32, %s408_s29, %s16552_s13  }
  0x5c   : > { %s16388_s3 = smov [#allocation9]   ;;  %s16609_s18 = scalar_lea.hbm %s19310_s5, %s16585_s1 }
  0x5d   : > { %s333_s9 = sshll.u32 %s16388_s3, 4  ;;  %s418_s28 = scalar_lea.vmem [#allocation13], %s16543_s11  ;;  %s334_s9 = int_to_ptr.vmem [resolvable:$true] %s333_s9 }
  0x5e   : > { %s426_s30 = sshll.u32 %s418_s28, 4  ;;  %s16180_s22 = scalar_lea.vmem %s334_s9, 32  ;;  %s427_s30 = int_to_ptr.vmem [resolvable:$true] %s426_s30 }
  0x5f   : > { %p16181_p5 = scmp.ne.s32.totalorder %s334_s9, %s16180_s22  ;;  %p19355_p6 = scmp.ne.s32.totalorder %s19346_s27, 0 }
  0x60   : > { %p16188_p11 = scmp.lt.s32.totalorder %s334_s9, %s334_s9  ;;  %p16189_p12 = scmp.lt.s32.totalorder %s16180_s22, %s16180_s22 }
  0x61   : > { %p19356_p8 = pneg %p19355_p6 }
  0x62   : > { %p16190_p13 = por %p16189_p12, %p16188_p11 }
  0x63   : > { %p16183_p9 = pnand %p16181_p5, %p19356_p8 }
  0x65   : > { %p16184_p10 = pneg %p16183_p9 }
  0x67   : > { %p16191_p2 = pnand %p16190_p13, %p16184_p10 }
  0x69   : > { %16194 = shalt.err (!%p16191_p2)
}
  0x6a   : > { %14610 = dma.hbm_to_vmem [thread:$0]  (!%p19355_p6), %s19307_s2, 32, %s334_s9, [#allocation10]  }
  0x6b   : > { %s16195_s16 = scalar_lea.hbm %s16609_s18, 32  ;;  %s16200_s26 = scalar_lea.hbm %s19310_s5, 128 }
  0x6c   : > { %p16196_p7 = scmp.ne.s32.totalorder %s16609_s18, %s16195_s16  ;;  %p16201_p5 = scmp.lt.s32.totalorder %s16609_s18, %s19310_s5 }
  0x6d   : > { %p16202_p8 = scmp.lt.s32.totalorder %s16200_s26, %s16195_s16 }
  0x6e   : > { %p16198_p1 = pnand %p16196_p7, %p16558_p3 }
  0x6f   : > { %p16203_p9 = por %p16202_p8, %p16201_p5 }
  0x70   : > { %p16199_p4 = pneg %p16198_p1 }
  0x72   : > { %p16204_p10 = pnand %p16203_p9, %p16199_p4 }
  0x74   : > { %16207 = shalt.err (!%p16204_p10)
}
  0x75   : > { %s16208_s17 = scalar_lea.vmem %s427_s30, 32  ;;  %s16389_s9 = smov [#allocation13]  }
  0x76   : > { %p16209_p11 = scmp.ne.s32.totalorder %s427_s30, %s16208_s17  ;;  %s16213_s28 = sshll.u32 %s16389_s9, 4  ;;  %s16214_s28 = int_to_ptr.vmem [resolvable:$false] %s16213_s28 }
  0x77   : > { %s16215_s22 = scalar_lea.vmem %s16214_s28, 64  ;;  %p16216_p2 = scmp.lt.s32.totalorder %s427_s30, %s16214_s28 }
  0x78   : > { %p16211_p12 = pnand %p16209_p11, %p16558_p3  ;;  %p16217_p7 = scmp.lt.s32.totalorder %s16215_s22, %s16208_s17 }
  0x7a   : > { %p16212_p13 = pneg %p16211_p12  ;;  %p16218_p1 = por %p16217_p7, %p16216_p2 }
  0x7c   : > { %p16219_p6 = pnand %p16218_p1, %p16212_p13 }
  0x7e   : > { %16222 = shalt.err (!%p16219_p6)
}
  0x7f   : > { %14626 = dma.hbm_to_vmem [thread:$0]  (!%p16538_p0), %s16609_s18, 32, %s427_s30, %s16552_s13  }
  0x80   : > { %s16390_s29 = smov [#allocation15]   ;;  %p19357_p5 = scmp.ne.s32.totalorder %s19346_s27, 0 }
  0x81   : > { %s343_s15 = sshll.u32 %s16390_s29, 4  ;;  %s344_s15 = int_to_ptr.vmem [resolvable:$true] %s343_s15 }
  0x82   : > { %s16234_s16 = scalar_lea.vmem %s344_s15, 32768  ;;  %p19358_p8 = pneg %p19357_p5 }
  0x83   : > { %p16235_p4 = scmp.ne.s32.totalorder %s344_s15, %s16234_s16  ;;  %p16242_p11 = scmp.lt.s32.totalorder %s344_s15, %s344_s15 }
  0x84   : > { %p16243_p12 = scmp.lt.s32.totalorder %s16234_s16, %s16234_s16 }
  0x85   : > { %p16237_p9 = pnand %p16235_p4, %p19358_p8 }
  0x86   : > { %p16244_p2 = por %p16243_p12, %p16242_p11 }
  0x87   : > { %p16238_p10 = pneg %p16237_p9 }
  0x89   : > { %p16245_p13 = pnand %p16244_p2, %p16238_p10 }
  0x8b   : > { %16248 = shalt.err (!%p16245_p13)
}
  0x8c   : > { %s16391_s14 = smov 1024   ;;  %s16392_s18 = smov 64  }
  0x8d   : > { %14613 = dma.hbm_to_vmem [thread:$0]  (!%p19357_p5), %s19312_s7, 32768, %s344_s15, [#allocation10], %s16391_s14, %s16391_s14, %s16392_s18  }
  0x8e   : > { %s16393_s26 = smov [#allocation16]   ;;  %s16649_s9 = scalar_lea.hbm %s19311_s6, %s16585_s1 }
  0x8f   : > { %s357_s3 = sshll.u32 %s16393_s26, 4  ;;  %s437_s28 = scalar_lea.vmem [#allocation14], %s16543_s11  ;;  %s358_s3 = int_to_ptr.vmem [resolvable:$true] %s357_s3 }
  0x90   : > { %s445_s22 = sshll.u32 %s437_s28, 4  ;;  %s16260_s29 = scalar_lea.vmem %s358_s3, 256  ;;  %s446_s22 = int_to_ptr.vmem [resolvable:$true] %s445_s22 }
  0x91   : > { %p16261_p6 = scmp.ne.s32.totalorder %s358_s3, %s16260_s29  ;;  %p19359_p7 = pmov %p19358_p8 }
  0x92   : > { %p16268_p8 = scmp.lt.s32.totalorder %s358_s3, %s358_s3  ;;  %p16269_p9 = scmp.lt.s32.totalorder %s16260_s29, %s16260_s29 }
  0x93   : > { %p16263_p1 = pnand %p16261_p6, %p19359_p7 }
  0x94   : > { %p16270_p10 = por %p16269_p9, %p16268_p8 }
  0x95   : > { %p16264_p4 = pneg %p16263_p1 }
  0x97   : > { %p16271_p11 = pnand %p16270_p10, %p16264_p4 }
  0x99   : > { %16274 = shalt.err (!%p16271_p11)
}
  0x9a   : > { %14616 = dma.hbm_to_vmem [thread:$0]  (!%p19357_p5), %s19313_s8, 256, %s358_s3, [#allocation17]  }
  0x9b   : > { %s16275_s11 = scalar_lea.hbm %s16649_s9, 32  ;;  %s16280_s18 = scalar_lea.hbm %s19311_s6, 128 }
  0x9c   : > { %p16276_p12 = scmp.ne.s32.totalorder %s16649_s9, %s16275_s11  ;;  %p16281_p6 = scmp.lt.s32.totalorder %s16649_s9, %s19311_s6 }
  0x9d   : > { %p16282_p7 = scmp.lt.s32.totalorder %s16280_s18, %s16275_s11 }
  0x9e   : > { %p16278_p2 = pnand %p16276_p12, %p16558_p3 }
  0x9f   : > { %p16283_p1 = por %p16282_p7, %p16281_p6 }
  0xa0   : > { %p16279_p13 = pneg %p16278_p2 }
  0xa2   : > { %p16284_p4 = pnand %p16283_p1, %p16279_p13 }
  0xa4   : > { %16287 = shalt.err (!%p16284_p4)
}
  0xa5   : > { %s16288_s25 = scalar_lea.vmem %s446_s22, 32  ;;  %s16394_s26 = smov [#allocation14]  }
  0xa6   : > { %p16289_p5 = scmp.ne.s32.totalorder %s446_s22, %s16288_s25  ;;  %s16293_s3 = sshll.u32 %s16394_s26, 4  ;;  %s16294_s3 = int_to_ptr.vmem [resolvable:$false] %s16293_s3 }
  0xa7   : > { %s16295_s21 = scalar_lea.vmem %s16294_s3, 64  ;;  %p16296_p10 = scmp.lt.s32.totalorder %s446_s22, %s16294_s3 }
  0xa8   : > { %p16291_p8 = pnand %p16289_p5, %p16558_p3  ;;  %p16297_p11 = scmp.lt.s32.totalorder %s16295_s21, %s16288_s25 }
  0xaa   : > { %p16292_p9 = pneg %p16291_p8  ;;  %p16298_p12 = por %p16297_p11, %p16296_p10 }
  0xac   : > { %p16299_p2 = pnand %p16298_p12, %p16292_p9 }
  0xae   : > { %16302 = shalt.err (!%p16299_p2)
}
  0xaf   : > { %14629 = dma.hbm_to_vmem [thread:$0]  (!%p16538_p0), %s16649_s9, 32, %s446_s22, %s16552_s13  }
  0xb0   : > { %p19360_p13 = scmp.ne.s32.totalorder %s19345_s24, 0 }
  0xb2   : > { %454 = sbr.rel (%p19360_p13) target bundleno = 2968 (0xb98), region = 64 }
  0xb7   : > { %p19361_p3 = scmp.eq.s32.totalorder %s16485_s10, 0 }
  0xb9   : > { %16344 = dma.done.wait (%p19361_p3), [#allocation7], 768   ;;  %p19362_p6 = pmov %p19361_p3 }
  0xba   : > { %p19363_p7 = pmov %p19361_p3 }
  0xbb   : > { %16346 = vsyncadd (%p19362_p6), [#allocation7], 4294966528 }
  0xbc   : > { %16348 = dma.done.wait (%p19363_p7), [#allocation10], 32   ;;  %p19364_p1 = pmov %p19361_p3 }
  0xbd   : > { %s464_s12 = sand.u32 1, %s16485_s10   ;;  %s466_s13 = sand.u32 1, %s16373_s20  }
  0xbe   : > { %16350 = vsyncadd (%p19364_p1), [#allocation10], 4294967264  ;;  %s14575_s19 = smul.u32 6656, %s466_s13  ;;  %s465_s24 = scalar_lea.sflag [#allocation7], %s464_s12 }
  0xbf   : > { %p19365_p0 = scmp.ne.s32.totalorder %s19344_s23, 0 }
  0xc0   : > { %s16689_s17 = scalar_lea.vmem [#allocation11], %s14575_s19 }
  0xc1   : > { %16352 = dma.done.wait (%p19365_p0), %s465_s24, 106592  }
  0xc2   : > { %16354 = vsyncadd (%p19365_p0), %s465_s24, 4294860704  ;;  %s16695_s9 = sshll.u32 %s466_s13, 1  ;;  %p19366_p4 = pmov %p19364_p1 }
  0xc3   : > { %s477_s28 = scalar_lea.vmem [#allocation12], %s16695_s9  ;;  %s486_s22 = scalar_lea.vmem [#allocation13], %s16695_s9 }
  0xc4   : > { %s495_s29 = scalar_lea.vmem [#allocation14], %s16695_s9 }
  0xc5   : > { %16356 = dma.done.wait (%p19366_p4), [#allocation10], 32768   ;;  %p19367_p5 = pmov %p19364_p1 }
  0xc6   : > { %p19368_p8 = pmov %p19364_p1 }
  0xc7   : > { %16358 = vsyncadd (%p19367_p5), [#allocation10], 4294934528 }
  0xc8   : > { %16360 = dma.done.wait (%p19368_p8), [#allocation17], 256   ;;  %p19369_p9 = pmov %p19364_p1 }
  0xc9   : > { %p19370_p10 = scmp.ne.s32.totalorder %s16485_s10, 0 }
  0xca   : > { %16362 = vsyncadd (%p19369_p9), [#allocation17], 4294967040 }
  0xcb   : > { %556 = sbr.rel (%p19370_p10) target bundleno = 424 (0x1a8), region = 100 }
  0xd0   : > { %v14689_v1 = vld [vmem:[#allocation6 + $0x24] ss:$8 sps:$4 sm:$0xff]   ;;  %v14691_v2 = vld [vmem:[#allocation6 + $0x20] ss:$8 sps:$4 sm:$0xff]   ;;  %v16395_v3 = vmov 0   ;;  %v576_v11 = vld [vmem:[%s19305_s0 + $0x18] sm:$0xff]  ;;  %v587_v14 = vlaneseq }
  0xd1   : > { %557 = vst [vmem:[#allocation3] sm:$0xff] %v16395_v3  ;;  %558 = vst [vmem:[#allocation3 + $0x8] sm:$0xff] %v16395_v3  ;;  %666 = vmatprep.mubr.bf16.mxu0 %v16395_v3  ;;  %676 = vmatprep.mubr.bf16.mxu1 %v16395_v3  ;;  %v14692_v4 = vld [vmem:[#allocation6 + $0x14] ss:$8 sps:$4 sm:$0xff]   ;;  %v14694_v5 = vld [vmem:[#allocation6 + $0x10] ss:$8 sps:$4 sm:$0xff]  }
  0xd2   : > { %559 = vst [vmem:[#allocation3 + $0x10] sm:$0xff] %v16395_v3  ;;  %560 = vst [vmem:[#allocation3 + $0x18] sm:$0xff] %v16395_v3  ;;  %644 = vmatprep.subr.bf16.mxu0 %v14689_v1  ;;  %14567 = vmatprep.subr.bf16.mxu1 %v14689_v1  ;;  %v14695_v6 = vld [vmem:[#allocation6 + $0x4] ss:$8 sps:$4 sm:$0xff]   ;;  %v14697_v7 = vld [vmem:[#allocation6] ss:$8 sps:$4 sm:$0xff]  }
  0xd3   : > { %561 = vst [vmem:[#allocation3 + $0x20] sm:$0xff] %v16395_v3  ;;  %562 = vst [vmem:[#allocation3 + $0x28] sm:$0xff] %v16395_v3  ;;  %645 = vmatpush1.bf16.msra.mxu0 %v14691_v2  ;;  %14570 = vmatpush1.bf16.msra.mxu1 %v14691_v2  ;;  %v573_v8 = vld [vmem:[%s19305_s0] sm:$0xff]  ;;  %v574_v9 = vld [vmem:[%s19305_s0 + $0x8] sm:$0xff]  ;;  %vm627_vm0 = vcmask 392192   ;;  %v588_v15 = vshrl.u32 %v587_v14, 7 }
  0xd4   : > { %563 = vst [vmem:[#allocation3 + $0x30] sm:$0xff] %v16395_v3  ;;  %564 = vst [vmem:[#allocation3 + $0x38] sm:$0xff] %v16395_v3  ;;  %646 = vmatprep.subr.bf16.mxu0 %v14692_v4  ;;  %14568 = vmatprep.subr.bf16.mxu1 %v14692_v4  ;;  %v575_v10 = vld [vmem:[%s19305_s0 + $0x10] sm:$0xff]  ;;  %v577_v12 = vpack.c.bf16 %v574_v9, %v573_v8 }
  0xd5   : > { %565 = vst [vmem:[#allocation3 + $0x40] sm:$0xff] %v16395_v3  ;;  %566 = vst [vmem:[#allocation3 + $0x48] sm:$0xff] %v16395_v3  ;;  %v578_v13 = vpack.c.bf16 %v576_v11, %v575_v10  ;;  %v589_v16 = vsub.s32 0, %v588_v15  ;;  %v585_v17 = vld [vmem:[#allocation9] sm:$0x3]  ;;  %v593_v18 = vsub.s32 1, %v588_v15 }
  0xd6   : > { %567 = vst [vmem:[#allocation3 + $0x50] sm:$0xff] %v16395_v3  ;;  %568 = vst [vmem:[#allocation3 + $0x58] sm:$0xff] %v16395_v3 }
  0xd7   : > { %569 = vst [vmem:[#allocation3 + $0x60] sm:$0xff] %v16395_v3  ;;  %570 = vst [vmem:[#allocation3 + $0x68] sm:$0xff] %v16395_v3  ;;  %647 = vmatpush1.bf16.msra.mxu0 %v14694_v5  ;;  %14571 = vmatpush1.bf16.msra.mxu1 %v14694_v5  ;;  %v590_v19 = vrot.slane %v585_v17, %v589_v16  ;;  %v594_v20 = vrot.slane %v585_v17, %v593_v18 }
  0xd8   : > { %571 = vst [vmem:[#allocation3 + $0x70] sm:$0xff] %v16395_v3  ;;  %572 = vst [vmem:[#allocation3 + $0x78] sm:$0xff] %v16395_v3  ;;  %648 = vmatprep.subr.bf16.mxu0 %v14695_v6  ;;  %14569 = vmatprep.subr.bf16.mxu1 %v14695_v6 }
  0xdb   : > { %649 = vmatpush1.bf16.msra.mxu0 %v14697_v7  ;;  %14572 = vmatpush1.bf16.msra.mxu1 %v14697_v7 }
  0xde   : > { %12975 = vmatmul.mubr.msk.bf16.vlgmr.msra.gmra.mxu0 %vm627_vm0, %v577_v12  ;;  %12976 = vmatmul.mubr.msk.bf16.vlgmr.msra.gmra.mxu1 %vm627_vm0, %v578_v13 }
 0x19e   : > { %v668_v21 = vpop.f32.mrf.mxu0  ;;  %v678_v22 = vpop.f32.mrf.mxu1 }
 0x19f   : > { %v669_v23 = vadd.f32 %v668_v21, %v590_v19  ;;  %v679_v24 = vadd.f32 %v678_v22, %v590_v19 }
 0x1a0   : > { %v670_v25 = vpop.f32.mrf.mxu0  ;;  %v680_v26 = vpop.f32.mrf.mxu1 }
 0x1a1   : > { %687 = vst [vmem:[#allocation2 + $0x30] sm:$0xff] %v669_v23  ;;  %691 = vst [vmem:[#allocation2 + $0x8] sm:$0xff] %v679_v24  ;;  %v671_v27 = vadd.f32 %v670_v25, %v594_v20  ;;  %v681_v28 = vadd.f32 %v680_v26, %v594_v20 }
 0x1a2   : > { %v672_v29 = vpop.f32.mrf.mxu0  ;;  %v682_v30 = vpop.f32.mrf.mxu1 }
 0x1a3   : > { %688 = vst [vmem:[#allocation2] sm:$0xff] %v671_v27  ;;  %692 = vst [vmem:[#allocation2 + $0x20] sm:$0xff] %v681_v28  ;;  %v673_v31 = vadd.f32 %v672_v29, %v590_v19  ;;  %v683_v32 = vadd.f32 %v682_v30, %v590_v19 }
 0x1a4   : > { %v674_v33 = vpop.f32.mrf.mxu0  ;;  %v684_v34 = vpop.f32.mrf.mxu1 }
 0x1a5   : > { %689 = vst [vmem:[#allocation2 + $0x18] sm:$0xff] %v673_v31  ;;  %693 = vst [vmem:[#allocation2 + $0x28] sm:$0xff] %v683_v32  ;;  %v675_v35 = vadd.f32 %v674_v33, %v594_v20  ;;  %v685_v36 = vadd.f32 %v684_v34, %v594_v20 }
 0x1a7   : > { %690 = vst [vmem:[#allocation2 + $0x10] sm:$0xff] %v675_v35  ;;  %694 = vst [vmem:[#allocation2 + $0x38] sm:$0xff] %v685_v36 }
 0x1a8 PF: > { %v14698_v37 = vld [vmem:[%s16689_s17 + $0x74] ss:$8 sps:$4 sm:$0xff]   ;;  %v14702_v39 = vld [vmem:[%s16689_s17 + $0x70] ss:$8 sps:$4 sm:$0xff]   ;;  %v14704_v41 = vld [vmem:[%s16689_s17 + $0x64] ss:$8 sps:$4 sm:$0xff]  }
 0x1a9   : > { %v14700_v38 = vld [vmem:[%s16689_s17 + $0x174] ss:$8 sps:$4 sm:$0xff]   ;;  %7642 = vmatprep.subr.bf16.mxu0 %v14698_v37  ;;  %v14703_v40 = vld [vmem:[%s16689_s17 + $0x170] ss:$8 sps:$4 sm:$0xff]   ;;  %v14706_v42 = vld [vmem:[%s16689_s17 + $0x164] ss:$8 sps:$4 sm:$0xff]  }
 0x1aa   : > { %7695 = vmatprep.subr.bf16.mxu1 %v14700_v38  ;;  %7643 = vmatpush1.bf16.msra.mxu0 %v14702_v39  ;;  %v14708_v43 = vld [vmem:[%s16689_s17 + $0x60] ss:$8 sps:$4 sm:$0xff]   ;;  %v14710_v45 = vld [vmem:[%s16689_s17 + $0x54] ss:$8 sps:$4 sm:$0xff]   ;;  %v14714_v47 = vld [vmem:[%s16689_s17 + $0x50] ss:$8 sps:$4 sm:$0xff]  }
 0x1ab   : > { %7696 = vmatpush1.bf16.msra.mxu1 %v14703_v40  ;;  %7644 = vmatprep.subr.bf16.mxu0 %v14704_v41  ;;  %v14709_v44 = vld [vmem:[%s16689_s17 + $0x160] ss:$8 sps:$4 sm:$0xff]   ;;  %v14712_v46 = vld [vmem:[%s16689_s17 + $0x154] ss:$8 sps:$4 sm:$0xff]   ;;  %v14715_v48 = vld [vmem:[%s16689_s17 + $0x150] ss:$8 sps:$4 sm:$0xff]  }
 0x1ac   : > { %7697 = vmatprep.subr.bf16.mxu1 %v14706_v42  ;;  %v14716_v49 = vld [vmem:[%s16689_s17 + $0x44] ss:$8 sps:$4 sm:$0xff]   ;;  %v14720_v51 = vld [vmem:[%s16689_s17 + $0x40] ss:$8 sps:$4 sm:$0xff]   ;;  %v14722_v53 = vld [vmem:[%s16689_s17 + $0x34] ss:$8 sps:$4 sm:$0xff]  }
 0x1ad   : > { %v14718_v50 = vld [vmem:[%s16689_s17 + $0x144] ss:$8 sps:$4 sm:$0xff]   ;;  %v14721_v52 = vld [vmem:[%s16689_s17 + $0x140] ss:$8 sps:$4 sm:$0xff]   ;;  %v14724_v54 = vld [vmem:[%s16689_s17 + $0x134] ss:$8 sps:$4 sm:$0xff]  }
 0x1ae   : > { %7645 = vmatpush1.bf16.msra.mxu0 %v14708_v43  ;;  %v14726_v55 = vld [vmem:[%s16689_s17 + $0x30] ss:$8 sps:$4 sm:$0xff]   ;;  %v14728_v57 = vld [vmem:[%s16689_s17 + $0x24] ss:$8 sps:$4 sm:$0xff]   ;;  %v14732_v59 = vld [vmem:[%s16689_s17 + $0x20] ss:$8 sps:$4 sm:$0xff]  }
 0x1af   : > { %7698 = vmatpush1.bf16.msra.mxu1 %v14709_v44  ;;  %7646 = vmatprep.subr.bf16.mxu0 %v14710_v45  ;;  %v14727_v56 = vld [vmem:[%s16689_s17 + $0x130] ss:$8 sps:$4 sm:$0xff]   ;;  %v14730_v58 = vld [vmem:[%s16689_s17 + $0x124] ss:$8 sps:$4 sm:$0xff]   ;;  %v14733_v60 = vld [vmem:[%s16689_s17 + $0x120] ss:$8 sps:$4 sm:$0xff]  }
 0x1b0   : > { %7699 = vmatprep.subr.bf16.mxu1 %v14712_v46  ;;  %v14734_v61 = vld [vmem:[%s16689_s17 + $0x14] ss:$8 sps:$4 sm:$0xff]   ;;  %v14738_v63 = vld [vmem:[%s16689_s17 + $0x10] ss:$8 sps:$4 sm:$0xff]   ;;  %v14740_v1 = vld [vmem:[%s16689_s17 + $0x4] ss:$8 sps:$4 sm:$0xff]  }
 0x1b1   : > { %v14736_v62 = vld [vmem:[%s16689_s17 + $0x114] ss:$8 sps:$4 sm:$0xff]   ;;  %v14739_v0 = vld [vmem:[%s16689_s17 + $0x110] ss:$8 sps:$4 sm:$0xff]   ;;  %v14742_v2 = vld [vmem:[%s16689_s17 + $0x104] ss:$8 sps:$4 sm:$0xff]  }
 0x1b2   : > { %7647 = vmatpush1.bf16.msra.mxu0 %v14714_v47  ;;  %v14744_v3 = vld [vmem:[%s16689_s17] ss:$8 sps:$4 sm:$0xff]   ;;  %v14746_v5 = vld [vmem:[%s16689_s17 + $0xf4] ss:$8 sps:$4 sm:$0xff]   ;;  %v14750_v7 = vld [vmem:[%s16689_s17 + $0xf0] ss:$8 sps:$4 sm:$0xff]  }
 0x1b3   : > { %7700 = vmatpush1.bf16.msra.mxu1 %v14715_v48  ;;  %7648 = vmatprep.subr.bf16.mxu0 %v14716_v49  ;;  %v14745_v4 = vld [vmem:[%s16689_s17 + $0x100] ss:$8 sps:$4 sm:$0xff]   ;;  %v14748_v6 = vld [vmem:[%s16689_s17 + $0x1f4] ss:$8 sps:$4 sm:$0xff]   ;;  %v14751_v8 = vld [vmem:[%s16689_s17 + $0x1f0] ss:$8 sps:$4 sm:$0xff]  }
 0x1b4   : > { %7701 = vmatprep.subr.bf16.mxu1 %v14718_v50  ;;  %v14752_v9 = vld [vmem:[%s16689_s17 + $0xe4] ss:$8 sps:$4 sm:$0xff]   ;;  %v14756_v11 = vld [vmem:[%s16689_s17 + $0xe0] ss:$8 sps:$4 sm:$0xff]   ;;  %v14758_v13 = vld [vmem:[%s16689_s17 + $0xd4] ss:$8 sps:$4 sm:$0xff]  }
 0x1b5   : > { %v14754_v10 = vld [vmem:[%s16689_s17 + $0x1e4] ss:$8 sps:$4 sm:$0xff]   ;;  %v14757_v12 = vld [vmem:[%s16689_s17 + $0x1e0] ss:$8 sps:$4 sm:$0xff]   ;;  %v14760_v14 = vld [vmem:[%s16689_s17 + $0x1d4] ss:$8 sps:$4 sm:$0xff]  }
 0x1b6   : > { %7649 = vmatpush1.bf16.msra.mxu0 %v14720_v51  ;;  %v14762_v15 = vld [vmem:[%s16689_s17 + $0xd0] ss:$8 sps:$4 sm:$0xff]   ;;  %v14764_v17 = vld [vmem:[%s16689_s17 + $0xc4] ss:$8 sps:$4 sm:$0xff]   ;;  %v14768_v19 = vld [vmem:[%s16689_s17 + $0xc0] ss:$8 sps:$4 sm:$0xff]  }
 0x1b7   : > { %7702 = vmatpush1.bf16.msra.mxu1 %v14721_v52  ;;  %7650 = vmatprep.subr.bf16.mxu0 %v14722_v53  ;;  %v14763_v16 = vld [vmem:[%s16689_s17 + $0x1d0] ss:$8 sps:$4 sm:$0xff]   ;;  %v14766_v18 = vld [vmem:[%s16689_s17 + $0x1c4] ss:$8 sps:$4 sm:$0xff]   ;;  %v14769_v24 = vld [vmem:[%s16689_s17 + $0x1c0] ss:$8 sps:$4 sm:$0xff]  }
 0x1b8   : > { %7703 = vmatprep.subr.bf16.mxu1 %v14724_v54  ;;  %v695_v20 = vld [vmem:[#allocation2 + $0x30] sm:$0xff]  ;;  %v696_v21 = vld [vmem:[#allocation2] sm:$0xff]  ;;  %v697_v22 = vld [vmem:[#allocation2 + $0x18] sm:$0xff]  ;;  %vm743_vm1 = vcmask 1043712   ;;  %vm760_vm2 = vcmask 781312   ;;  %vm793_vm3 = vcmask 1042432  }
 0x1b9   : > { %v698_v23 = vld [vmem:[#allocation2 + $0x10] sm:$0xff]  ;;  %v14339_v25 = vpack.c.bf16 %v696_v21, %v695_v20  ;;  %v14774_v29 = vld [vmem:[%s16689_s17 + $0xb0] ss:$8 sps:$4 sm:$0xff]   ;;  %vm794_vm4 = vcmask 1046532   ;;  %vm852_vm6 = vsmask.f32 2304 }
 0x1ba   : > { %7651 = vmatpush1.bf16.msra.mxu0 %v14726_v55  ;;  %v14340_v26 = vpack.c.bf16 %v698_v23, %v697_v22  ;;  %v14770_v27 = vld [vmem:[%s16689_s17 + $0xb4] ss:$8 sps:$4 sm:$0xff]   ;;  %v14775_v30 = vld [vmem:[%s16689_s17 + $0x1b0] ss:$8 sps:$4 sm:$0xff]   ;;  %v14776_v31 = vld [vmem:[%s16689_s17 + $0xa4] ss:$8 sps:$4 sm:$0xff]  }
 0x1bb   : > { %7704 = vmatpush1.bf16.msra.mxu1 %v14727_v56  ;;  %7652 = vmatprep.subr.bf16.mxu0 %v14728_v57  ;;  %v14772_v28 = vld [vmem:[%s16689_s17 + $0x1b4] ss:$8 sps:$4 sm:$0xff]   ;;  %727 = vst [vmem:[#allocation3 + $0x14] sm:$0xff] %v14339_v25  ;;  %733 = vst [vmem:[#allocation3 + $0x34] sm:$0x77] %v14339_v25  ;;  %vm1007_vm9 = vcmask 1041408  }
 0x1bc   : > { %7705 = vmatprep.subr.bf16.mxu1 %v14730_v58  ;;  %728 = vst [vmem:[#allocation3 + $0x24] sm:$0xff] %v14340_v26  ;;  %731 = vst [vmem:[#allocation3 + $0x4] sm:$0xee] %v14340_v26  ;;  %v14778_v32 = vld [vmem:[%s16689_s17 + $0x1a4] ss:$8 sps:$4 sm:$0xff]   ;;  %vm1008_vm10 = vcmask 1045508  }
 0x1bd   : > { %v14780_v33 = vld [vmem:[%s16689_s17 + $0xa0] ss:$8 sps:$4 sm:$0xff]   ;;  %v14782_v35 = vld [vmem:[%s16689_s17 + $0x94] ss:$8 sps:$4 sm:$0xff]   ;;  %v14786_v43 = vld [vmem:[%s16689_s17 + $0x90] ss:$8 sps:$4 sm:$0xff]  }
 0x1be   : > { %7653 = vmatpush1.bf16.msra.mxu0 %v14732_v59  ;;  %v14781_v34 = vld [vmem:[%s16689_s17 + $0x1a0] ss:$8 sps:$4 sm:$0xff]   ;;  %v14784_v36 = vld [vmem:[%s16689_s17 + $0x194] ss:$8 sps:$4 sm:$0xff]   ;;  %v14787_v44 = vld [vmem:[%s16689_s17 + $0x190] ss:$8 sps:$4 sm:$0xff]  }
 0x1bf   : > { %7706 = vmatpush1.bf16.msra.mxu1 %v14733_v60  ;;  %7654 = vmatprep.subr.bf16.mxu0 %v14734_v61  ;;  %v14788_v45 = vld [vmem:[%s16689_s17 + $0x84] ss:$8 sps:$4 sm:$0xff]   ;;  %v14792_v47 = vld [vmem:[%s16689_s17 + $0x80] ss:$8 sps:$4 sm:$0xff]   ;;  %vm16792_vm5 = vmor %vm793_vm3, %vm794_vm4  ;;  %vm853_vm7 = vsmask.f32 6416 }
 0x1c0   : > { %7707 = vmatprep.subr.bf16.mxu1 %v14736_v62  ;;  %v14790_v46 = vld [vmem:[%s16689_s17 + $0x184] ss:$8 sps:$4 sm:$0xff]   ;;  %v14793_v48 = vld [vmem:[%s16689_s17 + $0x180] ss:$8 sps:$4 sm:$0xff]   ;;  %v14796_v50 = vld [vmem:[%s16689_s17 + $0x274] ss:$8 sps:$4 sm:$0xff]  }
 0x1c1   : > { %v14799_v51 = vld [vmem:[%s16689_s17 + $0x374] ss:$8 sps:$4 sm:$0xff]   ;;  %v14814_v20 = vld [vmem:[%s16689_s17 + $0x244] ss:$8 sps:$4 sm:$0xff]   ;;  %v14812_v22 = vld [vmem:[%s16689_s17 + $0x240] ss:$8 sps:$4 sm:$0xff]  }
 0x1c2   : > { %7655 = vmatpush1.bf16.msra.mxu0 %v14738_v63  ;;  %v736_v38 = vld [vmem:[#allocation3 + $0x18] sm:$0xf]  ;;  %v753_v41 = vld [vmem:[#allocation3 + $0x14] sm:$0xf]  ;;  %v14823_v25 = vld [vmem:[%s16689_s17 + $0x334] ss:$8 sps:$4 sm:$0xff]  }
 0x1c3   : > { %7708 = vmatpush1.bf16.msra.mxu1 %v14739_v0  ;;  %7656 = vmatprep.subr.bf16.mxu0 %v14740_v1  ;;  %v735_v37 = vld [vmem:[#allocation3 + $0x8] sm:$0xf]  ;;  %745 = vst.msk [vmem:[#allocation3 + $0x10] sm:$0xf] %vm743_vm1, %v736_v38  ;;  %v752_v40 = vld [vmem:[#allocation3 + $0x4] sm:$0xf]  ;;  %vm16875_vm8 = vmor %vm852_vm6, %vm853_vm7 }
 0x1c4   : > { %7709 = vmatprep.subr.bf16.mxu1 %v14742_v2  ;;  %v737_v39 = vld [vmem:[#allocation3 + $0x28] sm:$0xf]  ;;  %744 = vst.msk [vmem:[#allocation3] sm:$0xf] %vm743_vm1, %v735_v37  ;;  %v754_v42 = vld [vmem:[#allocation3 + $0x24] sm:$0xf]  ;;  %vm16962_vm11 = vmor %vm1007_vm9, %vm1008_vm10 }
 0x1c5   : > { %746 = vst.msk [vmem:[#allocation3 + $0x20] sm:$0xf] %vm743_vm1, %v737_v39  ;;  %v14817_v21 = vld [vmem:[%s16689_s17 + $0x344] ss:$8 sps:$4 sm:$0xff]   ;;  %v14815_v23 = vld [vmem:[%s16689_s17 + $0x340] ss:$8 sps:$4 sm:$0xff]  }
 0x1c6   : > { %7657 = vmatpush1.bf16.msra.mxu0 %v14744_v3  ;;  %761 = vst.msk [vmem:[#allocation3 + $0xc] sm:$0xf] %vm760_vm2, %v752_v40  ;;  %762 = vst.msk [vmem:[#allocation3 + $0x1c] sm:$0xf] %vm760_vm2, %v753_v41  ;;  %v14818_v26 = vld [vmem:[%s16689_s17 + $0x230] ss:$8 sps:$4 sm:$0xff]  }
 0x1c7   : > { %7710 = vmatpush1.bf16.msra.mxu1 %v14745_v4  ;;  %7658 = vmatprep.subr.bf16.mxu0 %v14746_v5  ;;  %763 = vst.msk [vmem:[#allocation3 + $0x2c] sm:$0xf] %vm760_vm2, %v754_v42  ;;  %v14827_v41 = vld [vmem:[%s16689_s17 + $0x320] ss:$8 sps:$4 sm:$0xff]   ;;  %v14832_v42 = vld [vmem:[%s16689_s17 + $0x214] ss:$8 sps:$4 sm:$0xff]  }
 0x1c8   : > { %7711 = vmatprep.subr.bf16.mxu1 %v14748_v6  ;;  %vm1066_vm12 = vsmask.f32 1280  ;;  %vm1067_vm13 = vsmask.f32 5392  ;;  %vm1221_vm15 = vcmask 1040384   ;;  %vm1222_vm0 = vcmask 1044484  }
 0x1c9   : > { %vm17085_vm14 = vmor %vm1066_vm12, %vm1067_vm13  ;;  %vm1280_vm4 = vsmask.f32 256  ;;  %vm1281_vm6 = vsmask.f32 4368  ;;  %v15581_v49 = vld [vmem:[%s16689_s17 + $0x1364] ss:$8 sps:$4 sm:$0xff]  }
 0x1ca   : > { %7659 = vmatpush2.bf16.msra.mxu0 %v14750_v7  ;;  %v16798_v53 = vld [vmem:[#allocation3 + $0x10] sm:$0xff]  ;;  %vm17235_vm3 = vmor %vm1221_vm15, %vm1222_vm0  ;;  %s16396_s27 = smov 16   ;;  %s16397_s25 = smov 32  }
 0x1cb   : > { %7712 = vmatpush2.bf16.msra.mxu1 %v14751_v8  ;;  %7660 = vmatprep.subr.bf16.mxu0 %v14752_v9  ;;  %v769_v52 = vld [vmem:[#allocation3] sm:$0xee]  ;;  %v798_v56 = vrot.slane %v16798_v53, 5  ;;  %v865_v37 = vshrl.u32 %v16798_v53, 16  ;;  %v868_v38 = vshll.u32 %v16798_v53, 16  ;;  %vm17399_vm7 = vmor %vm1280_vm4, %vm1281_vm6  ;;  %s16398_s26 = smov 64  }
 0x1cc   : > { %7713 = vmatprep.subr.bf16.mxu1 %v14754_v10  ;;  %v773_v54 = vld [vmem:[#allocation3 + $0x20] sm:$0x11]  ;;  %v12981_v55 = vrot.slane %v769_v52, 9  ;;  %v14836_v53 = vld [vmem:[%s16689_s17 + $0x200] ss:$8 sps:$4 sm:$0xff]   ;;  %p13945_p11 = scmp.ge.s32.totalorder %s16485_s10, 3 }
 0x1cd   : > { %v805_v57 = vrot.slane %v773_v54, 5  ;;  %v770_v58 = vld [vmem:[#allocation3 + $0x8] sm:$0xee]  ;;  %v16801_v59 = vld [vmem:[#allocation3 + $0x18] sm:$0xff]  ;;  %v804_v0 = vrot.slane %v798_v56, 4 }
 0x1ce   : > { %7661 = vmatpush2.bf16.msra.mxu0 %v14756_v11  ;;  %v774_v60 = vld [vmem:[#allocation3 + $0x28] sm:$0x11]  ;;  %v12982_v61 = vrot.slane %v770_v58, 9  ;;  %v802_v62 = vrot.slane %v16801_v59, 5  ;;  %v799_v63 = vsel %vm16792_vm5, %v12981_v55, %v798_v56  ;;  %v883_v39 = vshrl.u32 %v16801_v59, 16 }
 0x1cf   : > { %7714 = vmatpush2.bf16.msra.mxu1 %v14757_v12  ;;  %7662 = vmatprep.subr.bf16.mxu0 %v14758_v13  ;;  %v808_v1 = vrot.slane %v774_v60, 5  ;;  %v806_v4 = vsel %vm16792_vm5, %v804_v0, %v805_v57  ;;  %v14794_v8 = vld [vmem:[%s16689_s17 + $0x270] ss:$8 sps:$4 sm:$0xff]   ;;  %v14802_v12 = vld [vmem:[%s16689_s17 + $0x264] ss:$8 sps:$4 sm:$0xff]   ;;  %v886_v40 = vshll.u32 %v16801_v59, 16 }
 0x1d0   : > { %7715 = vmatprep.subr.bf16.mxu1 %v14760_v14  ;;  %v803_v2 = vsel %vm16792_vm5, %v12982_v61, %v802_v62  ;;  %v807_v3 = vrot.slane %v802_v62, 4  ;;  %v13009_v5 = vcombine.low %v799_v63, %v806_v4  ;;  %v13010_v6 = vcombine.high %v799_v63, %v806_v4  ;;  %v14797_v11 = vld [vmem:[%s16689_s17 + $0x370] ss:$8 sps:$4 sm:$0xff]   ;;  %v14805_v13 = vld [vmem:[%s16689_s17 + $0x364] ss:$8 sps:$4 sm:$0xff]  }
 0x1d1   : > { %v14800_v14 = vld [vmem:[%s16689_s17 + $0x260] ss:$8 sps:$4 sm:$0xff]   ;;  %v14841_v52 = vld [vmem:[%s16689_s17 + $0x304] ss:$8 sps:$4 sm:$0xff]   ;;  %v841_v56 = vld [vmem:[#allocation3 + $0x8] sm:$0xee] }
 0x1d2   : > { %7663 = vmatpush2.bf16.msra.mxu0 %v14762_v15  ;;  %v809_v7 = vsel %vm16792_vm5, %v807_v3, %v808_v1  ;;  %7674 = vmatprep.mubr.bf16.mxu0 %v13010_v6  ;;  %v14803_v15 = vld [vmem:[%s16689_s17 + $0x360] ss:$8 sps:$4 sm:$0xff]   ;;  %v840_v54 = vld [vmem:[#allocation3] sm:$0xee] }
 0x1d3   : > { %7716 = vmatpush2.bf16.msra.mxu1 %v14763_v16  ;;  %7664 = vmatprep.subr.bf16.mxu0 %v14764_v17  ;;  %v13011_v9 = vcombine.low %v803_v2, %v809_v7  ;;  %v13012_v10 = vcombine.high %v803_v2, %v809_v7  ;;  %v14808_v16 = vld [vmem:[%s16689_s17 + $0x254] ss:$8 sps:$4 sm:$0xff]   ;;  %v844_v55 = vld [vmem:[#allocation3 + $0x20] sm:$0x33]  ;;  %v14839_v57 = vld [vmem:[%s16689_s17 + $0x300] ss:$8 sps:$4 sm:$0xff]  }
 0x1d4   : > { %7717 = vmatprep.subr.bf16.mxu1 %v14766_v18  ;;  %v14811_v17 = vld [vmem:[%s16689_s17 + $0x354] ss:$8 sps:$4 sm:$0xff]   ;;  %v14806_v18 = vld [vmem:[%s16689_s17 + $0x250] ss:$8 sps:$4 sm:$0xff]   ;;  %v856_v4 = vshrl.u32 %v840_v54, 16  ;;  %v893_v6 = vshrl.u32 %v844_v55, 16 }
 0x1d5   : > { %7727 = vmatprep.mubr.bf16.mxu1 %v13012_v10  ;;  %v14844_v58 = vld [vmem:[%s16689_s17 + $0x2f4] ss:$8 sps:$4 sm:$0xff]   ;;  %v896_v7 = vshll.u32 %v844_v55, 16  ;;  %v877_v10 = vshll.u32 %v841_v56, 16  ;;  %v14854_v55 = vld [vmem:[%s16689_s17 + $0x2d0] ss:$8 sps:$4 sm:$0xff]  }
 0x1d6   : > { %7665 = vmatpush2.bf16.msra.mxu0 %v14768_v19  ;;  %v14809_v19 = vld [vmem:[%s16689_s17 + $0x350] ss:$8 sps:$4 sm:$0xff]   ;;  %v14847_v62 = vld [vmem:[%s16689_s17 + $0x3f4] ss:$8 sps:$4 sm:$0xff]  }
 0x1d7   : > { %7718 = vmatpush2.bf16.msra.mxu1 %v14769_v24  ;;  %7666 = vmatprep.subr.bf16.mxu0 %v14770_v27  ;;  %v14820_v24 = vld [vmem:[%s16689_s17 + $0x234] ss:$8 sps:$4 sm:$0xff]   ;;  %v14821_v27 = vld [vmem:[%s16689_s17 + $0x330] ss:$8 sps:$4 sm:$0xff]  }
 0x1d8   : > { %7719 = vmatprep.subr.bf16.mxu1 %v14772_v28  ;;  %v14826_v28 = vld [vmem:[%s16689_s17 + $0x224] ss:$8 sps:$4 sm:$0xff]  }
 0x1da   : > { %7667 = vmatpush2.bf16.msra.mxu0 %v14774_v29  ;;  %v699_v29 = vld [vmem:[#allocation2 + $0x8] sm:$0xff] }
 0x1db   : > { %7720 = vmatpush2.bf16.msra.mxu1 %v14775_v30  ;;  %7668 = vmatprep.subr.bf16.mxu0 %v14776_v31  ;;  %v700_v30 = vld [vmem:[#allocation2 + $0x20] sm:$0xff]  ;;  %v701_v31 = vld [vmem:[#allocation2 + $0x28] sm:$0xff] }
 0x1dc   : > { %7721 = vmatprep.subr.bf16.mxu1 %v14778_v32  ;;  %v702_v32 = vld [vmem:[#allocation2 + $0x38] sm:$0xff] }
 0x1de   : > { %7669 = vmatpush2.bf16.msra.mxu0 %v14780_v33  ;;  %v14829_v33 = vld [vmem:[%s16689_s17 + $0x324] ss:$8 sps:$4 sm:$0xff]  }
 0x1df   : > { %7722 = vmatpush2.bf16.msra.mxu1 %v14781_v34  ;;  %7670 = vmatprep.subr.bf16.mxu0 %v14782_v35  ;;  %v14341_v34 = vpack.c.bf16 %v700_v30, %v699_v29  ;;  %v14342_v35 = vpack.c.bf16 %v702_v32, %v701_v31  ;;  %v14851_v30 = vld [vmem:[%s16689_s17 + $0x3e0] ss:$8 sps:$4 sm:$0xff]   ;;  %v14856_v31 = vld [vmem:[%s16689_s17 + $0x2d4] ss:$8 sps:$4 sm:$0xff]  }
 0x1e0   : > { %7723 = vmatprep.subr.bf16.mxu1 %v14784_v36  ;;  %v14824_v36 = vld [vmem:[%s16689_s17 + $0x220] ss:$8 sps:$4 sm:$0xff]  }
 0x1e1   : > { %729 = vst [vmem:[#allocation3 + $0x54] sm:$0xff] %v14341_v34  ;;  %730 = vst [vmem:[#allocation3 + $0x64] sm:$0xff] %v14342_v35 }
 0x1e2   : > { %7671 = vmatpush2.bf16.msra.mxu0 %v14786_v43  ;;  %732 = vst [vmem:[#allocation3 + $0x44] sm:$0xee] %v14342_v35  ;;  %734 = vst [vmem:[#allocation3 + $0x74] sm:$0x77] %v14341_v34  ;;  %v14830_v43 = vld [vmem:[%s16689_s17 + $0x210] ss:$8 sps:$4 sm:$0xff]  }
 0x1e3   : > { %7724 = vmatpush2.bf16.msra.mxu1 %v14787_v44  ;;  %7672 = vmatprep.subr.bf16.mxu0 %v14788_v45  ;;  %v14835_v44 = vld [vmem:[%s16689_s17 + $0x314] ss:$8 sps:$4 sm:$0xff]   ;;  %v14833_v45 = vld [vmem:[%s16689_s17 + $0x310] ss:$8 sps:$4 sm:$0xff]  }
 0x1e4   : > { %7725 = vmatprep.subr.bf16.mxu1 %v14790_v46  ;;  %v867_v46 = vrot.slane %v865_v37, 5 }
 0x1e6   : > { %7673 = vmatpush2.bf16.msra.mxu0 %v14792_v47  ;;  %v870_v47 = vrot.slane %v868_v38, 6 }
 0x1e7   : > { %7726 = vmatpush2.bf16.msra.mxu1 %v14793_v48  ;;  %7748 = vmatprep.subr.bf16.mxu0 %v14796_v50  ;;  %v885_v48 = vrot.slane %v883_v39, 5  ;;  %v888_v50 = vrot.slane %v886_v40, 6 }
 0x1e8   : > { %7801 = vmatprep.subr.bf16.mxu1 %v14799_v51  ;;  %v14838_v51 = vld [vmem:[%s16689_s17 + $0x204] ss:$8 sps:$4 sm:$0xff]   ;;  %v741_v61 = vld [vmem:[#allocation3 + $0x68] sm:$0xf]  ;;  %v758_v1 = vld [vmem:[#allocation3 + $0x64] sm:$0xf]  ;;  %v16851_v2 = vor.u32 %v870_v47, %v867_v46 }
 0x1e9   : > { %7675 = vmatmul.mubr.bf16.vlgmr.msra.gmra.mxu0 %v13009_v5  ;;  %v739_v59 = vld [vmem:[#allocation3 + $0x48] sm:$0xf]  ;;  %v740_v60 = vld [vmem:[#allocation3 + $0x58] sm:$0xf]  ;;  %750 = vst.msk [vmem:[#allocation3 + $0x60] sm:$0xf] %vm743_vm1, %v741_v61  ;;  %v16853_v3 = vor.u32 %v888_v50, %v885_v48 }
 0x1ea   : > { %7728 = vmatmul.mubr.bf16.vlgmr.msra.gmra.mxu1 %v13011_v9  ;;  %7749 = vmatpush1.bf16.msra.mxu0 %v14794_v8  ;;  %748 = vst.msk [vmem:[#allocation3 + $0x40] sm:$0xf] %vm743_vm1, %v739_v59  ;;  %749 = vst.msk [vmem:[#allocation3 + $0x50] sm:$0xf] %vm743_vm1, %v740_v60  ;;  %v756_v63 = vld [vmem:[#allocation3 + $0x44] sm:$0xf] }
 0x1eb   : > { %7802 = vmatpush1.bf16.msra.mxu1 %v14797_v11  ;;  %7750 = vmatprep.subr.bf16.mxu0 %v14802_v12  ;;  %v757_v0 = vld [vmem:[#allocation3 + $0x54] sm:$0xf]  ;;  %765 = vst.msk [vmem:[#allocation3 + $0x4c] sm:$0xf] %vm760_vm2, %v756_v63  ;;  %767 = vst.msk [vmem:[#allocation3 + $0x6c] sm:$0xf] %vm760_vm2, %v758_v1 }
 0x1ec   : > { %7803 = vmatprep.subr.bf16.mxu1 %v14805_v13  ;;  %766 = vst.msk [vmem:[#allocation3 + $0x5c] sm:$0xf] %vm760_vm2, %v757_v0  ;;  %v859_v5 = vshll.u32 %v840_v54, 16  ;;  %v845_v8 = vld [vmem:[#allocation3 + $0x28] sm:$0x33]  ;;  %v874_v9 = vshrl.u32 %v841_v56, 16 }
 0x1ed   : > { %v903_v11 = vshrl.u32 %v845_v8, 16  ;;  %v906_v12 = vshll.u32 %v845_v8, 16  ;;  %v14842_v13 = vld [vmem:[%s16689_s17 + $0x2f0] ss:$8 sps:$4 sm:$0xff]   ;;  %v901_v29 = vrot.slane %v16853_v3, 4 }
 0x1ee   : > { %7751 = vmatpush1.bf16.msra.mxu0 %v14800_v14  ;;  %v858_v14 = vrot.slane %v856_v4, 5  ;;  %v14859_v48 = vld [vmem:[%s16689_s17 + $0x3d4] ss:$8 sps:$4 sm:$0xff]   ;;  %v14857_v60 = vld [vmem:[%s16689_s17 + $0x3d0] ss:$8 sps:$4 sm:$0xff]  }
 0x1ef   : > { %7804 = vmatpush1.bf16.msra.mxu1 %v14803_v15  ;;  %7752 = vmatprep.subr.bf16.mxu0 %v14808_v16  ;;  %v861_v15 = vrot.slane %v859_v5, 6  ;;  %v895_v16 = vrot.slane %v893_v6, 5  ;;  %v14862_v61 = vld [vmem:[%s16689_s17 + $0x2c4] ss:$8 sps:$4 sm:$0xff]   ;;  %v14860_v5 = vld [vmem:[%s16689_s17 + $0x2c0] ss:$8 sps:$4 sm:$0xff]  }
 0x1f0   : > { %7805 = vmatprep.subr.bf16.mxu1 %v14811_v17  ;;  %v898_v17 = vrot.slane %v896_v7, 6  ;;  %v779_v34 = vld [vmem:[#allocation3 + $0x60] sm:$0x11] }
 0x1f1   : > { %v775_v32 = vld [vmem:[#allocation3 + $0x40] sm:$0xee]  ;;  %v819_v39 = vrot.slane %v779_v34, 5 }
 0x1f2   : > { %7753 = vmatpush1.bf16.msra.mxu0 %v14806_v18  ;;  %v14845_v18 = vld [vmem:[%s16689_s17 + $0x3f0] ss:$8 sps:$4 sm:$0xff]   ;;  %v12983_v37 = vrot.slane %v775_v32, 9  ;;  %v14865_v1 = vld [vmem:[%s16689_s17 + $0x3c4] ss:$8 sps:$4 sm:$0xff]  }
 0x1f3   : > { %7806 = vmatpush1.bf16.msra.mxu1 %v14809_v19  ;;  %7754 = vmatprep.subr.bf16.mxu0 %v14814_v20  ;;  %v876_v19 = vrot.slane %v874_v9, 5  ;;  %v879_v20 = vrot.slane %v877_v10, 6  ;;  %v776_v40 = vld [vmem:[#allocation3 + $0x48] sm:$0xee]  ;;  %v846_v8 = vld [vmem:[#allocation3 + $0x40] sm:$0xee] }
 0x1f4   : > { %7807 = vmatprep.subr.bf16.mxu1 %v14817_v21  ;;  %v905_v21 = vrot.slane %v903_v11, 5  ;;  %v14863_v9 = vld [vmem:[%s16689_s17 + $0x3c0] ss:$8 sps:$4 sm:$0xff]   ;;  %v14868_v10 = vld [vmem:[%s16689_s17 + $0x2b4] ss:$8 sps:$4 sm:$0xff]  }
 0x1f5   : > { %v847_v11 = vld [vmem:[#allocation3 + $0x48] sm:$0xee] }
 0x1f6   : > { %7755 = vmatpush1.bf16.msra.mxu0 %v14812_v22  ;;  %v908_v22 = vrot.slane %v906_v12, 6  ;;  %v14871_v12 = vld [vmem:[%s16689_s17 + $0x3b4] ss:$8 sps:$4 sm:$0xff]  }
 0x1f7   : > { %7808 = vmatpush1.bf16.msra.mxu1 %v14815_v23  ;;  %7756 = vmatprep.subr.bf16.mxu0 %v14820_v24  ;;  %v14850_v23 = vld [vmem:[%s16689_s17 + $0x2e4] ss:$8 sps:$4 sm:$0xff]   ;;  %v862_v24 = vor.u32 %v861_v15, %v858_v14  ;;  %v912_v15 = vshrl.u32 %v846_v8, 16 }
 0x1f8   : > { %7809 = vmatprep.subr.bf16.mxu1 %v14823_v25  ;;  %v14848_v25 = vld [vmem:[%s16689_s17 + $0x2e0] ss:$8 sps:$4 sm:$0xff]   ;;  %v850_v14 = vld [vmem:[#allocation3 + $0x60] sm:$0x33] }
 0x1f9   : > { %v863_v35 = vrot.slane %v862_v24, 4  ;;  %v933_v24 = vshll.u32 %v847_v11, 16 }
 0x1fa   : > { %7757 = vmatpush1.bf16.msra.mxu0 %v14818_v26  ;;  %v14853_v26 = vld [vmem:[%s16689_s17 + $0x3e4] ss:$8 sps:$4 sm:$0xff]  }
 0x1fb   : > { %7810 = vmatpush1.bf16.msra.mxu1 %v14821_v27  ;;  %7758 = vmatprep.subr.bf16.mxu0 %v14826_v28  ;;  %v891_v27 = vrot.slane %v16851_v2, 4  ;;  %v880_v28 = vor.u32 %v879_v20, %v876_v19  ;;  %v930_v20 = vshrl.u32 %v847_v11, 16 }
 0x1fc   : > { %7811 = vmatprep.subr.bf16.mxu1 %v14829_v33  ;;  %v16867_v33 = vld [vmem:[#allocation3 + $0x50] sm:$0xff] }
 0x1fd   : > { %v812_v38 = vrot.slane %v16867_v33, 5  ;;  %v881_v47 = vrot.slane %v880_v28, 4  ;;  %v924_v19 = vshll.u32 %v16867_v33, 16  ;;  %v914_v28 = vrot.slane %v912_v15, 5 }
 0x1fe   : > { %7759 = vmatpush1.bf16.msra.mxu0 %v14824_v36  ;;  %v899_v36 = vor.u32 %v898_v17, %v895_v16  ;;  %v921_v16 = vshrl.u32 %v16867_v33, 16  ;;  %v14869_v17 = vld [vmem:[%s16689_s17 + $0x3b0] ss:$8 sps:$4 sm:$0xff]  }
 0x1ff   : > { %7812 = vmatpush1.bf16.msra.mxu1 %v14827_v41  ;;  %7760 = vmatprep.subr.bf16.mxu0 %v14832_v42  ;;  %v16870_v41 = vld [vmem:[#allocation3 + $0x58] sm:$0xff]  ;;  %v909_v42 = vor.u32 %v908_v22, %v905_v21  ;;  %v813_v50 = vsel %vm16792_vm5, %v12983_v37, %v812_v38  ;;  %v16907_v0 = vsel %vm16875_vm8, %v881_v47, %v16853_v3  ;;  %v926_v34 = vrot.slane %v924_v19, 6  ;;  %v14904_v19 = vld [vmem:[%s16689_s17 + $0x454] ss:$8 sps:$4 sm:$0xff]  }
 0x200   : > { %7813 = vmatprep.subr.bf16.mxu1 %v14835_v44  ;;  %v12984_v44 = vrot.slane %v776_v40, 9  ;;  %v939_v21 = vshrl.u32 %v16870_v41, 16  ;;  %v14874_v22 = vld [vmem:[%s16689_s17 + $0x2a4] ss:$8 sps:$4 sm:$0xff]   ;;  %v935_v37 = vrot.slane %v933_v24, 6 }
 0x201   : > { %v16898_v59 = vsel %vm16875_vm8, %v901_v29, %v909_v42  ;;  %v923_v29 = vrot.slane %v921_v16, 5  ;;  %v14875_v42 = vld [vmem:[%s16689_s17 + $0x3a0] ss:$8 sps:$4 sm:$0xff]   ;;  %v14901_v16 = vld [vmem:[%s16689_s17 + $0x564] ss:$8 sps:$4 sm:$0xff]  }
 0x202   : > { %7761 = vmatpush1.bf16.msra.mxu0 %v14830_v43  ;;  %v780_v43 = vld [vmem:[#allocation3 + $0x68] sm:$0x11]  ;;  %v13016_v3 = vcombine.high %v16907_v0, %v16898_v59 }
 0x203   : > { %7814 = vmatpush1.bf16.msra.mxu1 %v14833_v45  ;;  %7762 = vmatprep.subr.bf16.mxu0 %v14838_v51  ;;  %v816_v45 = vrot.slane %v16870_v41, 5  ;;  %v818_v51 = vrot.slane %v812_v38, 4 }
 0x204   : > { %7815 = vmatprep.subr.bf16.mxu1 %v14841_v52  ;;  %v822_v52 = vrot.slane %v780_v43, 5  ;;  %v14880_v43 = vld [vmem:[%s16689_s17 + $0x294] ss:$8 sps:$4 sm:$0xff]  }
 0x205   : > { %v821_v54 = vrot.slane %v816_v45, 4  ;;  %v820_v56 = vsel %vm16792_vm5, %v818_v51, %v819_v39 }
 0x206   : > { %7763 = vmatpush1.bf16.msra.mxu0 %v14836_v53  ;;  %v817_v53 = vsel %vm16792_vm5, %v12984_v44, %v816_v45  ;;  %v14883_v44 = vld [vmem:[%s16689_s17 + $0x394] ss:$8 sps:$4 sm:$0xff]   ;;  %v14878_v45 = vld [vmem:[%s16689_s17 + $0x290] ss:$8 sps:$4 sm:$0xff]  }
 0x207   : > { %7816 = vmatpush1.bf16.msra.mxu1 %v14839_v57  ;;  %7764 = vmatprep.subr.bf16.mxu0 %v14844_v58  ;;  %v16890_v57 = vsel %vm16875_vm8, %v863_v35, %v16851_v2  ;;  %v16894_v58 = vsel %vm16875_vm8, %v891_v27, %v899_v36  ;;  %v823_v63 = vsel %vm16792_vm5, %v821_v54, %v822_v52  ;;  %v14872_v27 = vld [vmem:[%s16689_s17 + $0x2a0] ss:$8 sps:$4 sm:$0xff]   ;;  %v932_v35 = vrot.slane %v930_v20, 5  ;;  %v14881_v52 = vld [vmem:[%s16689_s17 + $0x390] ss:$8 sps:$4 sm:$0xff]  }
 0x208   : > { %7817 = vmatprep.subr.bf16.mxu1 %v14847_v62  ;;  %v13062_v62 = vcombine.high %v813_v50, %v820_v56  ;;  %v13061_v2 = vcombine.low %v813_v50, %v820_v56  ;;  %v13064_v4 = vcombine.high %v817_v53, %v823_v63  ;;  %v13063_v6 = vcombine.low %v817_v53, %v823_v63  ;;  %v14907_v20 = vld [vmem:[%s16689_s17 + $0x554] ss:$8 sps:$4 sm:$0xff]  }
 0x209   : > { %v13014_v7 = vcombine.high %v16890_v57, %v16894_v58  ;;  %v941_v36 = vrot.slane %v939_v21, 5  ;;  %v936_v53 = vor.u32 %v935_v37, %v932_v35  ;;  %v14922_v35 = vld [vmem:[%s16689_s17 + $0x424] ss:$8 sps:$4 sm:$0xff]  }
 0x20a   : > { %7765 = vmatpush2.bf16.msra.mxu0 %v14842_v13  ;;  %7684 = vmatprep.mubr.bf16.mxu0 %v13062_v62  ;;  %v14866_v13 = vld [vmem:[%s16689_s17 + $0x2b0] ss:$8 sps:$4 sm:$0xff]   ;;  %v14884_v62 = vld [vmem:[%s16689_s17 + $0x280] ss:$8 sps:$4 sm:$0xff]  }
 0x20b   : > { %7818 = vmatpush2.bf16.msra.mxu1 %v14845_v18  ;;  %7766 = vmatprep.subr.bf16.mxu0 %v14850_v23  ;;  %v915_v18 = vshll.u32 %v846_v8, 16  ;;  %v14877_v23 = vld [vmem:[%s16689_s17 + $0x3a4] ss:$8 sps:$4 sm:$0xff]   ;;  %v14892_v8 = vld [vmem:[%s16689_s17 + $0x474] ss:$8 sps:$4 sm:$0xff]  }
 0x20c   : > { %7819 = vmatprep.subr.bf16.mxu1 %v14853_v26  ;;  %7737 = vmatprep.mubr.bf16.mxu1 %v13064_v4  ;;  %v851_v26 = vld [vmem:[#allocation3 + $0x68] sm:$0x33]  ;;  %v14887_v4 = vld [vmem:[%s16689_s17 + $0x380] ss:$8 sps:$4 sm:$0xff]   ;;  %v983_v37 = vld [vmem:[#allocation3] sm:$0xcc] }
 0x20d   : > { %7685 = vmatmul.mubr.bf16.gmra.mxu0 %v13061_v2  ;;  %7738 = vmatmul.mubr.bf16.gmra.mxu1 %v13063_v6  ;;  %v917_v32 = vrot.slane %v915_v18, 6  ;;  %v959_v39 = vshrl.u32 %v851_v26, 16  ;;  %v962_v40 = vshll.u32 %v851_v26, 16  ;;  %v14899_v18 = vld [vmem:[%s16689_s17 + $0x560] ss:$8 sps:$4 sm:$0xff]  }
 0x20e   : > { %7767 = vmatpush2.bf16.msra.mxu0 %v14848_v25  ;;  %7780 = vmatprep.mubr.bf16.mxu0 %v13014_v7  ;;  %v942_v25 = vshll.u32 %v16870_v41, 16  ;;  %v14913_v26 = vld [vmem:[%s16689_s17 + $0x544] ss:$8 sps:$4 sm:$0xff]  }
 0x20f   : > { %7820 = vmatpush2.bf16.msra.mxu1 %v14851_v30  ;;  %7768 = vmatprep.subr.bf16.mxu0 %v14856_v31  ;;  %v949_v30 = vshrl.u32 %v850_v14, 16  ;;  %v952_v31 = vshll.u32 %v850_v14, 16  ;;  %v918_v47 = vor.u32 %v917_v32, %v914_v28  ;;  %v964_v56 = vrot.slane %v962_v40, 6  ;;  %v14893_v14 = vld [vmem:[%s16689_s17 + $0x570] ss:$8 sps:$4 sm:$0xff]  }
 0x210   : > { %7821 = vmatprep.subr.bf16.mxu1 %v14859_v48  ;;  %7833 = vmatprep.mubr.bf16.mxu1 %v13016_v3  ;;  %v944_v38 = vrot.slane %v942_v25, 6  ;;  %v927_v48 = vor.u32 %v926_v34, %v923_v29  ;;  %v14910_v25 = vld [vmem:[%s16689_s17 + $0x444] ss:$8 sps:$4 sm:$0xff]   ;;  %v14908_v28 = vld [vmem:[%s16689_s17 + $0x440] ss:$8 sps:$4 sm:$0xff]   ;;  %v12985_v40 = vrot.slane %v983_v37, 10 }
 0x211   : > { %v951_v50 = vrot.slane %v949_v30, 5  ;;  %v954_v51 = vrot.slane %v952_v31, 6  ;;  %v919_v63 = vrot.slane %v918_v47, 4  ;;  %v14911_v29 = vld [vmem:[%s16689_s17 + $0x540] ss:$8 sps:$4 sm:$0xff]  }
 0x212   : > { %7769 = vmatpush2.bf16.msra.mxu0 %v14854_v55  ;;  %v945_v54 = vor.u32 %v944_v38, %v941_v36  ;;  %v961_v55 = vrot.slane %v959_v39, 5  ;;  %v14916_v30 = vld [vmem:[%s16689_s17 + $0x434] ss:$8 sps:$4 sm:$0xff]   ;;  %v14914_v32 = vld [vmem:[%s16689_s17 + $0x430] ss:$8 sps:$4 sm:$0xff]  }
 0x213   : > { %7822 = vmatpush2.bf16.msra.mxu1 %v14857_v60  ;;  %7770 = vmatprep.subr.bf16.mxu0 %v14862_v61  ;;  %v14886_v60 = vld [vmem:[%s16689_s17 + $0x284] ss:$8 sps:$4 sm:$0xff]   ;;  %v955_v2 = vor.u32 %v954_v51, %v951_v50  ;;  %v928_v3 = vsel %vm16875_vm8, %v919_v63, %v927_v48  ;;  %v14919_v31 = vld [vmem:[%s16689_s17 + $0x534] ss:$8 sps:$4 sm:$0xff]   ;;  %v14917_v34 = vld [vmem:[%s16689_s17 + $0x530] ss:$8 sps:$4 sm:$0xff]  }
 0x214   : > { %7823 = vmatprep.subr.bf16.mxu1 %v14865_v1  ;;  %v14889_v61 = vld [vmem:[%s16689_s17 + $0x384] ss:$8 sps:$4 sm:$0xff]   ;;  %v947_v1 = vrot.slane %v927_v48, 4  ;;  %v957_v6 = vrot.slane %v945_v54, 4  ;;  %v965_v7 = vor.u32 %v964_v56, %v961_v55  ;;  %v988_v47 = vld [vmem:[#allocation3 + $0x28] sm:$0x33] }
 0x215   : > { %v14925_v36 = vld [vmem:[%s16689_s17 + $0x524] ss:$8 sps:$4 sm:$0xff]   ;;  %v14920_v51 = vld [vmem:[%s16689_s17 + $0x420] ss:$8 sps:$4 sm:$0xff]   ;;  %v1022_v55 = vrot.slane %v988_v47, 6 }
 0x216   : > { %7771 = vmatpush2.bf16.msra.mxu0 %v14860_v5  ;;  %v937_v5 = vrot.slane %v936_v53, 4  ;;  %v956_v11 = vsel %vm16875_vm8, %v947_v1, %v955_v2  ;;  %v16974_v38 = vld [vmem:[#allocation3 + $0x10] sm:$0xff]  ;;  %v987_v39 = vld [vmem:[#allocation3 + $0x20] sm:$0x33] }
 0x217   : > { %7824 = vmatpush2.bf16.msra.mxu1 %v14863_v9  ;;  %7772 = vmatprep.subr.bf16.mxu0 %v14868_v10  ;;  %v14895_v9 = vld [vmem:[%s16689_s17 + $0x574] ss:$8 sps:$4 sm:$0xff]   ;;  %v13013_v10 = vcombine.low %v16890_v57, %v16894_v58  ;;  %v966_v57 = vsel %vm16875_vm8, %v957_v6, %v965_v7  ;;  %v14898_v58 = vld [vmem:[%s16689_s17 + $0x464] ss:$8 sps:$4 sm:$0xff]   ;;  %v13065_v21 = vcombine.low %v928_v3, %v956_v11  ;;  %v14929_v6 = vld [vmem:[%s16689_s17 + $0x510] ss:$8 sps:$4 sm:$0xff]  }
 0x218   : > { %7825 = vmatprep.subr.bf16.mxu1 %v14871_v12  ;;  %v13015_v12 = vcombine.low %v16907_v0, %v16898_v59  ;;  %v946_v15 = vsel %vm16875_vm8, %v937_v5, %v945_v54  ;;  %v14896_v0 = vld [vmem:[%s16689_s17 + $0x460] ss:$8 sps:$4 sm:$0xff]   ;;  %v14928_v56 = vld [vmem:[%s16689_s17 + $0x414] ss:$8 sps:$4 sm:$0xff]   ;;  %v14934_v7 = vld [vmem:[%s16689_s17 + $0x404] ss:$8 sps:$4 sm:$0xff]  }
 0x219   : > { %v13068_v59 = vcombine.high %v946_v15, %v966_v57  ;;  %v13067_v24 = vcombine.low %v946_v15, %v966_v57  ;;  %v14949_v15 = vld [vmem:[%s16689_s17 + $0x5e4] ss:$8 sps:$4 sm:$0xff]   ;;  %v14944_v57 = vld [vmem:[%s16689_s17 + $0x4e0] ss:$8 sps:$4 sm:$0xff]   ;;  %v14979_v37 = vld [vmem:[%s16689_s17 + $0x594] ss:$8 sps:$4 sm:$0xff]  }
 0x21a   : > { %7773 = vmatpush2.bf16.msra.mxu0 %v14866_v13  ;;  %v14890_v13 = vld [vmem:[%s16689_s17 + $0x470] ss:$8 sps:$4 sm:$0xff]  }
 0x21b   : > { %7826 = vmatpush2.bf16.msra.mxu1 %v14869_v17  ;;  %7774 = vmatprep.subr.bf16.mxu0 %v14874_v22  ;;  %v13066_v17 = vcombine.high %v928_v3, %v956_v11  ;;  %v14902_v22 = vld [vmem:[%s16689_s17 + $0x450] ss:$8 sps:$4 sm:$0xff]   ;;  %v14940_v3 = vld [vmem:[%s16689_s17 + $0x4f4] ss:$8 sps:$4 sm:$0xff]  }
 0x21c   : > { %7827 = vmatprep.subr.bf16.mxu1 %v14877_v23  ;;  %v14905_v23 = vld [vmem:[%s16689_s17 + $0x550] ss:$8 sps:$4 sm:$0xff]   ;;  %v14943_v11 = vld [vmem:[%s16689_s17 + $0x5f4] ss:$8 sps:$4 sm:$0xff]  }
 0x21d   : > { %v14977_v47 = vld [vmem:[%s16689_s17 + $0x590] ss:$8 sps:$4 sm:$0xff]  }
 0x21e   : > { %7775 = vmatpush2.bf16.msra.mxu0 %v14872_v27  ;;  %v15773_v27 = vld [vmem:[%s16689_s17 + $0x1764] ss:$8 sps:$4 sm:$0xff]  }
 0x21f   : > { %7828 = vmatpush2.bf16.msra.mxu1 %v14875_v42  ;;  %7776 = vmatprep.subr.bf16.mxu0 %v14880_v43  ;;  %v1012_v42 = vrot.slane %v16974_v38, 6  ;;  %v1019_v43 = vrot.slane %v987_v39, 6  ;;  %v989_v39 = vld [vmem:[#allocation3 + $0x40] sm:$0xcc] }
 0x220   : > { %7829 = vmatprep.subr.bf16.mxu1 %v14883_v44  ;;  %v984_v44 = vld [vmem:[#allocation3 + $0x8] sm:$0xcc] }
 0x221   : > { %v12986_v48 = vrot.slane %v984_v44, 10  ;;  %v16984_v53 = vsel %vm16962_vm11, %v12985_v40, %v1012_v42  ;;  %v1018_v54 = vrot.slane %v1012_v42, 4  ;;  %v993_v40 = vld [vmem:[#allocation3 + $0x60] sm:$0x33]  ;;  %v990_v42 = vld [vmem:[#allocation3 + $0x48] sm:$0xcc] }
 0x222   : > { %7777 = vmatpush2.bf16.msra.mxu0 %v14878_v45  ;;  %v16977_v45 = vld [vmem:[#allocation3 + $0x18] sm:$0xff]  ;;  %v994_v44 = vld [vmem:[#allocation3 + $0x68] sm:$0x33] }
 0x223   : > { %7830 = vmatpush2.bf16.msra.mxu1 %v14881_v52  ;;  %7778 = vmatprep.subr.bf16.mxu0 %v14886_v60  ;;  %v1016_v50 = vrot.slane %v16977_v45, 6  ;;  %v14923_v52 = vld [vmem:[%s16689_s17 + $0x520] ss:$8 sps:$4 sm:$0xff]   ;;  %v16994_v63 = vsel %vm16962_vm11, %v1018_v54, %v1019_v43  ;;  %v14974_v43 = vld [vmem:[%s16689_s17 + $0x490] ss:$8 sps:$4 sm:$0xff]   ;;  %v1100_v54 = vshll.u32 %v16977_v45, 16 }
 0x224   : > { %7831 = vmatprep.subr.bf16.mxu1 %v14889_v61  ;;  %v13018_v1 = vcombine.high %v16984_v53, %v16994_v63 }
 0x225   : > { %v16989_v60 = vsel %vm16962_vm11, %v12986_v48, %v1016_v50  ;;  %v1021_v61 = vrot.slane %v1016_v50, 4 }
 0x226   : > { %7779 = vmatpush2.bf16.msra.mxu0 %v14884_v62  ;;  %v14931_v62 = vld [vmem:[%s16689_s17 + $0x514] ss:$8 sps:$4 sm:$0xff]  }
 0x227   : > { %7832 = vmatpush2.bf16.msra.mxu1 %v14887_v4  ;;  %7854 = vmatprep.subr.bf16.mxu0 %v14892_v8  ;;  %v17000_v2 = vsel %vm16962_vm11, %v1021_v61, %v1022_v55  ;;  %v14926_v4 = vld [vmem:[%s16689_s17 + $0x410] ss:$8 sps:$4 sm:$0xff]   ;;  %v14937_v8 = vld [vmem:[%s16689_s17 + $0x504] ss:$8 sps:$4 sm:$0xff]   ;;  %v1036_v61 = vrot.slane %v994_v44, 6 }
 0x228   : > { %7907 = vmatprep.subr.bf16.mxu1 %v14895_v9  ;;  %v13020_v5 = vcombine.high %v16989_v60, %v17000_v2  ;;  %v14932_v9 = vld [vmem:[%s16689_s17 + $0x400] ss:$8 sps:$4 sm:$0xff]   ;;  %v14982_v55 = vld [vmem:[%s16689_s17 + $0x484] ss:$8 sps:$4 sm:$0xff]  }
 0x229   : > { %7781 = vmatmul.mubr.bf16.vlgmr.msra.gmra.mxu0 %v13013_v10  ;;  %v14935_v10 = vld [vmem:[%s16689_s17 + $0x500] ss:$8 sps:$4 sm:$0xff]  }
 0x22a   : > { %7834 = vmatmul.mubr.bf16.vlgmr.msra.gmra.mxu1 %v13015_v12  ;;  %7855 = vmatpush1.bf16.msra.mxu0 %v14890_v13  ;;  %v14938_v12 = vld [vmem:[%s16689_s17 + $0x4f0] ss:$8 sps:$4 sm:$0xff]  }
 0x22b   : > { %7908 = vmatpush1.bf16.msra.mxu1 %v14893_v14  ;;  %7856 = vmatprep.subr.bf16.mxu0 %v14898_v58  ;;  %v14941_v13 = vld [vmem:[%s16689_s17 + $0x5f0] ss:$8 sps:$4 sm:$0xff]   ;;  %v14946_v14 = vld [vmem:[%s16689_s17 + $0x4e4] ss:$8 sps:$4 sm:$0xff]   ;;  %v14947_v58 = vld [vmem:[%s16689_s17 + $0x5e0] ss:$8 sps:$4 sm:$0xff]  }
 0x22c   : > { %7909 = vmatprep.subr.bf16.mxu1 %v14901_v16  ;;  %7790 = vmatprep.mubr.bf16.mxu0 %v13066_v17  ;;  %v14952_v16 = vld [vmem:[%s16689_s17 + $0x4d4] ss:$8 sps:$4 sm:$0xff]  }
 0x22d   : > { %7843 = vmatprep.mubr.bf16.mxu1 %v13068_v59  ;;  %v14955_v17 = vld [vmem:[%s16689_s17 + $0x5d4] ss:$8 sps:$4 sm:$0xff]   ;;  %v14950_v59 = vld [vmem:[%s16689_s17 + $0x4d0] ss:$8 sps:$4 sm:$0xff]  }
 0x22e   : > { %7857 = vmatpush1.bf16.msra.mxu0 %v14896_v0  ;;  %v14953_v0 = vld [vmem:[%s16689_s17 + $0x5d0] ss:$8 sps:$4 sm:$0xff]  }
 0x22f   : > { %7910 = vmatpush1.bf16.msra.mxu1 %v14899_v18  ;;  %7858 = vmatprep.subr.bf16.mxu0 %v14904_v19  ;;  %v14958_v18 = vld [vmem:[%s16689_s17 + $0x4c4] ss:$8 sps:$4 sm:$0xff]  }
 0x230   : > { %7911 = vmatprep.subr.bf16.mxu1 %v14907_v20  ;;  %v14961_v19 = vld [vmem:[%s16689_s17 + $0x5c4] ss:$8 sps:$4 sm:$0xff]   ;;  %v14956_v20 = vld [vmem:[%s16689_s17 + $0x4c0] ss:$8 sps:$4 sm:$0xff]  }
 0x231   : > { %7791 = vmatmul.mubr.bf16.gmra.mxu0 %v13065_v21  ;;  %v14959_v21 = vld [vmem:[%s16689_s17 + $0x5c0] ss:$8 sps:$4 sm:$0xff]  }
 0x232   : > { %7859 = vmatpush1.bf16.msra.mxu0 %v14902_v22  ;;  %7844 = vmatmul.mubr.bf16.gmra.mxu1 %v13067_v24  ;;  %v14964_v22 = vld [vmem:[%s16689_s17 + $0x4b4] ss:$8 sps:$4 sm:$0xff]   ;;  %v14962_v24 = vld [vmem:[%s16689_s17 + $0x4b0] ss:$8 sps:$4 sm:$0xff]  }
 0x233   : > { %7912 = vmatpush1.bf16.msra.mxu1 %v14905_v23  ;;  %7860 = vmatprep.subr.bf16.mxu0 %v14910_v25  ;;  %v14967_v23 = vld [vmem:[%s16689_s17 + $0x5b4] ss:$8 sps:$4 sm:$0xff]   ;;  %v14965_v25 = vld [vmem:[%s16689_s17 + $0x5b0] ss:$8 sps:$4 sm:$0xff]  }
 0x234   : > { %7913 = vmatprep.subr.bf16.mxu1 %v14913_v26  ;;  %7886 = vmatprep.mubr.bf16.mxu0 %v13018_v1  ;;  %v14970_v26 = vld [vmem:[%s16689_s17 + $0x4a4] ss:$8 sps:$4 sm:$0xff]   ;;  %v14980_v1 = vld [vmem:[%s16689_s17 + $0x480] ss:$8 sps:$4 sm:$0xff]  }
 0x235   : > { %7939 = vmatprep.mubr.bf16.mxu1 %v13020_v5  ;;  %v14983_v5 = vld [vmem:[%s16689_s17 + $0x580] ss:$8 sps:$4 sm:$0xff]  }
 0x236   : > { %7861 = vmatpush1.bf16.msra.mxu0 %v14908_v28  ;;  %v14968_v28 = vld [vmem:[%s16689_s17 + $0x4a0] ss:$8 sps:$4 sm:$0xff]  }
 0x237   : > { %7914 = vmatpush1.bf16.msra.mxu1 %v14911_v29  ;;  %7862 = vmatprep.subr.bf16.mxu0 %v14916_v30  ;;  %v14973_v29 = vld [vmem:[%s16689_s17 + $0x5a4] ss:$8 sps:$4 sm:$0xff]   ;;  %v1026_v30 = vrot.slane %v16867_v33, 6 }
 0x238   : > { %7915 = vmatprep.subr.bf16.mxu1 %v14919_v31  ;;  %v14971_v31 = vld [vmem:[%s16689_s17 + $0x5a0] ss:$8 sps:$4 sm:$0xff]  }
 0x239   : > { %v1032_v33 = vrot.slane %v1026_v30, 4 }
 0x23a   : > { %7863 = vmatpush1.bf16.msra.mxu0 %v14914_v32  ;;  %v14976_v32 = vld [vmem:[%s16689_s17 + $0x494] ss:$8 sps:$4 sm:$0xff]  }
 0x23b   : > { %7916 = vmatpush1.bf16.msra.mxu1 %v14917_v34  ;;  %7864 = vmatprep.subr.bf16.mxu0 %v14922_v35  ;;  %v1030_v34 = vrot.slane %v16870_v41, 6  ;;  %v1079_v35 = vshrl.u32 %v16974_v38, 16 }
 0x23c   : > { %7917 = vmatprep.subr.bf16.mxu1 %v14925_v36  ;;  %v1082_v36 = vshll.u32 %v16974_v38, 16  ;;  %v12987_v38 = vrot.slane %v989_v39, 10 }
 0x23d   : > { %v1035_v41 = vrot.slane %v1030_v34, 4  ;;  %v1081_v48 = vrot.slane %v1079_v35, 6  ;;  %v14995_v35 = vld [vmem:[%s16689_s17 + $0x760] ss:$8 sps:$4 sm:$0xff]  }
 0x23e   : > { %7865 = vmatpush1.bf16.msra.mxu0 %v14920_v51  ;;  %v1084_v50 = vrot.slane %v1082_v36, 7  ;;  %v1033_v51 = vrot.slane %v993_v40, 6 }
 0x23f   : > { %7918 = vmatpush1.bf16.msra.mxu1 %v14923_v52  ;;  %7866 = vmatprep.subr.bf16.mxu0 %v14928_v56  ;;  %v1097_v52 = vshrl.u32 %v16977_v45, 16  ;;  %v12988_v56 = vrot.slane %v990_v42, 10 }
 0x240   : > { %7919 = vmatprep.subr.bf16.mxu1 %v14931_v62  ;;  %v14985_v62 = vld [vmem:[%s16689_s17 + $0x584] ss:$8 sps:$4 sm:$0xff]   ;;  %v17056_v45 = vsel %vm16962_vm11, %v1032_v33, %v1033_v51 }
 0x242   : > { %7867 = vmatpush1.bf16.msra.mxu0 %v14926_v4  ;;  %v17047_v4 = vor.u32 %v1084_v50, %v1081_v48 }
 0x243   : > { %7920 = vmatpush1.bf16.msra.mxu1 %v14929_v6  ;;  %7868 = vmatprep.subr.bf16.mxu0 %v14934_v7  ;;  %v17052_v6 = vsel %vm16962_vm11, %v12987_v38, %v1026_v30  ;;  %v1099_v7 = vrot.slane %v1097_v52, 6  ;;  %v14998_v52 = vld [vmem:[%s16689_s17 + $0x650] ss:$8 sps:$4 sm:$0xff]  }
 0x244   : > { %7921 = vmatprep.subr.bf16.mxu1 %v14937_v8  ;;  %v1102_v8 = vrot.slane %v1100_v54, 7  ;;  %v13069_v50 = vcombine.low %v17052_v6, %v17056_v45 }
 0x246   : > { %7869 = vmatpush1.bf16.msra.mxu0 %v14932_v9  ;;  %v14988_v9 = vld [vmem:[%s16689_s17 + $0x674] ss:$8 sps:$4 sm:$0xff]  }
 0x247   : > { %7922 = vmatpush1.bf16.msra.mxu1 %v14935_v10  ;;  %7870 = vmatprep.subr.bf16.mxu0 %v14940_v3  ;;  %v17061_v10 = vsel %vm16962_vm11, %v12988_v56, %v1030_v34  ;;  %v17065_v3 = vsel %vm16962_vm11, %v1035_v41, %v1036_v61  ;;  %v15001_v61 = vld [vmem:[%s16689_s17 + $0x750] ss:$8 sps:$4 sm:$0xff]  }
 0x248   : > { %7923 = vmatprep.subr.bf16.mxu1 %v14943_v11  ;;  %v14986_v11 = vld [vmem:[%s16689_s17 + $0x670] ss:$8 sps:$4 sm:$0xff]   ;;  %v13071_v54 = vcombine.low %v17061_v10, %v17065_v3 }
 0x24a   : > { %7871 = vmatpush2.bf16.msra.mxu0 %v14938_v12  ;;  %v14991_v12 = vld [vmem:[%s16689_s17 + $0x774] ss:$8 sps:$4 sm:$0xff]  }
 0x24b   : > { %7924 = vmatpush2.bf16.msra.mxu1 %v14941_v13  ;;  %7872 = vmatprep.subr.bf16.mxu0 %v14946_v14  ;;  %v13017_v13 = vcombine.low %v16984_v53, %v16994_v63  ;;  %v13019_v14 = vcombine.low %v16989_v60, %v17000_v2  ;;  %v1055_v63 = vld [vmem:[#allocation3 + $0x8] sm:$0xcc] }
 0x24c   : > { %7925 = vmatprep.subr.bf16.mxu1 %v14949_v15  ;;  %v14989_v15 = vld [vmem:[%s16689_s17 + $0x770] ss:$8 sps:$4 sm:$0xff]  }
 0x24e   : > { %7873 = vmatpush2.bf16.msra.mxu0 %v14944_v57  ;;  %v14994_v57 = vld [vmem:[%s16689_s17 + $0x664] ss:$8 sps:$4 sm:$0xff]  }
 0x24f   : > { %7926 = vmatpush2.bf16.msra.mxu1 %v14947_v58  ;;  %7874 = vmatprep.subr.bf16.mxu0 %v14952_v16  ;;  %v13070_v58 = vcombine.high %v17052_v6, %v17056_v45  ;;  %v1054_v16 = vld [vmem:[#allocation3] sm:$0xcc]  ;;  %v15004_v45 = vld [vmem:[%s16689_s17 + $0x640] ss:$8 sps:$4 sm:$0xff]  }
 0x250   : > { %7927 = vmatprep.subr.bf16.mxu1 %v14955_v17  ;;  %v1105_v17 = vrot.slane %v17047_v4, 4  ;;  %v1073_v53 = vshll.u32 %v1054_v16, 16 }
 0x252   : > { %7875 = vmatpush2.bf16.msra.mxu0 %v14950_v59  ;;  %v13072_v59 = vcombine.high %v17061_v10, %v17065_v3  ;;  %v15010_v10 = vld [vmem:[%s16689_s17 + $0x630] ss:$8 sps:$4 sm:$0xff]  }
 0x253   : > { %7928 = vmatpush2.bf16.msra.mxu1 %v14953_v0  ;;  %7876 = vmatprep.subr.bf16.mxu0 %v14958_v18  ;;  %v1058_v0 = vld [vmem:[#allocation3 + $0x20] sm:$0x77]  ;;  %v1070_v18 = vshrl.u32 %v1054_v16, 16 }
 0x254   : > { %7929 = vmatprep.subr.bf16.mxu1 %v14961_v19  ;;  %v1103_v19 = vor.u32 %v1102_v8, %v1099_v7  ;;  %v1107_v60 = vshrl.u32 %v1058_v0, 16  ;;  %v1110_v2 = vshll.u32 %v1058_v0, 16  ;;  %v15007_v7 = vld [vmem:[%s16689_s17 + $0x740] ss:$8 sps:$4 sm:$0xff]   ;;  %v15012_v8 = vld [vmem:[%s16689_s17 + $0x634] ss:$8 sps:$4 sm:$0xff]  }
 0x255   : > { %v15013_v3 = vld [vmem:[%s16689_s17 + $0x730] ss:$8 sps:$4 sm:$0xff]   ;;  %v15028_v0 = vld [vmem:[%s16689_s17 + $0x600] ss:$8 sps:$4 sm:$0xff]  }
 0x256   : > { %7877 = vmatpush2.bf16.msra.mxu0 %v14956_v20  ;;  %v1059_v20 = vld [vmem:[#allocation3 + $0x28] sm:$0x77]  ;;  %v1109_v30 = vrot.slane %v1107_v60, 6  ;;  %v1115_v39 = vrot.slane %v1103_v19, 4 }
 0x257   : > { %7930 = vmatpush2.bf16.msra.mxu1 %v14959_v21  ;;  %7878 = vmatprep.subr.bf16.mxu0 %v14964_v22  ;;  %v1088_v21 = vshrl.u32 %v1055_v63, 16  ;;  %v1091_v22 = vshll.u32 %v1055_v63, 16  ;;  %v15025_v16 = vld [vmem:[%s16689_s17 + $0x710] ss:$8 sps:$4 sm:$0xff]   ;;  %v15039_v63 = vld [vmem:[%s16689_s17 + $0x7f4] ss:$8 sps:$4 sm:$0xff]  }
 0x258   : > { %7931 = vmatprep.subr.bf16.mxu1 %v14967_v23  ;;  %v14992_v23 = vld [vmem:[%s16689_s17 + $0x660] ss:$8 sps:$4 sm:$0xff]   ;;  %v15037_v60 = vld [vmem:[%s16689_s17 + $0x7f0] ss:$8 sps:$4 sm:$0xff]  }
 0x259   : > { %v1093_v34 = vrot.slane %v1091_v22, 7  ;;  %v15043_v22 = vld [vmem:[%s16689_s17 + $0x7e0] ss:$8 sps:$4 sm:$0xff]  }
 0x25a   : > { %7879 = vmatpush2.bf16.msra.mxu0 %v14962_v24  ;;  %v14997_v24 = vld [vmem:[%s16689_s17 + $0x764] ss:$8 sps:$4 sm:$0xff]  }
 0x25b   : > { %7932 = vmatpush2.bf16.msra.mxu1 %v14965_v25  ;;  %7880 = vmatprep.subr.bf16.mxu0 %v14970_v26  ;;  %v1072_v25 = vrot.slane %v1070_v18, 6  ;;  %v1075_v26 = vrot.slane %v1073_v53, 7  ;;  %v15031_v18 = vld [vmem:[%s16689_s17 + $0x700] ss:$8 sps:$4 sm:$0xff]   ;;  %v15036_v53 = vld [vmem:[%s16689_s17 + $0x6f4] ss:$8 sps:$4 sm:$0xff]  }
 0x25c   : > { %7933 = vmatprep.subr.bf16.mxu1 %v14973_v29  ;;  %v1120_v29 = vshll.u32 %v1059_v20, 16 }
 0x25e   : > { %7881 = vmatpush2.bf16.msra.mxu0 %v14968_v28  ;;  %v1117_v28 = vshrl.u32 %v1059_v20, 16  ;;  %v1122_v42 = vrot.slane %v1120_v29, 7  ;;  %v15045_v20 = vld [vmem:[%s16689_s17 + $0x7e4] ss:$8 sps:$4 sm:$0xff]   ;;  %v15052_v29 = vld [vmem:[%s16689_s17 + $0x6c0] ss:$8 sps:$4 sm:$0xff]  }
 0x25f   : > { %7934 = vmatpush2.bf16.msra.mxu1 %v14971_v31  ;;  %7882 = vmatprep.subr.bf16.mxu0 %v14976_v32  ;;  %v1112_v31 = vrot.slane %v1110_v2, 7  ;;  %v1090_v32 = vrot.slane %v1088_v21, 6  ;;  %v15042_v2 = vld [vmem:[%s16689_s17 + $0x6e4] ss:$8 sps:$4 sm:$0xff]   ;;  %v15040_v21 = vld [vmem:[%s16689_s17 + $0x6e0] ss:$8 sps:$4 sm:$0xff]  }
 0x260   : > { %7935 = vmatprep.subr.bf16.mxu1 %v14979_v37  ;;  %v1076_v37 = vor.u32 %v1075_v26, %v1072_v25  ;;  %v1119_v40 = vrot.slane %v1117_v28, 6  ;;  %v15046_v25 = vld [vmem:[%s16689_s17 + $0x6d0] ss:$8 sps:$4 sm:$0xff]   ;;  %v15054_v28 = vld [vmem:[%s16689_s17 + $0x6c4] ss:$8 sps:$4 sm:$0xff]  }
 0x261   : > { %v1113_v33 = vor.u32 %v1112_v31, %v1109_v30  ;;  %v1094_v44 = vor.u32 %v1093_v34, %v1090_v32  ;;  %v15049_v26 = vld [vmem:[%s16689_s17 + $0x7d0] ss:$8 sps:$4 sm:$0xff]   ;;  %v15057_v30 = vld [vmem:[%s16689_s17 + $0x7c4] ss:$8 sps:$4 sm:$0xff]   ;;  %v15055_v32 = vld [vmem:[%s16689_s17 + $0x7c0] ss:$8 sps:$4 sm:$0xff]  }
 0x262   : > { %7883 = vmatpush2.bf16.msra.mxu0 %v14974_v43  ;;  %v15000_v43 = vld [vmem:[%s16689_s17 + $0x654] ss:$8 sps:$4 sm:$0xff]   ;;  %v1077_v41 = vrot.slane %v1076_v37, 4  ;;  %v1123_v48 = vor.u32 %v1122_v42, %v1119_v40  ;;  %v17158_v40 = vld [vmem:[#allocation3 + $0x58] sm:$0xff]  ;;  %v15058_v42 = vld [vmem:[%s16689_s17 + $0x6b0] ss:$8 sps:$4 sm:$0xff]  }
 0x263   : > { %7936 = vmatpush2.bf16.msra.mxu1 %v14977_v47  ;;  %7884 = vmatprep.subr.bf16.mxu0 %v14982_v55  ;;  %v15003_v47 = vld [vmem:[%s16689_s17 + $0x754] ss:$8 sps:$4 sm:$0xff]   ;;  %v17095_v38 = vsel %vm17085_vm14, %v1105_v17, %v1113_v33  ;;  %v1095_v51 = vrot.slane %v1094_v44, 4  ;;  %v15030_v17 = vld [vmem:[%s16689_s17 + $0x604] ss:$8 sps:$4 sm:$0xff]  }
 0x264   : > { %7937 = vmatprep.subr.bf16.mxu1 %v14985_v62  ;;  %v17103_v55 = vsel %vm17085_vm14, %v1077_v41, %v17047_v4  ;;  %v17107_v56 = vsel %vm17085_vm14, %v1115_v39, %v1123_v48  ;;  %v15006_v62 = vld [vmem:[%s16689_s17 + $0x644] ss:$8 sps:$4 sm:$0xff]   ;;  %v15060_v34 = vld [vmem:[%s16689_s17 + $0x6b4] ss:$8 sps:$4 sm:$0xff]   ;;  %v15061_v41 = vld [vmem:[%s16689_s17 + $0x7b0] ss:$8 sps:$4 sm:$0xff]  }
 0x265   : > { %v13022_v4 = vcombine.high %v17103_v55, %v17095_v38  ;;  %v1060_v31 = vld [vmem:[#allocation3 + $0x40] sm:$0xcc]  ;;  %v1061_v37 = vld [vmem:[#allocation3 + $0x48] sm:$0xcc] }
 0x266   : > { %7885 = vmatpush2.bf16.msra.mxu0 %v14980_v1  ;;  %v17113_v1 = vsel %vm17085_vm14, %v1095_v51, %v1103_v19  ;;  %v15034_v19 = vld [vmem:[%s16689_s17 + $0x6f0] ss:$8 sps:$4 sm:$0xff]   ;;  %v15063_v39 = vld [vmem:[%s16689_s17 + $0x7b4] ss:$8 sps:$4 sm:$0xff]   ;;  %v1126_v33 = vshrl.u32 %v1060_v31, 16  ;;  %v1129_v44 = vshll.u32 %v1060_v31, 16 }
 0x267   : > { %7938 = vmatpush2.bf16.msra.mxu1 %v14983_v5  ;;  %7960 = vmatprep.subr.bf16.mxu0 %v14988_v9  ;;  %v15009_v5 = vld [vmem:[%s16689_s17 + $0x744] ss:$8 sps:$4 sm:$0xff]   ;;  %v13024_v6 = vcombine.high %v17113_v1, %v17107_v56  ;;  %v15015_v9 = vld [vmem:[%s16689_s17 + $0x734] ss:$8 sps:$4 sm:$0xff]   ;;  %v1144_v51 = vshrl.u32 %v1061_v37, 16 }
 0x268   : > { %8013 = vmatprep.subr.bf16.mxu1 %v14991_v12  ;;  %v15021_v12 = vld [vmem:[%s16689_s17 + $0x724] ss:$8 sps:$4 sm:$0xff]  }
 0x269   : > { %7887 = vmatmul.mubr.bf16.vlgmr.msra.gmra.mxu0 %v13017_v13  ;;  %v15016_v13 = vld [vmem:[%s16689_s17 + $0x620] ss:$8 sps:$4 sm:$0xff]  }
 0x26a   : > { %7940 = vmatmul.mubr.bf16.vlgmr.msra.gmra.mxu1 %v13019_v14  ;;  %7961 = vmatpush1.bf16.msra.mxu0 %v14986_v11  ;;  %v15018_v11 = vld [vmem:[%s16689_s17 + $0x624] ss:$8 sps:$4 sm:$0xff]   ;;  %v15019_v14 = vld [vmem:[%s16689_s17 + $0x720] ss:$8 sps:$4 sm:$0xff]  }
 0x26b   : > { %8014 = vmatpush1.bf16.msra.mxu1 %v14989_v15  ;;  %7962 = vmatprep.subr.bf16.mxu0 %v14994_v57  ;;  %v15024_v15 = vld [vmem:[%s16689_s17 + $0x614] ss:$8 sps:$4 sm:$0xff]  }
 0x26c   : > { %8015 = vmatprep.subr.bf16.mxu1 %v14997_v24  ;;  %7896 = vmatprep.mubr.bf16.mxu0 %v13070_v58  ;;  %v15027_v57 = vld [vmem:[%s16689_s17 + $0x714] ss:$8 sps:$4 sm:$0xff]   ;;  %v15022_v58 = vld [vmem:[%s16689_s17 + $0x610] ss:$8 sps:$4 sm:$0xff]  }
 0x26d   : > { %7949 = vmatprep.mubr.bf16.mxu1 %v13072_v59  ;;  %v15033_v59 = vld [vmem:[%s16689_s17 + $0x704] ss:$8 sps:$4 sm:$0xff]   ;;  %v15051_v24 = vld [vmem:[%s16689_s17 + $0x7d4] ss:$8 sps:$4 sm:$0xff]  }
 0x26e   : > { %7963 = vmatpush1.bf16.msra.mxu0 %v14992_v23  ;;  %v15048_v23 = vld [vmem:[%s16689_s17 + $0x6d4] ss:$8 sps:$4 sm:$0xff]  }
 0x26f   : > { %8016 = vmatpush1.bf16.msra.mxu1 %v14995_v35  ;;  %7964 = vmatprep.subr.bf16.mxu0 %v15000_v43  ;;  %v17155_v35 = vld [vmem:[#allocation3 + $0x50] sm:$0xff]  ;;  %v1064_v43 = vld [vmem:[#allocation3 + $0x60] sm:$0x77] }
 0x270   : > { %8017 = vmatprep.subr.bf16.mxu1 %v15003_v47  ;;  %v1135_v47 = vshrl.u32 %v17155_v35, 16  ;;  %v1138_v48 = vshll.u32 %v17155_v35, 16 }
 0x271   : > { %7897 = vmatmul.mubr.bf16.gmra.mxu0 %v13069_v50  ;;  %v1065_v50 = vld [vmem:[#allocation3 + $0x68] sm:$0x77] }
 0x272   : > { %7965 = vmatpush1.bf16.msra.mxu0 %v14998_v52  ;;  %7950 = vmatmul.mubr.bf16.gmra.mxu1 %v13071_v54  ;;  %v1147_v52 = vshll.u32 %v1061_v37, 16  ;;  %v1153_v54 = vshrl.u32 %v17158_v40, 16 }
 0x273   : > { %8018 = vmatpush1.bf16.msra.mxu1 %v15001_v61  ;;  %7966 = vmatprep.subr.bf16.mxu0 %v15006_v62  ;;  %v1156_v61 = vshll.u32 %v17158_v40, 16  ;;  %v15066_v62 = vld [vmem:[%s16689_s17 + $0x6a4] ss:$8 sps:$4 sm:$0xff]  }
 0x274   : > { %8019 = vmatprep.subr.bf16.mxu1 %v15009_v5  ;;  %7992 = vmatprep.mubr.bf16.mxu0 %v13022_v4  ;;  %v15069_v5 = vld [vmem:[%s16689_s17 + $0x7a4] ss:$8 sps:$4 sm:$0xff]   ;;  %v19330_v4 = vlaneseq }
 0x275   : > { %8045 = vmatprep.mubr.bf16.mxu1 %v13024_v6  ;;  %v1128_v6 = vrot.slane %v1126_v33, 6  ;;  %v17189_v33 = vld [vmem:[#allocation3 + $0x18] sm:$0xff] }
 0x276   : > { %7967 = vmatpush1.bf16.msra.mxu0 %v15004_v45  ;;  %v1131_v45 = vrot.slane %v1129_v44, 7 }
 0x277   : > { %8020 = vmatpush1.bf16.msra.mxu1 %v15007_v7  ;;  %7968 = vmatprep.subr.bf16.mxu0 %v15012_v8  ;;  %v1163_v7 = vshrl.u32 %v1064_v43, 16  ;;  %v1166_v8 = vshll.u32 %v1064_v43, 16  ;;  %v15084_v43 = vld [vmem:[%s16689_s17 + $0x874] ss:$8 sps:$4 sm:$0xff]  }
 0x278   : > { %8021 = vmatprep.subr.bf16.mxu1 %v15015_v9  ;;  %v15064_v9 = vld [vmem:[%s16689_s17 + $0x6a0] ss:$8 sps:$4 sm:$0xff]  }
 0x27a   : > { %7969 = vmatpush1.bf16.msra.mxu0 %v15010_v10  ;;  %v1137_v10 = vrot.slane %v1135_v47, 6  ;;  %v15082_v47 = vld [vmem:[%s16689_s17 + $0x870] ss:$8 sps:$4 sm:$0xff]  }
 0x27b   : > { %8022 = vmatpush1.bf16.msra.mxu1 %v15013_v3  ;;  %7970 = vmatprep.subr.bf16.mxu0 %v15018_v11  ;;  %v1140_v3 = vrot.slane %v1138_v48, 7  ;;  %v1146_v11 = vrot.slane %v1144_v51, 6  ;;  %v15085_v51 = vld [vmem:[%s16689_s17 + $0x970] ss:$8 sps:$4 sm:$0xff]  }
 0x27c   : > { %8023 = vmatprep.subr.bf16.mxu1 %v15021_v12  ;;  %v1173_v12 = vshrl.u32 %v1065_v50, 16 }
 0x27e   : > { %7971 = vmatpush1.bf16.msra.mxu0 %v15016_v13  ;;  %v15067_v13 = vld [vmem:[%s16689_s17 + $0x7a0] ss:$8 sps:$4 sm:$0xff]  }
 0x27f   : > { %8024 = vmatpush1.bf16.msra.mxu1 %v15019_v14  ;;  %7972 = vmatprep.subr.bf16.mxu0 %v15024_v15  ;;  %v1149_v14 = vrot.slane %v1147_v52, 7  ;;  %v1155_v15 = vrot.slane %v1153_v54, 6  ;;  %v15090_v52 = vld [vmem:[%s16689_s17 + $0x864] ss:$8 sps:$4 sm:$0xff]  }
 0x280   : > { %8025 = vmatprep.subr.bf16.mxu1 %v15027_v57  ;;  %v1158_v57 = vrot.slane %v1156_v61, 7 }
 0x282   : > { %7973 = vmatpush1.bf16.msra.mxu0 %v15022_v58  ;;  %v1176_v58 = vshll.u32 %v1065_v50, 16  ;;  %v13021_v50 = vcombine.low %v17103_v55, %v17095_v38 }
 0x283   : > { %8026 = vmatpush1.bf16.msra.mxu1 %v15025_v16  ;;  %7974 = vmatprep.subr.bf16.mxu0 %v15030_v17  ;;  %v15072_v16 = vld [vmem:[%s16689_s17 + $0x694] ss:$8 sps:$4 sm:$0xff]  }
 0x284   : > { %8027 = vmatprep.subr.bf16.mxu1 %v15033_v59  ;;  %v15075_v17 = vld [vmem:[%s16689_s17 + $0x794] ss:$8 sps:$4 sm:$0xff]   ;;  %v17173_v59 = vshrl.u32 %v19330_v4, 7 }
 0x286   : > { %7975 = vmatpush1.bf16.msra.mxu0 %v15028_v0  ;;  %19379 = vst [vmem:[#allocation28_spill] sm:$0xff] %v17173_v59  ;;  %v1132_v0 = vor.u32 %v1131_v45, %v1128_v6  ;;  %v17197_v48 = vsub.s32 1, %v17173_v59  ;;  %v13023_v6 = vcombine.low %v17113_v1, %v17107_v56  ;;  %v1201_v45 = vld [vmem:[#allocation3 + $0x20] sm:$0x77]  ;;  %v15088_v56 = vld [vmem:[%s16689_s17 + $0x860] ss:$8 sps:$4 sm:$0xff]  }
 0x287   : > { %8028 = vmatpush1.bf16.msra.mxu1 %v15031_v18  ;;  %7976 = vmatprep.subr.bf16.mxu0 %v15036_v53  ;;  %v1141_v18 = vor.u32 %v1140_v3, %v1137_v10  ;;  %v1165_v53 = vrot.slane %v1163_v7, 6  ;;  %v1230_v7 = vrot.slane %v17189_v33, 7  ;;  %v15093_v1 = vld [vmem:[%s16689_s17 + $0x964] ss:$8 sps:$4 sm:$0xff]  }
 0x288   : > { %8029 = vmatprep.subr.bf16.mxu1 %v15039_v63  ;;  %v1168_v63 = vrot.slane %v1166_v8, 7  ;;  %19381 = vst [vmem:[#allocation30_spill] sm:$0xff] %v17197_v48  ;;  %v1198_v8 = vld [vmem:[#allocation3 + $0x8] sm:$0x88] }
 0x289   : > { %v1161_v31 = vrot.slane %v1141_v18, 4 }
 0x28a   : > { %7977 = vmatpush2.bf16.msra.mxu0 %v15034_v19  ;;  %v15070_v19 = vld [vmem:[%s16689_s17 + $0x690] ss:$8 sps:$4 sm:$0xff]  }
 0x28b   : > { %8030 = vmatpush2.bf16.msra.mxu1 %v15037_v60  ;;  %7978 = vmatprep.subr.bf16.mxu0 %v15042_v2  ;;  %v1150_v60 = vor.u32 %v1149_v14, %v1146_v11  ;;  %v1159_v2 = vor.u32 %v1158_v57, %v1155_v15  ;;  %v1233_v15 = vrot.slane %v1201_v45, 7  ;;  %v15106_v45 = vld [vmem:[%s16689_s17 + $0x830] ss:$8 sps:$4 sm:$0xff]  }
 0x28c   : > { %8031 = vmatprep.subr.bf16.mxu1 %v15045_v20  ;;  %v1175_v20 = vrot.slane %v1173_v12, 6 }
 0x28d   : > { %v1171_v37 = vrot.slane %v1159_v2, 4 }
 0x28e   : > { %7979 = vmatpush2.bf16.msra.mxu0 %v15040_v21  ;;  %v1178_v21 = vrot.slane %v1176_v58, 7 }
 0x28f   : > { %8032 = vmatpush2.bf16.msra.mxu1 %v15043_v22  ;;  %7980 = vmatprep.subr.bf16.mxu0 %v15048_v23  ;;  %v15073_v22 = vld [vmem:[%s16689_s17 + $0x790] ss:$8 sps:$4 sm:$0xff]   ;;  %v15078_v23 = vld [vmem:[%s16689_s17 + $0x684] ss:$8 sps:$4 sm:$0xff]  }
 0x290   : > { %8033 = vmatprep.subr.bf16.mxu1 %v15051_v24  ;;  %v15076_v24 = vld [vmem:[%s16689_s17 + $0x680] ss:$8 sps:$4 sm:$0xff]  }
 0x292   : > { %7981 = vmatpush2.bf16.msra.mxu0 %v15046_v25  ;;  %v15081_v25 = vld [vmem:[%s16689_s17 + $0x784] ss:$8 sps:$4 sm:$0xff]  }
 0x293   : > { %8034 = vmatpush2.bf16.msra.mxu1 %v15049_v26  ;;  %7982 = vmatprep.subr.bf16.mxu0 %v15054_v28  ;;  %v17181_v26 = vsub.s32 0, %v17173_v59  ;;  %v15079_v28 = vld [vmem:[%s16689_s17 + $0x780] ss:$8 sps:$4 sm:$0xff]  }
 0x294   : > { %8035 = vmatprep.subr.bf16.mxu1 %v15057_v30  ;;  %v1133_v30 = vrot.slane %v1132_v0, 4  ;;  %v1235_v0 = vrot.slane %v1230_v7, 4 }
 0x295   : > { %19380 = vst [vmem:[#allocation29_spill] sm:$0xff] %v17181_v26 }
 0x296   : > { %7983 = vmatpush2.bf16.msra.mxu0 %v15052_v29  ;;  %v2950_v29 = vld [vmem:[%s477_s28] sm:$0x3]  ;;  %v17205_v54 = vsel %vm17085_vm14, %v1133_v30, %v1141_v18 }
 0x297   : > { %8036 = vmatpush2.bf16.msra.mxu1 %v15055_v32  ;;  %7984 = vmatprep.subr.bf16.mxu0 %v15060_v34  ;;  %v1169_v32 = vor.u32 %v1168_v63, %v1165_v53  ;;  %v1151_v34 = vrot.slane %v1150_v60, 4  ;;  %v17192_v44 = vrot.slane %v2950_v29, %v17181_v26  ;;  %v17224_v10 = vrot.slane %v2950_v29, %v17197_v48  ;;  %v15091_v63 = vld [vmem:[%s16689_s17 + $0x960] ss:$8 sps:$4 sm:$0xff]  }
 0x298   : > { %8037 = vmatprep.subr.bf16.mxu1 %v15063_v39  ;;  %v1179_v39 = vor.u32 %v1178_v21, %v1175_v20  ;;  %v15099_v21 = vld [vmem:[%s16689_s17 + $0x954] ss:$8 sps:$4 sm:$0xff]  }
 0x299   : > { %v17209_v61 = vsel %vm17085_vm14, %v1161_v31, %v1169_v32  ;;  %v17216_v38 = vsel %vm17085_vm14, %v1151_v34, %v1159_v2  ;;  %v15094_v32 = vld [vmem:[%s16689_s17 + $0x850] ss:$8 sps:$4 sm:$0xff]  }
 0x29a   : > { %7985 = vmatpush2.bf16.msra.mxu0 %v15058_v42  ;;  %v17186_v42 = vld [vmem:[#allocation3 + $0x10] sm:$0xff]  ;;  %v17220_v55 = vsel %vm17085_vm14, %v1171_v37, %v1179_v39  ;;  %v13074_v3 = vcombine.high %v17205_v54, %v17209_v61 }
 0x29b   : > { %8038 = vmatpush2.bf16.msra.mxu1 %v15061_v41  ;;  %7986 = vmatprep.subr.bf16.mxu0 %v15066_v62  ;;  %v15087_v41 = vld [vmem:[%s16689_s17 + $0x974] ss:$8 sps:$4 sm:$0xff]   ;;  %v13076_v12 = vcombine.high %v17216_v38, %v17220_v55 }
 0x29c   : > { %8039 = vmatprep.subr.bf16.mxu1 %v15069_v5  ;;  %v1197_v62 = vld [vmem:[#allocation3] sm:$0x88]  ;;  %v1226_v5 = vrot.slane %v17186_v42, 7 }
 0x29e   : > { %7987 = vmatpush2.bf16.msra.mxu0 %v15064_v9  ;;  %v1202_v9 = vld [vmem:[#allocation3 + $0x28] sm:$0x77]  ;;  %v1232_v14 = vrot.slane %v1226_v5, 4 }
 0x29f   : > { %8040 = vmatpush2.bf16.msra.mxu1 %v15067_v13  ;;  %7988 = vmatprep.subr.bf16.mxu0 %v15072_v16  ;;  %v12989_v13 = vrot.slane %v1197_v62, 11  ;;  %v1236_v18 = vrot.slane %v1202_v9, 7  ;;  %v15117_v9 = vld [vmem:[%s16689_s17 + $0x924] ss:$8 sps:$4 sm:$0xff]  }
 0x2a0   : > { %8041 = vmatprep.subr.bf16.mxu1 %v15075_v17  ;;  %v12990_v17 = vrot.slane %v1198_v8, 11  ;;  %v15114_v8 = vld [vmem:[%s16689_s17 + $0x824] ss:$8 sps:$4 sm:$0xff]  }
 0x2a1   : > { %v17267_v37 = vsel %vm17235_vm3, %v1235_v0, %v1236_v18  ;;  %v15135_v0 = vld [vmem:[%s16689_s17 + $0x9f4] ss:$8 sps:$4 sm:$0xff]   ;;  %v15130_v18 = vld [vmem:[%s16689_s17 + $0x8f0] ss:$8 sps:$4 sm:$0xff]  }
 0x2a2   : > { %7989 = vmatpush2.bf16.msra.mxu0 %v15070_v19  ;;  %v15096_v19 = vld [vmem:[%s16689_s17 + $0x854] ss:$8 sps:$4 sm:$0xff]   ;;  %v17263_v34 = vsel %vm17235_vm3, %v12990_v17, %v1230_v7  ;;  %v15109_v7 = vld [vmem:[%s16689_s17 + $0x930] ss:$8 sps:$4 sm:$0xff]  }
 0x2a3   : > { %8042 = vmatpush2.bf16.msra.mxu1 %v15073_v22  ;;  %7990 = vmatprep.subr.bf16.mxu0 %v15078_v23  ;;  %v13073_v23 = vcombine.low %v17205_v54, %v17209_v61  ;;  %v13028_v61 = vcombine.high %v17263_v34, %v17267_v37  ;;  %v15132_v17 = vld [vmem:[%s16689_s17 + $0x8f4] ss:$8 sps:$4 sm:$0xff]  }
 0x2a4   : > { %8043 = vmatprep.subr.bf16.mxu1 %v15081_v25  ;;  %v17251_v25 = vsel %vm17235_vm3, %v12989_v13, %v1226_v5  ;;  %v15100_v5 = vld [vmem:[%s16689_s17 + $0x840] ss:$8 sps:$4 sm:$0xff]   ;;  %v15121_v13 = vld [vmem:[%s16689_s17 + $0x910] ss:$8 sps:$4 sm:$0xff]  }
 0x2a6   : > { %7991 = vmatpush2.bf16.msra.mxu0 %v15076_v24  ;;  %v13075_v24 = vcombine.low %v17216_v38, %v17220_v55  ;;  %v15108_v38 = vld [vmem:[%s16689_s17 + $0x834] ss:$8 sps:$4 sm:$0xff]  }
 0x2a7   : > { %8044 = vmatpush2.bf16.msra.mxu1 %v15079_v28  ;;  %8066 = vmatprep.subr.bf16.mxu0 %v15084_v43  ;;  %v17255_v28 = vsel %vm17235_vm3, %v1232_v14, %v1233_v15  ;;  %v15097_v43 = vld [vmem:[%s16689_s17 + $0x950] ss:$8 sps:$4 sm:$0xff]   ;;  %v15111_v55 = vld [vmem:[%s16689_s17 + $0x934] ss:$8 sps:$4 sm:$0xff]   ;;  %v15126_v14 = vld [vmem:[%s16689_s17 + $0x804] ss:$8 sps:$4 sm:$0xff]  }
 0x2a8   : > { %8119 = vmatprep.subr.bf16.mxu1 %v15087_v41  ;;  %v15129_v15 = vld [vmem:[%s16689_s17 + $0x904] ss:$8 sps:$4 sm:$0xff]  }
 0x2a9   : > { %v7676_v11 = vpop.f32.mrf.mxu0  ;;  %7993 = vmatmul.mubr.bf16.vlgmr.msra.gmra.mxu0 %v13021_v50 }
 0x2aa   : > { %v7677_v57 = vadd.f32 %v7676_v11, %v17192_v44  ;;  %v7729_v58 = vpop.f32.mrf.mxu1  ;;  %8046 = vmatmul.mubr.bf16.vlgmr.msra.gmra.mxu1 %v13023_v6  ;;  %8067 = vmatpush1.bf16.msra.mxu0 %v15082_v47  ;;  %v15102_v47 = vld [vmem:[%s16689_s17 + $0x844] ss:$8 sps:$4 sm:$0xff]   ;;  %v15103_v6 = vld [vmem:[%s16689_s17 + $0x940] ss:$8 sps:$4 sm:$0xff]   ;;  %v15123_v11 = vld [vmem:[%s16689_s17 + $0x914] ss:$8 sps:$4 sm:$0xff]  }
 0x2ab   : > { %8120 = vmatpush1.bf16.msra.mxu1 %v15085_v51  ;;  %v7678_v53 = vpop.f32.mrf.mxu0  ;;  %8068 = vmatprep.subr.bf16.mxu0 %v15090_v52  ;;  %v15105_v51 = vld [vmem:[%s16689_s17 + $0x944] ss:$8 sps:$4 sm:$0xff]   ;;  %v13026_v52 = vcombine.high %v17251_v25, %v17255_v28 }
 0x2ac   : > { %v17241_v60 = vadd.f32 %v7729_v58, %v7677_v57  ;;  %v7679_v2 = vadd.f32 %v7678_v53, %v17224_v10  ;;  %v7731_v20 = vpop.f32.mrf.mxu1  ;;  %8121 = vmatprep.subr.bf16.mxu1 %v15093_v1  ;;  %8002 = vmatprep.mubr.bf16.mxu0 %v13074_v3  ;;  %v15115_v1 = vld [vmem:[%s16689_s17 + $0x920] ss:$8 sps:$4 sm:$0xff]   ;;  %v15120_v3 = vld [vmem:[%s16689_s17 + $0x814] ss:$8 sps:$4 sm:$0xff]   ;;  %v15133_v53 = vld [vmem:[%s16689_s17 + $0x9f0] ss:$8 sps:$4 sm:$0xff]  }
 0x2ad   : > { %v7680_v22 = vpop.f32.mrf.mxu0  ;;  %8055 = vmatprep.mubr.bf16.mxu1 %v13076_v12  ;;  %v15118_v12 = vld [vmem:[%s16689_s17 + $0x810] ss:$8 sps:$4 sm:$0xff]   ;;  %v15124_v57 = vld [vmem:[%s16689_s17 + $0x800] ss:$8 sps:$4 sm:$0xff]  }
 0x2ae   : > { %v17257_v29 = vadd.f32 %v7731_v20, %v7679_v2  ;;  %v7681_v30 = vadd.f32 %v7680_v22, %v17192_v44  ;;  %v7733_v31 = vpop.f32.mrf.mxu1  ;;  %8069 = vmatpush1.bf16.msra.mxu0 %v15088_v56  ;;  %v15112_v56 = vld [vmem:[%s16689_s17 + $0x820] ss:$8 sps:$4 sm:$0xff]   ;;  %v15147_v22 = vld [vmem:[%s16689_s17 + $0x9d4] ss:$8 sps:$4 sm:$0xff]  }
 0x2af   : > { %8122 = vmatpush1.bf16.msra.mxu1 %v15091_v63  ;;  %v7682_v39 = vpop.f32.mrf.mxu0  ;;  %8070 = vmatprep.subr.bf16.mxu0 %v15096_v19  ;;  %v15127_v58 = vld [vmem:[%s16689_s17 + $0x900] ss:$8 sps:$4 sm:$0xff]   ;;  %v15138_v63 = vld [vmem:[%s16689_s17 + $0x8e4] ss:$8 sps:$4 sm:$0xff]  }
 0x2b0   : > { %v17271_v41 = vadd.f32 %v7733_v31, %v7681_v30  ;;  %v7683_v50 = vadd.f32 %v7682_v39, %v17224_v10  ;;  %8123 = vmatprep.subr.bf16.mxu1 %v15099_v21  ;;  %v7735_v54 = vpop.f32.mrf.mxu1  ;;  %v15141_v19 = vld [vmem:[%s16689_s17 + $0x9e4] ss:$8 sps:$4 sm:$0xff]   ;;  %v15136_v2 = vld [vmem:[%s16689_s17 + $0x8e0] ss:$8 sps:$4 sm:$0xff]   ;;  %v15144_v21 = vld [vmem:[%s16689_s17 + $0x8d4] ss:$8 sps:$4 sm:$0xff]  }
 0x2b1   : > { %8003 = vmatmul.mubr.bf16.gmra.mxu0 %v13073_v23  ;;  %v15139_v20 = vld [vmem:[%s16689_s17 + $0x9e0] ss:$8 sps:$4 sm:$0xff]   ;;  %v15142_v23 = vld [vmem:[%s16689_s17 + $0x8d0] ss:$8 sps:$4 sm:$0xff]   ;;  %v15150_v30 = vld [vmem:[%s16689_s17 + $0x8c4] ss:$8 sps:$4 sm:$0xff]  }
 0x2b2   : > { %v17279_v62 = vadd.f32 %v7735_v54, %v7683_v50  ;;  %8071 = vmatpush1.bf16.msra.mxu0 %v15094_v32  ;;  %8056 = vmatmul.mubr.bf16.gmra.mxu1 %v13075_v24  ;;  %v15145_v24 = vld [vmem:[%s16689_s17 + $0x9d0] ss:$8 sps:$4 sm:$0xff]   ;;  %v15153_v31 = vld [vmem:[%s16689_s17 + $0x9c4] ss:$8 sps:$4 sm:$0xff]   ;;  %v15148_v32 = vld [vmem:[%s16689_s17 + $0x8c0] ss:$8 sps:$4 sm:$0xff]  }
 0x2b3   : > { %8124 = vmatpush1.bf16.msra.mxu1 %v15097_v43  ;;  %8072 = vmatprep.subr.bf16.mxu0 %v15102_v47  ;;  %v15151_v39 = vld [vmem:[%s16689_s17 + $0x9c0] ss:$8 sps:$4 sm:$0xff]   ;;  %v15156_v43 = vld [vmem:[%s16689_s17 + $0x8b4] ss:$8 sps:$4 sm:$0xff]  }
 0x2b4   : > { %8125 = vmatprep.subr.bf16.mxu1 %v15105_v51  ;;  %8098 = vmatprep.mubr.bf16.mxu0 %v13026_v52  ;;  %v15159_v47 = vld [vmem:[%s16689_s17 + $0x9b4] ss:$8 sps:$4 sm:$0xff]   ;;  %v15154_v51 = vld [vmem:[%s16689_s17 + $0x8b0] ss:$8 sps:$4 sm:$0xff]  }
 0x2b5   : > { %8151 = vmatprep.mubr.bf16.mxu1 %v13028_v61 }
 0x2b6   : > { %8073 = vmatpush1.bf16.msra.mxu0 %v15100_v5  ;;  %v15157_v5 = vld [vmem:[%s16689_s17 + $0x9b0] ss:$8 sps:$4 sm:$0xff]  }
 0x2b7   : > { %8126 = vmatpush1.bf16.msra.mxu1 %v15103_v6  ;;  %8074 = vmatprep.subr.bf16.mxu0 %v15108_v38  ;;  %v15162_v6 = vld [vmem:[%s16689_s17 + $0x8a4] ss:$8 sps:$4 sm:$0xff]  }
 0x2b8   : > { %8127 = vmatprep.subr.bf16.mxu1 %v15111_v55 }
 0x2ba   : > { %8075 = vmatpush1.bf16.msra.mxu0 %v15106_v45 }
 0x2bb   : > { %8128 = vmatpush1.bf16.msra.mxu1 %v15109_v7  ;;  %8076 = vmatprep.subr.bf16.mxu0 %v15114_v8  ;;  %v15165_v7 = vld [vmem:[%s16689_s17 + $0x9a4] ss:$8 sps:$4 sm:$0xff]  }
 0x2bc   : > { %8129 = vmatprep.subr.bf16.mxu1 %v15117_v9  ;;  %v15160_v9 = vld [vmem:[%s16689_s17 + $0x8a0] ss:$8 sps:$4 sm:$0xff]  }
 0x2be   : > { %8077 = vmatpush1.bf16.msra.mxu0 %v15112_v56  ;;  %v15163_v56 = vld [vmem:[%s16689_s17 + $0x9a0] ss:$8 sps:$4 sm:$0xff]  }
 0x2bf   : > { %8130 = vmatpush1.bf16.msra.mxu1 %v15115_v1  ;;  %8078 = vmatprep.subr.bf16.mxu0 %v15120_v3 }
 0x2c0   : > { %8131 = vmatprep.subr.bf16.mxu1 %v15123_v11 }
 0x2c2   : > { %8079 = vmatpush1.bf16.msra.mxu0 %v15118_v12  ;;  %v15168_v12 = vld [vmem:[%s16689_s17 + $0x894] ss:$8 sps:$4 sm:$0xff]  }
 0x2c3   : > { %8132 = vmatpush1.bf16.msra.mxu1 %v15121_v13  ;;  %8080 = vmatprep.subr.bf16.mxu0 %v15126_v14  ;;  %v1240_v14 = vrot.slane %v17155_v35, 7  ;;  %v15174_v35 = vld [vmem:[%s16689_s17 + $0x884] ss:$8 sps:$4 sm:$0xff]  }
 0x2c4   : > { %8133 = vmatprep.subr.bf16.mxu1 %v15129_v15  ;;  %v1244_v15 = vrot.slane %v17158_v40, 7  ;;  %v1208_v40 = vld [vmem:[#allocation3 + $0x68] sm:$0x77] }
 0x2c6   : > { %8081 = vmatpush1.bf16.msra.mxu0 %v15124_v57  ;;  %v15171_v57 = vld [vmem:[%s16689_s17 + $0x994] ss:$8 sps:$4 sm:$0xff]  }
 0x2c7   : > { %8134 = vmatpush1.bf16.msra.mxu1 %v15127_v58  ;;  %8082 = vmatprep.subr.bf16.mxu0 %v15132_v17 }
 0x2c8   : > { %8135 = vmatprep.subr.bf16.mxu1 %v15135_v0  ;;  %v15166_v0 = vld [vmem:[%s16689_s17 + $0x890] ss:$8 sps:$4 sm:$0xff]  }
 0x2ca   : > { %8083 = vmatpush2.bf16.msra.mxu0 %v15130_v18  ;;  %v1203_v18 = vld [vmem:[#allocation3 + $0x40] sm:$0x88] }
 0x2cb   : > { %8136 = vmatpush2.bf16.msra.mxu1 %v15133_v53  ;;  %8084 = vmatprep.subr.bf16.mxu0 %v15138_v63  ;;  %v1207_v53 = vld [vmem:[#allocation3 + $0x60] sm:$0x77] }
 0x2cc   : > { %8137 = vmatprep.subr.bf16.mxu1 %v15141_v19  ;;  %v15169_v63 = vld [vmem:[%s16689_s17 + $0x990] ss:$8 sps:$4 sm:$0xff]  }
 0x2cd   : > { %v7686_v50 = vpop.f32.mrf.mxu0  ;;  %v7739_v54 = vpop.f32.mrf.mxu1 }
 0x2ce   : > { %8085 = vmatpush2.bf16.msra.mxu0 %v15136_v2  ;;  %v7687_v52 = vadd.f32 %v7686_v50, %v17192_v44  ;;  %v1204_v2 = vld [vmem:[#allocation3 + $0x48] sm:$0x88]  ;;  %v15175_v50 = vld [vmem:[%s16689_s17 + $0x980] ss:$8 sps:$4 sm:$0xff]  }
 0x2cf   : > { %8138 = vmatpush2.bf16.msra.mxu1 %v15139_v20  ;;  %8086 = vmatprep.subr.bf16.mxu0 %v15144_v21  ;;  %v7688_v61 = vpop.f32.mrf.mxu0  ;;  %v7741_v45 = vpop.f32.mrf.mxu1  ;;  %v1246_v20 = vrot.slane %v1240_v14, 4  ;;  %v17342_v21 = vld [vmem:[#allocation3 + $0x20] sm:$0xff] }
 0x2d0   : > { %8139 = vmatprep.subr.bf16.mxu1 %v15147_v22  ;;  %v7689_v38 = vadd.f32 %v7688_v61, %v17224_v10  ;;  %v17322_v55 = vadd.f32 %v7739_v54, %v7687_v52  ;;  %v12991_v22 = vrot.slane %v1203_v18, 11  ;;  %v1311_v52 = vshrl.u32 %v17342_v21, 16  ;;  %v1268_v54 = vld [vmem:[#allocation3] sm:$0x88]  ;;  %v15189_v18 = vld [vmem:[%s16689_s17 + $0xb64] ss:$8 sps:$4 sm:$0xff]  }
 0x2d1   : > { %v7690_v8 = vpop.f32.mrf.mxu0  ;;  %v7743_v11 = vpop.f32.mrf.mxu1 }
 0x2d2   : > { %8087 = vmatpush2.bf16.msra.mxu0 %v15142_v23  ;;  %v7691_v1 = vadd.f32 %v7690_v8, %v17192_v44  ;;  %v17328_v3 = vadd.f32 %v7741_v45, %v7689_v38  ;;  %v1247_v23 = vrot.slane %v1207_v53, 7  ;;  %v15178_v8 = vld [vmem:[%s16689_s17 + $0xa70] ss:$8 sps:$4 sm:$0xff]  }
 0x2d3   : > { %8140 = vmatpush2.bf16.msra.mxu1 %v15145_v24  ;;  %8088 = vmatprep.subr.bf16.mxu0 %v15150_v30  ;;  %v7692_v13 = vpop.f32.mrf.mxu0  ;;  %v7745_v44 = vpop.f32.mrf.mxu1  ;;  %v1289_v24 = vshrl.u32 %v17186_v42, 16  ;;  %v17345_v30 = vld [vmem:[#allocation3 + $0x28] sm:$0xff] }
 0x2d4   : > { %8141 = vmatprep.subr.bf16.mxu1 %v15153_v31  ;;  %v7693_v58 = vadd.f32 %v7692_v13, %v17224_v10  ;;  %v17335_v17 = vadd.f32 %v7743_v11, %v7691_v1  ;;  %v1249_v10 = vrot.slane %v1244_v15, 4  ;;  %v15172_v31 = vld [vmem:[%s16689_s17 + $0x880] ss:$8 sps:$4 sm:$0xff]   ;;  %v1320_v61 = vshrl.u32 %v17345_v30, 16  ;;  %v15181_v11 = vld [vmem:[%s16689_s17 + $0xb70] ss:$8 sps:$4 sm:$0xff]  }
 0x2d5   : > { %v17362_v38 = vsel %vm17235_vm3, %v1246_v20, %v1247_v23  ;;  %v17364_v45 = vrot.slane %v1289_v24, 7  ;;  %v1284_v13 = vshrl.u32 %v1268_v54, 16  ;;  %v15195_v54 = vld [vmem:[%s16689_s17 + $0xb54] ss:$8 sps:$4 sm:$0xff]   ;;  %v15280_v24 = vld [vmem:[%s16689_s17 + $0xc60] ss:$8 sps:$4 sm:$0xff]  }
 0x2d6   : > { %8089 = vmatpush2.bf16.msra.mxu0 %v15148_v32  ;;  %v17339_v19 = vadd.f32 %v7745_v44, %v7693_v58  ;;  %v15177_v32 = vld [vmem:[%s16689_s17 + $0x984] ss:$8 sps:$4 sm:$0xff]   ;;  %v1305_v58 = vshll.u32 %v17189_v33, 16 }
 0x2d7   : > { %8142 = vmatpush2.bf16.msra.mxu1 %v15151_v39  ;;  %8090 = vmatprep.subr.bf16.mxu0 %v15156_v43  ;;  %v12992_v39 = vrot.slane %v1204_v2, 11  ;;  %v1250_v43 = vrot.slane %v1208_v40, 7  ;;  %v12993_v2 = vrot.slane %v1284_v13, 11  ;;  %v15201_v13 = vld [vmem:[%s16689_s17 + $0xb44] ss:$8 sps:$4 sm:$0xff]  }
 0x2d8   : > { %8143 = vmatprep.subr.bf16.mxu1 %v15159_v47  ;;  %v1302_v47 = vshrl.u32 %v17189_v33, 16 }
 0x2da   : > { %8091 = vmatpush2.bf16.msra.mxu0 %v15154_v51  ;;  %v15180_v51 = vld [vmem:[%s16689_s17 + $0xa74] ss:$8 sps:$4 sm:$0xff]   ;;  %v17377_v1 = vrot.slane %v1302_v47, 7 }
 0x2db   : > { %8144 = vmatpush2.bf16.msra.mxu1 %v15157_v5  ;;  %8092 = vmatprep.subr.bf16.mxu0 %v15162_v6  ;;  %v13025_v5 = vcombine.low %v17251_v25, %v17255_v28  ;;  %v17358_v6 = vsel %vm17235_vm3, %v12991_v22, %v1240_v14  ;;  %v17374_v25 = vsel %vm17235_vm3, %v1249_v10, %v1250_v43  ;;  %v1292_v28 = vshll.u32 %v17186_v42, 16 }
 0x2dc   : > { %8145 = vmatprep.subr.bf16.mxu1 %v15165_v7  ;;  %v1269_v7 = vld [vmem:[#allocation3 + $0x8] sm:$0x88]  ;;  %v1313_v14 = vrot.slane %v1311_v52, 7  ;;  %v1323_v42 = vshll.u32 %v17345_v30, 16  ;;  %v13078_v53 = vcombine.high %v17358_v6, %v17362_v38  ;;  %v1307_v10 = vor.u32 %v1305_v58, %v17377_v1 }
 0x2dd   : > { %v1297_v44 = vshrl.u32 %v1269_v7, 16  ;;  %v1294_v40 = vor.u32 %v1292_v28, %v17364_v45  ;;  %v15190_v52 = vld [vmem:[%s16689_s17 + $0xa50] ss:$8 sps:$4 sm:$0xff]   ;;  %v17424_v28 = vld [vmem:[#allocation3 + $0x50] sm:$0xff] }
 0x2de   : > { %8093 = vmatpush2.bf16.msra.mxu0 %v15160_v9  ;;  %v15183_v9 = vld [vmem:[%s16689_s17 + $0xb74] ss:$8 sps:$4 sm:$0xff]  }
 0x2df   : > { %8146 = vmatpush2.bf16.msra.mxu1 %v15163_v56  ;;  %8094 = vmatprep.subr.bf16.mxu0 %v15168_v12  ;;  %v17370_v56 = vsel %vm17235_vm3, %v12992_v39, %v1244_v15  ;;  %v15186_v12 = vld [vmem:[%s16689_s17 + $0xa64] ss:$8 sps:$4 sm:$0xff]   ;;  %v13027_v15 = vcombine.low %v17263_v34, %v17267_v37  ;;  %v15184_v37 = vld [vmem:[%s16689_s17 + $0xa60] ss:$8 sps:$4 sm:$0xff]  }
 0x2e0   : > { %8147 = vmatprep.subr.bf16.mxu1 %v15171_v57  ;;  %v1314_v57 = vshll.u32 %v17342_v21, 16  ;;  %v13080_v33 = vcombine.high %v17370_v56, %v17374_v25  ;;  %v13079_v7 = vcombine.low %v17370_v56, %v17374_v25 }
 0x2e2   : > { %8095 = vmatpush2.bf16.msra.mxu0 %v15166_v0  ;;  %v1322_v0 = vrot.slane %v1320_v61, 7  ;;  %v1316_v20 = vor.u32 %v1314_v57, %v1313_v14 }
 0x2e3   : > { %8148 = vmatpush2.bf16.msra.mxu1 %v15169_v63  ;;  %8096 = vmatprep.subr.bf16.mxu0 %v15174_v35  ;;  %v1309_v63 = vrot.slane %v17364_v45, 4  ;;  %v15187_v35 = vld [vmem:[%s16689_s17 + $0xb60] ss:$8 sps:$4 sm:$0xff]   ;;  %v15193_v45 = vld [vmem:[%s16689_s17 + $0xb50] ss:$8 sps:$4 sm:$0xff]  }
 0x2e4   : > { %8149 = vmatprep.subr.bf16.mxu1 %v15177_v32  ;;  %v1318_v32 = vrot.slane %v17377_v1, 4  ;;  %v1325_v39 = vor.u32 %v1323_v42, %v1322_v0  ;;  %v17449_v0 = vld [vmem:[#allocation3 + $0x68] sm:$0xff] }
 0x2e6   : > { %8097 = vmatpush2.bf16.msra.mxu0 %v15172_v31  ;;  %v12994_v31 = vrot.slane %v1297_v44, 11  ;;  %v17435_v25 = vsel %vm17399_vm7, %v1318_v32, %v1325_v39  ;;  %v17447_v44 = vld [vmem:[#allocation3 + $0x58] sm:$0xff] }
 0x2e7   : > { %8150 = vmatpush2.bf16.msra.mxu1 %v15175_v50  ;;  %8172 = vmatprep.subr.bf16.mxu0 %v15180_v51 }
 0x2e8   : > { %8225 = vmatprep.subr.bf16.mxu1 %v15183_v9  ;;  %v17418_v9 = vsel %vm17399_vm7, %v12993_v2, %v1294_v40  ;;  %v17431_v56 = vsel %vm17399_vm7, %v12994_v31, %v1307_v10  ;;  %v13087_v2 = vcombine.low %v17447_v44, %v17449_v0 }
 0x2e9   : > { %v7782_v34 = vpop.f32.mrf.mxu0  ;;  %8099 = vmatmul.mubr.bf16.vlgmr.msra.gmra.mxu0 %v13025_v5  ;;  %v13077_v5 = vcombine.low %v17358_v6, %v17362_v38 }
 0x2ea   : > { %v7783_v22 = vadd.f32 %v7782_v34, %v17241_v60  ;;  %v7835_v23 = vpop.f32.mrf.mxu1  ;;  %8152 = vmatmul.mubr.bf16.vlgmr.msra.gmra.mxu1 %v13027_v15  ;;  %8173 = vmatpush1.bf16.msra.mxu0 %v15178_v8  ;;  %v15192_v60 = vld [vmem:[%s16689_s17 + $0xa54] ss:$8 sps:$4 sm:$0xff]   ;;  %v15198_v8 = vld [vmem:[%s16689_s17 + $0xa44] ss:$8 sps:$4 sm:$0xff]  }
 0x2eb   : > { %8226 = vmatpush1.bf16.msra.mxu1 %v15181_v11  ;;  %v7784_v43 = vpop.f32.mrf.mxu0  ;;  %8174 = vmatprep.subr.bf16.mxu0 %v15186_v12  ;;  %v17437_v11 = vld [vmem:[#allocation3 + $0x60] sm:$0xff] }
 0x2ec   : > { %v17405_v47 = vadd.f32 %v7835_v23, %v7783_v22  ;;  %v7785_v50 = vadd.f32 %v7784_v43, %v17257_v29  ;;  %v7837_v51 = vpop.f32.mrf.mxu1  ;;  %8227 = vmatprep.subr.bf16.mxu1 %v15189_v18  ;;  %8108 = vmatprep.mubr.bf16.mxu0 %v13078_v53  ;;  %v17422_v29 = vsel %vm17399_vm7, %v1309_v63, %v1316_v20  ;;  %v15196_v53 = vld [vmem:[%s16689_s17 + $0xa40] ss:$8 sps:$4 sm:$0xff]   ;;  %v15204_v20 = vld [vmem:[%s16689_s17 + $0xa34] ss:$8 sps:$4 sm:$0xff]  }
 0x2ed   : > { %v7786_v61 = vpop.f32.mrf.mxu0  ;;  %8161 = vmatprep.mubr.bf16.mxu1 %v13080_v33  ;;  %v13030_v15 = vcombine.high %v17418_v9, %v17422_v29  ;;  %v13085_v42 = vcombine.low %v17424_v28, %v17437_v11  ;;  %v13088_v33 = vcombine.high %v17447_v44, %v17449_v0 }
 0x2ee   : > { %v17426_v1 = vadd.f32 %v7837_v51, %v7785_v50  ;;  %v7787_v6 = vadd.f32 %v7786_v61, %v17271_v41  ;;  %v7839_v38 = vpop.f32.mrf.mxu1  ;;  %8175 = vmatpush1.bf16.msra.mxu0 %v15184_v37  ;;  %v13086_v41 = vcombine.high %v17424_v28, %v17437_v11  ;;  %v15205_v50 = vld [vmem:[%s16689_s17 + $0xb30] ss:$8 sps:$4 sm:$0xff]   ;;  %v15210_v51 = vld [vmem:[%s16689_s17 + $0xa24] ss:$8 sps:$4 sm:$0xff]  }
 0x2ef   : > { %8228 = vmatpush1.bf16.msra.mxu1 %v15187_v35  ;;  %v7788_v12 = vpop.f32.mrf.mxu0  ;;  %8176 = vmatprep.subr.bf16.mxu0 %v15192_v60  ;;  %v15199_v35 = vld [vmem:[%s16689_s17 + $0xb40] ss:$8 sps:$4 sm:$0xff]   ;;  %v15202_v60 = vld [vmem:[%s16689_s17 + $0xa30] ss:$8 sps:$4 sm:$0xff]   ;;  %v15213_v61 = vld [vmem:[%s16689_s17 + $0xb24] ss:$8 sps:$4 sm:$0xff]  }
 0x2f0   : > { %v17442_v14 = vadd.f32 %v7839_v38, %v7787_v6  ;;  %v7789_v57 = vadd.f32 %v7788_v12, %v17279_v62  ;;  %v7841_v58 = vpop.f32.mrf.mxu1  ;;  %8229 = vmatprep.subr.bf16.mxu1 %v15195_v54  ;;  %v13032_v62 = vcombine.high %v17431_v56, %v17435_v25  ;;  %v15214_v6 = vld [vmem:[%s16689_s17 + $0xa10] ss:$8 sps:$4 sm:$0xff]   ;;  %v15222_v12 = vld [vmem:[%s16689_s17 + $0xa04] ss:$8 sps:$4 sm:$0xff]  }
 0x2f1   : > { %v7792_v18 = vpop.f32.mrf.mxu0  ;;  %8109 = vmatmul.mubr.bf16.gmra.mxu0 %v13077_v5  ;;  %v15217_v38 = vld [vmem:[%s16689_s17 + $0xb10] ss:$8 sps:$4 sm:$0xff]  }
 0x2f2   : > { %v17458_v63 = vadd.f32 %v7841_v58, %v7789_v57  ;;  %v7793_v34 = vadd.f32 %v7792_v18, %v17322_v55  ;;  %8177 = vmatpush1.bf16.msra.mxu0 %v15190_v52  ;;  %v7845_v37 = vpop.f32.mrf.mxu1  ;;  %8162 = vmatmul.mubr.bf16.gmra.mxu1 %v13079_v7  ;;  %v15207_v55 = vld [vmem:[%s16689_s17 + $0xb34] ss:$8 sps:$4 sm:$0xff]   ;;  %v15211_v7 = vld [vmem:[%s16689_s17 + $0xb20] ss:$8 sps:$4 sm:$0xff]  }
 0x2f3   : > { %8230 = vmatpush1.bf16.msra.mxu1 %v15193_v45  ;;  %v7794_v40 = vpop.f32.mrf.mxu0  ;;  %8178 = vmatprep.subr.bf16.mxu0 %v15198_v8  ;;  %v15208_v45 = vld [vmem:[%s16689_s17 + $0xa20] ss:$8 sps:$4 sm:$0xff]   ;;  %v15216_v8 = vld [vmem:[%s16689_s17 + $0xa14] ss:$8 sps:$4 sm:$0xff]  }
 0x2f4   : > { %v7795_v10 = vadd.f32 %v7794_v40, %v17328_v3  ;;  %v17466_v22 = vadd.f32 %v7845_v37, %v7793_v34  ;;  %v7847_v23 = vpop.f32.mrf.mxu1  ;;  %8231 = vmatprep.subr.bf16.mxu1 %v15201_v13  ;;  %8204 = vmatprep.mubr.bf16.mxu0 %v13030_v15  ;;  %v15225_v13 = vld [vmem:[%s16689_s17 + $0xb04] ss:$8 sps:$4 sm:$0xff]   ;;  %v15220_v57 = vld [vmem:[%s16689_s17 + $0xa00] ss:$8 sps:$4 sm:$0xff]   ;;  %v15228_v15 = vld [vmem:[%s16689_s17 + $0xaf4] ss:$8 sps:$4 sm:$0xff]  }
 0x2f5   : > { %v7796_v31 = vpop.f32.mrf.mxu0  ;;  %8257 = vmatprep.mubr.bf16.mxu1 %v13032_v62  ;;  %v15223_v58 = vld [vmem:[%s16689_s17 + $0xb00] ss:$8 sps:$4 sm:$0xff]   ;;  %v15231_v18 = vld [vmem:[%s16689_s17 + $0xbf4] ss:$8 sps:$4 sm:$0xff]   ;;  %v15229_v62 = vld [vmem:[%s16689_s17 + $0xbf0] ss:$8 sps:$4 sm:$0xff]  }
 0x2f6   : > { %v7797_v32 = vadd.f32 %v7796_v31, %v17335_v17  ;;  %v17470_v39 = vadd.f32 %v7847_v23, %v7795_v10  ;;  %8179 = vmatpush1.bf16.msra.mxu0 %v15196_v53  ;;  %v7849_v43 = vpop.f32.mrf.mxu1  ;;  %v15226_v53 = vld [vmem:[%s16689_s17 + $0xaf0] ss:$8 sps:$4 sm:$0xff]   ;;  %v15234_v34 = vld [vmem:[%s16689_s17 + $0xae4] ss:$8 sps:$4 sm:$0xff]   ;;  %v15235_v40 = vld [vmem:[%s16689_s17 + $0xbe0] ss:$8 sps:$4 sm:$0xff]  }
 0x2f7   : > { %8232 = vmatpush1.bf16.msra.mxu1 %v15199_v35  ;;  %v7798_v3 = vpop.f32.mrf.mxu0  ;;  %8180 = vmatprep.subr.bf16.mxu0 %v15204_v20  ;;  %v15237_v37 = vld [vmem:[%s16689_s17 + $0xbe4] ss:$8 sps:$4 sm:$0xff]   ;;  %v15232_v35 = vld [vmem:[%s16689_s17 + $0xae0] ss:$8 sps:$4 sm:$0xff]   ;;  %v15240_v20 = vld [vmem:[%s16689_s17 + $0xad4] ss:$8 sps:$4 sm:$0xff]  }
 0x2f8   : > { %v7799_v52 = vadd.f32 %v7798_v3, %v17339_v19  ;;  %v17476_v54 = vadd.f32 %v7849_v43, %v7797_v32  ;;  %v7851_v17 = vpop.f32.mrf.mxu1  ;;  %8233 = vmatprep.subr.bf16.mxu1 %v15207_v55  ;;  %v15219_v19 = vld [vmem:[%s16689_s17 + $0xb14] ss:$8 sps:$4 sm:$0xff]   ;;  %v15238_v23 = vld [vmem:[%s16689_s17 + $0xad0] ss:$8 sps:$4 sm:$0xff]   ;;  %v15246_v31 = vld [vmem:[%s16689_s17 + $0xac4] ss:$8 sps:$4 sm:$0xff]  }
 0x2f9   : > { %v15243_v10 = vld [vmem:[%s16689_s17 + $0xbd4] ss:$8 sps:$4 sm:$0xff]   ;;  %v15241_v55 = vld [vmem:[%s16689_s17 + $0xbd0] ss:$8 sps:$4 sm:$0xff]   ;;  %v15249_v32 = vld [vmem:[%s16689_s17 + $0xbc4] ss:$8 sps:$4 sm:$0xff]  }
 0x2fa   : > { %v17479_v5 = vadd.f32 %v7851_v17, %v7799_v52  ;;  %8181 = vmatpush1.bf16.msra.mxu0 %v15202_v60  ;;  %v15244_v43 = vld [vmem:[%s16689_s17 + $0xac0] ss:$8 sps:$4 sm:$0xff]   ;;  %v15252_v3 = vld [vmem:[%s16689_s17 + $0xab4] ss:$8 sps:$4 sm:$0xff]   ;;  %v15253_v52 = vld [vmem:[%s16689_s17 + $0xbb0] ss:$8 sps:$4 sm:$0xff]  }
 0x2fb   : > { %8234 = vmatpush1.bf16.msra.mxu1 %v15205_v50  ;;  %8182 = vmatprep.subr.bf16.mxu0 %v15210_v51  ;;  %v15247_v60 = vld [vmem:[%s16689_s17 + $0xbc0] ss:$8 sps:$4 sm:$0xff]   ;;  %v15255_v50 = vld [vmem:[%s16689_s17 + $0xbb4] ss:$8 sps:$4 sm:$0xff]   ;;  %v15250_v51 = vld [vmem:[%s16689_s17 + $0xab0] ss:$8 sps:$4 sm:$0xff]  }
 0x2fc   : > { %8235 = vmatprep.subr.bf16.mxu1 %v15213_v61  ;;  %v15258_v17 = vld [vmem:[%s16689_s17 + $0xaa4] ss:$8 sps:$4 sm:$0xff]   ;;  %v15256_v61 = vld [vmem:[%s16689_s17 + $0xaa0] ss:$8 sps:$4 sm:$0xff]  }
 0x2fe   : > { %8183 = vmatpush1.bf16.msra.mxu0 %v15208_v45  ;;  %v15261_v45 = vld [vmem:[%s16689_s17 + $0xba4] ss:$8 sps:$4 sm:$0xff]  }
 0x2ff   : > { %8236 = vmatpush1.bf16.msra.mxu1 %v15211_v7  ;;  %8184 = vmatprep.subr.bf16.mxu0 %v15216_v8  ;;  %v15259_v7 = vld [vmem:[%s16689_s17 + $0xba0] ss:$8 sps:$4 sm:$0xff]   ;;  %v1274_v8 = vld [vmem:[#allocation3 + $0x40] sm:$0x88] }
 0x300   : > { %8237 = vmatprep.subr.bf16.mxu1 %v15219_v19  ;;  %v1333_v19 = vshrl.u32 %v17424_v28, 16 }
 0x302   : > { %8185 = vmatpush1.bf16.msra.mxu0 %v15214_v6  ;;  %v1355_v6 = vshrl.u32 %v17437_v11, 16 }
 0x303   : > { %8238 = vmatpush1.bf16.msra.mxu1 %v15217_v38  ;;  %8186 = vmatprep.subr.bf16.mxu0 %v15222_v12  ;;  %v1275_v38 = vld [vmem:[#allocation3 + $0x48] sm:$0x88]  ;;  %v1346_v12 = vshrl.u32 %v17447_v44, 16 }
 0x304   : > { %8239 = vmatprep.subr.bf16.mxu1 %v15225_v13  ;;  %v1364_v13 = vshrl.u32 %v17449_v0, 16 }
 0x306   : > { %8187 = vmatpush1.bf16.msra.mxu0 %v15220_v57  ;;  %v15264_v57 = vld [vmem:[%s16689_s17 + $0xa94] ss:$8 sps:$4 sm:$0xff]  }
 0x307   : > { %8240 = vmatpush1.bf16.msra.mxu1 %v15223_v58  ;;  %8188 = vmatprep.subr.bf16.mxu0 %v15228_v15  ;;  %v15267_v58 = vld [vmem:[%s16689_s17 + $0xb94] ss:$8 sps:$4 sm:$0xff]   ;;  %v15262_v15 = vld [vmem:[%s16689_s17 + $0xa90] ss:$8 sps:$4 sm:$0xff]  }
 0x308   : > { %8241 = vmatprep.subr.bf16.mxu1 %v15231_v18  ;;  %v1328_v18 = vshrl.u32 %v1274_v8, 16  ;;  %v755_v8 = vld [vmem:[#allocation3 + $0x34] sm:$0xf] }
 0x309   : > { %764 = vst.msk [vmem:[#allocation3 + $0x3c] sm:$0xf] %vm760_vm2, %v755_v8  ;;  %v15289_v8 = vld [vmem:[%s16689_s17 + $0xd50] ss:$8 sps:$4 sm:$0xff]  }
 0x30a   : > { %8189 = vmatpush2.bf16.msra.mxu0 %v15226_v53  ;;  %v1336_v53 = vshll.u32 %v17424_v28, 16 }
 0x30b   : > { %8242 = vmatpush2.bf16.msra.mxu1 %v15229_v62  ;;  %8190 = vmatprep.subr.bf16.mxu0 %v15234_v34  ;;  %v1358_v62 = vshll.u32 %v17437_v11, 16  ;;  %v1335_v34 = vrot.slane %v1333_v19, 7  ;;  %v15271_v19 = vld [vmem:[%s16689_s17 + $0xb80] ss:$8 sps:$4 sm:$0xff]  }
 0x30c   : > { %8243 = vmatprep.subr.bf16.mxu1 %v15237_v37  ;;  %v1357_v37 = vrot.slane %v1355_v6, 7  ;;  %v15276_v6 = vld [vmem:[%s16689_s17 + $0xc74] ss:$8 sps:$4 sm:$0xff]  }
 0x30e   : > { %8191 = vmatpush2.bf16.msra.mxu0 %v15232_v35  ;;  %v1341_v35 = vshrl.u32 %v1275_v38, 16  ;;  %v15274_v38 = vld [vmem:[%s16689_s17 + $0xc70] ss:$8 sps:$4 sm:$0xff]  }
 0x30f   : > { %8244 = vmatpush2.bf16.msra.mxu1 %v15235_v40  ;;  %8192 = vmatprep.subr.bf16.mxu0 %v15240_v20  ;;  %v1349_v40 = vshll.u32 %v17447_v44, 16  ;;  %v1348_v20 = vrot.slane %v1346_v12, 7  ;;  %v15279_v12 = vld [vmem:[%s16689_s17 + $0xd74] ss:$8 sps:$4 sm:$0xff]  }
 0x310   : > { %8245 = vmatprep.subr.bf16.mxu1 %v15243_v10  ;;  %v1366_v10 = vrot.slane %v1364_v13, 7  ;;  %v13029_v13 = vcombine.low %v17418_v9, %v17422_v29  ;;  %v742_v9 = vld [vmem:[#allocation3 + $0x78] sm:$0xf] }
 0x311   : > { %v15285_v29 = vld [vmem:[%s16689_s17 + $0xd64] ss:$8 sps:$4 sm:$0xff]   ;;  %751 = vst.msk [vmem:[#allocation3 + $0x70] sm:$0xf] %vm743_vm1, %v742_v9 }
 0x312   : > { %8193 = vmatpush2.bf16.msra.mxu0 %v15238_v23  ;;  %v1367_v23 = vshll.u32 %v17449_v0, 16 }
 0x313   : > { %8246 = vmatpush2.bf16.msra.mxu1 %v15241_v55  ;;  %8194 = vmatprep.subr.bf16.mxu0 %v15246_v31  ;;  %v15265_v55 = vld [vmem:[%s16689_s17 + $0xb90] ss:$8 sps:$4 sm:$0xff]   ;;  %v15270_v31 = vld [vmem:[%s16689_s17 + $0xa84] ss:$8 sps:$4 sm:$0xff]  }
 0x314   : > { %8247 = vmatprep.subr.bf16.mxu1 %v15249_v32  ;;  %v15268_v32 = vld [vmem:[%s16689_s17 + $0xa80] ss:$8 sps:$4 sm:$0xff]  }
 0x316   : > { %8195 = vmatpush2.bf16.msra.mxu0 %v15244_v43  ;;  %v15273_v43 = vld [vmem:[%s16689_s17 + $0xb84] ss:$8 sps:$4 sm:$0xff]  }
 0x317   : > { %8248 = vmatpush2.bf16.msra.mxu1 %v15247_v60  ;;  %8196 = vmatprep.subr.bf16.mxu0 %v15252_v3  ;;  %v12995_v60 = vrot.slane %v1328_v18, 11  ;;  %v1338_v3 = vor.u32 %v1336_v53, %v1335_v34  ;;  %v13031_v53 = vcombine.low %v17431_v56, %v17435_v25 }
 0x318   : > { %8249 = vmatprep.subr.bf16.mxu1 %v15255_v50  ;;  %v1353_v50 = vrot.slane %v1335_v34, 4 }
 0x31a   : > { %8197 = vmatpush2.bf16.msra.mxu0 %v15250_v51  ;;  %v1360_v51 = vor.u32 %v1358_v62, %v1357_v37 }
 0x31b   : > { %8250 = vmatpush2.bf16.msra.mxu1 %v15253_v52  ;;  %8198 = vmatprep.subr.bf16.mxu0 %v15258_v17  ;;  %v738_v52 = vld [vmem:[#allocation3 + $0x38] sm:$0xf]  ;;  %v12996_v17 = vrot.slane %v1341_v35, 11 }
 0x31c   : > { %8251 = vmatprep.subr.bf16.mxu1 %v15261_v45  ;;  %v1362_v45 = vrot.slane %v1348_v20, 4  ;;  %747 = vst.msk [vmem:[#allocation3 + $0x30] sm:$0xf] %vm743_vm1, %v738_v52  ;;  %v1361_v18 = vsel %vm17399_vm7, %v1353_v50, %v1360_v51  ;;  %v17561_v50 = vld [vmem:[#allocation3 + $0x10] sm:$0xff]  ;;  %v17563_v51 = vld [vmem:[#allocation3 + $0x18] sm:$0xff] }
 0x31d   : > { %vm1415_vm1 = vsmask.f32 3328 }
 0x31e   : > { %8199 = vmatpush2.bf16.msra.mxu0 %v15256_v61  ;;  %v1351_v61 = vor.u32 %v1349_v40, %v1348_v20  ;;  %v15283_v20 = vld [vmem:[%s16689_s17 + $0xd60] ss:$8 sps:$4 sm:$0xff]  }
 0x31f   : > { %8252 = vmatpush2.bf16.msra.mxu1 %v15259_v7  ;;  %8200 = vmatprep.subr.bf16.mxu0 %v15264_v57  ;;  %v1369_v7 = vor.u32 %v1367_v23, %v1366_v10  ;;  %v15277_v57 = vld [vmem:[%s16689_s17 + $0xd70] ss:$8 sps:$4 sm:$0xff]   ;;  %v15288_v23 = vld [vmem:[%s16689_s17 + $0xc54] ss:$8 sps:$4 sm:$0xff]  }
 0x320   : > { %8253 = vmatprep.subr.bf16.mxu1 %v15267_v58  ;;  %v15282_v58 = vld [vmem:[%s16689_s17 + $0xc64] ss:$8 sps:$4 sm:$0xff]   ;;  %v1352_v62 = vsel %vm17399_vm7, %v12996_v17, %v1351_v61 }
 0x321   : > { %v1370_v34 = vsel %vm17399_vm7, %v1362_v45, %v1369_v7  ;;  %v759_v45 = vld [vmem:[#allocation3 + $0x74] sm:$0xf] }
 0x322   : > { %8201 = vmatpush2.bf16.msra.mxu0 %v15262_v15  ;;  %v1339_v15 = vsel %vm17399_vm7, %v12995_v60, %v1338_v3  ;;  %v13084_v56 = vcombine.high %v1352_v62, %v1370_v34  ;;  %v15286_v3 = vld [vmem:[%s16689_s17 + $0xc50] ss:$8 sps:$4 sm:$0xff]   ;;  %v13083_v61 = vcombine.low %v1352_v62, %v1370_v34  ;;  %768 = vst.msk [vmem:[#allocation3 + $0x7c] sm:$0xf] %vm760_vm2, %v759_v45  ;;  %v15295_v62 = vld [vmem:[%s16689_s17 + $0xd40] ss:$8 sps:$4 sm:$0xff]  }
 0x323   : > { %8254 = vmatpush2.bf16.msra.mxu1 %v15265_v55  ;;  %8202 = vmatprep.subr.bf16.mxu0 %v15270_v31  ;;  %v13082_v37 = vcombine.high %v1339_v15, %v1361_v18  ;;  %v13081_v60 = vcombine.low %v1339_v15, %v1361_v18  ;;  %v13036_v15 = vcombine.high %v17563_v51, %v17345_v30  ;;  %v15321_v45 = vld [vmem:[%s16689_s17 + $0xd04] ss:$8 sps:$4 sm:$0xff]   ;;  %vm1416_vm2 = vsmask.f32 7440 }
 0x324   : > { %8255 = vmatprep.subr.bf16.mxu1 %v15273_v43  ;;  %v15291_v43 = vld [vmem:[%s16689_s17 + $0xd54] ss:$8 sps:$4 sm:$0xff]   ;;  %vm17671_vm9 = vmor %vm1415_vm1, %vm1416_vm2 }
 0x326   : > { %8203 = vmatpush2.bf16.msra.mxu0 %v15268_v32 }
 0x327   : > { %8256 = vmatpush2.bf16.msra.mxu1 %v15271_v19  ;;  %8278 = vmatprep.subr.bf16.mxu0 %v15276_v6  ;;  %v15294_v19 = vld [vmem:[%s16689_s17 + $0xc44] ss:$8 sps:$4 sm:$0xff]  }
 0x328   : > { %8331 = vmatprep.subr.bf16.mxu1 %v15279_v12 }
 0x329   : > { %v7888_v35 = vpop.f32.mrf.mxu0  ;;  %8205 = vmatmul.mubr.bf16.vlgmr.msra.gmra.mxu0 %v13029_v13  ;;  %v13034_v13 = vcombine.high %v17561_v50, %v17342_v21  ;;  %v15300_v21 = vld [vmem:[%s16689_s17 + $0xc34] ss:$8 sps:$4 sm:$0xff]  }
 0x32a   : > { %v7889_v25 = vadd.f32 %v7888_v35, %v17405_v47  ;;  %v7941_v40 = vpop.f32.mrf.mxu1  ;;  %8258 = vmatmul.mubr.bf16.vlgmr.msra.gmra.mxu1 %v13031_v53  ;;  %8279 = vmatpush1.bf16.msra.mxu0 %v15274_v38  ;;  %v15298_v35 = vld [vmem:[%s16689_s17 + $0xc30] ss:$8 sps:$4 sm:$0xff]  }
 0x32b   : > { %8332 = vmatpush1.bf16.msra.mxu1 %v15277_v57  ;;  %v7890_v10 = vpop.f32.mrf.mxu0  ;;  %8280 = vmatprep.subr.bf16.mxu0 %v15282_v58  ;;  %v15292_v58 = vld [vmem:[%s16689_s17 + $0xc40] ss:$8 sps:$4 sm:$0xff]  }
 0x32c   : > { %v17556_v55 = vadd.f32 %v7941_v40, %v7889_v25  ;;  %v7891_v31 = vadd.f32 %v7890_v10, %v17426_v1  ;;  %v7943_v32 = vpop.f32.mrf.mxu1  ;;  %8333 = vmatprep.subr.bf16.mxu1 %v15285_v29  ;;  %8214 = vmatprep.mubr.bf16.mxu0 %v13082_v37  ;;  %v15303_v37 = vld [vmem:[%s16689_s17 + $0xd34] ss:$8 sps:$4 sm:$0xff]  }
 0x32d   : > { %v7892_v47 = vpop.f32.mrf.mxu0  ;;  %8267 = vmatprep.mubr.bf16.mxu1 %v13084_v56  ;;  %v15301_v56 = vld [vmem:[%s16689_s17 + $0xd30] ss:$8 sps:$4 sm:$0xff]  }
 0x32e   : > { %v17565_v52 = vadd.f32 %v7943_v32, %v7891_v31  ;;  %v7893_v17 = vadd.f32 %v7892_v47, %v17442_v14  ;;  %v7945_v1 = vpop.f32.mrf.mxu1  ;;  %8281 = vmatpush1.bf16.msra.mxu0 %v15280_v24  ;;  %v15297_v14 = vld [vmem:[%s16689_s17 + $0xd44] ss:$8 sps:$4 sm:$0xff]   ;;  %v15304_v32 = vld [vmem:[%s16689_s17 + $0xc20] ss:$8 sps:$4 sm:$0xff]  }
 0x32f   : > { %8334 = vmatpush1.bf16.msra.mxu1 %v15283_v20  ;;  %v7894_v7 = vpop.f32.mrf.mxu0  ;;  %8282 = vmatprep.subr.bf16.mxu0 %v15288_v23  ;;  %v15307_v47 = vld [vmem:[%s16689_s17 + $0xd20] ss:$8 sps:$4 sm:$0xff]  }
 0x330   : > { %v17571_v6 = vadd.f32 %v7945_v1, %v7893_v17  ;;  %v7895_v38 = vadd.f32 %v7894_v7, %v17458_v63  ;;  %v7947_v12 = vpop.f32.mrf.mxu1  ;;  %8335 = vmatprep.subr.bf16.mxu1 %v15291_v43  ;;  %v15313_v17 = vld [vmem:[%s16689_s17 + $0xd10] ss:$8 sps:$4 sm:$0xff]   ;;  %v15318_v1 = vld [vmem:[%s16689_s17 + $0xc04] ss:$8 sps:$4 sm:$0xff]   ;;  %v15319_v7 = vld [vmem:[%s16689_s17 + $0xd00] ss:$8 sps:$4 sm:$0xff]  }
 0x331   : > { %v7898_v57 = vpop.f32.mrf.mxu0  ;;  %8215 = vmatmul.mubr.bf16.gmra.mxu0 %v13081_v60  ;;  %v15312_v60 = vld [vmem:[%s16689_s17 + $0xc14] ss:$8 sps:$4 sm:$0xff]  }
 0x332   : > { %v17580_v18 = vadd.f32 %v7947_v12, %v7895_v38  ;;  %v7899_v53 = vadd.f32 %v7898_v57, %v17466_v22  ;;  %8283 = vmatpush1.bf16.msra.mxu0 %v15286_v3  ;;  %v7951_v63 = vpop.f32.mrf.mxu1  ;;  %8268 = vmatmul.mubr.bf16.gmra.mxu1 %v13083_v61  ;;  %v15315_v3 = vld [vmem:[%s16689_s17 + $0xd14] ss:$8 sps:$4 sm:$0xff]   ;;  %v15316_v61 = vld [vmem:[%s16689_s17 + $0xc00] ss:$8 sps:$4 sm:$0xff]   ;;  %v15325_v12 = vld [vmem:[%s16689_s17 + $0xdf0] ss:$8 sps:$4 sm:$0xff]  }
 0x333   : > { %8336 = vmatpush1.bf16.msra.mxu1 %v15289_v8  ;;  %v7900_v34 = vpop.f32.mrf.mxu0  ;;  %8284 = vmatprep.subr.bf16.mxu0 %v15294_v19  ;;  %v15324_v8 = vld [vmem:[%s16689_s17 + $0xcf4] ss:$8 sps:$4 sm:$0xff]   ;;  %v15322_v19 = vld [vmem:[%s16689_s17 + $0xcf0] ss:$8 sps:$4 sm:$0xff]   ;;  %v15333_v57 = vld [vmem:[%s16689_s17 + $0xde4] ss:$8 sps:$4 sm:$0xff]  }
 0x334   : > { %v7901_v9 = vadd.f32 %v7900_v34, %v17470_v39  ;;  %v17586_v29 = vadd.f32 %v7951_v63, %v7899_v53  ;;  %v7953_v30 = vpop.f32.mrf.mxu1  ;;  %8337 = vmatprep.subr.bf16.mxu1 %v15297_v14  ;;  %8310 = vmatprep.mubr.bf16.mxu0 %v13034_v13  ;;  %v15306_v39 = vld [vmem:[%s16689_s17 + $0xc24] ss:$8 sps:$4 sm:$0xff]   ;;  %v15327_v38 = vld [vmem:[%s16689_s17 + $0xdf4] ss:$8 sps:$4 sm:$0xff]   ;;  %v15328_v13 = vld [vmem:[%s16689_s17 + $0xce0] ss:$8 sps:$4 sm:$0xff]  }
 0x335   : > { %v7902_v22 = vpop.f32.mrf.mxu0  ;;  %8363 = vmatprep.mubr.bf16.mxu1 %v13036_v15  ;;  %v15330_v14 = vld [vmem:[%s16689_s17 + $0xce4] ss:$8 sps:$4 sm:$0xff]   ;;  %v15336_v15 = vld [vmem:[%s16689_s17 + $0xcd4] ss:$8 sps:$4 sm:$0xff]   ;;  %v15334_v53 = vld [vmem:[%s16689_s17 + $0xcd0] ss:$8 sps:$4 sm:$0xff]  }
 0x336   : > { %v7903_v25 = vadd.f32 %v7902_v22, %v17476_v54  ;;  %v17592_v40 = vadd.f32 %v7953_v30, %v7901_v9  ;;  %8285 = vmatpush1.bf16.msra.mxu0 %v15292_v58  ;;  %v7955_v24 = vpop.f32.mrf.mxu1  ;;  %v15309_v54 = vld [vmem:[%s16689_s17 + $0xd24] ss:$8 sps:$4 sm:$0xff]   ;;  %v15331_v58 = vld [vmem:[%s16689_s17 + $0xde0] ss:$8 sps:$4 sm:$0xff]   ;;  %v15339_v63 = vld [vmem:[%s16689_s17 + $0xdd4] ss:$8 sps:$4 sm:$0xff]  }
 0x337   : > { %8338 = vmatpush1.bf16.msra.mxu1 %v15295_v62  ;;  %v7904_v20 = vpop.f32.mrf.mxu0  ;;  %8286 = vmatprep.subr.bf16.mxu0 %v15300_v21  ;;  %v15337_v62 = vld [vmem:[%s16689_s17 + $0xdd0] ss:$8 sps:$4 sm:$0xff]   ;;  %v15342_v34 = vld [vmem:[%s16689_s17 + $0xcc4] ss:$8 sps:$4 sm:$0xff]   ;;  %v15340_v21 = vld [vmem:[%s16689_s17 + $0xcc0] ss:$8 sps:$4 sm:$0xff]  }
 0x338   : > { %v7905_v10 = vadd.f32 %v7904_v20, %v17479_v5  ;;  %v17596_v23 = vadd.f32 %v7955_v24, %v7903_v25  ;;  %v7957_v31 = vpop.f32.mrf.mxu1  ;;  %8339 = vmatprep.subr.bf16.mxu1 %v15303_v37  ;;  %v15310_v5 = vld [vmem:[%s16689_s17 + $0xc10] ss:$8 sps:$4 sm:$0xff]   ;;  %v15345_v9 = vld [vmem:[%s16689_s17 + $0xdc4] ss:$8 sps:$4 sm:$0xff]   ;;  %v15343_v30 = vld [vmem:[%s16689_s17 + $0xdc0] ss:$8 sps:$4 sm:$0xff]  }
 0x339   : > { %v15348_v37 = vld [vmem:[%s16689_s17 + $0xcb4] ss:$8 sps:$4 sm:$0xff]   ;;  %v15346_v22 = vld [vmem:[%s16689_s17 + $0xcb0] ss:$8 sps:$4 sm:$0xff]   ;;  %v15354_v25 = vld [vmem:[%s16689_s17 + $0xca4] ss:$8 sps:$4 sm:$0xff]  }
 0x33a   : > { %v17600_v43 = vadd.f32 %v7957_v31, %v7905_v10  ;;  %8287 = vmatpush1.bf16.msra.mxu0 %v15298_v35  ;;  %v15351_v35 = vld [vmem:[%s16689_s17 + $0xdb4] ss:$8 sps:$4 sm:$0xff]   ;;  %v15357_v24 = vld [vmem:[%s16689_s17 + $0xda4] ss:$8 sps:$4 sm:$0xff]   ;;  %v15355_v10 = vld [vmem:[%s16689_s17 + $0xda0] ss:$8 sps:$4 sm:$0xff]  }
 0x33b   : > { %8340 = vmatpush1.bf16.msra.mxu1 %v15301_v56  ;;  %8288 = vmatprep.subr.bf16.mxu0 %v15306_v39  ;;  %v15349_v56 = vld [vmem:[%s16689_s17 + $0xdb0] ss:$8 sps:$4 sm:$0xff]   ;;  %v15352_v39 = vld [vmem:[%s16689_s17 + $0xca0] ss:$8 sps:$4 sm:$0xff]   ;;  %v15360_v31 = vld [vmem:[%s16689_s17 + $0xc94] ss:$8 sps:$4 sm:$0xff]  }
 0x33c   : > { %8341 = vmatprep.subr.bf16.mxu1 %v15309_v54  ;;  %v17634_v20 = vld [vmem:[#allocation3 + $0x20] sm:$0xff]  ;;  %v17638_v54 = vld [vmem:[#allocation3 + $0x28] sm:$0xff] }
 0x33e   : > { %8289 = vmatpush1.bf16.msra.mxu0 %v15304_v32  ;;  %v15358_v32 = vld [vmem:[%s16689_s17 + $0xc90] ss:$8 sps:$4 sm:$0xff]  }
 0x33f   : > { %8342 = vmatpush1.bf16.msra.mxu1 %v15307_v47  ;;  %8290 = vmatprep.subr.bf16.mxu0 %v15312_v60  ;;  %v15363_v47 = vld [vmem:[%s16689_s17 + $0xd94] ss:$8 sps:$4 sm:$0xff]   ;;  %v1419_v60 = vshrl.u32 %v17561_v50, 16 }
 0x340   : > { %8343 = vmatprep.subr.bf16.mxu1 %v15315_v3  ;;  %v1428_v3 = vshll.u32 %v17634_v20, 16 }
 0x342   : > { %8291 = vmatpush1.bf16.msra.mxu0 %v15310_v5  ;;  %v1422_v5 = vshll.u32 %v17561_v50, 16 }
 0x343   : > { %8344 = vmatpush1.bf16.msra.mxu1 %v15313_v17  ;;  %8292 = vmatprep.subr.bf16.mxu0 %v15318_v1  ;;  %v1446_v17 = vshrl.u32 %v17634_v20, 16  ;;  %v1433_v1 = vshrl.u32 %v17563_v51, 16 }
 0x344   : > { %8345 = vmatprep.subr.bf16.mxu1 %v15321_v45  ;;  %v1442_v45 = vshll.u32 %v17638_v54, 16 }
 0x346   : > { %8293 = vmatpush1.bf16.msra.mxu0 %v15316_v61  ;;  %v1436_v61 = vshll.u32 %v17563_v51, 16 }
 0x347   : > { %8346 = vmatpush1.bf16.msra.mxu1 %v15319_v7  ;;  %8294 = vmatprep.subr.bf16.mxu0 %v15324_v8  ;;  %v1456_v7 = vshrl.u32 %v17638_v54, 16  ;;  %v15361_v8 = vld [vmem:[%s16689_s17 + $0xd90] ss:$8 sps:$4 sm:$0xff]  }
 0x348   : > { %8347 = vmatprep.subr.bf16.mxu1 %v15327_v38  ;;  %v15369_v38 = vld [vmem:[%s16689_s17 + $0xd84] ss:$8 sps:$4 sm:$0xff]  }
 0x34a   : > { %8295 = vmatpush2.bf16.msra.mxu0 %v15322_v19  ;;  %v15366_v19 = vld [vmem:[%s16689_s17 + $0xc84] ss:$8 sps:$4 sm:$0xff]  }
 0x34b   : > { %8348 = vmatpush2.bf16.msra.mxu1 %v15325_v12  ;;  %8296 = vmatprep.subr.bf16.mxu0 %v15330_v14  ;;  %v15364_v12 = vld [vmem:[%s16689_s17 + $0xc80] ss:$8 sps:$4 sm:$0xff]  }
 0x34c   : > { %8349 = vmatprep.subr.bf16.mxu1 %v15333_v57  ;;  %v1407_v14 = vld [vmem:[#allocation3 + $0x30] sm:$0x11]  ;;  %v1424_v57 = vrot.slane %v1422_v5, 5 }
 0x34e   : > { %8297 = vmatpush2.bf16.msra.mxu0 %v15328_v13  ;;  %v1421_v13 = vrot.slane %v1419_v60, 4 }
 0x34f   : > { %8350 = vmatpush2.bf16.msra.mxu1 %v15331_v58  ;;  %8298 = vmatprep.subr.bf16.mxu0 %v15336_v15  ;;  %v17654_v58 = vrot.slane %v1428_v3, 5  ;;  %v1448_v15 = vrot.slane %v1446_v17, 4  ;;  %v15380_v17 = vld [vmem:[%s16689_s17 + $0xe60] ss:$8 sps:$4 sm:$0xff]  }
 0x350   : > { %8351 = vmatprep.subr.bf16.mxu1 %v15339_v63  ;;  %v1438_v63 = vrot.slane %v1436_v61, 5 }
 0x352   : > { %8299 = vmatpush2.bf16.msra.mxu0 %v15334_v53  ;;  %v1435_v53 = vrot.slane %v1433_v1, 4  ;;  %v15483_v1 = vld [vmem:[%s16689_s17 + $0x1160] ss:$8 sps:$4 sm:$0xff]  }
 0x353   : > { %8352 = vmatpush2.bf16.msra.mxu1 %v15337_v62  ;;  %8300 = vmatprep.subr.bf16.mxu0 %v15342_v34  ;;  %v17656_v62 = vrot.slane %v1442_v45, 5  ;;  %v1458_v34 = vrot.slane %v1456_v7, 4 }
 0x354   : > { %8353 = vmatprep.subr.bf16.mxu1 %v15345_v9  ;;  %v15376_v9 = vld [vmem:[%s16689_s17 + $0xe74] ss:$8 sps:$4 sm:$0xff]   ;;  %v1439_v60 = vor.u32 %v1438_v63, %v1435_v53 }
 0x355   : > { %v1459_v5 = vor.u32 %v1458_v34, %v17656_v62  ;;  %v15393_v34 = vld [vmem:[%s16689_s17 + $0xf54] ss:$8 sps:$4 sm:$0xff]  }
 0x356   : > { %8301 = vmatpush2.bf16.msra.mxu0 %v15340_v21  ;;  %v15367_v21 = vld [vmem:[%s16689_s17 + $0xd80] ss:$8 sps:$4 sm:$0xff]  }
 0x357   : > { %8354 = vmatpush2.bf16.msra.mxu1 %v15343_v30  ;;  %8302 = vmatprep.subr.bf16.mxu0 %v15348_v37  ;;  %v1408_v30 = vld [vmem:[#allocation3 + $0x38] sm:$0x11]  ;;  %v15956_v37 = vld [vmem:[#allocation3 + $0x20] sm:$0xff] }
 0x358   : > { %8355 = vmatprep.subr.bf16.mxu1 %v15351_v35  ;;  %v15957_v35 = vld [vmem:[#allocation3 + $0x28] sm:$0xff] }
 0x35a   : > { %8303 = vmatpush2.bf16.msra.mxu0 %v15346_v22  ;;  %v13033_v22 = vcombine.low %v17561_v50, %v15956_v37  ;;  %v1462_v50 = vshll.u32 %v1408_v30, 16 }
 0x35b   : > { %8356 = vmatpush2.bf16.msra.mxu1 %v15349_v56  ;;  %8304 = vmatprep.subr.bf16.mxu0 %v15354_v25  ;;  %v13035_v56 = vcombine.low %v17563_v51, %v15957_v35  ;;  %v15374_v25 = vld [vmem:[%s16689_s17 + $0xe70] ss:$8 sps:$4 sm:$0xff]   ;;  %v15385_v51 = vld [vmem:[%s16689_s17 + $0xf64] ss:$8 sps:$4 sm:$0xff]  }
 0x35c   : > { %8357 = vmatprep.subr.bf16.mxu1 %v15357_v24  ;;  %v15379_v24 = vld [vmem:[%s16689_s17 + $0xf74] ss:$8 sps:$4 sm:$0xff]   ;;  %v15391_v35 = vld [vmem:[%s16689_s17 + $0xf50] ss:$8 sps:$4 sm:$0xff]  }
 0x35e   : > { %8305 = vmatpush2.bf16.msra.mxu0 %v15352_v39  ;;  %v15377_v39 = vld [vmem:[%s16689_s17 + $0xf70] ss:$8 sps:$4 sm:$0xff]  }
 0x35f   : > { %8358 = vmatpush2.bf16.msra.mxu1 %v15355_v10  ;;  %8306 = vmatprep.subr.bf16.mxu0 %v15360_v31  ;;  %v15382_v10 = vld [vmem:[%s16689_s17 + $0xe64] ss:$8 sps:$4 sm:$0xff]   ;;  %v1425_v31 = vor.u32 %v1424_v57, %v1421_v13  ;;  %v15383_v57 = vld [vmem:[%s16689_s17 + $0xf60] ss:$8 sps:$4 sm:$0xff]  }
 0x360   : > { %8359 = vmatprep.subr.bf16.mxu1 %v15363_v47  ;;  %v1452_v47 = vshll.u32 %v1407_v14, 16  ;;  %v1464_v14 = vrot.slane %v1462_v50, 5 }
 0x361   : > { %v1426_v61 = vrot.slane %v1425_v31, 4  ;;  %v15401_v31 = vld [vmem:[%s16689_s17 + $0xf44] ss:$8 sps:$4 sm:$0xff]  }
 0x362   : > { %8307 = vmatpush2.bf16.msra.mxu0 %v15358_v32  ;;  %v1449_v32 = vor.u32 %v1448_v15, %v17654_v58  ;;  %v1454_v7 = vrot.slane %v1452_v47, 5  ;;  %v15390_v15 = vld [vmem:[%s16689_s17 + $0xe54] ss:$8 sps:$4 sm:$0xff]   ;;  %v15399_v47 = vld [vmem:[%s16689_s17 + $0xf40] ss:$8 sps:$4 sm:$0xff]  }
 0x363   : > { %8360 = vmatpush2.bf16.msra.mxu1 %v15361_v8  ;;  %8308 = vmatprep.subr.bf16.mxu0 %v15366_v19  ;;  %v17692_v30 = vsel %vm17671_vm9, %v1426_v61, %v17654_v58  ;;  %v15407_v61 = vld [vmem:[%s16689_s17 + $0xf34] ss:$8 sps:$4 sm:$0xff]  }
 0x364   : > { %8361 = vmatprep.subr.bf16.mxu1 %v15369_v38  ;;  %v1450_v45 = vrot.slane %v1449_v32, 4  ;;  %v1440_v38 = vrot.slane %v1439_v60, 4  ;;  %v15404_v60 = vld [vmem:[%s16689_s17 + $0xe34] ss:$8 sps:$4 sm:$0xff]  }
 0x366   : > { %8309 = vmatpush2.bf16.msra.mxu0 %v15364_v12  ;;  %v1460_v12 = vrot.slane %v1459_v5, 4  ;;  %v17706_v58 = vsel %vm17671_vm9, %v1440_v38, %v17656_v62 }
 0x367   : > { %8362 = vmatpush2.bf16.msra.mxu1 %v15367_v21  ;;  %8384 = vmatprep.subr.bf16.mxu0 %v15376_v9  ;;  %v15388_v9 = vld [vmem:[%s16689_s17 + $0xe50] ss:$8 sps:$4 sm:$0xff]  }
 0x368   : > { %8437 = vmatprep.subr.bf16.mxu1 %v15379_v24 }
 0x369   : > { %v7994_v3 = vpop.f32.mrf.mxu0  ;;  %8311 = vmatmul.mubr.bf16.vlgmr.msra.gmra.mxu0 %v13033_v22 }
 0x36a   : > { %v7995_v8 = vadd.f32 %v7994_v3, %v17556_v55  ;;  %v8047_v19 = vpop.f32.mrf.mxu1  ;;  %8364 = vmatmul.mubr.bf16.vlgmr.msra.gmra.mxu1 %v13035_v56  ;;  %8385 = vmatpush1.bf16.msra.mxu0 %v15374_v25  ;;  %v17710_v56 = vsel %vm17671_vm9, %v1460_v12, %v1464_v14  ;;  %v15408_v12 = vld [vmem:[%s16689_s17 + $0xe20] ss:$8 sps:$4 sm:$0xff]  }
 0x36b   : > { %8438 = vmatpush1.bf16.msra.mxu1 %v15377_v39  ;;  %v7996_v13 = vpop.f32.mrf.mxu0  ;;  %8386 = vmatprep.subr.bf16.mxu0 %v15382_v10  ;;  %v15396_v10 = vld [vmem:[%s16689_s17 + $0xe40] ss:$8 sps:$4 sm:$0xff]   ;;  %v13040_v5 = vcombine.high %v17706_v58, %v17710_v56 }
 0x36c   : > { %v17678_v53 = vadd.f32 %v8047_v19, %v7995_v8  ;;  %v7997_v63 = vadd.f32 %v7996_v13, %v17565_v52  ;;  %v8049_v55 = vpop.f32.mrf.mxu1  ;;  %8439 = vmatprep.subr.bf16.mxu1 %v15385_v51  ;;  %8320 = vmatprep.mubr.bf16.mxu0 %v13086_v41  ;;  %v17696_v52 = vsel %vm17671_vm9, %v1450_v45, %v1454_v7  ;;  %v15405_v45 = vld [vmem:[%s16689_s17 + $0xf30] ss:$8 sps:$4 sm:$0xff]   ;;  %v15410_v7 = vld [vmem:[%s16689_s17 + $0xe24] ss:$8 sps:$4 sm:$0xff]   ;;  %v15411_v13 = vld [vmem:[%s16689_s17 + $0xf20] ss:$8 sps:$4 sm:$0xff]  }
 0x36d   : > { %v7998_v21 = vpop.f32.mrf.mxu0  ;;  %8373 = vmatprep.mubr.bf16.mxu1 %v13088_v33  ;;  %v15398_v33 = vld [vmem:[%s16689_s17 + $0xe44] ss:$8 sps:$4 sm:$0xff]   ;;  %v13038_v32 = vcombine.high %v17692_v30, %v17696_v52 }
 0x36e   : > { %v17698_v37 = vadd.f32 %v8049_v55, %v7997_v63  ;;  %v7999_v41 = vadd.f32 %v7998_v21, %v17571_v6  ;;  %v8051_v22 = vpop.f32.mrf.mxu1  ;;  %8387 = vmatpush1.bf16.msra.mxu0 %v15380_v17  ;;  %v15402_v17 = vld [vmem:[%s16689_s17 + $0xe30] ss:$8 sps:$4 sm:$0xff]   ;;  %v15422_v55 = vld [vmem:[%s16689_s17 + $0xe04] ss:$8 sps:$4 sm:$0xff]  }
 0x36f   : > { %8440 = vmatpush1.bf16.msra.mxu1 %v15383_v57  ;;  %v8000_v25 = vpop.f32.mrf.mxu0  ;;  %8388 = vmatprep.subr.bf16.mxu0 %v15390_v15  ;;  %v15416_v57 = vld [vmem:[%s16689_s17 + $0xe14] ss:$8 sps:$4 sm:$0xff]   ;;  %v15417_v63 = vld [vmem:[%s16689_s17 + $0xf10] ss:$8 sps:$4 sm:$0xff]   ;;  %v15425_v21 = vld [vmem:[%s16689_s17 + $0xf04] ss:$8 sps:$4 sm:$0xff]  }
 0x370   : > { %v17712_v24 = vadd.f32 %v8051_v22, %v7999_v41  ;;  %v8001_v6 = vadd.f32 %v8000_v25, %v17580_v18  ;;  %v8053_v39 = vpop.f32.mrf.mxu1  ;;  %8441 = vmatprep.subr.bf16.mxu1 %v15393_v34  ;;  %v15419_v15 = vld [vmem:[%s16689_s17 + $0xf14] ss:$8 sps:$4 sm:$0xff]   ;;  %v15420_v34 = vld [vmem:[%s16689_s17 + $0xe00] ss:$8 sps:$4 sm:$0xff]   ;;  %v15426_v22 = vld [vmem:[%s16689_s17 + $0xef0] ss:$8 sps:$4 sm:$0xff]  }
 0x371   : > { %v8004_v62 = vpop.f32.mrf.mxu0  ;;  %8321 = vmatmul.mubr.bf16.gmra.mxu0 %v13085_v42  ;;  %v15428_v41 = vld [vmem:[%s16689_s17 + $0xef4] ss:$8 sps:$4 sm:$0xff]   ;;  %v15434_v25 = vld [vmem:[%s16689_s17 + $0xee4] ss:$8 sps:$4 sm:$0xff]  }
 0x372   : > { %v17726_v18 = vadd.f32 %v8053_v39, %v8001_v6  ;;  %v8005_v50 = vadd.f32 %v8004_v62, %v17586_v29  ;;  %8389 = vmatpush1.bf16.msra.mxu0 %v15388_v9  ;;  %v8057_v51 = vpop.f32.mrf.mxu1  ;;  %8374 = vmatmul.mubr.bf16.gmra.mxu1 %v13087_v2  ;;  %v15423_v9 = vld [vmem:[%s16689_s17 + $0xf00] ss:$8 sps:$4 sm:$0xff]   ;;  %v15437_v39 = vld [vmem:[%s16689_s17 + $0xfe4] ss:$8 sps:$4 sm:$0xff]   ;;  %v15443_v62 = vld [vmem:[%s16689_s17 + $0xfd4] ss:$8 sps:$4 sm:$0xff]  }
 0x373   : > { %8442 = vmatpush1.bf16.msra.mxu1 %v15391_v35  ;;  %v8006_v28 = vpop.f32.mrf.mxu0  ;;  %8390 = vmatprep.subr.bf16.mxu0 %v15398_v33  ;;  %v15431_v35 = vld [vmem:[%s16689_s17 + $0xff4] ss:$8 sps:$4 sm:$0xff]   ;;  %v15429_v33 = vld [vmem:[%s16689_s17 + $0xff0] ss:$8 sps:$4 sm:$0xff]   ;;  %v15432_v6 = vld [vmem:[%s16689_s17 + $0xee0] ss:$8 sps:$4 sm:$0xff]  }
 0x374   : > { %v8007_v11 = vadd.f32 %v8006_v28, %v17592_v40  ;;  %v17733_v42 = vadd.f32 %v8057_v51, %v8005_v50  ;;  %v8059_v3 = vpop.f32.mrf.mxu1  ;;  %8443 = vmatprep.subr.bf16.mxu1 %v15401_v31  ;;  %8416 = vmatprep.mubr.bf16.mxu0 %v13038_v32  ;;  %v15440_v31 = vld [vmem:[%s16689_s17 + $0xed4] ss:$8 sps:$4 sm:$0xff]   ;;  %v15438_v32 = vld [vmem:[%s16689_s17 + $0xed0] ss:$8 sps:$4 sm:$0xff]   ;;  %v15444_v51 = vld [vmem:[%s16689_s17 + $0xec0] ss:$8 sps:$4 sm:$0xff]  }
 0x375   : > { %v8008_v29 = vpop.f32.mrf.mxu0  ;;  %8469 = vmatprep.mubr.bf16.mxu1 %v13040_v5  ;;  %v15449_v5 = vld [vmem:[%s16689_s17 + $0xfc4] ss:$8 sps:$4 sm:$0xff]  }
 0x376   : > { %v8009_v44 = vadd.f32 %v8008_v29, %v17596_v23  ;;  %v17740_v0 = vadd.f32 %v8059_v3, %v8007_v11  ;;  %8391 = vmatpush1.bf16.msra.mxu0 %v15396_v10  ;;  %v8061_v2 = vpop.f32.mrf.mxu1  ;;  %v15413_v23 = vld [vmem:[%s16689_s17 + $0xf24] ss:$8 sps:$4 sm:$0xff]   ;;  %v15435_v10 = vld [vmem:[%s16689_s17 + $0xfe0] ss:$8 sps:$4 sm:$0xff]   ;;  %v15450_v29 = vld [vmem:[%s16689_s17 + $0xeb0] ss:$8 sps:$4 sm:$0xff]  }
 0x377   : > { %8444 = vmatpush1.bf16.msra.mxu1 %v15399_v47  ;;  %v8010_v40 = vpop.f32.mrf.mxu0  ;;  %8392 = vmatprep.subr.bf16.mxu0 %v15404_v60  ;;  %v15441_v47 = vld [vmem:[%s16689_s17 + $0xfd0] ss:$8 sps:$4 sm:$0xff]   ;;  %v15446_v60 = vld [vmem:[%s16689_s17 + $0xec4] ss:$8 sps:$4 sm:$0xff]   ;;  %v15447_v3 = vld [vmem:[%s16689_s17 + $0xfc0] ss:$8 sps:$4 sm:$0xff]  }
 0x378   : > { %v8011_v8 = vadd.f32 %v8010_v40, %v17600_v43  ;;  %v17743_v19 = vadd.f32 %v8061_v2, %v8009_v44  ;;  %v8063_v38 = vpop.f32.mrf.mxu1  ;;  %8445 = vmatprep.subr.bf16.mxu1 %v15407_v61  ;;  %v15414_v43 = vld [vmem:[%s16689_s17 + $0xe10] ss:$8 sps:$4 sm:$0xff]   ;;  %v1409_v50 = vld [vmem:[#allocation3 + $0x50] sm:$0xff]  ;;  %v1410_v11 = vld [vmem:[#allocation3 + $0x58] sm:$0xff] }
 0x379   : > { %v17773_v28 = vld [vmem:[#allocation3 + $0x60] sm:$0xff]  ;;  %v17777_v61 = vld [vmem:[#allocation3 + $0x68] sm:$0xff]  ;;  %v1470_v44 = vshll.u32 %v1409_v50, 16 }
 0x37a   : > { %v17747_v14 = vadd.f32 %v8063_v38, %v8011_v8  ;;  %8393 = vmatpush1.bf16.msra.mxu0 %v15402_v17  ;;  %v15452_v17 = vld [vmem:[%s16689_s17 + $0xeb4] ss:$8 sps:$4 sm:$0xff]   ;;  %v1476_v2 = vshll.u32 %v17773_v28, 16  ;;  %v1494_v40 = vshrl.u32 %v17773_v28, 16  ;;  %v1481_v8 = vshrl.u32 %v1410_v11, 16 }
 0x37b   : > { %8446 = vmatpush1.bf16.msra.mxu1 %v15405_v45  ;;  %8394 = vmatprep.subr.bf16.mxu0 %v15410_v7  ;;  %v15455_v45 = vld [vmem:[%s16689_s17 + $0xfb4] ss:$8 sps:$4 sm:$0xff]   ;;  %v1467_v7 = vshrl.u32 %v1409_v50, 16  ;;  %v1484_v38 = vshll.u32 %v1410_v11, 16  ;;  %v15470_v11 = vld [vmem:[%s16689_s17 + $0xe84] ss:$8 sps:$4 sm:$0xff]  }
 0x37c   : > { %8447 = vmatprep.subr.bf16.mxu1 %v15413_v23  ;;  %v1490_v23 = vshll.u32 %v17777_v61, 16 }
 0x37e   : > { %8395 = vmatpush1.bf16.msra.mxu0 %v15408_v12  ;;  %v1504_v12 = vshrl.u32 %v17777_v61, 16 }
 0x37f   : > { %8448 = vmatpush1.bf16.msra.mxu1 %v15411_v13  ;;  %8396 = vmatprep.subr.bf16.mxu0 %v15416_v57  ;;  %v15453_v13 = vld [vmem:[%s16689_s17 + $0xfb0] ss:$8 sps:$4 sm:$0xff]   ;;  %v15458_v57 = vld [vmem:[%s16689_s17 + $0xea4] ss:$8 sps:$4 sm:$0xff]  }
 0x380   : > { %8449 = vmatprep.subr.bf16.mxu1 %v15419_v15  ;;  %v15456_v15 = vld [vmem:[%s16689_s17 + $0xea0] ss:$8 sps:$4 sm:$0xff]  }
 0x382   : > { %8397 = vmatpush1.bf16.msra.mxu0 %v15414_v43  ;;  %v15461_v43 = vld [vmem:[%s16689_s17 + $0xfa4] ss:$8 sps:$4 sm:$0xff]  }
 0x383   : > { %8450 = vmatpush1.bf16.msra.mxu1 %v15417_v63  ;;  %8398 = vmatprep.subr.bf16.mxu0 %v15422_v55  ;;  %v1413_v63 = vld [vmem:[#allocation3 + $0x70] sm:$0x11]  ;;  %v1469_v55 = vrot.slane %v1467_v7, 4 }
 0x384   : > { %8451 = vmatprep.subr.bf16.mxu1 %v15425_v21  ;;  %v1478_v21 = vrot.slane %v1476_v2, 5 }
 0x386   : > { %8399 = vmatpush1.bf16.msra.mxu0 %v15420_v34  ;;  %v1472_v34 = vrot.slane %v1470_v44, 5 }
 0x387   : > { %8452 = vmatpush1.bf16.msra.mxu1 %v15423_v9  ;;  %8400 = vmatprep.subr.bf16.mxu0 %v15428_v41  ;;  %v1496_v9 = vrot.slane %v1494_v40, 4  ;;  %v1483_v41 = vrot.slane %v1481_v8, 4  ;;  %v15471_v8 = vld [vmem:[%s16689_s17 + $0xf80] ss:$8 sps:$4 sm:$0xff]  }
 0x388   : > { %8453 = vmatprep.subr.bf16.mxu1 %v15431_v35  ;;  %v1492_v35 = vrot.slane %v1490_v23, 5  ;;  %v15474_v23 = vld [vmem:[%s16689_s17 + $0x1070] ss:$8 sps:$4 sm:$0xff]  }
 0x38a   : > { %8401 = vmatpush2.bf16.msra.mxu0 %v15426_v22  ;;  %v1486_v22 = vrot.slane %v1484_v38, 5  ;;  %v15476_v38 = vld [vmem:[%s16689_s17 + $0x1074] ss:$8 sps:$4 sm:$0xff]  }
 0x38b   : > { %8454 = vmatpush2.bf16.msra.mxu1 %v15429_v33  ;;  %8402 = vmatprep.subr.bf16.mxu0 %v15434_v25  ;;  %v1506_v33 = vrot.slane %v1504_v12, 4  ;;  %v15459_v25 = vld [vmem:[%s16689_s17 + $0xfa0] ss:$8 sps:$4 sm:$0xff]   ;;  %v15479_v12 = vld [vmem:[%s16689_s17 + $0x1174] ss:$8 sps:$4 sm:$0xff]  }
 0x38c   : > { %8455 = vmatprep.subr.bf16.mxu1 %v15437_v39  ;;  %v1414_v39 = vld [vmem:[#allocation3 + $0x78] sm:$0x11] }
 0x38d   : > { %v1510_v50 = vshll.u32 %v1414_v39, 16 }
 0x38e   : > { %8403 = vmatpush2.bf16.msra.mxu0 %v15432_v6  ;;  %v15464_v6 = vld [vmem:[%s16689_s17 + $0xe94] ss:$8 sps:$4 sm:$0xff]  }
 0x38f   : > { %8456 = vmatpush2.bf16.msra.mxu1 %v15435_v10  ;;  %8404 = vmatprep.subr.bf16.mxu0 %v15440_v31  ;;  %v15467_v10 = vld [vmem:[%s16689_s17 + $0xf94] ss:$8 sps:$4 sm:$0xff]   ;;  %v1473_v31 = vor.u32 %v1472_v34, %v1469_v55  ;;  %v1512_v40 = vrot.slane %v1510_v50, 5  ;;  %v1556_v55 = vrot.slane %v17634_v20, 5  ;;  %v13039_v34 = vcombine.low %v17706_v58, %v17710_v56  ;;  %v1531_v20 = vld [vmem:[#allocation3 + $0x18] sm:$0xee] }
 0x390   : > { %8457 = vmatprep.subr.bf16.mxu1 %v15443_v62  ;;  %v1500_v62 = vshll.u32 %v1413_v63, 16  ;;  %v1530_v63 = vld [vmem:[#allocation3 + $0x10] sm:$0xee] }
 0x391   : > { %v15480_v58 = vld [vmem:[%s16689_s17 + $0x1060] ss:$8 sps:$4 sm:$0xff]   ;;  %v15485_v56 = vld [vmem:[%s16689_s17 + $0x1164] ss:$8 sps:$4 sm:$0xff]  }
 0x392   : > { %8405 = vmatpush2.bf16.msra.mxu0 %v15438_v32  ;;  %v1497_v32 = vor.u32 %v1496_v9, %v1478_v21  ;;  %v1502_v7 = vrot.slane %v1500_v62, 5  ;;  %v1560_v9 = vrot.slane %v17638_v54, 5  ;;  %v1562_v54 = vrot.slane %v1556_v55, 4 }
 0x393   : > { %8458 = vmatpush2.bf16.msra.mxu1 %v15441_v47  ;;  %8406 = vmatprep.subr.bf16.mxu0 %v15446_v60  ;;  %v15462_v47 = vld [vmem:[%s16689_s17 + $0xe90] ss:$8 sps:$4 sm:$0xff]   ;;  %v1487_v60 = vor.u32 %v1486_v22, %v1483_v41  ;;  %v15482_v41 = vld [vmem:[%s16689_s17 + $0x1064] ss:$8 sps:$4 sm:$0xff]   ;;  %v12998_v62 = vrot.slane %v1531_v20, 9 }
 0x394   : > { %8459 = vmatprep.subr.bf16.mxu1 %v15449_v5  ;;  %v1507_v5 = vor.u32 %v1506_v33, %v1492_v35  ;;  %v1535_v22 = vld [vmem:[#allocation3 + $0x38] sm:$0x11] }
 0x395   : > { %v1488_v44 = vrot.slane %v1487_v60, 4  ;;  %v1566_v60 = vrot.slane %v1535_v22, 5 }
 0x396   : > { %8407 = vmatpush2.bf16.msra.mxu0 %v15444_v51  ;;  %v15465_v51 = vld [vmem:[%s16689_s17 + $0xf90] ss:$8 sps:$4 sm:$0xff]   ;;  %v1508_v2 = vrot.slane %v1507_v5, 4 }
 0x397   : > { %8460 = vmatpush2.bf16.msra.mxu1 %v15447_v3  ;;  %8408 = vmatprep.subr.bf16.mxu0 %v15452_v17  ;;  %v15473_v3 = vld [vmem:[%s16689_s17 + $0xf84] ss:$8 sps:$4 sm:$0xff]   ;;  %v15468_v17 = vld [vmem:[%s16689_s17 + $0xe80] ss:$8 sps:$4 sm:$0xff]  }
 0x398   : > { %8461 = vmatprep.subr.bf16.mxu1 %v15455_v45  ;;  %v1498_v45 = vrot.slane %v1497_v32, 4  ;;  %v15488_v32 = vld [vmem:[%s16689_s17 + $0x1054] ss:$8 sps:$4 sm:$0xff]  }
 0x39a   : > { %8409 = vmatpush2.bf16.msra.mxu0 %v15450_v29  ;;  %v1474_v29 = vrot.slane %v1473_v31, 4 }
 0x39b   : > { %8462 = vmatpush2.bf16.msra.mxu1 %v15453_v13  ;;  %8410 = vmatprep.subr.bf16.mxu0 %v15458_v57  ;;  %v13037_v13 = vcombine.low %v17692_v30, %v17696_v52  ;;  %v15477_v57 = vld [vmem:[%s16689_s17 + $0x1170] ss:$8 sps:$4 sm:$0xff]   ;;  %v17817_v30 = vsel %vm17671_vm9, %v1488_v44, %v1492_v35  ;;  %v17821_v52 = vsel %vm17671_vm9, %v1508_v2, %v1512_v40  ;;  %v15494_v44 = vld [vmem:[%s16689_s17 + $0x1044] ss:$8 sps:$4 sm:$0xff]  }
 0x39c   : > { %8463 = vmatprep.subr.bf16.mxu1 %v15461_v43  ;;  %v17806_v43 = vsel %vm17671_vm9, %v1474_v29, %v1478_v21  ;;  %v1534_v21 = vld [vmem:[#allocation3 + $0x30] sm:$0x11]  ;;  %v15486_v29 = vld [vmem:[%s16689_s17 + $0x1050] ss:$8 sps:$4 sm:$0xff]  }
 0x39d   : > { %v1563_v39 = vrot.slane %v1534_v21, 5 }
 0x39e   : > { %8411 = vmatpush2.bf16.msra.mxu0 %v15456_v15  ;;  %v17810_v15 = vsel %vm17671_vm9, %v1498_v45, %v1502_v7  ;;  %v15489_v45 = vld [vmem:[%s16689_s17 + $0x1150] ss:$8 sps:$4 sm:$0xff]   ;;  %v13091_v7 = vcombine.low %v17817_v30, %v17821_v52 }
 0x39f   : > { %8464 = vmatpush2.bf16.msra.mxu1 %v15459_v25  ;;  %8412 = vmatprep.subr.bf16.mxu0 %v15464_v6  ;;  %v13090_v35 = vcombine.high %v17806_v43, %v17810_v15  ;;  %v13092_v25 = vcombine.high %v17817_v30, %v17821_v52  ;;  %v12997_v6 = vrot.slane %v1530_v63, 9  ;;  %v15495_v30 = vld [vmem:[%s16689_s17 + $0x1140] ss:$8 sps:$4 sm:$0xff]   ;;  %v15500_v52 = vld [vmem:[%s16689_s17 + $0x1034] ss:$8 sps:$4 sm:$0xff]  }
 0x3a0   : > { %8465 = vmatprep.subr.bf16.mxu1 %v15467_v10 }
 0x3a1   : > { %v17847_v2 = vsel %vm16792_vm5, %v12997_v6, %v1556_v55 }
 0x3a2   : > { %8413 = vmatpush2.bf16.msra.mxu0 %v15462_v47  ;;  %v1565_v47 = vrot.slane %v1560_v9, 4 }
 0x3a3   : > { %8466 = vmatpush2.bf16.msra.mxu1 %v15465_v51  ;;  %8414 = vmatprep.subr.bf16.mxu0 %v15470_v11 }
 0x3a4   : > { %8467 = vmatprep.subr.bf16.mxu1 %v15473_v3 }
 0x3a6   : > { %8415 = vmatpush2.bf16.msra.mxu0 %v15468_v17  ;;  %v13089_v17 = vcombine.low %v17806_v43, %v17810_v15  ;;  %v15497_v15 = vld [vmem:[%s16689_s17 + $0x1144] ss:$8 sps:$4 sm:$0xff]  }
 0x3a7   : > { %8468 = vmatpush2.bf16.msra.mxu1 %v15471_v8  ;;  %8490 = vmatprep.subr.bf16.mxu0 %v15476_v38 }
 0x3a8   : > { %8543 = vmatprep.subr.bf16.mxu1 %v15479_v12  ;;  %v17862_v12 = vsel %vm16792_vm5, %v1565_v47, %v1566_v60  ;;  %v15507_v60 = vld [vmem:[%s16689_s17 + $0x1120] ss:$8 sps:$4 sm:$0xff]  }
 0x3a9   : > { %v8100_v33 = vpop.f32.mrf.mxu0  ;;  %8417 = vmatmul.mubr.bf16.vlgmr.msra.gmra.mxu0 %v13037_v13 }
 0x3aa   : > { %v8101_v10 = vadd.f32 %v8100_v33, %v17678_v53  ;;  %v8153_v31 = vpop.f32.mrf.mxu1  ;;  %8470 = vmatmul.mubr.bf16.vlgmr.msra.gmra.mxu1 %v13039_v34  ;;  %8491 = vmatpush1.bf16.msra.mxu0 %v15474_v23  ;;  %v15491_v53 = vld [vmem:[%s16689_s17 + $0x1154] ss:$8 sps:$4 sm:$0xff]   ;;  %v17858_v23 = vsel %vm16792_vm5, %v12998_v62, %v1560_v9  ;;  %v15492_v34 = vld [vmem:[%s16689_s17 + $0x1040] ss:$8 sps:$4 sm:$0xff]  }
 0x3ab   : > { %8544 = vmatpush1.bf16.msra.mxu1 %v15477_v57  ;;  %v8102_v5 = vpop.f32.mrf.mxu0  ;;  %8492 = vmatprep.subr.bf16.mxu0 %v15482_v41  ;;  %v13044_v21 = vcombine.high %v17858_v23, %v17862_v12  ;;  %v15504_v62 = vld [vmem:[%s16689_s17 + $0x1020] ss:$8 sps:$4 sm:$0xff]  }
 0x3ac   : > { %v17834_v50 = vadd.f32 %v8153_v31, %v8101_v10  ;;  %v8103_v51 = vadd.f32 %v8102_v5, %v17698_v37  ;;  %v8155_v11 = vpop.f32.mrf.mxu1  ;;  %8545 = vmatprep.subr.bf16.mxu1 %v15485_v56  ;;  %8426 = vmatprep.mubr.bf16.mxu0 %v13090_v35  ;;  %v17851_v37 = vsel %vm16792_vm5, %v1562_v54, %v1563_v39  ;;  %v15503_v35 = vld [vmem:[%s16689_s17 + $0x1134] ss:$8 sps:$4 sm:$0xff]  }
 0x3ad   : > { %v8104_v3 = vpop.f32.mrf.mxu0  ;;  %8479 = vmatprep.mubr.bf16.mxu1 %v13092_v25  ;;  %v13042_v63 = vcombine.high %v17847_v2, %v17851_v37  ;;  %v15512_v5 = vld [vmem:[%s16689_s17 + $0x1014] ss:$8 sps:$4 sm:$0xff]  }
 0x3ae   : > { %v17853_v40 = vadd.f32 %v8155_v11, %v8103_v51  ;;  %v8105_v8 = vadd.f32 %v8104_v3, %v17712_v24  ;;  %v8157_v38 = vpop.f32.mrf.mxu1  ;;  %8493 = vmatpush1.bf16.msra.mxu0 %v15480_v58  ;;  %v15515_v51 = vld [vmem:[%s16689_s17 + $0x1114] ss:$8 sps:$4 sm:$0xff]   ;;  %v15513_v11 = vld [vmem:[%s16689_s17 + $0x1110] ss:$8 sps:$4 sm:$0xff]   ;;  %v15516_v3 = vld [vmem:[%s16689_s17 + $0x1000] ss:$8 sps:$4 sm:$0xff]  }
 0x3af   : > { %8546 = vmatpush1.bf16.msra.mxu1 %v15483_v1  ;;  %v8106_v13 = vpop.f32.mrf.mxu0  ;;  %8494 = vmatprep.subr.bf16.mxu0 %v15488_v32  ;;  %v15498_v1 = vld [vmem:[%s16689_s17 + $0x1030] ss:$8 sps:$4 sm:$0xff]  }
 0x3b0   : > { %v17864_v57 = vadd.f32 %v8157_v38, %v8105_v8  ;;  %v8107_v24 = vadd.f32 %v8106_v13, %v17726_v18  ;;  %v8159_v43 = vpop.f32.mrf.mxu1  ;;  %8547 = vmatprep.subr.bf16.mxu1 %v15491_v53  ;;  %v15518_v53 = vld [vmem:[%s16689_s17 + $0x1004] ss:$8 sps:$4 sm:$0xff]   ;;  %v15525_v8 = vld [vmem:[%s16689_s17 + $0x11f0] ss:$8 sps:$4 sm:$0xff]   ;;  %v15528_v13 = vld [vmem:[%s16689_s17 + $0x10e0] ss:$8 sps:$4 sm:$0xff]  }
 0x3b1   : > { %v8110_v55 = vpop.f32.mrf.mxu0  ;;  %8427 = vmatmul.mubr.bf16.gmra.mxu0 %v13089_v17  ;;  %v15521_v17 = vld [vmem:[%s16689_s17 + $0x1104] ss:$8 sps:$4 sm:$0xff]  }
 0x3b2   : > { %v17875_v9 = vadd.f32 %v8159_v43, %v8107_v24  ;;  %v8111_v18 = vadd.f32 %v8110_v55, %v17733_v42  ;;  %8495 = vmatpush1.bf16.msra.mxu0 %v15486_v29  ;;  %v8163_v41 = vpop.f32.mrf.mxu1  ;;  %8480 = vmatmul.mubr.bf16.gmra.mxu1 %v13091_v7  ;;  %v15501_v42 = vld [vmem:[%s16689_s17 + $0x1130] ss:$8 sps:$4 sm:$0xff]   ;;  %v15519_v29 = vld [vmem:[%s16689_s17 + $0x1100] ss:$8 sps:$4 sm:$0xff]   ;;  %v15530_v38 = vld [vmem:[%s16689_s17 + $0x10e4] ss:$8 sps:$4 sm:$0xff]  }
 0x3b3   : > { %8548 = vmatpush1.bf16.msra.mxu1 %v15489_v45  ;;  %v8112_v20 = vpop.f32.mrf.mxu0  ;;  %8496 = vmatprep.subr.bf16.mxu0 %v15494_v44  ;;  %v15524_v45 = vld [vmem:[%s16689_s17 + $0x10f4] ss:$8 sps:$4 sm:$0xff]   ;;  %v15522_v7 = vld [vmem:[%s16689_s17 + $0x10f0] ss:$8 sps:$4 sm:$0xff]   ;;  %v15533_v24 = vld [vmem:[%s16689_s17 + $0x11e4] ss:$8 sps:$4 sm:$0xff]  }
 0x3b4   : > { %v8113_v22 = vadd.f32 %v8112_v20, %v17740_v0  ;;  %v17879_v58 = vadd.f32 %v8163_v41, %v8111_v18  ;;  %v8165_v56 = vpop.f32.mrf.mxu1  ;;  %8549 = vmatprep.subr.bf16.mxu1 %v15497_v15  ;;  %8522 = vmatprep.mubr.bf16.mxu0 %v13042_v63  ;;  %v15506_v0 = vld [vmem:[%s16689_s17 + $0x1024] ss:$8 sps:$4 sm:$0xff]   ;;  %v15527_v44 = vld [vmem:[%s16689_s17 + $0x11f4] ss:$8 sps:$4 sm:$0xff]   ;;  %v15531_v43 = vld [vmem:[%s16689_s17 + $0x11e0] ss:$8 sps:$4 sm:$0xff]  }
 0x3b5   : > { %v8114_v33 = vpop.f32.mrf.mxu0  ;;  %8575 = vmatprep.mubr.bf16.mxu1 %v13044_v21  ;;  %v15536_v15 = vld [vmem:[%s16689_s17 + $0x10d4] ss:$8 sps:$4 sm:$0xff]   ;;  %v15534_v63 = vld [vmem:[%s16689_s17 + $0x10d0] ss:$8 sps:$4 sm:$0xff]   ;;  %v15545_v21 = vld [vmem:[%s16689_s17 + $0x11c4] ss:$8 sps:$4 sm:$0xff]  }
 0x3b6   : > { %v8115_v25 = vadd.f32 %v8114_v33, %v17743_v19  ;;  %v17885_v6 = vadd.f32 %v8165_v56, %v8113_v22  ;;  %8497 = vmatpush1.bf16.msra.mxu0 %v15492_v34  ;;  %v8167_v54 = vpop.f32.mrf.mxu1  ;;  %v15509_v19 = vld [vmem:[%s16689_s17 + $0x1124] ss:$8 sps:$4 sm:$0xff]   ;;  %v15539_v55 = vld [vmem:[%s16689_s17 + $0x11d4] ss:$8 sps:$4 sm:$0xff]   ;;  %v15537_v34 = vld [vmem:[%s16689_s17 + $0x11d0] ss:$8 sps:$4 sm:$0xff]  }
 0x3b7   : > { %8550 = vmatpush1.bf16.msra.mxu1 %v15495_v30  ;;  %v8116_v39 = vpop.f32.mrf.mxu0  ;;  %8498 = vmatprep.subr.bf16.mxu0 %v15500_v52  ;;  %v15542_v30 = vld [vmem:[%s16689_s17 + $0x10c4] ss:$8 sps:$4 sm:$0xff]   ;;  %v15540_v52 = vld [vmem:[%s16689_s17 + $0x10c0] ss:$8 sps:$4 sm:$0xff]   ;;  %v15548_v41 = vld [vmem:[%s16689_s17 + $0x10b4] ss:$8 sps:$4 sm:$0xff]  }
 0x3b8   : > { %v8117_v10 = vadd.f32 %v8116_v39, %v17747_v14  ;;  %v17889_v31 = vadd.f32 %v8167_v54, %v8115_v25  ;;  %v8169_v32 = vpop.f32.mrf.mxu1  ;;  %8551 = vmatprep.subr.bf16.mxu1 %v15503_v35  ;;  %v15510_v14 = vld [vmem:[%s16689_s17 + $0x1010] ss:$8 sps:$4 sm:$0xff]   ;;  %v15543_v18 = vld [vmem:[%s16689_s17 + $0x11c0] ss:$8 sps:$4 sm:$0xff]   ;;  %v15551_v22 = vld [vmem:[%s16689_s17 + $0x11b4] ss:$8 sps:$4 sm:$0xff]  }
 0x3b9   : > { %v15546_v20 = vld [vmem:[%s16689_s17 + $0x10b0] ss:$8 sps:$4 sm:$0xff]   ;;  %v15554_v35 = vld [vmem:[%s16689_s17 + $0x10a4] ss:$8 sps:$4 sm:$0xff]   ;;  %v15552_v25 = vld [vmem:[%s16689_s17 + $0x10a0] ss:$8 sps:$4 sm:$0xff]  }
 0x3ba   : > { %v17893_v47 = vadd.f32 %v8169_v32, %v8117_v10  ;;  %8499 = vmatpush1.bf16.msra.mxu0 %v15498_v1  ;;  %v15549_v56 = vld [vmem:[%s16689_s17 + $0x11b0] ss:$8 sps:$4 sm:$0xff]   ;;  %v15557_v33 = vld [vmem:[%s16689_s17 + $0x11a4] ss:$8 sps:$4 sm:$0xff]   ;;  %v15555_v39 = vld [vmem:[%s16689_s17 + $0x11a0] ss:$8 sps:$4 sm:$0xff]  }
 0x3bb   : > { %8552 = vmatpush1.bf16.msra.mxu1 %v15501_v42  ;;  %8500 = vmatprep.subr.bf16.mxu0 %v15506_v0  ;;  %v1598_v1 = vld [vmem:[#allocation3 + $0x10] sm:$0xee]  ;;  %v17926_v42 = vld [vmem:[#allocation3 + $0x20] sm:$0xff]  ;;  %v1599_v0 = vld [vmem:[#allocation3 + $0x18] sm:$0xee] }
 0x3bc   : > { %8553 = vmatprep.subr.bf16.mxu1 %v15509_v19  ;;  %v17929_v54 = vld [vmem:[#allocation3 + $0x50] sm:$0xee]  ;;  %v1540_v19 = vld [vmem:[#allocation3 + $0x70] sm:$0x11] }
 0x3bd   : > { %v15560_v10 = vld [vmem:[%s16689_s17 + $0x1094] ss:$8 sps:$4 sm:$0xff]  }
 0x3be   : > { %8501 = vmatpush1.bf16.msra.mxu0 %v15504_v62  ;;  %v15563_v32 = vld [vmem:[%s16689_s17 + $0x1194] ss:$8 sps:$4 sm:$0xff]   ;;  %v1570_v62 = vrot.slane %v17773_v28, 5  ;;  %v15566_v28 = vld [vmem:[%s16689_s17 + $0x1084] ss:$8 sps:$4 sm:$0xff]  }
 0x3bf   : > { %8554 = vmatpush1.bf16.msra.mxu1 %v15507_v60  ;;  %8502 = vmatprep.subr.bf16.mxu0 %v15512_v5  ;;  %v1537_v60 = vld [vmem:[#allocation3 + $0x58] sm:$0xee]  ;;  %v1541_v5 = vld [vmem:[#allocation3 + $0x78] sm:$0x11] }
 0x3c0   : > { %8555 = vmatprep.subr.bf16.mxu1 %v15515_v51  ;;  %v1611_v51 = vshrl.u32 %v1598_v1, 16 }
 0x3c2   : > { %8503 = vmatpush1.bf16.msra.mxu0 %v15510_v14  ;;  %v1574_v14 = vrot.slane %v17777_v61, 5  ;;  %v1576_v61 = vrot.slane %v1570_v62, 4 }
 0x3c3   : > { %8556 = vmatpush1.bf16.msra.mxu1 %v15513_v11  ;;  %8504 = vmatprep.subr.bf16.mxu0 %v15518_v53  ;;  %v1614_v11 = vshll.u32 %v1598_v1, 16  ;;  %v17936_v53 = vld [vmem:[#allocation3 + $0x28] sm:$0xff] }
 0x3c4   : > { %8557 = vmatprep.subr.bf16.mxu1 %v15521_v17  ;;  %v1602_v17 = vld [vmem:[#allocation3 + $0x30] sm:$0x33] }
 0x3c6   : > { %8505 = vmatpush1.bf16.msra.mxu0 %v15516_v3  ;;  %v15558_v3 = vld [vmem:[%s16689_s17 + $0x1090] ss:$8 sps:$4 sm:$0xff]  }
 0x3c7   : > { %8558 = vmatpush1.bf16.msra.mxu1 %v15519_v29  ;;  %8506 = vmatprep.subr.bf16.mxu0 %v15524_v45  ;;  %v1620_v29 = vshrl.u32 %v17926_v42, 16  ;;  %v1623_v45 = vshll.u32 %v17926_v42, 16 }
 0x3c8   : > { %8559 = vmatprep.subr.bf16.mxu1 %v15527_v44  ;;  %v12999_v44 = vrot.slane %v17929_v54, 9 }
 0x3ca   : > { %8507 = vmatpush2.bf16.msra.mxu0 %v15522_v7  ;;  %v15561_v7 = vld [vmem:[%s16689_s17 + $0x1190] ss:$8 sps:$4 sm:$0xff]  }
 0x3cb   : > { %8560 = vmatpush2.bf16.msra.mxu1 %v15525_v8  ;;  %8508 = vmatprep.subr.bf16.mxu0 %v15530_v38  ;;  %v1629_v8 = vshrl.u32 %v1599_v0, 16  ;;  %v1632_v38 = vshll.u32 %v1599_v0, 16 }
 0x3cc   : > { %8561 = vmatprep.subr.bf16.mxu1 %v15533_v24  ;;  %v1638_v24 = vshrl.u32 %v17936_v53, 16 }
 0x3ce   : > { %8509 = vmatpush2.bf16.msra.mxu0 %v15528_v13  ;;  %v15569_v13 = vld [vmem:[%s16689_s17 + $0x1184] ss:$8 sps:$4 sm:$0xff]   ;;  %v1640_v1 = vrot.slane %v1638_v24, 5 }
 0x3cf   : > { %8562 = vmatpush2.bf16.msra.mxu1 %v15531_v43  ;;  %8510 = vmatprep.subr.bf16.mxu0 %v15536_v15  ;;  %v1641_v43 = vshll.u32 %v17936_v53, 16  ;;  %v1577_v15 = vrot.slane %v1540_v19, 5  ;;  %v15572_v19 = vld [vmem:[%s16689_s17 + $0x1274] ss:$8 sps:$4 sm:$0xff]  }
 0x3d0   : > { %8563 = vmatprep.subr.bf16.mxu1 %v15539_v55  ;;  %v1579_v55 = vrot.slane %v1574_v14, 4 }
 0x3d2   : > { %8511 = vmatpush2.bf16.msra.mxu0 %v15534_v63  ;;  %v13000_v63 = vrot.slane %v1537_v60, 9  ;;  %v15575_v60 = vld [vmem:[%s16689_s17 + $0x1374] ss:$8 sps:$4 sm:$0xff]  }
 0x3d3   : > { %8564 = vmatpush2.bf16.msra.mxu1 %v15537_v34  ;;  %8512 = vmatprep.subr.bf16.mxu0 %v15542_v30  ;;  %v1580_v34 = vrot.slane %v1541_v5, 5  ;;  %v1603_v30 = vld [vmem:[#allocation3 + $0x38] sm:$0x33]  ;;  %v17957_v5 = vsel %vm16792_vm5, %v12999_v44, %v1570_v62 }
 0x3d4   : > { %8565 = vmatprep.subr.bf16.mxu1 %v15545_v21  ;;  %v1616_v21 = vrot.slane %v1614_v11, 6  ;;  %v1658_v54 = vshrl.u32 %v1603_v30, 16  ;;  %v1661_v0 = vshll.u32 %v1603_v30, 16  ;;  %v17965_v11 = vsel %vm16792_vm5, %v13000_v63, %v1574_v14  ;;  %v15573_v14 = vld [vmem:[%s16689_s17 + $0x1370] ss:$8 sps:$4 sm:$0xff]  }
 0x3d5   : > { %v15576_v63 = vld [vmem:[%s16689_s17 + $0x1260] ss:$8 sps:$4 sm:$0xff]  }
 0x3d6   : > { %8513 = vmatpush2.bf16.msra.mxu0 %v15540_v52  ;;  %v1613_v52 = vrot.slane %v1611_v51, 5  ;;  %v17961_v51 = vsel %vm16792_vm5, %v1576_v61, %v1577_v15 }
 0x3d7   : > { %8566 = vmatpush2.bf16.msra.mxu1 %v15543_v18  ;;  %8514 = vmatprep.subr.bf16.mxu0 %v15548_v41  ;;  %v1622_v18 = vrot.slane %v1620_v29, 5  ;;  %v1625_v41 = vrot.slane %v1623_v45, 6  ;;  %v1660_v45 = vrot.slane %v1658_v54, 5  ;;  %v13094_v44 = vcombine.high %v17957_v5, %v17961_v51 }
 0x3d8   : > { %8567 = vmatprep.subr.bf16.mxu1 %v15551_v22  ;;  %v1651_v22 = vshll.u32 %v1602_v17, 16 }
 0x3da   : > { %8515 = vmatpush2.bf16.msra.mxu0 %v15546_v20  ;;  %v1648_v20 = vshrl.u32 %v1602_v17, 16  ;;  %v1653_v62 = vrot.slane %v1651_v22, 6 }
 0x3db   : > { %8568 = vmatpush2.bf16.msra.mxu1 %v15549_v56  ;;  %8516 = vmatprep.subr.bf16.mxu0 %v15554_v35  ;;  %v1631_v56 = vrot.slane %v1629_v8, 5  ;;  %v1634_v35 = vrot.slane %v1632_v38, 6 }
 0x3dc   : > { %8569 = vmatprep.subr.bf16.mxu1 %v15557_v33  ;;  %v15564_v33 = vld [vmem:[%s16689_s17 + $0x1080] ss:$8 sps:$4 sm:$0xff]  }
 0x3dd   : > { %v1635_v17 = vor.u32 %v1634_v35, %v1631_v56  ;;  %v13093_v35 = vcombine.low %v17957_v5, %v17961_v51  ;;  %v15590_v5 = vld [vmem:[%s16689_s17 + $0x1244] ss:$8 sps:$4 sm:$0xff]  }
 0x3de   : > { %8517 = vmatpush2.bf16.msra.mxu0 %v15552_v25  ;;  %v1643_v25 = vrot.slane %v1641_v43, 6 }
 0x3df   : > { %8570 = vmatpush2.bf16.msra.mxu1 %v15555_v39  ;;  %8518 = vmatprep.subr.bf16.mxu0 %v15560_v10  ;;  %v15567_v39 = vld [vmem:[%s16689_s17 + $0x1180] ss:$8 sps:$4 sm:$0xff]   ;;  %v13041_v10 = vcombine.low %v17847_v2, %v17851_v37  ;;  %v17969_v2 = vsel %vm16792_vm5, %v1579_v55, %v1580_v34  ;;  %v1617_v37 = vor.u32 %v1616_v21, %v1613_v52  ;;  %v1636_v55 = vrot.slane %v1635_v17, 4 }
 0x3e0   : > { %8571 = vmatprep.subr.bf16.mxu1 %v15563_v32  ;;  %v13043_v32 = vcombine.low %v17858_v23, %v17862_v12  ;;  %v1626_v23 = vor.u32 %v1625_v41, %v1622_v18  ;;  %v1650_v12 = vrot.slane %v1648_v20, 5  ;;  %v1644_v29 = vor.u32 %v1643_v25, %v1640_v1  ;;  %v15579_v21 = vld [vmem:[%s16689_s17 + $0x1360] ss:$8 sps:$4 sm:$0xff]   ;;  %v15584_v18 = vld [vmem:[%s16689_s17 + $0x1254] ss:$8 sps:$4 sm:$0xff]  }
 0x3e1   : > { %v13096_v38 = vcombine.high %v17965_v11, %v17969_v2  ;;  %v15588_v17 = vld [vmem:[%s16689_s17 + $0x1240] ss:$8 sps:$4 sm:$0xff]  }
 0x3e2   : > { %8519 = vmatpush2.bf16.msra.mxu0 %v15558_v3  ;;  %v15570_v3 = vld [vmem:[%s16689_s17 + $0x1270] ss:$8 sps:$4 sm:$0xff]   ;;  %v1646_v61 = vrot.slane %v1626_v23, 4  ;;  %v1654_v24 = vor.u32 %v1653_v62, %v1650_v12  ;;  %v1656_v34 = vrot.slane %v1644_v29, 4 }
 0x3e3   : > { %8572 = vmatpush2.bf16.msra.mxu1 %v15561_v7  ;;  %8520 = vmatprep.subr.bf16.mxu0 %v15566_v28  ;;  %v1663_v7 = vrot.slane %v1661_v0, 6  ;;  %v15578_v28 = vld [vmem:[%s16689_s17 + $0x1264] ss:$8 sps:$4 sm:$0xff]  }
 0x3e4   : > { %8573 = vmatprep.subr.bf16.mxu1 %v15569_v13  ;;  %v1618_v13 = vrot.slane %v1617_v37, 4 }
 0x3e5   : > { %v1664_v30 = vor.u32 %v1663_v7, %v1660_v45  ;;  %v15591_v45 = vld [vmem:[%s16689_s17 + $0x1340] ss:$8 sps:$4 sm:$0xff]   ;;  %v15596_v7 = vld [vmem:[%s16689_s17 + $0x1234] ss:$8 sps:$4 sm:$0xff]  }
 0x3e6   : > { %8521 = vmatpush2.bf16.msra.mxu0 %v15564_v33  ;;  %v13095_v33 = vcombine.low %v17965_v11, %v17969_v2  ;;  %v17993_v1 = vsel %vm16875_vm8, %v1618_v13, %v1626_v23  ;;  %v15593_v2 = vld [vmem:[%s16689_s17 + $0x1344] ss:$8 sps:$4 sm:$0xff]  }
 0x3e7   : > { %8574 = vmatpush2.bf16.msra.mxu1 %v15567_v39  ;;  %8596 = vmatprep.subr.bf16.mxu0 %v15572_v19  ;;  %v15582_v39 = vld [vmem:[%s16689_s17 + $0x1250] ss:$8 sps:$4 sm:$0xff]  }
 0x3e8   : > { %8649 = vmatprep.subr.bf16.mxu1 %v15575_v60  ;;  %v15585_v60 = vld [vmem:[%s16689_s17 + $0x1350] ss:$8 sps:$4 sm:$0xff]  }
 0x3e9   : > { %v8206_v8 = vpop.f32.mrf.mxu0  ;;  %8523 = vmatmul.mubr.bf16.vlgmr.msra.gmra.mxu0 %v13041_v10  ;;  %v18005_v10 = vsel %vm16875_vm8, %v1636_v55, %v1644_v29  ;;  %v15605_v55 = vld [vmem:[%s16689_s17 + $0x1324] ss:$8 sps:$4 sm:$0xff]  }
 0x3ea   : > { %v8207_v43 = vadd.f32 %v8206_v8, %v17834_v50  ;;  %v8259_v15 = vpop.f32.mrf.mxu1  ;;  %8576 = vmatmul.mubr.bf16.vlgmr.msra.gmra.mxu1 %v13043_v32  ;;  %8597 = vmatpush1.bf16.msra.mxu0 %v15570_v3  ;;  %v15587_v50 = vld [vmem:[%s16689_s17 + $0x1354] ss:$8 sps:$4 sm:$0xff]   ;;  %v18009_v32 = vsel %vm16875_vm8, %v1656_v34, %v1664_v30  ;;  %v15600_v30 = vld [vmem:[%s16689_s17 + $0x1220] ss:$8 sps:$4 sm:$0xff]  }
 0x3eb   : > { %8650 = vmatpush1.bf16.msra.mxu1 %v15573_v14  ;;  %v8208_v52 = vpop.f32.mrf.mxu0  ;;  %8598 = vmatprep.subr.bf16.mxu0 %v15578_v28  ;;  %v13048_v12 = vcombine.high %v18005_v10, %v18009_v32 }
 0x3ec   : > { %v17983_v41 = vadd.f32 %v8259_v15, %v8207_v43  ;;  %v8209_v20 = vadd.f32 %v8208_v52, %v17853_v40  ;;  %v8261_v22 = vpop.f32.mrf.mxu1  ;;  %8651 = vmatprep.subr.bf16.mxu1 %v15581_v49  ;;  %8532 = vmatprep.mubr.bf16.mxu0 %v13094_v44  ;;  %v17997_v40 = vsel %vm16875_vm8, %v1646_v61, %v1654_v24  ;;  %v15599_v44 = vld [vmem:[%s16689_s17 + $0x1334] ss:$8 sps:$4 sm:$0xff]   ;;  %v15594_v61 = vld [vmem:[%s16689_s17 + $0x1230] ss:$8 sps:$4 sm:$0xff]   ;;  %v15602_v43 = vld [vmem:[%s16689_s17 + $0x1224] ss:$8 sps:$4 sm:$0xff]  }
 0x3ed   : > { %v8210_v56 = vpop.f32.mrf.mxu0  ;;  %8585 = vmatprep.mubr.bf16.mxu1 %v13096_v38  ;;  %v13046_v37 = vcombine.high %v17993_v1, %v17997_v40  ;;  %v15597_v24 = vld [vmem:[%s16689_s17 + $0x1330] ss:$8 sps:$4 sm:$0xff]   ;;  %v15603_v52 = vld [vmem:[%s16689_s17 + $0x1320] ss:$8 sps:$4 sm:$0xff]  }
 0x3ee   : > { %v17999_v25 = vadd.f32 %v8261_v22, %v8209_v20  ;;  %v8211_v54 = vadd.f32 %v8210_v56, %v17864_v57  ;;  %v8263_v0 = vpop.f32.mrf.mxu1  ;;  %8599 = vmatpush1.bf16.msra.mxu0 %v15576_v63  ;;  %v15609_v20 = vld [vmem:[%s16689_s17 + $0x1310] ss:$8 sps:$4 sm:$0xff]   ;;  %v15614_v22 = vld [vmem:[%s16689_s17 + $0x1204] ss:$8 sps:$4 sm:$0xff]   ;;  %v15612_v56 = vld [vmem:[%s16689_s17 + $0x1200] ss:$8 sps:$4 sm:$0xff]  }
 0x3ef   : > { %8652 = vmatpush1.bf16.msra.mxu1 %v15579_v21  ;;  %v8212_v19 = vpop.f32.mrf.mxu0  ;;  %8600 = vmatprep.subr.bf16.mxu0 %v15584_v18  ;;  %v15608_v21 = vld [vmem:[%s16689_s17 + $0x1214] ss:$8 sps:$4 sm:$0xff]   ;;  %v15606_v18 = vld [vmem:[%s16689_s17 + $0x1210] ss:$8 sps:$4 sm:$0xff]  }
 0x3f0   : > { %v18013_v51 = vadd.f32 %v8263_v0, %v8211_v54  ;;  %v8213_v57 = vadd.f32 %v8212_v19, %v17875_v9  ;;  %v8265_v11 = vpop.f32.mrf.mxu1  ;;  %8653 = vmatprep.subr.bf16.mxu1 %v15587_v50  ;;  %v15617_v50 = vld [vmem:[%s16689_s17 + $0x1304] ss:$8 sps:$4 sm:$0xff]   ;;  %v15623_v54 = vld [vmem:[%s16689_s17 + $0x13f4] ss:$8 sps:$4 sm:$0xff]   ;;  %v15618_v0 = vld [vmem:[%s16689_s17 + $0x12f0] ss:$8 sps:$4 sm:$0xff]  }
 0x3f1   : > { %v8216_v23 = vpop.f32.mrf.mxu0  ;;  %8533 = vmatmul.mubr.bf16.gmra.mxu0 %v13093_v35  ;;  %v15615_v35 = vld [vmem:[%s16689_s17 + $0x1300] ss:$8 sps:$4 sm:$0xff]   ;;  %v15626_v19 = vld [vmem:[%s16689_s17 + $0x12e4] ss:$8 sps:$4 sm:$0xff]  }
 0x3f2   : > { %v18021_v62 = vadd.f32 %v8265_v11, %v8213_v57  ;;  %v8217_v3 = vadd.f32 %v8216_v23, %v17879_v58  ;;  %8601 = vmatpush1.bf16.msra.mxu0 %v15582_v39  ;;  %v8269_v9 = vpop.f32.mrf.mxu1  ;;  %8586 = vmatmul.mubr.bf16.gmra.mxu1 %v13095_v33  ;;  %v15620_v33 = vld [vmem:[%s16689_s17 + $0x12f4] ss:$8 sps:$4 sm:$0xff]   ;;  %v15621_v39 = vld [vmem:[%s16689_s17 + $0x13f0] ss:$8 sps:$4 sm:$0xff]   ;;  %v15627_v57 = vld [vmem:[%s16689_s17 + $0x13e0] ss:$8 sps:$4 sm:$0xff]  }
 0x3f3   : > { %8654 = vmatpush1.bf16.msra.mxu1 %v15585_v60  ;;  %v8218_v29 = vpop.f32.mrf.mxu0  ;;  %8602 = vmatprep.subr.bf16.mxu0 %v15590_v5  ;;  %v15629_v60 = vld [vmem:[%s16689_s17 + $0x13e4] ss:$8 sps:$4 sm:$0xff]   ;;  %v15624_v5 = vld [vmem:[%s16689_s17 + $0x12e0] ss:$8 sps:$4 sm:$0xff]   ;;  %v15632_v11 = vld [vmem:[%s16689_s17 + $0x12d4] ss:$8 sps:$4 sm:$0xff]  }
 0x3f4   : > { %v8219_v14 = vadd.f32 %v8218_v29, %v17885_v6  ;;  %v18028_v28 = vadd.f32 %v8269_v9, %v8217_v3  ;;  %v8271_v49 = vpop.f32.mrf.mxu1  ;;  %8655 = vmatprep.subr.bf16.mxu1 %v15593_v2  ;;  %8628 = vmatprep.mubr.bf16.mxu0 %v13046_v37  ;;  %v15635_v2 = vld [vmem:[%s16689_s17 + $0x13d4] ss:$8 sps:$4 sm:$0xff]   ;;  %v15630_v37 = vld [vmem:[%s16689_s17 + $0x12d0] ss:$8 sps:$4 sm:$0xff]   ;;  %v15641_v3 = vld [vmem:[%s16689_s17 + $0x13c4] ss:$8 sps:$4 sm:$0xff]  }
 0x3f5   : > { %v8220_v58 = vpop.f32.mrf.mxu0  ;;  %8681 = vmatprep.mubr.bf16.mxu1 %v13048_v12  ;;  %v15633_v23 = vld [vmem:[%s16689_s17 + $0x13d0] ss:$8 sps:$4 sm:$0xff]   ;;  %v15638_v12 = vld [vmem:[%s16689_s17 + $0x12c4] ss:$8 sps:$4 sm:$0xff]   ;;  %v15636_v29 = vld [vmem:[%s16689_s17 + $0x12c0] ss:$8 sps:$4 sm:$0xff]  }
 0x3f6   : > { %v8221_v8 = vadd.f32 %v8220_v58, %v17889_v31  ;;  %v18032_v38 = vadd.f32 %v8271_v49, %v8219_v14  ;;  %8603 = vmatpush1.bf16.msra.mxu0 %v15588_v17  ;;  %v8273_v13 = vpop.f32.mrf.mxu1  ;;  %v1604_v9 = vld [vmem:[#allocation3 + $0x50] sm:$0xee]  ;;  %v18067_v17 = vld [vmem:[#allocation3 + $0x60] sm:$0xff]  ;;  %v18072_v49 = vld [vmem:[#allocation3 + $0x68] sm:$0xff] }
 0x3f7   : > { %8656 = vmatpush1.bf16.msra.mxu1 %v15591_v45  ;;  %v8222_v6 = vpop.f32.mrf.mxu0  ;;  %8604 = vmatprep.subr.bf16.mxu0 %v15596_v7  ;;  %v1605_v45 = vld [vmem:[#allocation3 + $0x58] sm:$0xee]  ;;  %v15644_v14 = vld [vmem:[%s16689_s17 + $0x12b4] ss:$8 sps:$4 sm:$0xff]   ;;  %v1667_v58 = vshrl.u32 %v1604_v9, 16 }
 0x3f8   : > { %v8223_v15 = vadd.f32 %v8222_v6, %v17893_v47  ;;  %v18038_v63 = vadd.f32 %v8273_v13, %v8221_v8  ;;  %v8275_v31 = vpop.f32.mrf.mxu1  ;;  %8657 = vmatprep.subr.bf16.mxu1 %v15599_v44  ;;  %v15611_v47 = vld [vmem:[%s16689_s17 + $0x1314] ss:$8 sps:$4 sm:$0xff]   ;;  %v15639_v7 = vld [vmem:[%s16689_s17 + $0x13c0] ss:$8 sps:$4 sm:$0xff]   ;;  %v1670_v8 = vshll.u32 %v1604_v9, 16  ;;  %v1676_v13 = vshrl.u32 %v18067_v17, 16 }
 0x3f9   : > { %v15647_v44 = vld [vmem:[%s16689_s17 + $0x13b4] ss:$8 sps:$4 sm:$0xff]   ;;  %v1679_v6 = vshll.u32 %v18067_v17, 16  ;;  %v15654_v9 = vld [vmem:[%s16689_s17 + $0x1290] ss:$8 sps:$4 sm:$0xff]  }
 0x3fa   : > { %v18041_v34 = vadd.f32 %v8275_v31, %v8223_v15  ;;  %8605 = vmatpush1.bf16.msra.mxu0 %v15594_v61  ;;  %v1608_v61 = vld [vmem:[#allocation3 + $0x70] sm:$0x33]  ;;  %v15642_v15 = vld [vmem:[%s16689_s17 + $0x12b0] ss:$8 sps:$4 sm:$0xff]   ;;  %v1694_v31 = vshrl.u32 %v18072_v49, 16 }
 0x3fb   : > { %8658 = vmatpush1.bf16.msra.mxu1 %v15597_v24  ;;  %8606 = vmatprep.subr.bf16.mxu0 %v15602_v43  ;;  %v1685_v24 = vshrl.u32 %v1605_v45, 16  ;;  %v1688_v43 = vshll.u32 %v1605_v45, 16 }
 0x3fc   : > { %8659 = vmatprep.subr.bf16.mxu1 %v15605_v55  ;;  %v1697_v55 = vshll.u32 %v18072_v49, 16 }
 0x3fe   : > { %8607 = vmatpush1.bf16.msra.mxu0 %v15600_v30  ;;  %v15645_v30 = vld [vmem:[%s16689_s17 + $0x13b0] ss:$8 sps:$4 sm:$0xff]  }
 0x3ff   : > { %8660 = vmatpush1.bf16.msra.mxu1 %v15603_v52  ;;  %8608 = vmatprep.subr.bf16.mxu0 %v15608_v21  ;;  %v15650_v52 = vld [vmem:[%s16689_s17 + $0x12a4] ss:$8 sps:$4 sm:$0xff]  }
 0x400   : > { %8661 = vmatprep.subr.bf16.mxu1 %v15611_v47  ;;  %v1609_v21 = vld [vmem:[#allocation3 + $0x78] sm:$0x33] }
 0x401   : > { %v15653_v47 = vld [vmem:[%s16689_s17 + $0x13a4] ss:$8 sps:$4 sm:$0xff]  }
 0x402   : > { %8609 = vmatpush1.bf16.msra.mxu0 %v15606_v18  ;;  %v1669_v18 = vrot.slane %v1667_v58, 5  ;;  %v15662_v58 = vld [vmem:[%s16689_s17 + $0x1284] ss:$8 sps:$4 sm:$0xff]  }
 0x403   : > { %8662 = vmatpush1.bf16.msra.mxu1 %v15609_v20  ;;  %8610 = vmatprep.subr.bf16.mxu0 %v15614_v22  ;;  %v1672_v20 = vrot.slane %v1670_v8, 6  ;;  %v1678_v22 = vrot.slane %v1676_v13, 5  ;;  %v15665_v8 = vld [vmem:[%s16689_s17 + $0x1384] ss:$8 sps:$4 sm:$0xff]  }
 0x404   : > { %8663 = vmatprep.subr.bf16.mxu1 %v15617_v50  ;;  %v1704_v50 = vshrl.u32 %v1608_v61, 16 }
 0x406   : > { %8611 = vmatpush1.bf16.msra.mxu0 %v15612_v56  ;;  %v1681_v56 = vrot.slane %v1679_v6, 6 }
 0x407   : > { %8664 = vmatpush1.bf16.msra.mxu1 %v15615_v35  ;;  %8612 = vmatprep.subr.bf16.mxu0 %v15620_v33  ;;  %v1707_v35 = vshll.u32 %v1608_v61, 16  ;;  %v1687_v33 = vrot.slane %v1685_v24, 5  ;;  %v15660_v24 = vld [vmem:[%s16689_s17 + $0x1280] ss:$8 sps:$4 sm:$0xff]  }
 0x408   : > { %8665 = vmatprep.subr.bf16.mxu1 %v15623_v54  ;;  %v1690_v54 = vrot.slane %v1688_v43, 6 }
 0x40a   : > { %8613 = vmatpush2.bf16.msra.mxu0 %v15618_v0  ;;  %v15648_v0 = vld [vmem:[%s16689_s17 + $0x12a0] ss:$8 sps:$4 sm:$0xff]  }
 0x40b   : > { %8666 = vmatpush2.bf16.msra.mxu1 %v15621_v39  ;;  %8614 = vmatprep.subr.bf16.mxu0 %v15626_v19  ;;  %v1696_v39 = vrot.slane %v1694_v31, 5  ;;  %v1699_v19 = vrot.slane %v1697_v55, 6  ;;  %v15663_v55 = vld [vmem:[%s16689_s17 + $0x1380] ss:$8 sps:$4 sm:$0xff]  }
 0x40c   : > { %8667 = vmatprep.subr.bf16.mxu1 %v15629_v60  ;;  %v1714_v60 = vshrl.u32 %v1609_v21, 16 }
 0x40d   : > { %v1700_v45 = vor.u32 %v1699_v19, %v1696_v39  ;;  %v1743_v39 = vld [vmem:[#allocation3 + $0x38] sm:$0x33] }
 0x40e   : > { %8615 = vmatpush2.bf16.msra.mxu0 %v15624_v5  ;;  %v1717_v5 = vshll.u32 %v1609_v21, 16  ;;  %v13045_v21 = vcombine.low %v17993_v1, %v17997_v40 }
 0x40f   : > { %8668 = vmatpush2.bf16.msra.mxu1 %v15627_v57  ;;  %8616 = vmatprep.subr.bf16.mxu0 %v15632_v11  ;;  %v15651_v57 = vld [vmem:[%s16689_s17 + $0x13a0] ss:$8 sps:$4 sm:$0xff]   ;;  %v15656_v11 = vld [vmem:[%s16689_s17 + $0x1294] ss:$8 sps:$4 sm:$0xff]  }
 0x410   : > { %8669 = vmatprep.subr.bf16.mxu1 %v15635_v2  ;;  %v15659_v2 = vld [vmem:[%s16689_s17 + $0x1394] ss:$8 sps:$4 sm:$0xff]  }
 0x412   : > { %8617 = vmatpush2.bf16.msra.mxu0 %v15630_v37  ;;  %v1673_v37 = vor.u32 %v1672_v20, %v1669_v18  ;;  %v15669_v18 = vld [vmem:[%s16689_s17 + $0x1570] ss:$8 sps:$4 sm:$0xff]  }
 0x413   : > { %8670 = vmatpush2.bf16.msra.mxu1 %v15633_v23  ;;  %8618 = vmatprep.subr.bf16.mxu0 %v15638_v12  ;;  %v1682_v23 = vor.u32 %v1681_v56, %v1678_v22  ;;  %v1706_v12 = vrot.slane %v1704_v50, 5  ;;  %v1764_v50 = vrot.slane %v17926_v42, 6  ;;  %v13047_v56 = vcombine.low %v18005_v10, %v18009_v32  ;;  %v1739_v42 = vld [vmem:[#allocation3 + $0x18] sm:$0xcc] }
 0x414   : > { %8671 = vmatprep.subr.bf16.mxu1 %v15641_v3  ;;  %v1709_v3 = vrot.slane %v1707_v35, 6  ;;  %v1674_v13 = vrot.slane %v1673_v37, 4  ;;  %v1738_v35 = vld [vmem:[#allocation3 + $0x10] sm:$0xcc]  ;;  %v13002_v37 = vrot.slane %v1739_v42, 10 }
 0x415   : > { %v1702_v61 = vrot.slane %v1682_v23, 4  ;;  %v15677_v10 = vld [vmem:[%s16689_s17 + $0x1564] ss:$8 sps:$4 sm:$0xff]  }
 0x416   : > { %8619 = vmatpush2.bf16.msra.mxu0 %v15636_v29  ;;  %v1691_v29 = vor.u32 %v1690_v54, %v1687_v33  ;;  %v1710_v6 = vor.u32 %v1709_v3, %v1706_v12  ;;  %v18101_v20 = vsel %vm16875_vm8, %v1674_v13, %v1682_v23  ;;  %v1742_v33 = vld [vmem:[#allocation3 + $0x30] sm:$0x33]  ;;  %v1768_v54 = vrot.slane %v17936_v53, 6 }
 0x417   : > { %8672 = vmatpush2.bf16.msra.mxu1 %v15639_v7  ;;  %8620 = vmatprep.subr.bf16.mxu0 %v15644_v14  ;;  %v1716_v7 = vrot.slane %v1714_v60, 5  ;;  %v1719_v14 = vrot.slane %v1717_v5, 6  ;;  %v13001_v60 = vrot.slane %v1738_v35, 10  ;;  %v1770_v53 = vrot.slane %v1764_v50, 4 }
 0x418   : > { %8673 = vmatprep.subr.bf16.mxu1 %v15647_v44  ;;  %v15657_v44 = vld [vmem:[%s16689_s17 + $0x1390] ss:$8 sps:$4 sm:$0xff]   ;;  %v1692_v43 = vrot.slane %v1691_v29, 4  ;;  %v18105_v22 = vsel %vm16875_vm8, %v1702_v61, %v1710_v6  ;;  %v1771_v5 = vrot.slane %v1742_v33, 6  ;;  %v1773_v23 = vrot.slane %v1768_v54, 4 }
 0x419   : > { %v1720_v31 = vor.u32 %v1719_v14, %v1716_v7  ;;  %v13098_v32 = vcombine.high %v18101_v20, %v18105_v22  ;;  %v1774_v12 = vrot.slane %v1743_v39, 6  ;;  %v15680_v29 = vld [vmem:[%s16689_s17 + $0x1454] ss:$8 sps:$4 sm:$0xff]   ;;  %v18139_v13 = vsel %vm16962_vm11, %v13001_v60, %v1764_v50  ;;  %v15687_v33 = vld [vmem:[%s16689_s17 + $0x1540] ss:$8 sps:$4 sm:$0xff]  }
 0x41a   : > { %8621 = vmatpush2.bf16.msra.mxu0 %v15642_v15  ;;  %v1712_v15 = vrot.slane %v1700_v45, 4  ;;  %v18112_v1 = vsel %vm16875_vm8, %v1692_v43, %v1700_v45  ;;  %v15678_v43 = vld [vmem:[%s16689_s17 + $0x1450] ss:$8 sps:$4 sm:$0xff]  }
 0x41b   : > { %8674 = vmatpush2.bf16.msra.mxu1 %v15645_v30  ;;  %8622 = vmatprep.subr.bf16.mxu0 %v15650_v52  ;;  %v15668_v30 = vld [vmem:[%s16689_s17 + $0x1474] ss:$8 sps:$4 sm:$0xff]   ;;  %v15690_v60 = vld [vmem:[%s16689_s17 + $0x1430] ss:$8 sps:$4 sm:$0xff]  }
 0x41c   : > { %8675 = vmatprep.subr.bf16.mxu1 %v15653_v47  ;;  %v15671_v52 = vld [vmem:[%s16689_s17 + $0x1574] ss:$8 sps:$4 sm:$0xff]   ;;  %v15666_v47 = vld [vmem:[%s16689_s17 + $0x1470] ss:$8 sps:$4 sm:$0xff]   ;;  %v18116_v40 = vsel %vm16875_vm8, %v1712_v15, %v1720_v31  ;;  %v18151_v15 = vsel %vm16962_vm11, %v13002_v37, %v1768_v54  ;;  %v18155_v31 = vsel %vm16962_vm11, %v1773_v23, %v1774_v12  ;;  %v15696_v23 = vld [vmem:[%s16689_s17 + $0x1420] ss:$8 sps:$4 sm:$0xff]  }
 0x41d   : > { %v13100_v46 = vcombine.high %v18112_v1, %v18116_v40  ;;  %v13052_v50 = vcombine.high %v18151_v15, %v18155_v31  ;;  %v15692_v54 = vld [vmem:[%s16689_s17 + $0x1434] ss:$8 sps:$4 sm:$0xff]   ;;  %v15699_v12 = vld [vmem:[%s16689_s17 + $0x1520] ss:$8 sps:$4 sm:$0xff]  }
 0x41e   : > { %8623 = vmatpush2.bf16.msra.mxu0 %v15648_v0  ;;  %v15674_v0 = vld [vmem:[%s16689_s17 + $0x1464] ss:$8 sps:$4 sm:$0xff]  }
 0x41f   : > { %8676 = vmatpush2.bf16.msra.mxu1 %v15651_v57  ;;  %8624 = vmatprep.subr.bf16.mxu0 %v15656_v11 }
 0x420   : > { %8677 = vmatprep.subr.bf16.mxu1 %v15659_v2  ;;  %v15672_v2 = vld [vmem:[%s16689_s17 + $0x1460] ss:$8 sps:$4 sm:$0xff]  }
 0x422   : > { %8625 = vmatpush2.bf16.msra.mxu0 %v15654_v9  ;;  %v15675_v9 = vld [vmem:[%s16689_s17 + $0x1560] ss:$8 sps:$4 sm:$0xff]  }
 0x423   : > { %8678 = vmatpush2.bf16.msra.mxu1 %v15657_v44  ;;  %8626 = vmatprep.subr.bf16.mxu0 %v15662_v58  ;;  %v13097_v58 = vcombine.low %v18101_v20, %v18105_v22 }
 0x424   : > { %8679 = vmatprep.subr.bf16.mxu1 %v15665_v8  ;;  %v13099_v8 = vcombine.low %v18112_v1, %v18116_v40  ;;  %v15684_v40 = vld [vmem:[%s16689_s17 + $0x1440] ss:$8 sps:$4 sm:$0xff]  }
 0x426   : > { %8627 = vmatpush2.bf16.msra.mxu0 %v15660_v24 }
 0x427   : > { %8680 = vmatpush2.bf16.msra.mxu1 %v15663_v55  ;;  %8702 = vmatprep.subr.bf16.mxu0 %v15668_v30  ;;  %v15681_v30 = vld [vmem:[%s16689_s17 + $0x1550] ss:$8 sps:$4 sm:$0xff]  }
 0x428   : > { %8755 = vmatprep.subr.bf16.mxu1 %v15671_v52  ;;  %v15686_v52 = vld [vmem:[%s16689_s17 + $0x1444] ss:$8 sps:$4 sm:$0xff]  }
 0x429   : > { %v8312_v19 = vpop.f32.mrf.mxu0  ;;  %8629 = vmatmul.mubr.bf16.vlgmr.msra.gmra.mxu0 %v13045_v21 }
 0x42a   : > { %v8313_v57 = vadd.f32 %v8312_v19, %v17983_v41  ;;  %v8365_v11 = vpop.f32.mrf.mxu1  ;;  %8682 = vmatmul.mubr.bf16.vlgmr.msra.gmra.mxu1 %v13047_v56  ;;  %8703 = vmatpush1.bf16.msra.mxu0 %v15666_v47  ;;  %v15683_v41 = vld [vmem:[%s16689_s17 + $0x1554] ss:$8 sps:$4 sm:$0xff]  }
 0x42b   : > { %8756 = vmatpush1.bf16.msra.mxu1 %v15669_v18  ;;  %v8314_v3 = vpop.f32.mrf.mxu0  ;;  %8704 = vmatprep.subr.bf16.mxu0 %v15674_v0  ;;  %v15689_v18 = vld [vmem:[%s16689_s17 + $0x1544] ss:$8 sps:$4 sm:$0xff]  }
 0x42c   : > { %v18129_v45 = vadd.f32 %v8365_v11, %v8313_v57  ;;  %v8315_v7 = vadd.f32 %v8314_v3, %v17999_v25  ;;  %v8367_v14 = vpop.f32.mrf.mxu1  ;;  %8757 = vmatprep.subr.bf16.mxu1 %v15677_v10  ;;  %8638 = vmatprep.mubr.bf16.mxu0 %v13098_v32  ;;  %v18143_v25 = vsel %vm16962_vm11, %v1770_v53, %v1771_v5  ;;  %v15695_v10 = vld [vmem:[%s16689_s17 + $0x1534] ss:$8 sps:$4 sm:$0xff]   ;;  %v15693_v53 = vld [vmem:[%s16689_s17 + $0x1530] ss:$8 sps:$4 sm:$0xff]   ;;  %v15698_v5 = vld [vmem:[%s16689_s17 + $0x1424] ss:$8 sps:$4 sm:$0xff]  }
 0x42d   : > { %v8316_v44 = vpop.f32.mrf.mxu0  ;;  %8691 = vmatprep.mubr.bf16.mxu1 %v13100_v46  ;;  %v13050_v20 = vcombine.high %v18139_v13, %v18143_v25  ;;  %v15704_v3 = vld [vmem:[%s16689_s17 + $0x1414] ss:$8 sps:$4 sm:$0xff]  }
 0x42e   : > { %v18145_v61 = vadd.f32 %v8367_v14, %v8315_v7  ;;  %v8317_v6 = vadd.f32 %v8316_v44, %v18013_v51  ;;  %v8369_v24 = vpop.f32.mrf.mxu1  ;;  %8705 = vmatpush1.bf16.msra.mxu0 %v15672_v2  ;;  %v15701_v2 = vld [vmem:[%s16689_s17 + $0x1524] ss:$8 sps:$4 sm:$0xff]   ;;  %v15711_v44 = vld [vmem:[%s16689_s17 + $0x1500] ss:$8 sps:$4 sm:$0xff]  }
 0x42f   : > { %8758 = vmatpush1.bf16.msra.mxu1 %v15675_v9  ;;  %v8318_v55 = vpop.f32.mrf.mxu0  ;;  %8706 = vmatprep.subr.bf16.mxu0 %v15680_v29  ;;  %v15702_v9 = vld [vmem:[%s16689_s17 + $0x1410] ss:$8 sps:$4 sm:$0xff]   ;;  %v15710_v7 = vld [vmem:[%s16689_s17 + $0x1404] ss:$8 sps:$4 sm:$0xff]  }
 0x430   : > { %v18159_v21 = vadd.f32 %v8369_v24, %v8317_v6  ;;  %v8319_v51 = vadd.f32 %v8318_v55, %v18021_v62  ;;  %v8371_v47 = vpop.f32.mrf.mxu1  ;;  %8759 = vmatprep.subr.bf16.mxu1 %v15683_v41  ;;  %v15705_v29 = vld [vmem:[%s16689_s17 + $0x1510] ss:$8 sps:$4 sm:$0xff]   ;;  %v15713_v14 = vld [vmem:[%s16689_s17 + $0x1504] ss:$8 sps:$4 sm:$0xff]   ;;  %v15708_v41 = vld [vmem:[%s16689_s17 + $0x1400] ss:$8 sps:$4 sm:$0xff]  }
 0x431   : > { %v8322_v22 = vpop.f32.mrf.mxu0  ;;  %8639 = vmatmul.mubr.bf16.gmra.mxu0 %v13097_v58  ;;  %v15716_v58 = vld [vmem:[%s16689_s17 + $0x14f4] ss:$8 sps:$4 sm:$0xff]   ;;  %v15714_v6 = vld [vmem:[%s16689_s17 + $0x14f0] ss:$8 sps:$4 sm:$0xff]   ;;  %v15725_v55 = vld [vmem:[%s16689_s17 + $0x15e4] ss:$8 sps:$4 sm:$0xff]  }
 0x432   : > { %v18167_v56 = vadd.f32 %v8371_v47, %v8319_v51  ;;  %v8323_v1 = vadd.f32 %v8322_v22, %v18028_v28  ;;  %8707 = vmatpush1.bf16.msra.mxu0 %v15678_v43  ;;  %v8375_v62 = vpop.f32.mrf.mxu1  ;;  %8692 = vmatmul.mubr.bf16.gmra.mxu1 %v13099_v8  ;;  %v15719_v8 = vld [vmem:[%s16689_s17 + $0x15f4] ss:$8 sps:$4 sm:$0xff]   ;;  %v15717_v24 = vld [vmem:[%s16689_s17 + $0x15f0] ss:$8 sps:$4 sm:$0xff]   ;;  %v15722_v43 = vld [vmem:[%s16689_s17 + $0x14e4] ss:$8 sps:$4 sm:$0xff]  }
 0x433   : > { %8760 = vmatpush1.bf16.msra.mxu1 %v15681_v30  ;;  %v8324_v35 = vpop.f32.mrf.mxu0  ;;  %8708 = vmatprep.subr.bf16.mxu0 %v15686_v52  ;;  %v15720_v30 = vld [vmem:[%s16689_s17 + $0x14e0] ss:$8 sps:$4 sm:$0xff]   ;;  %v15728_v51 = vld [vmem:[%s16689_s17 + $0x14d4] ss:$8 sps:$4 sm:$0xff]   ;;  %v15734_v22 = vld [vmem:[%s16689_s17 + $0x14c4] ss:$8 sps:$4 sm:$0xff]  }
 0x434   : > { %v8325_v0 = vadd.f32 %v8324_v35, %v18032_v38  ;;  %v18174_v42 = vadd.f32 %v8375_v62, %v8323_v1  ;;  %v8377_v39 = vpop.f32.mrf.mxu1  ;;  %8761 = vmatprep.subr.bf16.mxu1 %v15689_v18  ;;  %8734 = vmatprep.mubr.bf16.mxu0 %v13050_v20  ;;  %v15723_v52 = vld [vmem:[%s16689_s17 + $0x15e0] ss:$8 sps:$4 sm:$0xff]   ;;  %v15731_v47 = vld [vmem:[%s16689_s17 + $0x15d4] ss:$8 sps:$4 sm:$0xff]   ;;  %v15726_v18 = vld [vmem:[%s16689_s17 + $0x14d0] ss:$8 sps:$4 sm:$0xff]  }
 0x435   : > { %v8326_v28 = vpop.f32.mrf.mxu0  ;;  %8787 = vmatprep.mubr.bf16.mxu1 %v13052_v50  ;;  %v15729_v20 = vld [vmem:[%s16689_s17 + $0x15d0] ss:$8 sps:$4 sm:$0xff]   ;;  %v15737_v50 = vld [vmem:[%s16689_s17 + $0x15c4] ss:$8 sps:$4 sm:$0xff]   ;;  %v15732_v1 = vld [vmem:[%s16689_s17 + $0x14c0] ss:$8 sps:$4 sm:$0xff]  }
 0x436   : > { %v8327_v32 = vadd.f32 %v8326_v28, %v18038_v63  ;;  %v18178_v19 = vadd.f32 %v8377_v39, %v8325_v0  ;;  %8709 = vmatpush1.bf16.msra.mxu0 %v15684_v40  ;;  %v8379_v46 = vpop.f32.mrf.mxu1  ;;  %v15735_v62 = vld [vmem:[%s16689_s17 + $0x15c0] ss:$8 sps:$4 sm:$0xff]   ;;  %v15740_v40 = vld [vmem:[%s16689_s17 + $0x14b4] ss:$8 sps:$4 sm:$0xff]   ;;  %v15746_v0 = vld [vmem:[%s16689_s17 + $0x14a4] ss:$8 sps:$4 sm:$0xff]  }
 0x437   : > { %8762 = vmatpush1.bf16.msra.mxu1 %v15687_v33  ;;  %v8328_v38 = vpop.f32.mrf.mxu0  ;;  %8710 = vmatprep.subr.bf16.mxu0 %v15692_v54  ;;  %v15743_v35 = vld [vmem:[%s16689_s17 + $0x15b4] ss:$8 sps:$4 sm:$0xff]   ;;  %v15738_v33 = vld [vmem:[%s16689_s17 + $0x14b0] ss:$8 sps:$4 sm:$0xff]   ;;  %v15744_v39 = vld [vmem:[%s16689_s17 + $0x14a0] ss:$8 sps:$4 sm:$0xff]  }
 0x438   : > { %v8329_v57 = vadd.f32 %v8328_v38, %v18041_v34  ;;  %v18184_v11 = vadd.f32 %v8379_v46, %v8327_v32  ;;  %v8381_v63 = vpop.f32.mrf.mxu1  ;;  %8763 = vmatprep.subr.bf16.mxu1 %v15695_v10  ;;  %v15707_v34 = vld [vmem:[%s16689_s17 + $0x1514] ss:$8 sps:$4 sm:$0xff]   ;;  %v15741_v54 = vld [vmem:[%s16689_s17 + $0x15b0] ss:$8 sps:$4 sm:$0xff]   ;;  %v15749_v10 = vld [vmem:[%s16689_s17 + $0x15a4] ss:$8 sps:$4 sm:$0xff]  }
 0x439   : > { %v15747_v28 = vld [vmem:[%s16689_s17 + $0x15a0] ss:$8 sps:$4 sm:$0xff]   ;;  %v15752_v32 = vld [vmem:[%s16689_s17 + $0x1494] ss:$8 sps:$4 sm:$0xff]  }
 0x43a   : > { %v18187_v37 = vadd.f32 %v8381_v63, %v8329_v57  ;;  %8711 = vmatpush1.bf16.msra.mxu0 %v15690_v60  ;;  %v1806_v46 = vld [vmem:[#allocation3 + $0x10] sm:$0xcc]  ;;  %v18224_v60 = vld [vmem:[#allocation3 + $0x20] sm:$0xff]  ;;  %v1807_v57 = vld [vmem:[#allocation3 + $0x18] sm:$0xcc] }
 0x43b   : > { %8764 = vmatpush1.bf16.msra.mxu1 %v15693_v53  ;;  %8712 = vmatprep.subr.bf16.mxu0 %v15698_v5  ;;  %v15755_v38 = vld [vmem:[%s16689_s17 + $0x1594] ss:$8 sps:$4 sm:$0xff]   ;;  %v1778_v5 = vrot.slane %v18067_v17, 6  ;;  %v15753_v17 = vld [vmem:[%s16689_s17 + $0x1590] ss:$8 sps:$4 sm:$0xff]  }
 0x43c   : > { %8765 = vmatprep.subr.bf16.mxu1 %v15701_v2  ;;  %v1744_v53 = vld [vmem:[#allocation3 + $0x50] sm:$0xcc]  ;;  %v1748_v63 = vld [vmem:[#allocation3 + $0x70] sm:$0x33]  ;;  %v1745_v2 = vld [vmem:[#allocation3 + $0x58] sm:$0xcc] }
 0x43e   : > { %8713 = vmatpush1.bf16.msra.mxu0 %v15696_v23  ;;  %v1782_v23 = vrot.slane %v18072_v49, 6  ;;  %v1810_v49 = vld [vmem:[#allocation3 + $0x30] sm:$0x77] }
 0x43f   : > { %8766 = vmatpush1.bf16.msra.mxu1 %v15699_v12  ;;  %8714 = vmatprep.subr.bf16.mxu0 %v15704_v3  ;;  %v18229_v12 = vld [vmem:[#allocation3 + $0x28] sm:$0xff] }
 0x440   : > { %8767 = vmatprep.subr.bf16.mxu1 %v15707_v34  ;;  %v15750_v3 = vld [vmem:[%s16689_s17 + $0x1490] ss:$8 sps:$4 sm:$0xff]   ;;  %v1749_v34 = vld [vmem:[#allocation3 + $0x78] sm:$0x33] }
 0x442   : > { %8715 = vmatpush1.bf16.msra.mxu0 %v15702_v9  ;;  %v1819_v9 = vshrl.u32 %v1806_v46, 16 }
 0x443   : > { %8768 = vmatpush1.bf16.msra.mxu1 %v15705_v29  ;;  %8716 = vmatprep.subr.bf16.mxu0 %v15710_v7  ;;  %v1822_v29 = vshll.u32 %v1806_v46, 16  ;;  %v1828_v7 = vshrl.u32 %v18224_v60, 16  ;;  %v13049_v46 = vcombine.low %v18139_v13, %v18143_v25 }
 0x444   : > { %8769 = vmatprep.subr.bf16.mxu1 %v15713_v14  ;;  %v1831_v14 = vshll.u32 %v18224_v60, 16 }
 0x446   : > { %8717 = vmatpush1.bf16.msra.mxu0 %v15708_v41  ;;  %v15758_v41 = vld [vmem:[%s16689_s17 + $0x1484] ss:$8 sps:$4 sm:$0xff]  }
 0x447   : > { %8770 = vmatpush1.bf16.msra.mxu1 %v15711_v44  ;;  %8718 = vmatprep.subr.bf16.mxu0 %v15716_v58  ;;  %v1837_v44 = vshrl.u32 %v1807_v57, 16  ;;  %v1840_v58 = vshll.u32 %v1807_v57, 16  ;;  %v15767_v57 = vld [vmem:[%s16689_s17 + $0x1774] ss:$8 sps:$4 sm:$0xff]  }
 0x448   : > { %8771 = vmatprep.subr.bf16.mxu1 %v15719_v8  ;;  %v13003_v8 = vrot.slane %v1744_v53, 10  ;;  %v15764_v53 = vld [vmem:[%s16689_s17 + $0x1674] ss:$8 sps:$4 sm:$0xff]  }
 0x44a   : > { %8719 = vmatpush2.bf16.msra.mxu0 %v15714_v6  ;;  %v1784_v6 = vrot.slane %v1778_v5, 4 }
 0x44b   : > { %8772 = vmatpush2.bf16.msra.mxu1 %v15717_v24  ;;  %8720 = vmatprep.subr.bf16.mxu0 %v15722_v43  ;;  %v1846_v24 = vshrl.u32 %v18229_v12, 16  ;;  %v1849_v43 = vshll.u32 %v18229_v12, 16 }
 0x44c   : > { %8773 = vmatprep.subr.bf16.mxu1 %v15725_v55  ;;  %v1785_v55 = vrot.slane %v1748_v63, 6  ;;  %v18249_v63 = vsel %vm16962_vm11, %v13003_v8, %v1778_v5 }
 0x44e   : > { %8721 = vmatpush2.bf16.msra.mxu0 %v15720_v30  ;;  %v13004_v30 = vrot.slane %v1745_v2, 10  ;;  %v18253_v2 = vsel %vm16962_vm11, %v1784_v6, %v1785_v55  ;;  %v15768_v55 = vld [vmem:[%s16689_s17 + $0x1660] ss:$8 sps:$4 sm:$0xff]  }
 0x44f   : > { %8774 = vmatpush2.bf16.msra.mxu1 %v15723_v52  ;;  %8722 = vmatprep.subr.bf16.mxu0 %v15728_v51  ;;  %v1787_v52 = vrot.slane %v1782_v23, 4  ;;  %v1788_v51 = vrot.slane %v1749_v34, 6  ;;  %v15762_v34 = vld [vmem:[%s16689_s17 + $0x1670] ss:$8 sps:$4 sm:$0xff]  }
 0x450   : > { %8775 = vmatprep.subr.bf16.mxu1 %v15731_v47  ;;  %v1811_v47 = vld [vmem:[#allocation3 + $0x38] sm:$0x77] }
 0x451   : > { %v18261_v13 = vsel %vm16962_vm11, %v1787_v52, %v1788_v51 }
 0x452   : > { %8723 = vmatpush2.bf16.msra.mxu0 %v15726_v18  ;;  %v15761_v18 = vld [vmem:[%s16689_s17 + $0x1584] ss:$8 sps:$4 sm:$0xff]  }
 0x453   : > { %8776 = vmatpush2.bf16.msra.mxu1 %v15729_v20  ;;  %8724 = vmatprep.subr.bf16.mxu0 %v15734_v22  ;;  %v1821_v20 = vrot.slane %v1819_v9, 6  ;;  %v1824_v22 = vrot.slane %v1822_v29, 7 }
 0x454   : > { %8777 = vmatprep.subr.bf16.mxu1 %v15737_v50  ;;  %v1830_v50 = vrot.slane %v1828_v7, 6 }
 0x455   : > { %v1825_v25 = vor.u32 %v1824_v22, %v1821_v20  ;;  %v15776_v20 = vld [vmem:[%s16689_s17 + $0x1654] ss:$8 sps:$4 sm:$0xff]  }
 0x456   : > { %8725 = vmatpush2.bf16.msra.mxu0 %v15732_v1  ;;  %v1833_v1 = vrot.slane %v1831_v14, 7 }
 0x457   : > { %8778 = vmatpush2.bf16.msra.mxu1 %v15735_v62  ;;  %8726 = vmatprep.subr.bf16.mxu0 %v15740_v40  ;;  %v1856_v62 = vshrl.u32 %v1810_v49, 16  ;;  %v1859_v40 = vshll.u32 %v1810_v49, 16  ;;  %v1826_v8 = vrot.slane %v1825_v25, 4 }
 0x458   : > { %8779 = vmatprep.subr.bf16.mxu1 %v15743_v35  ;;  %v1839_v35 = vrot.slane %v1837_v44, 6 }
 0x459   : > { %v1861_v5 = vrot.slane %v1859_v40, 7  ;;  %v13101_v40 = vcombine.low %v18249_v63, %v18253_v2 }
 0x45a   : > { %8727 = vmatpush2.bf16.msra.mxu0 %v15738_v33  ;;  %v1842_v33 = vrot.slane %v1840_v58, 7 }
 0x45b   : > { %8780 = vmatpush2.bf16.msra.mxu1 %v15741_v54  ;;  %8728 = vmatprep.subr.bf16.mxu0 %v15746_v0  ;;  %v15756_v54 = vld [vmem:[%s16689_s17 + $0x1480] ss:$8 sps:$4 sm:$0xff]   ;;  %v1848_v0 = vrot.slane %v1846_v24, 6 }
 0x45c   : > { %8781 = vmatprep.subr.bf16.mxu1 %v15749_v10  ;;  %v1866_v10 = vshrl.u32 %v1811_v47, 16  ;;  %v1843_v9 = vor.u32 %v1842_v33, %v1839_v35 }
 0x45e   : > { %8729 = vmatpush2.bf16.msra.mxu0 %v15744_v39  ;;  %v1851_v39 = vrot.slane %v1849_v43, 7  ;;  %v1868_v7 = vrot.slane %v1866_v10, 6  ;;  %v15774_v10 = vld [vmem:[%s16689_s17 + $0x1650] ss:$8 sps:$4 sm:$0xff]  }
 0x45f   : > { %8782 = vmatpush2.bf16.msra.mxu1 %v15747_v28  ;;  %8730 = vmatprep.subr.bf16.mxu0 %v15752_v32  ;;  %v1869_v28 = vshll.u32 %v1811_v47, 16  ;;  %v15759_v32 = vld [vmem:[%s16689_s17 + $0x1580] ss:$8 sps:$4 sm:$0xff]  }
 0x460   : > { %8783 = vmatprep.subr.bf16.mxu1 %v15755_v38  ;;  %v13051_v38 = vcombine.low %v18151_v15, %v18155_v31  ;;  %v1834_v15 = vor.u32 %v1833_v1, %v1830_v50  ;;  %v1858_v31 = vrot.slane %v1856_v62, 6  ;;  %v1852_v29 = vor.u32 %v1851_v39, %v1848_v0 }
 0x461   : > { %v1871_v14 = vrot.slane %v1869_v28, 7 }
 0x462   : > { %8731 = vmatpush2.bf16.msra.mxu0 %v15750_v3  ;;  %v18257_v3 = vsel %vm16962_vm11, %v13004_v30, %v1782_v23  ;;  %v15765_v23 = vld [vmem:[%s16689_s17 + $0x1770] ss:$8 sps:$4 sm:$0xff]   ;;  %v1854_v6 = vrot.slane %v1834_v15, 4  ;;  %v1862_v49 = vor.u32 %v1861_v5, %v1858_v31  ;;  %v1844_v30 = vrot.slane %v1843_v9, 4  ;;  %v15788_v9 = vld [vmem:[%s16689_s17 + $0x1634] ss:$8 sps:$4 sm:$0xff]  }
 0x463   : > { %8784 = vmatpush2.bf16.msra.mxu1 %v15753_v17  ;;  %8732 = vmatprep.subr.bf16.mxu0 %v15758_v41  ;;  %v15770_v17 = vld [vmem:[%s16689_s17 + $0x1664] ss:$8 sps:$4 sm:$0xff]   ;;  %v13102_v41 = vcombine.high %v18249_v63, %v18253_v2  ;;  %v13104_v58 = vcombine.high %v18257_v3, %v18261_v13  ;;  %v1864_v52 = vrot.slane %v1852_v29, 4  ;;  %v1872_v51 = vor.u32 %v1871_v14, %v1868_v7  ;;  %v15791_v14 = vld [vmem:[%s16689_s17 + $0x1734] ss:$8 sps:$4 sm:$0xff]  }
 0x464   : > { %8785 = vmatprep.subr.bf16.mxu1 %v15761_v18  ;;  %v15771_v18 = vld [vmem:[%s16689_s17 + $0x1760] ss:$8 sps:$4 sm:$0xff]   ;;  %v13103_v35 = vcombine.low %v18257_v3, %v18261_v13  ;;  %v18285_v33 = vsel %vm17085_vm14, %v1826_v8, %v1834_v15  ;;  %v18297_v28 = vsel %vm17085_vm14, %v1844_v30, %v1852_v29  ;;  %v15785_v2 = vld [vmem:[%s16689_s17 + $0x1744] ss:$8 sps:$4 sm:$0xff]   ;;  %v15800_v8 = vld [vmem:[%s16689_s17 + $0x1614] ss:$8 sps:$4 sm:$0xff]  }
 0x465   : > { %v15804_v30 = vld [vmem:[%s16689_s17 + $0x1600] ss:$8 sps:$4 sm:$0xff]  }
 0x466   : > { %8733 = vmatpush2.bf16.msra.mxu0 %v15756_v54 }
 0x467   : > { %8786 = vmatpush2.bf16.msra.mxu1 %v15759_v32  ;;  %8808 = vmatprep.subr.bf16.mxu0 %v15764_v53  ;;  %v18301_v32 = vsel %vm17085_vm14, %v1864_v52, %v1872_v51  ;;  %v15782_v53 = vld [vmem:[%s16689_s17 + $0x1644] ss:$8 sps:$4 sm:$0xff]   ;;  %v15807_v52 = vld [vmem:[%s16689_s17 + $0x1700] ss:$8 sps:$4 sm:$0xff]   ;;  %v15812_v51 = vld [vmem:[%s16689_s17 + $0x16f4] ss:$8 sps:$4 sm:$0xff]  }
 0x468   : > { %8861 = vmatprep.subr.bf16.mxu1 %v15767_v57  ;;  %v13056_v25 = vcombine.high %v18297_v28, %v18301_v32 }
 0x469   : > { %v8418_v44 = vpop.f32.mrf.mxu0  ;;  %8735 = vmatmul.mubr.bf16.vlgmr.msra.gmra.mxu0 %v13049_v46 }
 0x46a   : > { %v8419_v24 = vadd.f32 %v8418_v44, %v18129_v45  ;;  %v8471_v43 = vpop.f32.mrf.mxu1  ;;  %8788 = vmatmul.mubr.bf16.vlgmr.msra.gmra.mxu1 %v13051_v38  ;;  %8809 = vmatpush1.bf16.msra.mxu0 %v15762_v34  ;;  %v15779_v45 = vld [vmem:[%s16689_s17 + $0x1754] ss:$8 sps:$4 sm:$0xff]   ;;  %v15777_v38 = vld [vmem:[%s16689_s17 + $0x1750] ss:$8 sps:$4 sm:$0xff]   ;;  %v15783_v34 = vld [vmem:[%s16689_s17 + $0x1740] ss:$8 sps:$4 sm:$0xff]  }
 0x46b   : > { %8862 = vmatpush1.bf16.msra.mxu1 %v15765_v23  ;;  %v8420_v47 = vpop.f32.mrf.mxu0  ;;  %8810 = vmatprep.subr.bf16.mxu0 %v15770_v17  ;;  %v15786_v17 = vld [vmem:[%s16689_s17 + $0x1630] ss:$8 sps:$4 sm:$0xff]   ;;  %v15792_v44 = vld [vmem:[%s16689_s17 + $0x1620] ss:$8 sps:$4 sm:$0xff]  }
 0x46c   : > { %v18275_v22 = vadd.f32 %v8471_v43, %v8419_v24  ;;  %v8421_v50 = vadd.f32 %v8420_v47, %v18145_v61  ;;  %v8473_v1 = vpop.f32.mrf.mxu1  ;;  %8863 = vmatprep.subr.bf16.mxu1 %v15773_v27  ;;  %8744 = vmatprep.mubr.bf16.mxu0 %v13102_v41  ;;  %v18289_v61 = vsel %vm17085_vm14, %v1854_v6, %v1862_v49  ;;  %v15789_v27 = vld [vmem:[%s16689_s17 + $0x1730] ss:$8 sps:$4 sm:$0xff]   ;;  %v15794_v41 = vld [vmem:[%s16689_s17 + $0x1624] ss:$8 sps:$4 sm:$0xff]   ;;  %v15803_v6 = vld [vmem:[%s16689_s17 + $0x1714] ss:$8 sps:$4 sm:$0xff]  }
 0x46d   : > { %v8422_v62 = vpop.f32.mrf.mxu0  ;;  %8797 = vmatprep.mubr.bf16.mxu1 %v13104_v58  ;;  %v13054_v3 = vcombine.high %v18285_v33, %v18289_v61  ;;  %v15795_v58 = vld [vmem:[%s16689_s17 + $0x1720] ss:$8 sps:$4 sm:$0xff]   ;;  %v15798_v49 = vld [vmem:[%s16689_s17 + $0x1610] ss:$8 sps:$4 sm:$0xff]   ;;  %v15806_v43 = vld [vmem:[%s16689_s17 + $0x1604] ss:$8 sps:$4 sm:$0xff]  }
 0x46e   : > { %v18291_v54 = vadd.f32 %v8473_v1, %v8421_v50  ;;  %v8423_v0 = vadd.f32 %v8422_v62, %v18159_v21  ;;  %v8475_v39 = vpop.f32.mrf.mxu1  ;;  %8811 = vmatpush1.bf16.msra.mxu0 %v15768_v55  ;;  %v15801_v24 = vld [vmem:[%s16689_s17 + $0x1710] ss:$8 sps:$4 sm:$0xff]   ;;  %v15809_v55 = vld [vmem:[%s16689_s17 + $0x1704] ss:$8 sps:$4 sm:$0xff]   ;;  %v15815_v47 = vld [vmem:[%s16689_s17 + $0x17f4] ss:$8 sps:$4 sm:$0xff]  }
 0x46f   : > { %8864 = vmatpush1.bf16.msra.mxu1 %v15771_v18  ;;  %v8424_v46 = vpop.f32.mrf.mxu0  ;;  %8812 = vmatprep.subr.bf16.mxu0 %v15776_v20  ;;  %v15810_v18 = vld [vmem:[%s16689_s17 + $0x16f0] ss:$8 sps:$4 sm:$0xff]   ;;  %v15818_v50 = vld [vmem:[%s16689_s17 + $0x16e4] ss:$8 sps:$4 sm:$0xff]   ;;  %v15819_v62 = vld [vmem:[%s16689_s17 + $0x17e0] ss:$8 sps:$4 sm:$0xff]  }
 0x470   : > { %v18305_v57 = vadd.f32 %v8475_v39, %v8423_v0  ;;  %v8425_v21 = vadd.f32 %v8424_v46, %v18167_v56  ;;  %v8477_v63 = vpop.f32.mrf.mxu1  ;;  %8865 = vmatprep.subr.bf16.mxu1 %v15779_v45  ;;  %v15780_v56 = vld [vmem:[%s16689_s17 + $0x1640] ss:$8 sps:$4 sm:$0xff]   ;;  %v15813_v20 = vld [vmem:[%s16689_s17 + $0x17f0] ss:$8 sps:$4 sm:$0xff]   ;;  %v15821_v1 = vld [vmem:[%s16689_s17 + $0x17e4] ss:$8 sps:$4 sm:$0xff]  }
 0x471   : > { %v18311_v13 = vpop.f32.mrf.mxu0  ;;  %8745 = vmatmul.mubr.bf16.gmra.mxu0 %v13101_v40  ;;  %v15816_v45 = vld [vmem:[%s16689_s17 + $0x16e0] ss:$8 sps:$4 sm:$0xff]   ;;  %v15824_v40 = vld [vmem:[%s16689_s17 + $0x16d4] ss:$8 sps:$4 sm:$0xff]   ;;  %v15822_v0 = vld [vmem:[%s16689_s17 + $0x16d0] ss:$8 sps:$4 sm:$0xff]  }
 0x472   : > { %v18315_v15 = vadd.f32 %v8477_v63, %v8425_v21  ;;  %8813 = vmatpush1.bf16.msra.mxu0 %v15774_v10  ;;  %v18317_v31 = vpop.f32.mrf.mxu1  ;;  %8798 = vmatmul.mubr.bf16.gmra.mxu1 %v13103_v35  ;;  %v15827_v35 = vld [vmem:[%s16689_s17 + $0x17d4] ss:$8 sps:$4 sm:$0xff]   ;;  %v15825_v39 = vld [vmem:[%s16689_s17 + $0x17d0] ss:$8 sps:$4 sm:$0xff]   ;;  %v15830_v10 = vld [vmem:[%s16689_s17 + $0x16c4] ss:$8 sps:$4 sm:$0xff]  }
 0x473   : > { %8866 = vmatpush1.bf16.msra.mxu1 %v15777_v38  ;;  %v8430_v5 = vpop.f32.mrf.mxu0  ;;  %8814 = vmatprep.subr.bf16.mxu0 %v15782_v53  ;;  %v15833_v46 = vld [vmem:[%s16689_s17 + $0x17c4] ss:$8 sps:$4 sm:$0xff]   ;;  %v15828_v21 = vld [vmem:[%s16689_s17 + $0x16c0] ss:$8 sps:$4 sm:$0xff]  }
 0x474   : > { %v8431_v29 = vadd.f32 %v8430_v5, %v18178_v19  ;;  %v8483_v7 = vpop.f32.mrf.mxu1  ;;  %8867 = vmatprep.subr.bf16.mxu1 %v15785_v2  ;;  %8840 = vmatprep.mubr.bf16.mxu0 %v13054_v3  ;;  %v15797_v19 = vld [vmem:[%s16689_s17 + $0x1724] ss:$8 sps:$4 sm:$0xff]   ;;  %v15831_v2 = vld [vmem:[%s16689_s17 + $0x17c0] ss:$8 sps:$4 sm:$0xff]   ;;  %v15836_v3 = vld [vmem:[%s16689_s17 + $0x16b4] ss:$8 sps:$4 sm:$0xff]  }
 0x475   : > { %8893 = vmatprep.mubr.bf16.mxu1 %v13056_v25  ;;  %v1812_v38 = vld [vmem:[#allocation3 + $0x50] sm:$0xcc]  ;;  %v18354_v53 = vld [vmem:[#allocation3 + $0x60] sm:$0xff]  ;;  %v1813_v63 = vld [vmem:[#allocation3 + $0x58] sm:$0xcc]  ;;  %v8432_v16 = vpop.f32.mrf.mxu0 }
 0x476   : > { %v18324_v23 = vadd.f32 %v8483_v7, %v8431_v29  ;;  %8815 = vmatpush1.bf16.msra.mxu0 %v15780_v56  ;;  %v18359_v25 = vld [vmem:[#allocation3 + $0x68] sm:$0xff]  ;;  %v1875_v5 = vshrl.u32 %v1812_v38, 16  ;;  %v1816_v29 = vld [vmem:[#allocation3 + $0x70] sm:$0x77]  ;;  %v1887_v7 = vshll.u32 %v18354_v53, 16 }
 0x477   : > { %8868 = vmatpush1.bf16.msra.mxu1 %v15783_v34  ;;  %8816 = vmatprep.subr.bf16.mxu0 %v15788_v9  ;;  %v15839_v56 = vld [vmem:[%s16689_s17 + $0x17b4] ss:$8 sps:$4 sm:$0xff]   ;;  %v1878_v34 = vshll.u32 %v1812_v38, 16  ;;  %v1884_v9 = vshrl.u32 %v18354_v53, 16  ;;  %v15846_v38 = vld [vmem:[%s16689_s17 + $0x1690] ss:$8 sps:$4 sm:$0xff]  }
 0x478   : > { %8869 = vmatprep.subr.bf16.mxu1 %v15791_v14  ;;  %v1893_v14 = vshrl.u32 %v1813_v63, 16 }
 0x47a   : > { %8817 = vmatpush1.bf16.msra.mxu0 %v15786_v17  ;;  %v1896_v17 = vshll.u32 %v1813_v63, 16 }
 0x47b   : > { %8870 = vmatpush1.bf16.msra.mxu1 %v15789_v27  ;;  %8818 = vmatprep.subr.bf16.mxu0 %v15794_v41  ;;  %v15834_v27 = vld [vmem:[%s16689_s17 + $0x16b0] ss:$8 sps:$4 sm:$0xff]   ;;  %v1902_v41 = vshrl.u32 %v18359_v25, 16 }
 0x47c   : > { %8871 = vmatprep.subr.bf16.mxu1 %v15797_v19  ;;  %v1905_v19 = vshll.u32 %v18359_v25, 16 }
 0x47e   : > { %8819 = vmatpush1.bf16.msra.mxu0 %v15792_v44  ;;  %v15837_v44 = vld [vmem:[%s16689_s17 + $0x17b0] ss:$8 sps:$4 sm:$0xff]  }
 0x47f   : > { %8872 = vmatpush1.bf16.msra.mxu1 %v15795_v58  ;;  %8820 = vmatprep.subr.bf16.mxu0 %v15800_v8  ;;  %v15842_v58 = vld [vmem:[%s16689_s17 + $0x16a4] ss:$8 sps:$4 sm:$0xff]  }
 0x480   : > { %8873 = vmatprep.subr.bf16.mxu1 %v15803_v6  ;;  %v1817_v8 = vld [vmem:[#allocation3 + $0x78] sm:$0x77] }
 0x481   : > { %v15845_v6 = vld [vmem:[%s16689_s17 + $0x17a4] ss:$8 sps:$4 sm:$0xff]  }
 0x482   : > { %8821 = vmatpush1.bf16.msra.mxu0 %v15798_v49  ;;  %v1877_v49 = vrot.slane %v1875_v5, 6  ;;  %v15854_v5 = vld [vmem:[%s16689_s17 + $0x1684] ss:$8 sps:$4 sm:$0xff]  }
 0x483   : > { %8874 = vmatpush1.bf16.msra.mxu1 %v15801_v24  ;;  %8822 = vmatprep.subr.bf16.mxu0 %v15806_v43  ;;  %v1880_v24 = vrot.slane %v1878_v34, 7  ;;  %v1886_v43 = vrot.slane %v1884_v9, 6  ;;  %v15857_v34 = vld [vmem:[%s16689_s17 + $0x1784] ss:$8 sps:$4 sm:$0xff]  }
 0x484   : > { %8875 = vmatprep.subr.bf16.mxu1 %v15809_v55  ;;  %v1912_v55 = vshrl.u32 %v1816_v29, 16 }
 0x486   : > { %8823 = vmatpush1.bf16.msra.mxu0 %v15804_v30  ;;  %v1889_v30 = vrot.slane %v1887_v7, 7 }
 0x487   : > { %8876 = vmatpush1.bf16.msra.mxu1 %v15807_v52  ;;  %8824 = vmatprep.subr.bf16.mxu0 %v15812_v51  ;;  %v1915_v52 = vshll.u32 %v1816_v29, 16  ;;  %v1895_v51 = vrot.slane %v1893_v14, 6  ;;  %v15852_v14 = vld [vmem:[%s16689_s17 + $0x1680] ss:$8 sps:$4 sm:$0xff]  }
 0x488   : > { %8877 = vmatprep.subr.bf16.mxu1 %v15815_v47  ;;  %v1898_v47 = vrot.slane %v1896_v17, 7 }
 0x48a   : > { %8825 = vmatpush2.bf16.msra.mxu0 %v15810_v18  ;;  %v15840_v18 = vld [vmem:[%s16689_s17 + $0x16a0] ss:$8 sps:$4 sm:$0xff]  }
 0x48b   : > { %8878 = vmatpush2.bf16.msra.mxu1 %v15813_v20  ;;  %8826 = vmatprep.subr.bf16.mxu0 %v15818_v50  ;;  %v1904_v20 = vrot.slane %v1902_v41, 6  ;;  %v1907_v50 = vrot.slane %v1905_v19, 7  ;;  %v15855_v19 = vld [vmem:[%s16689_s17 + $0x1780] ss:$8 sps:$4 sm:$0xff]  }
 0x48c   : > { %8879 = vmatprep.subr.bf16.mxu1 %v15821_v1  ;;  %v1922_v1 = vshrl.u32 %v1817_v8, 16 }
 0x48d   : > { %v1908_v63 = vor.u32 %v1907_v50, %v1904_v20  ;;  %v1947_v20 = vld [vmem:[#allocation3 + $0x18] sm:$0x88] }
 0x48e   : > { %8827 = vmatpush2.bf16.msra.mxu0 %v15816_v45  ;;  %v1925_v45 = vshll.u32 %v1817_v8, 16  ;;  %v13053_v8 = vcombine.low %v18285_v33, %v18289_v61  ;;  %v1946_v61 = vld [vmem:[#allocation3 + $0x10] sm:$0x88] }
 0x48f   : > { %8880 = vmatpush2.bf16.msra.mxu1 %v15819_v62  ;;  %8828 = vmatprep.subr.bf16.mxu0 %v15824_v40  ;;  %v15843_v62 = vld [vmem:[%s16689_s17 + $0x17a0] ss:$8 sps:$4 sm:$0xff]   ;;  %v15848_v40 = vld [vmem:[%s16689_s17 + $0x1694] ss:$8 sps:$4 sm:$0xff]   ;;  %v15869_v50 = vld [vmem:[%s16689_s17 + $0x1964] ss:$8 sps:$4 sm:$0xff]  }
 0x490   : > { %8881 = vmatprep.subr.bf16.mxu1 %v15827_v35  ;;  %v15851_v35 = vld [vmem:[%s16689_s17 + $0x1794] ss:$8 sps:$4 sm:$0xff]   ;;  %v13005_v36 = vrot.slane %v1946_v61, 11  ;;  %v15900_v61 = vld [vmem:[%s16689_s17 + $0x1800] ss:$8 sps:$4 sm:$0xff]  }
 0x492   : > { %8829 = vmatpush2.bf16.msra.mxu0 %v15822_v0  ;;  %v1881_v0 = vor.u32 %v1880_v24, %v1877_v49  ;;  %v15861_v49 = vld [vmem:[%s16689_s17 + $0x1970] ss:$8 sps:$4 sm:$0xff]  }
 0x493   : > { %8882 = vmatpush2.bf16.msra.mxu1 %v15825_v39  ;;  %8830 = vmatprep.subr.bf16.mxu0 %v15830_v10  ;;  %v1890_v39 = vor.u32 %v1889_v30, %v1886_v43  ;;  %v1914_v10 = vrot.slane %v1912_v55, 6  ;;  %v1972_v55 = vrot.slane %v18224_v60, 7  ;;  %v13055_v30 = vcombine.low %v18297_v28, %v18301_v32  ;;  %v1951_v60 = vld [vmem:[#allocation3 + $0x38] sm:$0x77] }
 0x494   : > { %8883 = vmatprep.subr.bf16.mxu1 %v15833_v46  ;;  %v1917_v46 = vrot.slane %v1915_v52, 7  ;;  %v1882_v9 = vrot.slane %v1881_v0, 4  ;;  %v15867_v0 = vld [vmem:[%s16689_s17 + $0x1960] ss:$8 sps:$4 sm:$0xff]  }
 0x495   : > { %v1910_v29 = vrot.slane %v1890_v39, 4 }
 0x496   : > { %8831 = vmatpush2.bf16.msra.mxu0 %v15828_v21  ;;  %v1899_v21 = vor.u32 %v1898_v47, %v1895_v51  ;;  %v1918_v7 = vor.u32 %v1917_v46, %v1914_v10  ;;  %v1891_v24 = vsel %vm17085_vm14, %v1882_v9, %v1890_v39  ;;  %v1950_v51 = vld [vmem:[#allocation3 + $0x30] sm:$0x77]  ;;  %v1976_v47 = vrot.slane %v18229_v12, 7  ;;  %v15881_v9 = vld [vmem:[%s16689_s17 + $0x1944] ss:$8 sps:$4 sm:$0xff]  }
 0x497   : > { %8884 = vmatpush2.bf16.msra.mxu1 %v15831_v2  ;;  %8832 = vmatprep.subr.bf16.mxu0 %v15836_v3  ;;  %v1924_v2 = vrot.slane %v1922_v1, 6  ;;  %v1927_v3 = vrot.slane %v1925_v45, 7  ;;  %v1978_v1 = vrot.slane %v1972_v55, 4  ;;  %v1979_v45 = vrot.slane %v1950_v51, 7  ;;  %v15864_v12 = vld [vmem:[%s16689_s17 + $0x1860] ss:$8 sps:$4 sm:$0xff]  }
 0x498   : > { %8885 = vmatprep.subr.bf16.mxu1 %v15839_v56  ;;  %v15849_v56 = vld [vmem:[%s16689_s17 + $0x1790] ss:$8 sps:$4 sm:$0xff]   ;;  %v1900_v17 = vrot.slane %v1899_v21, 4  ;;  %v1919_v43 = vsel %vm17085_vm14, %v1910_v29, %v1918_v7  ;;  %v15872_v39 = vld [vmem:[%s16689_s17 + $0x1854] ss:$8 sps:$4 sm:$0xff]  }
 0x499   : > { %v1928_v41 = vor.u32 %v1927_v3, %v1924_v2  ;;  %v13106_v28 = vcombine.high %v1891_v24, %v1919_v43  ;;  %v15875_v10 = vld [vmem:[%s16689_s17 + $0x1954] ss:$8 sps:$4 sm:$0xff]   ;;  %v13105_v46 = vcombine.low %v1891_v24, %v1919_v43  ;;  %v18410_v21 = vsel %vm17235_vm3, %v1978_v1, %v1979_v45  ;;  %v15903_v51 = vld [vmem:[%s16689_s17 + $0x1900] ss:$8 sps:$4 sm:$0xff]  }
 0x49a   : > { %8833 = vmatpush2.bf16.msra.mxu0 %v15834_v27  ;;  %v1920_v27 = vrot.slane %v1908_v63, 4  ;;  %v1909_v52 = vsel %vm17085_vm14, %v1900_v17, %v1908_v63  ;;  %v15870_v63 = vld [vmem:[%s16689_s17 + $0x1850] ss:$8 sps:$4 sm:$0xff]   ;;  %v15879_v17 = vld [vmem:[%s16689_s17 + $0x1940] ss:$8 sps:$4 sm:$0xff]  }
 0x49b   : > { %8886 = vmatpush2.bf16.msra.mxu1 %v15837_v44  ;;  %8834 = vmatprep.subr.bf16.mxu0 %v15842_v58  ;;  %v15860_v44 = vld [vmem:[%s16689_s17 + $0x1874] ss:$8 sps:$4 sm:$0xff]  }
 0x49c   : > { %8887 = vmatprep.subr.bf16.mxu1 %v15845_v6  ;;  %v15863_v58 = vld [vmem:[%s16689_s17 + $0x1974] ss:$8 sps:$4 sm:$0xff]   ;;  %v15858_v6 = vld [vmem:[%s16689_s17 + $0x1870] ss:$8 sps:$4 sm:$0xff]   ;;  %v1929_v33 = vsel %vm17085_vm14, %v1920_v27, %v1928_v41 }
 0x49d   : > { %v13108_v32 = vcombine.high %v1909_v52, %v1929_v33  ;;  %v13107_v2 = vcombine.low %v1909_v52, %v1929_v33  ;;  %v15884_v27 = vld [vmem:[%s16689_s17 + $0x1834] ss:$8 sps:$4 sm:$0xff]   ;;  %v15902_v52 = vld [vmem:[%s16689_s17 + $0x1804] ss:$8 sps:$4 sm:$0xff]  }
 0x49e   : > { %8835 = vmatpush2.bf16.msra.mxu0 %v15840_v18  ;;  %v15866_v18 = vld [vmem:[%s16689_s17 + $0x1864] ss:$8 sps:$4 sm:$0xff]   ;;  %v15887_v41 = vld [vmem:[%s16689_s17 + $0x1934] ss:$8 sps:$4 sm:$0xff]  }
 0x49f   : > { %8888 = vmatpush2.bf16.msra.mxu1 %v15843_v62  ;;  %8836 = vmatprep.subr.bf16.mxu0 %v15848_v40  ;;  %v13006_v62 = vrot.slane %v1947_v20, 11  ;;  %v1981_v40 = vrot.slane %v1976_v47, 4  ;;  %v15896_v24 = vld [vmem:[%s16689_s17 + $0x1814] ss:$8 sps:$4 sm:$0xff]   ;;  %v15905_v33 = vld [vmem:[%s16689_s17 + $0x1904] ss:$8 sps:$4 sm:$0xff]  }
 0x4a0   : > { %8889 = vmatprep.subr.bf16.mxu1 %v15851_v35  ;;  %v1982_v35 = vrot.slane %v1951_v60, 7  ;;  %v15899_v43 = vld [vmem:[%s16689_s17 + $0x1914] ss:$8 sps:$4 sm:$0xff]   ;;  %v15906_v20 = vld [vmem:[%s16689_s17 + $0x18f0] ss:$8 sps:$4 sm:$0xff]  }
 0x4a1   : > { %v18415_v3 = vsel %vm17235_vm3, %v13006_v62, %v1976_v47  ;;  %v15908_v47 = vld [vmem:[%s16689_s17 + $0x18f4] ss:$8 sps:$4 sm:$0xff]   ;;  %v15909_v60 = vld [vmem:[%s16689_s17 + $0x19f0] ss:$8 sps:$4 sm:$0xff]  }
 0x4a2   : > { %8837 = vmatpush2.bf16.msra.mxu0 %v15846_v38  ;;  %v18406_v38 = vsel %vm17235_vm3, %v13005_v36, %v1972_v55  ;;  %v15894_v55 = vld [vmem:[%s16689_s17 + $0x1810] ss:$8 sps:$4 sm:$0xff]   ;;  %v15915_v36 = vld [vmem:[%s16689_s17 + $0x19e0] ss:$8 sps:$4 sm:$0xff]   ;;  %v15920_v1 = vld [vmem:[%s16689_s17 + $0x18d4] ss:$8 sps:$4 sm:$0xff]  }
 0x4a3   : > { %8890 = vmatpush2.bf16.msra.mxu1 %v15849_v56  ;;  %8838 = vmatprep.subr.bf16.mxu0 %v15854_v5  ;;  %v18419_v56 = vsel %vm17235_vm3, %v1981_v40, %v1982_v35  ;;  %v15873_v5 = vld [vmem:[%s16689_s17 + $0x1950] ss:$8 sps:$4 sm:$0xff]   ;;  %v13058_v29 = vcombine.high %v18406_v38, %v18410_v21  ;;  %v15923_v45 = vld [vmem:[%s16689_s17 + $0x19d4] ss:$8 sps:$4 sm:$0xff]   ;;  %v15926_v40 = vld [vmem:[%s16689_s17 + $0x18c4] ss:$8 sps:$4 sm:$0xff]  }
 0x4a4   : > { %8891 = vmatprep.subr.bf16.mxu1 %v15857_v34  ;;  %v15878_v34 = vld [vmem:[%s16689_s17 + $0x1844] ss:$8 sps:$4 sm:$0xff]   ;;  %v13060_v7 = vcombine.high %v18415_v3, %v18419_v56  ;;  %v15921_v62 = vld [vmem:[%s16689_s17 + $0x19d0] ss:$8 sps:$4 sm:$0xff]  }
 0x4a5   : > { %v15929_v35 = vld [vmem:[%s16689_s17 + $0x19c4] ss:$8 sps:$4 sm:$0xff]  }
 0x4a6   : > { %8839 = vmatpush2.bf16.msra.mxu0 %v15852_v14  ;;  %v15876_v14 = vld [vmem:[%s16689_s17 + $0x1840] ss:$8 sps:$4 sm:$0xff]  }
 0x4a7   : > { %8892 = vmatpush2.bf16.msra.mxu1 %v15855_v19  ;;  %8914 = vmatprep.subr.bf16.mxu0 %v15860_v44  ;;  %v15882_v19 = vld [vmem:[%s16689_s17 + $0x1830] ss:$8 sps:$4 sm:$0xff]  }
 0x4a8   : > { %8967 = vmatprep.subr.bf16.mxu1 %v15863_v58  ;;  %v15885_v44 = vld [vmem:[%s16689_s17 + $0x1930] ss:$8 sps:$4 sm:$0xff]   ;;  %v15890_v58 = vld [vmem:[%s16689_s17 + $0x1824] ss:$8 sps:$4 sm:$0xff]  }
 0x4a9   : > { %8841 = vmatmul.mubr.bf16.vlgmr.msra.gmra.mxu0 %v13053_v8  ;;  %v15893_v8 = vld [vmem:[%s16689_s17 + $0x1924] ss:$8 sps:$4 sm:$0xff]  }
 0x4aa   : > { %8894 = vmatmul.mubr.bf16.vlgmr.msra.gmra.mxu1 %v13055_v30  ;;  %8915 = vmatpush1.bf16.msra.mxu0 %v15858_v6  ;;  %v15888_v6 = vld [vmem:[%s16689_s17 + $0x1820] ss:$8 sps:$4 sm:$0xff]   ;;  %v15897_v30 = vld [vmem:[%s16689_s17 + $0x1910] ss:$8 sps:$4 sm:$0xff]  }
 0x4ab   : > { %8968 = vmatpush1.bf16.msra.mxu1 %v15861_v49  ;;  %8916 = vmatprep.subr.bf16.mxu0 %v15866_v18  ;;  %v15891_v49 = vld [vmem:[%s16689_s17 + $0x1920] ss:$8 sps:$4 sm:$0xff]   ;;  %v15911_v18 = vld [vmem:[%s16689_s17 + $0x19f4] ss:$8 sps:$4 sm:$0xff]  }
 0x4ac   : > { %8969 = vmatprep.subr.bf16.mxu1 %v15869_v50  ;;  %8850 = vmatprep.mubr.bf16.mxu0 %v13106_v28  ;;  %v15914_v50 = vld [vmem:[%s16689_s17 + $0x18e4] ss:$8 sps:$4 sm:$0xff]  }
 0x4ad   : > { %8903 = vmatprep.mubr.bf16.mxu1 %v13108_v32  ;;  %v15917_v28 = vld [vmem:[%s16689_s17 + $0x19e4] ss:$8 sps:$4 sm:$0xff]   ;;  %v15912_v32 = vld [vmem:[%s16689_s17 + $0x18e0] ss:$8 sps:$4 sm:$0xff]  }
 0x4ae   : > { %8917 = vmatpush1.bf16.msra.mxu0 %v15864_v12  ;;  %v15918_v12 = vld [vmem:[%s16689_s17 + $0x18d0] ss:$8 sps:$4 sm:$0xff]  }
 0x4af   : > { %8970 = vmatpush1.bf16.msra.mxu1 %v15867_v0  ;;  %8918 = vmatprep.subr.bf16.mxu0 %v15872_v39  ;;  %v15924_v0 = vld [vmem:[%s16689_s17 + $0x18c0] ss:$8 sps:$4 sm:$0xff]  }
 0x4b0   : > { %8971 = vmatprep.subr.bf16.mxu1 %v15875_v10  ;;  %v15927_v39 = vld [vmem:[%s16689_s17 + $0x19c0] ss:$8 sps:$4 sm:$0xff]   ;;  %v15932_v10 = vld [vmem:[%s16689_s17 + $0x18b4] ss:$8 sps:$4 sm:$0xff]  }
 0x4b1   : > { %8851 = vmatmul.mubr.bf16.gmra.mxu0 %v13105_v46  ;;  %v15935_v46 = vld [vmem:[%s16689_s17 + $0x19b4] ss:$8 sps:$4 sm:$0xff]  }
 0x4b2   : > { %8919 = vmatpush1.bf16.msra.mxu0 %v15870_v63  ;;  %8904 = vmatmul.mubr.bf16.gmra.mxu1 %v13107_v2  ;;  %v15930_v63 = vld [vmem:[%s16689_s17 + $0x18b0] ss:$8 sps:$4 sm:$0xff]  }
 0x4b3   : > { %8972 = vmatpush1.bf16.msra.mxu1 %v15873_v5  ;;  %8920 = vmatprep.subr.bf16.mxu0 %v15878_v34  ;;  %v15933_v2 = vld [vmem:[%s16689_s17 + $0x19b0] ss:$8 sps:$4 sm:$0xff]   ;;  %v15938_v5 = vld [vmem:[%s16689_s17 + $0x18a4] ss:$8 sps:$4 sm:$0xff]  }
 0x4b4   : > { %8973 = vmatprep.subr.bf16.mxu1 %v15881_v9  ;;  %8946 = vmatprep.mubr.bf16.mxu0 %v13058_v29  ;;  %v15941_v34 = vld [vmem:[%s16689_s17 + $0x19a4] ss:$8 sps:$4 sm:$0xff]   ;;  %v15936_v9 = vld [vmem:[%s16689_s17 + $0x18a0] ss:$8 sps:$4 sm:$0xff]  }
 0x4b5   : > { %8999 = vmatprep.mubr.bf16.mxu1 %v13060_v7  ;;  %v15939_v29 = vld [vmem:[%s16689_s17 + $0x19a0] ss:$8 sps:$4 sm:$0xff]   ;;  %v15944_v7 = vld [vmem:[%s16689_s17 + $0x1894] ss:$8 sps:$4 sm:$0xff]  }
 0x4b6   : > { %8921 = vmatpush1.bf16.msra.mxu0 %v15876_v14  ;;  %v15947_v14 = vld [vmem:[%s16689_s17 + $0x1994] ss:$8 sps:$4 sm:$0xff]  }
 0x4b7   : > { %8974 = vmatpush1.bf16.msra.mxu1 %v15879_v17  ;;  %8922 = vmatprep.subr.bf16.mxu0 %v15884_v27  ;;  %v1986_v17 = vrot.slane %v18354_v53, 7  ;;  %v1952_v27 = vld [vmem:[#allocation3 + $0x50] sm:$0x88] }
 0x4b8   : > { %8975 = vmatprep.subr.bf16.mxu1 %v15887_v41  ;;  %v1956_v41 = vld [vmem:[#allocation3 + $0x70] sm:$0x77]  ;;  %v15953_v53 = vld [vmem:[%s16689_s17 + $0x1984] ss:$8 sps:$4 sm:$0xff]  }
 0x4ba   : > { %8923 = vmatpush1.bf16.msra.mxu0 %v15882_v19  ;;  %v1990_v19 = vrot.slane %v18359_v25, 7  ;;  %v15948_v25 = vld [vmem:[%s16689_s17 + $0x1880] ss:$8 sps:$4 sm:$0xff]  }
 0x4bb   : > { %8976 = vmatpush1.bf16.msra.mxu1 %v15885_v44  ;;  %8924 = vmatprep.subr.bf16.mxu0 %v15890_v58  ;;  %v1953_v44 = vld [vmem:[#allocation3 + $0x58] sm:$0x88]  ;;  %v1957_v58 = vld [vmem:[#allocation3 + $0x78] sm:$0x77] }
 0x4bc   : > { %8977 = vmatprep.subr.bf16.mxu1 %v15893_v8  ;;  %v15942_v8 = vld [vmem:[%s16689_s17 + $0x1890] ss:$8 sps:$4 sm:$0xff]  }
 0x4be   : > { %8925 = vmatpush1.bf16.msra.mxu0 %v15888_v6  ;;  %v15945_v6 = vld [vmem:[%s16689_s17 + $0x1990] ss:$8 sps:$4 sm:$0xff]  }
 0x4bf   : > { %8978 = vmatpush1.bf16.msra.mxu1 %v15891_v49  ;;  %8926 = vmatprep.subr.bf16.mxu0 %v15896_v24  ;;  %v15950_v49 = vld [vmem:[%s16689_s17 + $0x1884] ss:$8 sps:$4 sm:$0xff]   ;;  %v13007_v24 = vrot.slane %v1952_v27, 11 }
 0x4c0   : > { %8979 = vmatprep.subr.bf16.mxu1 %v15899_v43  ;;  %v1992_v43 = vrot.slane %v1986_v17, 4 }
 0x4c2   : > { %8927 = vmatpush1.bf16.msra.mxu0 %v15894_v55  ;;  %v1993_v55 = vrot.slane %v1956_v41, 7 }
 0x4c3   : > { %8980 = vmatpush1.bf16.msra.mxu1 %v15897_v30  ;;  %8928 = vmatprep.subr.bf16.mxu0 %v15902_v52  ;;  %v13008_v30 = vrot.slane %v1953_v44, 11  ;;  %v1995_v52 = vrot.slane %v1990_v19, 4 }
 0x4c4   : > { %8981 = vmatprep.subr.bf16.mxu1 %v15905_v33  ;;  %v1996_v33 = vrot.slane %v1957_v58, 7 }
 0x4c6   : > { %8929 = vmatpush1.bf16.msra.mxu0 %v15900_v61  ;;  %v15951_v61 = vld [vmem:[%s16689_s17 + $0x1980] ss:$8 sps:$4 sm:$0xff]  }
 0x4c7   : > { %8982 = vmatpush1.bf16.msra.mxu1 %v15903_v51  ;;  %8930 = vmatprep.subr.bf16.mxu0 %v15908_v47  ;;  %v1987_v51 = vsel %vm17235_vm3, %v13007_v24, %v1986_v17  ;;  %v1994_v47 = vsel %vm17235_vm3, %v1992_v43, %v1993_v55 }
 0x4c8   : > { %8983 = vmatprep.subr.bf16.mxu1 %v15911_v18  ;;  %v1991_v18 = vsel %vm17235_vm3, %v13008_v30, %v1990_v19 }
 0x4ca   : > { %8931 = vmatpush2.bf16.msra.mxu0 %v15906_v20  ;;  %v1997_v20 = vsel %vm17235_vm3, %v1995_v52, %v1996_v33 }
 0x4cb   : > { %8984 = vmatpush2.bf16.msra.mxu1 %v15909_v60  ;;  %8932 = vmatprep.subr.bf16.mxu0 %v15914_v50  ;;  %v13057_v60 = vcombine.low %v18406_v38, %v18410_v21  ;;  %v13059_v50 = vcombine.low %v18415_v3, %v18419_v56  ;;  %v18494_v38 = vpop.f32.mrf.mxu1 }
 0x4cc   : > { %8985 = vmatprep.subr.bf16.mxu1 %v15917_v28  ;;  %v13110_v28 = vcombine.high %v1987_v51, %v1994_v47 }
 0x4ce   : > { %8933 = vmatpush2.bf16.msra.mxu0 %v15912_v32  ;;  %v13112_v32 = vcombine.high %v1991_v18, %v1997_v20 }
 0x4cf   : > { %8986 = vmatpush2.bf16.msra.mxu1 %v15915_v36  ;;  %8934 = vmatprep.subr.bf16.mxu0 %v15920_v1  ;;  %v13109_v36 = vcombine.low %v1987_v51, %v1994_v47  ;;  %v13111_v1 = vcombine.low %v1991_v18, %v1997_v20 }
 0x4d0   : > { %8987 = vmatprep.subr.bf16.mxu1 %v15923_v45  ;;  %v18492_v45 = vpop.f32.mrf.mxu0 }
 0x4d2   : > { %8935 = vmatpush2.bf16.msra.mxu0 %v15918_v12  ;;  %v8524_v12 = vpop.f32.mrf.mxu0 }
 0x4d3   : > { %8988 = vmatpush2.bf16.msra.mxu1 %v15921_v62  ;;  %8936 = vmatprep.subr.bf16.mxu0 %v15926_v40  ;;  %v18496_v62 = vpop.f32.mrf.mxu1 }
 0x4d4   : > { %8989 = vmatprep.subr.bf16.mxu1 %v15929_v35  ;;  %v8526_v21 = vpop.f32.mrf.mxu0 }
 0x4d5   : > { %v18498_v56 = vpop.f32.mrf.mxu1 }
 0x4d6   : > { %8937 = vmatpush2.bf16.msra.mxu0 %v15924_v0  ;;  %v8528_v3 = vpop.f32.mrf.mxu0 }
 0x4d7   : > { %8990 = vmatpush2.bf16.msra.mxu1 %v15927_v39  ;;  %8938 = vmatprep.subr.bf16.mxu0 %v15932_v10  ;;  %v18500_v35 = vpop.f32.mrf.mxu1 }
 0x4d8   : > { %8991 = vmatprep.subr.bf16.mxu1 %v15935_v46  ;;  %v8530_v40 = vpop.f32.mrf.mxu0 }
 0x4d9   : > { %v8581_v39 = vpop.f32.mrf.mxu1 }
 0x4da   : > { %8939 = vmatpush2.bf16.msra.mxu0 %v15930_v63  ;;  %v8534_v0 = vpop.f32.mrf.mxu0 }
 0x4db   : > { %8992 = vmatpush2.bf16.msra.mxu1 %v15933_v2  ;;  %8940 = vmatprep.subr.bf16.mxu0 %v15938_v5  ;;  %v8583_v46 = vpop.f32.mrf.mxu1 }
 0x4dc   : > { %8993 = vmatprep.subr.bf16.mxu1 %v15941_v34  ;;  %v8536_v10 = vpop.f32.mrf.mxu0 }
 0x4dd   : > { %v18502_v63 = vpop.f32.mrf.mxu1 }
 0x4de   : > { %8941 = vmatpush2.bf16.msra.mxu0 %v15936_v9  ;;  %v18504_v2 = vpop.f32.mrf.mxu0 }
 0x4df   : > { %8994 = vmatpush2.bf16.msra.mxu1 %v15939_v29  ;;  %8942 = vmatprep.subr.bf16.mxu0 %v15944_v7  ;;  %v18506_v5 = vpop.f32.mrf.mxu1 }
 0x4e0   : > { %8995 = vmatprep.subr.bf16.mxu1 %v15947_v14  ;;  %v18508_v34 = vpop.f32.mrf.mxu0 }
 0x4e1   : > { %v18512_v29 = vpop.f32.mrf.mxu1 }
 0x4e2   : > { %8943 = vmatpush2.bf16.msra.mxu0 %v15942_v8 }
 0x4e3   : > { %8996 = vmatpush2.bf16.msra.mxu1 %v15945_v6  ;;  %8944 = vmatprep.subr.bf16.mxu0 %v15950_v49  ;;  %v18516_v14 = vpop.f32.mrf.mxu1 }
 0x4e4   : > { %8997 = vmatprep.subr.bf16.mxu1 %v15953_v53 }
 0x4e6   : > { %8945 = vmatpush2.bf16.msra.mxu0 %v15948_v25 }
 0x4e7   : > { %8998 = vmatpush2.bf16.msra.mxu1 %v15951_v61 }
 0x4e9   : > { %8947 = vmatmul.mubr.bf16.vlgmr.msra.gmra.mxu0 %v13057_v60  ;;  %v18510_v9 = vpop.f32.mrf.mxu0 }
 0x4ea   : > { %9000 = vmatmul.mubr.bf16.vlgmr.msra.gmra.mxu1 %v13059_v50  ;;  %8956 = vmatprep.mubr.bf16.mxu0 %v13110_v28  ;;  %v18518_v17 = vpop.f32.mrf.mxu1 }
 0x4eb   : > { %9009 = vmatprep.mubr.bf16.mxu1 %v13112_v32  ;;  %v18514_v7 = vpop.f32.mrf.mxu0 }
 0x4ec   : > { %v18520_v41 = vpop.f32.mrf.mxu1 }
 0x4ed   : > { %v8634_v27 = vpop.f32.mrf.mxu0 }
 0x4ee   : > { %v8687_v44 = vpop.f32.mrf.mxu1 }
 0x4ef   : > { %v8636_v19 = vpop.f32.mrf.mxu0 }
 0x4f0   : > { %v18522_v8 = vpop.f32.mrf.mxu1 }
 0x4f1   : > { %8957 = vmatmul.mubr.bf16.gmra.mxu0 %v13109_v36  ;;  %v8640_v58 = vpop.f32.mrf.mxu0 }
 0x4f2   : > { %9010 = vmatmul.mubr.bf16.gmra.mxu1 %v13111_v1  ;;  %v18526_v49 = vpop.f32.mrf.mxu1 }
 0x4f3   : > { %v18524_v6 = vpop.f32.mrf.mxu0 }
 0x4f4   : > { %v18530_v43 = vpop.f32.mrf.mxu1 }
 0x4f5   : > { %v18528_v24 = vpop.f32.mrf.mxu0 }
 0x4f6   : > { %v18534_v53 = vpop.f32.mrf.mxu1 }
 0x4f7   : > { %v18532_v55 = vpop.f32.mrf.mxu0 }
 0x4f8   : > { %v18538_v52 = vpop.f32.mrf.mxu1 }
 0x4f9   : > { %19388 = vst [vmem:[#allocation31_spill] sm:$0xff] %v18538_v52 }
 0x529   : > { %v18536_v30 = vpop.f32.mrf.mxu0 }
 0x52a   : > { %v18542_v25 = vpop.f32.mrf.mxu1 }
 0x52b   : > { %v18540_v33 = vpop.f32.mrf.mxu0 }
 0x52c   : > { %v18544_v51 = vpop.f32.mrf.mxu1 }
 0x52d   : > { %v8740_v61 = vpop.f32.mrf.mxu0  ;;  %19389 = vst [vmem:[#allocation32_spill] sm:$0xff] %v18544_v51 }
 0x52e   : > { %v18546_v18 = vpop.f32.mrf.mxu1 }
 0x52f   : > { %v8742_v47 = vpop.f32.mrf.mxu0 }
 0x530   : > { %v18550_v60 = vpop.f32.mrf.mxu1 }
 0x531   : > { %v18548_v20 = vpop.f32.mrf.mxu0  ;;  %19390 = vst [vmem:[#allocation33_spill] sm:$0xff] %v18550_v60 }
 0x532   : > { %v18552_v50 = vpop.f32.mrf.mxu1 }
 0x533   : > { %19391 = vst [vmem:[#allocation34_spill] sm:$0xff] %v18552_v50  ;;  %v18554_v28 = vpop.f32.mrf.mxu0 }
 0x534   : > { %19392 = vst [vmem:[#allocation35_spill] sm:$0xff] %v18554_v28  ;;  %v18556_v32 = vpop.f32.mrf.mxu1 }
 0x535   : > { %19393 = vst [vmem:[#allocation36_spill] sm:$0xff] %v18556_v32  ;;  %v18558_v36 = vpop.f32.mrf.mxu0  ;;  %v8429_v32 = vadd.f32 %v18311_v13, %v18174_v42 }
 0x536   : > { %19394 = vst [vmem:[#allocation37_spill] sm:$0xff] %v18558_v36  ;;  %v18560_v1 = vpop.f32.mrf.mxu1  ;;  %v8529_v36 = vadd.f32 %v8528_v3, %v18305_v57 }
 0x537   : > { %19395 = vst [vmem:[#allocation38_spill] sm:$0xff] %v18560_v1  ;;  %v18562_v4 = vpop.f32.mrf.mxu0  ;;  %v8433_v1 = vadd.f32 %v8432_v16, %v18184_v11 }
 0x538   : > { %19396 = vst [vmem:[#allocation39_spill] sm:$0xff] %v18562_v4  ;;  %v18566_v48 = vpop.f32.mrf.mxu1  ;;  %v8582_v60 = vadd.f32 %v8581_v39, %v8529_v36 }
 0x539   : > { %19398 = vst [vmem:[#allocation41_spill] sm:$0xff] %v18566_v48  ;;  %v8525_v48 = vadd.f32 %v8524_v12, %v18275_v22  ;;  %v8486_v57 = vadd.f32 %v18494_v38, %v8433_v1 }
 0x53a   : > { %v8635_v22 = vadd.f32 %v8634_v27, %v8582_v60  ;;  %v19407_v36 = vld [vmem:[#allocation34_spill] sm:$0xff] }
 0x53b   : > { %v8578_v11 = vadd.f32 %v18498_v56, %v8525_v48 }
 0x53c   : > { %v8688_v56 = vadd.f32 %v8687_v44, %v8635_v22 }
 0x569   : > { %v18564_v59 = vpop.f32.mrf.mxu0 }
 0x56a   : > { %19397 = vst [vmem:[#allocation40_spill] sm:$0xff] %v18564_v59  ;;  %v18568_v26 = vpop.f32.mrf.mxu1  ;;  %v8482_v59 = vadd.f32 %v18317_v31, %v8429_v32  ;;  %v8537_v31 = vadd.f32 %v8536_v10, %v18324_v23  ;;  %v19406_v32 = vld [vmem:[#allocation32_spill] sm:$0xff] }
 0x56b   : > { %19399 = vst [vmem:[#allocation42_spill] sm:$0xff] %v18568_v26  ;;  %v18570_v51 = vpop.f32.mrf.mxu0  ;;  %v8531_v26 = vadd.f32 %v8530_v40, %v18315_v15 }
 0x56c   : > { %19400 = vst [vmem:[#allocation43_spill] sm:$0xff] %v18570_v51  ;;  %v18572_v52 = vpop.f32.mrf.mxu1  ;;  %v8527_v51 = vadd.f32 %v8526_v21, %v18291_v54  ;;  %v8535_v42 = vadd.f32 %v8534_v0, %v8482_v59 }
 0x56d   : > { %19401 = vst [vmem:[#allocation44_spill] sm:$0xff] %v18572_v52  ;;  %v8846_v50 = vpop.f32.mrf.mxu0  ;;  %v8435_v52 = vadd.f32 %v18492_v45, %v18187_v37  ;;  %v8584_v16 = vadd.f32 %v8583_v46, %v8531_v26  ;;  %v8539_v37 = vadd.f32 %v18504_v2, %v8486_v57  ;;  %v8631_v45 = vadd.f32 %v18510_v9, %v8578_v11 }
 0x56e   : > { %v18577_v28 = vpop.f32.mrf.mxu1  ;;  %v8580_v54 = vadd.f32 %v18500_v35, %v8527_v51  ;;  %v8588_v59 = vadd.f32 %v18502_v63, %v8535_v42  ;;  %v8590_v26 = vadd.f32 %v18506_v5, %v8537_v31  ;;  %v8741_v46 = vadd.f32 %v8740_v61, %v8688_v56  ;;  %v19410_v31 = vld [vmem:[#allocation36_spill] sm:$0xff] }
 0x56f   : > { %v8848_v4 = vpop.f32.mrf.mxu0  ;;  %v8488_v15 = vadd.f32 %v18496_v62, %v8435_v52  ;;  %v8637_v38 = vadd.f32 %v8636_v19, %v8584_v16  ;;  %v8592_v62 = vadd.f32 %v18512_v29, %v8539_v37  ;;  %v8684_v39 = vadd.f32 %v18518_v17, %v8631_v45  ;;  %v19412_v45 = vld [vmem:[#allocation38_spill] sm:$0xff] }
 0x570   : > { %v18586_v13 = vpop.f32.mrf.mxu1  ;;  %v8633_v23 = vadd.f32 %v18514_v7, %v8580_v54  ;;  %v8641_v40 = vadd.f32 %v8640_v58, %v8588_v59  ;;  %v8643_v10 = vadd.f32 %v18524_v6, %v8590_v26  ;;  %v8794_v58 = vadd.f32 %v18546_v18, %v8741_v46 }
 0x571   : > { %v8852_v3 = vpop.f32.mrf.mxu0  ;;  %v8541_v21 = vadd.f32 %v18508_v34, %v8488_v15  ;;  %v8690_v35 = vadd.f32 %v18522_v8, %v8637_v38  ;;  %v8645_v2 = vadd.f32 %v18528_v24, %v8592_v62  ;;  %v8737_v7 = vadd.f32 %v18536_v30, %v8684_v39  ;;  %v19403_v30 = vld [vmem:[#allocation35_spill] sm:$0xff]  ;;  %v19408_v1 = vld [vmem:[#allocation40_spill] sm:$0xff]  ;;  %v19414_v39 = vld [vmem:[#allocation41_spill] sm:$0xff] }
 0x572   : > { %v18591_v12 = vpop.f32.mrf.mxu1  ;;  %v8686_v5 = vadd.f32 %v18520_v41, %v8633_v23  ;;  %v8694_v9 = vadd.f32 %v18526_v49, %v8641_v40  ;;  %v8696_v19 = vadd.f32 %v18530_v43, %v8643_v10  ;;  %v19402_v49 = vld [vmem:[#allocation33_spill] sm:$0xff]  ;;  %v8847_v61 = vadd.f32 %v8846_v50, %v8794_v58  ;;  %v19413_v26 = vld [vmem:[#allocation42_spill] sm:$0xff] }
 0x573   : > { %v8854_v48 = vpop.f32.mrf.mxu0  ;;  %v8594_v63 = vadd.f32 %v18516_v14, %v8541_v21  ;;  %v8743_v27 = vadd.f32 %v8742_v47, %v8690_v35  ;;  %v8698_v8 = vadd.f32 %v18534_v53, %v8645_v2  ;;  %v8790_v41 = vadd.f32 %v18542_v25, %v8737_v7  ;;  %v19405_v43 = vld [vmem:[#allocation37_spill] sm:$0xff]  ;;  %v19409_v25 = vld [vmem:[#allocation39_spill] sm:$0xff] }
 0x574   : > { %v8907_v0 = vpop.f32.mrf.mxu1  ;;  %v8739_v44 = vadd.f32 %v18540_v33, %v8686_v5  ;;  %v8747_v14 = vadd.f32 %v18548_v20, %v8694_v9  ;;  %v8749_v52 = vadd.f32 %v19403_v30, %v8696_v19  ;;  %v19411_v50 = vld [vmem:[#allocation43_spill] sm:$0xff]  ;;  %v8900_v37 = vadd.f32 %v18577_v28, %v8847_v61 }
 0x575   : > { %v8856_v34 = vpop.f32.mrf.mxu0  ;;  %v8647_v17 = vadd.f32 %v18532_v55, %v8594_v63  ;;  %v8796_v24 = vadd.f32 %v19402_v49, %v8743_v27  ;;  %v19404_v55 = vld [vmem:[#allocation31_spill] sm:$0xff]  ;;  %v8751_v60 = vadd.f32 %v19405_v43, %v8698_v8  ;;  %v8843_v53 = vadd.f32 %v19408_v1, %v8790_v41  ;;  %v19415_v63 = vld [vmem:[#allocation44_spill] sm:$0xff] }
 0x576   : > { %v8909_v29 = vpop.f32.mrf.mxu1  ;;  %v8792_v18 = vadd.f32 %v19406_v32, %v8739_v44  ;;  %v8800_v20 = vadd.f32 %v19407_v36, %v8747_v14  ;;  %v8802_v22 = vadd.f32 %v19410_v31, %v8749_v52 }
 0x577   : > { %v8858_v6 = vpop.f32.mrf.mxu0  ;;  %v8700_v47 = vadd.f32 %v19404_v55, %v8647_v17  ;;  %v8849_v42 = vadd.f32 %v8848_v4, %v8796_v24  ;;  %v8804_v38 = vadd.f32 %v19412_v45, %v8751_v60  ;;  %v8896_v23 = vadd.f32 %v19413_v26, %v8843_v53 }
 0x578   : > { %v8911_v51 = vpop.f32.mrf.mxu1  ;;  %v8845_v15 = vadd.f32 %v19411_v50, %v8792_v18  ;;  %v8853_v54 = vadd.f32 %v8852_v3, %v8800_v20  ;;  %v8855_v4 = vadd.f32 %v8854_v48, %v8802_v22 }
 0x579   : > { %v8753_v11 = vadd.f32 %v19409_v25, %v8700_v47  ;;  %v8902_v56 = vadd.f32 %v18586_v13, %v8849_v42  ;;  %v8857_v10 = vadd.f32 %v8856_v34, %v8804_v38 }
 0x57a   : > { %v8898_v2 = vadd.f32 %v19415_v63, %v8845_v15  ;;  %v8906_v28 = vadd.f32 %v18591_v12, %v8853_v54  ;;  %v8908_v17 = vadd.f32 %v8907_v0, %v8855_v4  ;;  %v19416_v54 = vlaneseq }
 0x57b   : > { %v8806_v35 = vadd.f32 %v19414_v39, %v8753_v11  ;;  %v8910_v58 = vadd.f32 %v8909_v29, %v8857_v10 }
 0x57d   : > { %v8859_v7 = vadd.f32 %v8858_v6, %v8806_v35 }
 0x57f   : > { %v8912_v24 = vadd.f32 %v8911_v51, %v8859_v7 }
 0x5a9   : > { %v8948_v33 = vpop.f32.mrf.mxu0 }
 0x5aa   : > { %v9001_v57 = vpop.f32.mrf.mxu1  ;;  %v8949_v3 = vadd.f32 %v8948_v33, %v8896_v23 }
 0x5ab   : > { %v8950_v16 = vpop.f32.mrf.mxu0 }
 0x5ac   : > { %v9003_v59 = vpop.f32.mrf.mxu1  ;;  %v8951_v19 = vadd.f32 %v8950_v16, %v8898_v2  ;;  %v18636_v8 = vadd.f32 %v9001_v57, %v8949_v3 }
 0x5ad   : > { %v8952_v21 = vpop.f32.mrf.mxu0 }
 0x5ae   : > { %v8953_v40 = vadd.f32 %v8952_v21, %v8900_v37  ;;  %v9005_v62 = vpop.f32.mrf.mxu1  ;;  %v9004_v6 = vadd.f32 %v9003_v59, %v8951_v19  ;;  %v18649_v59 = vand.u32 127, %v19416_v54 }
 0x5af   : > { %v8954_v46 = vpop.f32.mrf.mxu0 }
 0x5b0   : > { %v8955_v5 = vadd.f32 %v8954_v46, %v8902_v56  ;;  %v9007_v9 = vpop.f32.mrf.mxu1  ;;  %v18634_v44 = vadd.f32 %v9005_v62, %v8953_v40  ;;  %vm9044_vm5 = vcmp.lt.s32.totalorder %v18649_v59, 16  ;;  %vm9053_vm8 = vcmp.lt.s32.totalorder %v18649_v59, 32 }
 0x5b1   : > { %v8958_v27 = vpop.f32.mrf.mxu0  ;;  %vm9062_vm10 = vcmp.lt.s32.totalorder %v18649_v59, 64 }
 0x5b2   : > { %v8959_v13 = vadd.f32 %v8958_v27, %v8906_v28  ;;  %v9011_v48 = vpop.f32.mrf.mxu1  ;;  %v18638_v34 = vadd.f32 %v9007_v9, %v8955_v5  ;;  %v9020_v0 = vadd.f32 %v18634_v44, %v18636_v8  ;;  %v19417_v27 = vld [vmem:[#allocation29_spill] sm:$0xff] }
 0x5b3   : > { %v8960_v14 = vpop.f32.mrf.mxu0 }
 0x5b4   : > { %v18640_v41 = vadd.f32 %v9011_v48, %v8959_v13  ;;  %v8961_v12 = vadd.f32 %v8960_v14, %v8908_v17  ;;  %v9013_v49 = vpop.f32.mrf.mxu1  ;;  %v9029_v29 = vadd.f32 %v18638_v34, %v9004_v6 }
 0x5b5   : > { %v8962_v30 = vpop.f32.mrf.mxu0 }
 0x5b6   : > { %v9014_v52 = vadd.f32 %v9013_v49, %v8961_v12  ;;  %v8963_v61 = vadd.f32 %v8962_v30, %v8910_v58  ;;  %v9015_v55 = vpop.f32.mrf.mxu1  ;;  %v9021_v43 = vadd.f32 %v9020_v0, %v18640_v41 }
 0x5b7   : > { %v8964_v47 = vpop.f32.mrf.mxu0 }
 0x5b8   : > { %v9016_v60 = vadd.f32 %v9015_v55, %v8963_v61  ;;  %v8965_v33 = vadd.f32 %v8964_v47, %v8912_v24  ;;  %v9017_v32 = vpop.f32.mrf.mxu1  ;;  %v9030_v18 = vadd.f32 %v9029_v29, %v9014_v52 }
 0x5ba   : > { %v9022_v36 = vadd.f32 %v9021_v43, %v9016_v60  ;;  %v9018_v20 = vadd.f32 %v9017_v32, %v8965_v33 }
 0x5bc   : > { %v9023_v51 = vrot.slane %v9022_v36, 4  ;;  %v9031_v1 = vadd.f32 %v9030_v18, %v9018_v20 }
 0x5be   : > { %v9024_v53 = vadd.f32 %v9023_v51, %v9022_v36  ;;  %v9032_v42 = vrot.slane %v9031_v1, 4 }
 0x5c0   : > { %v9033_v57 = vadd.f32 %v9032_v42, %v9031_v1  ;;  %v9025_v25 = vrot.slane %v9024_v53, 2 }
 0x5c2   : > { %v9034_v11 = vrot.slane %v9033_v57, 2  ;;  %v9026_v16 = vadd.f32 %v9025_v25, %v9024_v53 }
 0x5c4   : > { %v9027_v31 = vrot.slane %v9026_v16, 1  ;;  %v9035_v22 = vadd.f32 %v9034_v11, %v9033_v57 }
 0x5c6   : > { %v9028_v50 = vadd.f32 %v9027_v31, %v9026_v16  ;;  %v9036_v15 = vrot.slane %v9035_v22, 1 }
 0x5c8   : > { %9038 = vrot.lane.b32.xlu0 %v9028_v50, %s16396_s27  ;;  %v9037_v37 = vadd.f32 %v9036_v15, %v9035_v22 }
 0x5cc   : > { %9040 = vrot.lane.b32.xlu0 %v9037_v37, %s16396_s27 }
 0x63a   : > { %v9039_v45 = vpop.permute.xlu0 %9038 }
 0x63e   : > { %v9041_v38 = vpop.permute.xlu0 %9040 }
 0x63f   : > { %v9046_v21 = vsel %vm9044_vm5, %v9041_v38, %v9039_v45  ;;  %v9045_v23 = vsel %vm9044_vm5, %v9039_v45, %v9041_v38 }
 0x640   : > { %v9047_v26 = vadd.f32 %v9046_v21, %v9028_v50  ;;  %v9048_v56 = vadd.f32 %v9045_v23, %v9037_v37 }
 0x642   : > { %9049 = vrot.lane.b32.xlu1 %v9047_v26, %s16397_s25 }
 0x646   : > { %9051 = vrot.lane.b32.xlu1 %v9048_v56, %s16397_s25 }
 0x6b4   : > { %v9050_v4 = vpop.permute.xlu1 %9049 }
 0x6b8   : > { %v9052_v40 = vpop.permute.xlu1 %9051 }
 0x6b9   : > { %v9054_v62 = vsel %vm9053_vm8, %v9050_v4, %v9052_v40  ;;  %v9055_v39 = vsel %vm9053_vm8, %v9052_v40, %v9050_v4 }
 0x6ba   : > { %v9056_v35 = vadd.f32 %v9055_v39, %v9047_v26  ;;  %v9057_v10 = vadd.f32 %v9054_v62, %v9048_v56 }
 0x6bc   : > { %9058 = vrot.lane.b32.xlu0 %v9056_v35, %s16398_s26  ;;  %9060 = vrot.lane.b32.xlu1 %v9057_v10, %s16398_s26 }
 0x72e   : > { %v9059_v46 = vpop.permute.xlu0 %9058  ;;  %v9061_v63 = vpop.permute.xlu1 %9060 }
 0x72f   : > { %v9063_v2 = vsel %vm9062_vm10, %v9059_v46, %v9061_v63  ;;  %v9064_v28 = vsel %vm9062_vm10, %v9061_v63, %v9059_v46 }
 0x730   : > { %v9065_v3 = vadd.f32 %v9064_v28, %v9056_v35  ;;  %v9066_v5 = vadd.f32 %v9063_v2, %v9057_v10  ;;  %v9147_v2 = vld [vmem:[%s486_s22] sm:$0x3]  ;;  %v9167_v28 = vld [vmem:[%s495_s29] sm:$0x3] }
 0x731   : > { %v9172_v59 = vrot.slane %v9167_v28, %v19417_v27 }
 0x732   : > { %v9067_v9 = vadd.f32 %v9066_v5, %v9065_v3  ;;  %v9152_v5 = vrot.slane %v9147_v2, %v19417_v27 }
 0x734   : > { %v9068_v7 = vmul.f32 0.001953125, %v9067_v9  ;;  %v19418_v9 = vld [vmem:[#allocation30_spill] sm:$0xff] }
 0x736   : > { %v9072_v17 = vrot.slane %v9068_v7, %v19417_v27  ;;  %v9156_v7 = vrot.slane %v9147_v2, %v19418_v9 }
 0x738   : > { %v18671_v19 = vsub.f32 %v9004_v6, %v9072_v17  ;;  %v18674_v13 = vsub.f32 %v18638_v34, %v9072_v17  ;;  %v18676_v48 = vsub.f32 %v9014_v52, %v9072_v17  ;;  %v18679_v58 = vsub.f32 %v18636_v8, %v9072_v17 }
 0x739   : > { %v18682_v14 = vsub.f32 %v18634_v44, %v9072_v17  ;;  %v18685_v12 = vsub.f32 %v18640_v41, %v9072_v17  ;;  %v18687_v49 = vsub.f32 %v9018_v20, %v9072_v17  ;;  %v18693_v30 = vsub.f32 %v9016_v60, %v9072_v17 }
 0x73a   : > { %v9082_v24 = vmul.f32 %v18671_v19, %v18671_v19  ;;  %v9084_v34 = vmul.f32 %v18674_v13, %v18674_v13  ;;  %v9081_v8 = vmul.f32 %v18679_v58, %v18679_v58  ;;  %v9086_v41 = vmul.f32 %v18676_v48, %v18676_v48 }
 0x73b   : > { %v9083_v44 = vmul.f32 %v18682_v14, %v18682_v14  ;;  %v9085_v0 = vmul.f32 %v18685_v12, %v18685_v12  ;;  %v9088_v61 = vmul.f32 %v18687_v49, %v18687_v49  ;;  %v9087_v47 = vmul.f32 %v18693_v30, %v18693_v30 }
 0x73c   : > { %v9098_v6 = vadd.f32 %v9084_v34, %v9082_v24  ;;  %v9176_v24 = vrot.slane %v9167_v28, %v19418_v9 }
 0x73d   : > { %v9089_v52 = vadd.f32 %v9083_v44, %v9081_v8 }
 0x73e   : > { %v9099_v55 = vadd.f32 %v9098_v6, %v9086_v41 }
 0x73f   : > { %v9090_v29 = vadd.f32 %v9089_v52, %v9085_v0 }
 0x740   : > { %v9100_v43 = vadd.f32 %v9099_v55, %v9088_v61 }
 0x741   : > { %v9091_v60 = vadd.f32 %v9090_v29, %v9087_v47 }
 0x742   : > { %v9101_v33 = vrot.slane %v9100_v43, 4 }
 0x743   : > { %v9092_v32 = vrot.slane %v9091_v60, 4 }
 0x744   : > { %v9102_v18 = vadd.f32 %v9101_v33, %v9100_v43 }
 0x745   : > { %v9093_v36 = vadd.f32 %v9092_v32, %v9091_v60 }
 0x746   : > { %v9103_v20 = vrot.slane %v9102_v18, 2 }
 0x747   : > { %v9094_v51 = vrot.slane %v9093_v36, 2 }
 0x748   : > { %v9104_v1 = vadd.f32 %v9103_v20, %v9102_v18 }
 0x749   : > { %v9095_v53 = vadd.f32 %v9094_v51, %v9093_v36 }
 0x74a   : > { %v9105_v42 = vrot.slane %v9104_v1, 1 }
 0x74b   : > { %v9096_v57 = vrot.slane %v9095_v53, 1 }
 0x74c   : > { %v9106_v25 = vadd.f32 %v9105_v42, %v9104_v1 }
 0x74d   : > { %v9097_v11 = vadd.f32 %v9096_v57, %v9095_v53 }
 0x74e   : > { %9109 = vrot.lane.b32.xlu1 %v9106_v25, %s16396_s27 }
 0x74f   : > { %9107 = vrot.lane.b32.xlu0 %v9097_v11, %s16396_s27 }
 0x7c0   : > { %v9110_v16 = vpop.permute.xlu1 %9109 }
 0x7c1   : > { %v9108_v31 = vpop.permute.xlu0 %9107 }
 0x7c2   : > { %v9111_v22 = vsel %vm9044_vm5, %v9108_v31, %v9110_v16  ;;  %v9112_v50 = vsel %vm9044_vm5, %v9110_v16, %v9108_v31 }
 0x7c3   : > { %v9113_v15 = vadd.f32 %v9112_v50, %v9097_v11  ;;  %v9114_v37 = vadd.f32 %v9111_v22, %v9106_v25 }
 0x7c5   : > { %9115 = vrot.lane.b32.xlu0 %v9113_v15, %s16397_s25  ;;  %9117 = vrot.lane.b32.xlu1 %v9114_v37, %s16397_s25 }
 0x837   : > { %v9116_v54 = vpop.permute.xlu0 %9115  ;;  %v9118_v45 = vpop.permute.xlu1 %9117 }
 0x838   : > { %v9119_v38 = vsel %vm9053_vm8, %v9116_v54, %v9118_v45  ;;  %v9120_v21 = vsel %vm9053_vm8, %v9118_v45, %v9116_v54 }
 0x839   : > { %v9121_v26 = vadd.f32 %v9120_v21, %v9113_v15  ;;  %v9122_v23 = vadd.f32 %v9119_v38, %v9114_v37 }
 0x83b   : > { %9123 = vrot.lane.b32.xlu0 %v9121_v26, %s16398_s26  ;;  %9125 = vrot.lane.b32.xlu1 %v9122_v23, %s16398_s26 }
 0x8ad   : > { %v9124_v56 = vpop.permute.xlu0 %9123  ;;  %v9126_v4 = vpop.permute.xlu1 %9125 }
 0x8ae   : > { %v9127_v40 = vsel %vm9062_vm10, %v9124_v56, %v9126_v4  ;;  %v9128_v62 = vsel %vm9062_vm10, %v9126_v4, %v9124_v56 }
 0x8af   : > { %v9129_v39 = vadd.f32 %v9128_v62, %v9121_v26  ;;  %v9130_v35 = vadd.f32 %v9127_v40, %v9122_v23 }
 0x8b1   : > { %v9131_v10 = vadd.f32 %v9130_v35, %v9129_v39 }
 0x8b3   : > { %v9132_v46 = vmul.f32 0.001953125, %v9131_v10 }
 0x8b5   : > { %v9133_v63 = vadd.f32 1e-05, %v9132_v46 }
 0x8b7   : > { %15954 = vrsqrt.f32 %v9133_v63 }
 0x8c4   : > { %v15955_v3 = vpop.eup %15954 }
 0x8c5   : > { %v9138_v17 = vrot.slane %v15955_v3, %v19417_v27 }
 0x8c7   : > { %v9139_v34 = vmul.f32 %v9138_v17, %v18679_v58  ;;  %v9140_v8 = vmul.f32 %v9138_v17, %v18671_v19  ;;  %v9141_v44 = vmul.f32 %v9138_v17, %v18682_v14  ;;  %v9142_v41 = vmul.f32 %v9138_v17, %v18674_v13 }
 0x8c8   : > { %v9143_v6 = vmul.f32 %v9138_v17, %v18685_v12  ;;  %v9144_v0 = vmul.f32 %v9138_v17, %v18676_v48  ;;  %v9145_v52 = vmul.f32 %v9138_v17, %v18693_v30  ;;  %v9146_v61 = vmul.f32 %v9138_v17, %v18687_v49  ;;  %9190 = sbr.rel (%p13945_p11) target bundleno = 2259 (0x8d3), region = 104 }
 0x8c9   : > { %v9159_v55 = vmul.f32 %v9152_v5, %v9139_v34  ;;  %v9160_v27 = vmul.f32 %v9156_v7, %v9140_v8  ;;  %v9161_v47 = vmul.f32 %v9152_v5, %v9141_v44  ;;  %v9162_v29 = vmul.f32 %v9156_v7, %v9142_v41 }
 0x8ca   : > { %v9163_v43 = vmul.f32 %v9152_v5, %v9143_v6  ;;  %v9164_v58 = vmul.f32 %v9156_v7, %v9144_v0  ;;  %v9165_v60 = vmul.f32 %v9152_v5, %v9145_v52  ;;  %v9166_v19 = vmul.f32 %v9156_v7, %v9146_v61 }
 0x8cb   : > { %v18742_v33 = vadd.f32 %v9172_v59, %v9159_v55  ;;  %v9180_v14 = vadd.f32 %v9176_v24, %v9160_v27  ;;  %v18744_v13 = vadd.f32 %v9172_v59, %v9161_v47  ;;  %v9182_v12 = vadd.f32 %v9176_v24, %v9162_v29 }
 0x8cc   : > { %v18746_v32 = vadd.f32 %v9172_v59, %v9163_v43  ;;  %v18748_v48 = vadd.f32 %v9176_v24, %v9164_v58  ;;  %v18750_v30 = vadd.f32 %v9172_v59, %v9165_v60  ;;  %v18752_v49 = vadd.f32 %v9176_v24, %v9166_v19 }
 0x8cd   : > { %v9191_v18 = vmax.f32 %v18742_v33, 0.0  ;;  %v9192_v36 = vmax.f32 %v9180_v14, 0.0  ;;  %v9193_v20 = vmax.f32 %v18744_v13, 0.0  ;;  %v9194_v51 = vmax.f32 %v9182_v12, 0.0 }
 0x8ce   : > { %v9195_v1 = vmax.f32 %v18746_v32, 0.0  ;;  %v9196_v53 = vmax.f32 %v18748_v48, 0.0  ;;  %v9197_v42 = vmax.f32 %v18750_v30, 0.0  ;;  %v9198_v57 = vmax.f32 %v18752_v49, 0.0 }
 0x8cf   : > { %9199 = vst [vmem:[#allocation2 + $0x30] sm:$0xff] %v9191_v18  ;;  %9200 = vst [vmem:[#allocation2] sm:$0xff] %v9192_v36 }
 0x8d0   : > { %9201 = vst [vmem:[#allocation2 + $0x18] sm:$0xff] %v9193_v20  ;;  %9202 = vst [vmem:[#allocation2 + $0x10] sm:$0xff] %v9194_v51 }
 0x8d1   : > { %9203 = vst [vmem:[#allocation2 + $0x8] sm:$0xff] %v9195_v1  ;;  %9204 = vst [vmem:[#allocation2 + $0x20] sm:$0xff] %v9196_v53 }
 0x8d2   : > { %9205 = vst [vmem:[#allocation2 + $0x28] sm:$0xff] %v9197_v42  ;;  %9206 = vst [vmem:[#allocation2 + $0x38] sm:$0xff] %v9198_v57 }
 0x8d3 PF: > { %p13946_p12 = scmp.ne.s32.totalorder %s16485_s10, 3 }
 0x8d4   : > { %s19419_s12 = sld [smem:[#allocation47_spill]] (!%p13946_p12) }
 0x8d5   : > { %9210 = sbr.rel (%p13946_p12) target bundleno = 2946 (0xb82), region = 108 }
 0x8da   : > { %v9327_v25 = vld [vmem:[#allocation15 + $0x380] sm:$0xff]  ;;  %v9328_v16 = vld [vmem:[#allocation15 + $0x388] sm:$0xff]  ;;  %v18762_v31 = vpack.c.bf16 %v9182_v12, %v9180_v14  ;;  %vm12781_vm11 = vcmask 130048  }
 0x8db   : > { %v9335_v11 = vld [vmem:[#allocation15 + $0x3c0] sm:$0xff]  ;;  %v9336_v50 = vld [vmem:[#allocation15 + $0x3c8] sm:$0xff] }
 0x8dc   : > { %v14060_v22 = vcombine.high %v9327_v25, %v9335_v11  ;;  %v14059_v15 = vcombine.low %v9327_v25, %v9335_v11  ;;  %v9311_v37 = vld [vmem:[#allocation15 + $0x300] sm:$0xff]  ;;  %v14062_v45 = vcombine.high %v9328_v16, %v9336_v50  ;;  %v14061_v38 = vcombine.low %v9328_v16, %v9336_v50  ;;  %v9312_v26 = vld [vmem:[#allocation15 + $0x308] sm:$0xff]  ;;  %10867 = vmatprep.mubr.bf16.mxu0 %v18762_v31 }
 0x8dd   : > { %v9319_v54 = vld [vmem:[#allocation15 + $0x340] sm:$0xff]  ;;  %v9320_v23 = vld [vmem:[#allocation15 + $0x348] sm:$0xff]  ;;  %10920 = vmatprep.mubr.bf16.mxu1 %v18762_v31 }
 0x8de   : > { %v14044_v21 = vcombine.high %v9311_v37, %v9319_v54  ;;  %v9295_v56 = vld [vmem:[#allocation15 + $0x280] sm:$0xff]  ;;  %10835 = vmatprep.subr.bf16.mxu0 %v14060_v22  ;;  %v14046_v4 = vcombine.high %v9312_v26, %v9320_v23  ;;  %v9296_v62 = vld [vmem:[#allocation15 + $0x288] sm:$0xff]  ;;  %10888 = vmatprep.subr.bf16.mxu1 %v14062_v45  ;;  %v14043_v35 = vcombine.low %v9311_v37, %v9319_v54 }
 0x8df   : > { %v9303_v40 = vld [vmem:[#allocation15 + $0x2c0] sm:$0xff]  ;;  %v9304_v39 = vld [vmem:[#allocation15 + $0x2c8] sm:$0xff]  ;;  %10836 = vmatpush1.bf16.msra.mxu0 %v14059_v15  ;;  %10889 = vmatpush1.bf16.msra.mxu1 %v14061_v38  ;;  %v14045_v10 = vcombine.low %v9312_v26, %v9320_v23 }
 0x8e0   : > { %10837 = vmatprep.subr.bf16.mxu0 %v14044_v21  ;;  %v14028_v46 = vcombine.high %v9295_v56, %v9303_v40  ;;  %10890 = vmatprep.subr.bf16.mxu1 %v14046_v4  ;;  %v14030_v63 = vcombine.high %v9296_v62, %v9304_v39  ;;  %v9279_v2 = vld [vmem:[#allocation15 + $0x200] sm:$0xff]  ;;  %v9280_v3 = vld [vmem:[#allocation15 + $0x208] sm:$0xff]  ;;  %v14027_v9 = vcombine.low %v9295_v56, %v9303_v40 }
 0x8e1   : > { %v9287_v28 = vld [vmem:[#allocation15 + $0x240] sm:$0xff]  ;;  %v9288_v5 = vld [vmem:[#allocation15 + $0x248] sm:$0xff]  ;;  %v14029_v7 = vcombine.low %v9296_v62, %v9304_v39 }
 0x8e2   : > { %v14012_v17 = vcombine.high %v9279_v2, %v9287_v28  ;;  %v14014_v59 = vcombine.high %v9280_v3, %v9288_v5  ;;  %v9263_v24 = vld [vmem:[#allocation15 + $0x180] sm:$0xff]  ;;  %v9264_v8 = vld [vmem:[#allocation15 + $0x188] sm:$0xff]  ;;  %v14011_v41 = vcombine.low %v9279_v2, %v9287_v28  ;;  %v14013_v6 = vcombine.low %v9280_v3, %v9288_v5 }
 0x8e3   : > { %10838 = vmatpush1.bf16.msra.mxu0 %v14043_v35  ;;  %10891 = vmatpush1.bf16.msra.mxu1 %v14045_v10  ;;  %v9271_v34 = vld [vmem:[#allocation15 + $0x1c0] sm:$0xff]  ;;  %v9272_v44 = vld [vmem:[#allocation15 + $0x1c8] sm:$0xff] }
 0x8e4   : > { %10839 = vmatprep.subr.bf16.mxu0 %v14028_v46  ;;  %10892 = vmatprep.subr.bf16.mxu1 %v14030_v63  ;;  %v13996_v0 = vcombine.high %v9263_v24, %v9271_v34  ;;  %v13998_v52 = vcombine.high %v9264_v8, %v9272_v44  ;;  %v9247_v61 = vld [vmem:[#allocation15 + $0x100] sm:$0xff]  ;;  %v9248_v27 = vld [vmem:[#allocation15 + $0x108] sm:$0xff]  ;;  %v13995_v29 = vcombine.low %v9263_v24, %v9271_v34 }
 0x8e5   : > { %v9255_v55 = vld [vmem:[#allocation15 + $0x140] sm:$0xff]  ;;  %v9256_v47 = vld [vmem:[#allocation15 + $0x148] sm:$0xff]  ;;  %v13997_v43 = vcombine.low %v9264_v8, %v9272_v44 }
 0x8e6   : > { %v13980_v58 = vcombine.high %v9247_v61, %v9255_v55  ;;  %v13982_v60 = vcombine.high %v9248_v27, %v9256_v47  ;;  %v9231_v19 = vld [vmem:[#allocation15 + $0x80] sm:$0xff]  ;;  %v9232_v12 = vld [vmem:[#allocation15 + $0x88] sm:$0xff]  ;;  %v13979_v36 = vcombine.low %v9247_v61, %v9255_v55  ;;  %v13981_v20 = vcombine.low %v9248_v27, %v9256_v47 }
 0x8e7   : > { %10840 = vmatpush1.bf16.msra.mxu0 %v14027_v9  ;;  %10893 = vmatpush1.bf16.msra.mxu1 %v14029_v7  ;;  %v9239_v14 = vld [vmem:[#allocation15 + $0xc0] sm:$0xff]  ;;  %v9240_v18 = vld [vmem:[#allocation15 + $0xc8] sm:$0xff] }
 0x8e8   : > { %10841 = vmatprep.subr.bf16.mxu0 %v14012_v17  ;;  %10894 = vmatprep.subr.bf16.mxu1 %v14014_v59  ;;  %v13964_v51 = vcombine.high %v9231_v19, %v9239_v14  ;;  %v13966_v1 = vcombine.high %v9232_v12, %v9240_v18  ;;  %v9215_v53 = vld [vmem:[#allocation15] sm:$0xff]  ;;  %v9216_v57 = vld [vmem:[#allocation15 + $0x8] sm:$0xff]  ;;  %v13963_v11 = vcombine.low %v9231_v19, %v9239_v14 }
 0x8e9   : > { %v9223_v42 = vld [vmem:[#allocation15 + $0x40] sm:$0xff]  ;;  %v9224_v25 = vld [vmem:[#allocation15 + $0x48] sm:$0xff]  ;;  %v13965_v16 = vcombine.low %v9232_v12, %v9240_v18 }
 0x8ea   : > { %v13948_v22 = vcombine.high %v9215_v53, %v9223_v42  ;;  %v13950_v50 = vcombine.high %v9216_v57, %v9224_v25  ;;  %v9455_v15 = vld [vmem:[#allocation15 + $0x780] sm:$0xff]  ;;  %v9456_v54 = vld [vmem:[#allocation15 + $0x788] sm:$0xff]  ;;  %v13947_v38 = vcombine.low %v9215_v53, %v9223_v42  ;;  %v13949_v21 = vcombine.low %v9216_v57, %v9224_v25 }
 0x8eb   : > { %10842 = vmatpush1.bf16.msra.mxu0 %v14011_v41  ;;  %10895 = vmatpush1.bf16.msra.mxu1 %v14013_v6  ;;  %v9463_v37 = vld [vmem:[#allocation15 + $0x7c0] sm:$0xff]  ;;  %v9464_v45 = vld [vmem:[#allocation15 + $0x7c8] sm:$0xff] }
 0x8ec   : > { %10843 = vmatprep.subr.bf16.mxu0 %v13996_v0  ;;  %10896 = vmatprep.subr.bf16.mxu1 %v13998_v52  ;;  %v14188_v26 = vcombine.high %v9455_v15, %v9463_v37  ;;  %v14190_v23 = vcombine.high %v9456_v54, %v9464_v45  ;;  %v9439_v56 = vld [vmem:[#allocation15 + $0x700] sm:$0xff]  ;;  %v9440_v40 = vld [vmem:[#allocation15 + $0x708] sm:$0xff]  ;;  %v14187_v39 = vcombine.low %v9455_v15, %v9463_v37 }
 0x8ed   : > { %v9447_v4 = vld [vmem:[#allocation15 + $0x740] sm:$0xff]  ;;  %v9448_v62 = vld [vmem:[#allocation15 + $0x748] sm:$0xff]  ;;  %v14189_v35 = vcombine.low %v9456_v54, %v9464_v45 }
 0x8ee   : > { %v14172_v10 = vcombine.high %v9439_v56, %v9447_v4  ;;  %v14174_v46 = vcombine.high %v9440_v40, %v9448_v62  ;;  %v9423_v63 = vld [vmem:[#allocation15 + $0x680] sm:$0xff]  ;;  %v9424_v28 = vld [vmem:[#allocation15 + $0x688] sm:$0xff]  ;;  %v14171_v5 = vcombine.low %v9439_v56, %v9447_v4  ;;  %v14173_v9 = vcombine.low %v9440_v40, %v9448_v62  ;;  %v9337_v56 = vld [vmem:[#allocation15 + $0x3d0] sm:$0xff] }
 0x8ef   : > { %10844 = vmatpush1.bf16.msra.mxu0 %v13995_v29  ;;  %10897 = vmatpush1.bf16.msra.mxu1 %v13997_v43  ;;  %v9431_v2 = vld [vmem:[#allocation15 + $0x6c0] sm:$0xff]  ;;  %v9432_v3 = vld [vmem:[#allocation15 + $0x6c8] sm:$0xff]  ;;  %v9330_v4 = vld [vmem:[#allocation15 + $0x398] sm:$0xff] }
 0x8f0   : > { %10845 = vmatprep.subr.bf16.mxu0 %v13980_v58  ;;  %10898 = vmatprep.subr.bf16.mxu1 %v13982_v60  ;;  %v14156_v7 = vcombine.high %v9423_v63, %v9431_v2  ;;  %v14158_v17 = vcombine.high %v9424_v28, %v9432_v3  ;;  %v9407_v59 = vld [vmem:[#allocation15 + $0x600] sm:$0xff]  ;;  %v9408_v34 = vld [vmem:[#allocation15 + $0x608] sm:$0xff]  ;;  %v14155_v44 = vcombine.low %v9423_v63, %v9431_v2  ;;  %v9338_v40 = vld [vmem:[#allocation15 + $0x3d8] sm:$0xff] }
 0x8f1   : > { %v9415_v24 = vld [vmem:[#allocation15 + $0x640] sm:$0xff]  ;;  %v9416_v8 = vld [vmem:[#allocation15 + $0x648] sm:$0xff]  ;;  %v14157_v41 = vcombine.low %v9424_v28, %v9432_v3  ;;  %v9321_v63 = vld [vmem:[#allocation15 + $0x350] sm:$0xff]  ;;  %v18768_v2 = vpack.c.bf16 %v18744_v13, %v18742_v33 }
 0x8f2   : > { %v14140_v6 = vcombine.high %v9407_v59, %v9415_v24  ;;  %v14142_v0 = vcombine.high %v9408_v34, %v9416_v8  ;;  %v9391_v52 = vld [vmem:[#allocation15 + $0x580] sm:$0xff]  ;;  %v9392_v55 = vld [vmem:[#allocation15 + $0x588] sm:$0xff]  ;;  %v14139_v47 = vcombine.low %v9407_v59, %v9415_v24  ;;  %v14141_v29 = vcombine.low %v9408_v34, %v9416_v8  ;;  %v9314_v28 = vld [vmem:[#allocation15 + $0x318] sm:$0xff] }
 0x8f3   : > { %10846 = vmatpush1.bf16.msra.mxu0 %v13979_v36  ;;  %10899 = vmatpush1.bf16.msra.mxu1 %v13981_v20  ;;  %v9399_v61 = vld [vmem:[#allocation15 + $0x5c0] sm:$0xff]  ;;  %v9400_v27 = vld [vmem:[#allocation15 + $0x5c8] sm:$0xff]  ;;  %v9322_v3 = vld [vmem:[#allocation15 + $0x358] sm:$0xff] }
 0x8f4   : > { %10847 = vmatprep.subr.bf16.mxu0 %v13964_v51  ;;  %10900 = vmatprep.subr.bf16.mxu1 %v13966_v1  ;;  %v14124_v43 = vcombine.high %v9391_v52, %v9399_v61  ;;  %v14126_v58 = vcombine.high %v9392_v55, %v9400_v27  ;;  %v9375_v60 = vld [vmem:[#allocation15 + $0x500] sm:$0xff]  ;;  %v9376_v14 = vld [vmem:[#allocation15 + $0x508] sm:$0xff]  ;;  %v14123_v18 = vcombine.low %v9391_v52, %v9399_v61  ;;  %v9305_v59 = vld [vmem:[#allocation15 + $0x2d0] sm:$0xff] }
 0x8f5   : > { %v9383_v19 = vld [vmem:[#allocation15 + $0x540] sm:$0xff]  ;;  %v9384_v12 = vld [vmem:[#allocation15 + $0x548] sm:$0xff]  ;;  %v14125_v36 = vcombine.low %v9392_v55, %v9400_v27  ;;  %v9298_v24 = vld [vmem:[#allocation15 + $0x298] sm:$0xff]  ;;  %v14050_v34 = vcombine.high %v9314_v28, %v9322_v3  ;;  %v14049_v13 = vcombine.low %v9314_v28, %v9322_v3 }
 0x8f6   : > { %v14108_v20 = vcombine.high %v9375_v60, %v9383_v19  ;;  %v14110_v51 = vcombine.high %v9376_v14, %v9384_v12  ;;  %v9359_v1 = vld [vmem:[#allocation15 + $0x480] sm:$0xff]  ;;  %v9360_v42 = vld [vmem:[#allocation15 + $0x488] sm:$0xff]  ;;  %v14107_v25 = vcombine.low %v9375_v60, %v9383_v19  ;;  %v9306_v8 = vld [vmem:[#allocation15 + $0x2d8] sm:$0xff] }
 0x8f7   : > { %10848 = vmatpush1.bf16.msra.mxu0 %v13963_v11  ;;  %10901 = vmatpush1.bf16.msra.mxu1 %v13965_v16  ;;  %v9367_v53 = vld [vmem:[#allocation15 + $0x4c0] sm:$0xff]  ;;  %v9368_v57 = vld [vmem:[#allocation15 + $0x4c8] sm:$0xff]  ;;  %v14109_v11 = vcombine.low %v9376_v14, %v9384_v12  ;;  %v9282_v52 = vld [vmem:[#allocation15 + $0x218] sm:$0xff]  ;;  %v14034_v61 = vcombine.high %v9298_v24, %v9306_v8  ;;  %v14033_v27 = vcombine.low %v9298_v24, %v9306_v8 }
 0x8f8   : > { %10849 = vmatprep.subr.bf16.mxu0 %v13948_v22  ;;  %10902 = vmatprep.subr.bf16.mxu1 %v13950_v50  ;;  %v14092_v16 = vcombine.high %v9359_v1, %v9367_v53  ;;  %v14094_v22 = vcombine.high %v9360_v42, %v9368_v57  ;;  %v9343_v50 = vld [vmem:[#allocation15 + $0x400] sm:$0xff]  ;;  %v9344_v37 = vld [vmem:[#allocation15 + $0x408] sm:$0xff]  ;;  %v14091_v45 = vcombine.low %v9359_v1, %v9367_v53  ;;  %v9290_v55 = vld [vmem:[#allocation15 + $0x258] sm:$0xff] }
 0x8f9   : > { %v9351_v15 = vld [vmem:[#allocation15 + $0x440] sm:$0xff]  ;;  %v9352_v54 = vld [vmem:[#allocation15 + $0x448] sm:$0xff]  ;;  %v14018_v60 = vcombine.high %v9282_v52, %v9290_v55  ;;  %v9274_v19 = vld [vmem:[#allocation15 + $0x1d8] sm:$0xff] }
 0x8fa   : > { %v14075_v62 = vcombine.low %v9343_v50, %v9351_v15  ;;  %v9249_v12 = vld [vmem:[#allocation15 + $0x110] sm:$0xff] }
 0x8fb   : > { %10850 = vmatpush1.bf16.msra.mxu0 %v13947_v38  ;;  %10903 = vmatpush1.bf16.msra.mxu1 %v13949_v21  ;;  %v14093_v38 = vcombine.low %v9360_v42, %v9368_v57  ;;  %v14076_v21 = vcombine.high %v9343_v50, %v9351_v15  ;;  %v9233_v57 = vld [vmem:[#allocation15 + $0x90] sm:$0xff] }
 0x8fc   : > { %10851 = vmatprep.subr.bf16.mxu0 %v14188_v26  ;;  %10904 = vmatprep.subr.bf16.mxu1 %v14190_v23  ;;  %v14078_v26 = vcombine.high %v9344_v37, %v9352_v54  ;;  %v9329_v23 = vld [vmem:[#allocation15 + $0x390] sm:$0xff] }
 0x8fd   : > { %v9441_v3 = vld [vmem:[#allocation15 + $0x710] sm:$0xff] }
 0x8fe   : > { %v9425_v8 = vld [vmem:[#allocation15 + $0x690] sm:$0xff] }
 0x8ff   : > { %10852 = vmatpush2.bf16.msra.mxu0 %v14187_v39  ;;  %10905 = vmatpush2.bf16.msra.mxu1 %v14189_v35  ;;  %v14077_v39 = vcombine.low %v9344_v37, %v9352_v54  ;;  %v14064_v35 = vcombine.high %v9329_v23, %v9337_v56  ;;  %v9217_v54 = vld [vmem:[#allocation15 + $0x10] sm:$0xff] }
 0x900   : > { %10853 = vmatprep.subr.bf16.mxu0 %v14172_v10  ;;  %10906 = vmatprep.subr.bf16.mxu1 %v14174_v46  ;;  %v14066_v10 = vcombine.high %v9330_v4, %v9338_v40  ;;  %v9313_v46 = vld [vmem:[#allocation15 + $0x310] sm:$0xff] }
 0x901   : > { %v14047_v33 = vcombine.low %v9313_v46, %v9321_v63 }
 0x903   : > { %10854 = vmatpush2.bf16.msra.mxu0 %v14171_v5  ;;  %10907 = vmatpush2.bf16.msra.mxu1 %v14173_v9  ;;  %v14063_v5 = vcombine.low %v9329_v23, %v9337_v56  ;;  %v14065_v9 = vcombine.low %v9330_v4, %v9338_v40  ;;  %v9457_v40 = vld [vmem:[#allocation15 + $0x790] sm:$0xff] }
 0x904   : > { %10855 = vmatprep.subr.bf16.mxu0 %v14156_v7  ;;  %10908 = vmatprep.subr.bf16.mxu1 %v14158_v17  ;;  %v14048_v7 = vcombine.high %v9313_v46, %v9321_v63  ;;  %v9297_v17 = vld [vmem:[#allocation15 + $0x290] sm:$0xff] }
 0x907   : > { %10856 = vmatpush2.bf16.msra.mxu0 %v14155_v44  ;;  %10909 = vmatpush2.bf16.msra.mxu1 %v14157_v41  ;;  %v18772_v44 = vpack.c.bf16 %v18752_v49, %v18748_v48  ;;  %v14032_v41 = vcombine.high %v9297_v17, %v9305_v59  ;;  %v18779_v48 = vpack.c.bf16 %v18750_v30, %v18746_v32 }
 0x908   : > { %10857 = vmatprep.subr.bf16.mxu0 %v14140_v6  ;;  %10910 = vmatprep.subr.bf16.mxu1 %v14142_v0  ;;  %v9281_v6 = vld [vmem:[#allocation15 + $0x210] sm:$0xff]  ;;  %v14031_v49 = vcombine.low %v9297_v17, %v9305_v59  ;;  %v14017_v32 = vcombine.low %v9282_v52, %v9290_v55  ;;  %v9450_v17 = vld [vmem:[#allocation15 + $0x758] sm:$0xff] }
 0x909   : > { %v9289_v0 = vld [vmem:[#allocation15 + $0x250] sm:$0xff] }
 0x90a   : > { %v14015_v14 = vcombine.low %v9281_v6, %v9289_v0  ;;  %v9409_v55 = vld [vmem:[#allocation15 + $0x610] sm:$0xff] }
 0x90b   : > { %10858 = vmatpush2.bf16.msra.mxu0 %v14139_v47  ;;  %10911 = vmatpush2.bf16.msra.mxu1 %v14141_v29  ;;  %v14016_v47 = vcombine.high %v9281_v6, %v9289_v0  ;;  %v9265_v29 = vld [vmem:[#allocation15 + $0x190] sm:$0xff]  ;;  %v9434_v6 = vld [vmem:[#allocation15 + $0x6d8] sm:$0xff] }
 0x90c   : > { %10859 = vmatprep.subr.bf16.mxu0 %v14124_v43  ;;  %10912 = vmatprep.subr.bf16.mxu1 %v14126_v58  ;;  %v9273_v43 = vld [vmem:[#allocation15 + $0x1d0] sm:$0xff]  ;;  %v9266_v58 = vld [vmem:[#allocation15 + $0x198] sm:$0xff] }
 0x90d   : > { %v14000_v30 = vcombine.high %v9265_v29, %v9273_v43  ;;  %v13999_v1 = vcombine.low %v9265_v29, %v9273_v43  ;;  %v14001_v53 = vcombine.low %v9266_v58, %v9274_v19  ;;  %v9418_v29 = vld [vmem:[#allocation15 + $0x658] sm:$0xff] }
 0x90f   : > { %10860 = vmatpush2.bf16.msra.mxu0 %v14123_v18  ;;  %10913 = vmatpush2.bf16.msra.mxu1 %v14125_v36  ;;  %v9257_v18 = vld [vmem:[#allocation15 + $0x150] sm:$0xff]  ;;  %v9250_v36 = vld [vmem:[#allocation15 + $0x118] sm:$0xff] }
 0x910   : > { %10861 = vmatprep.subr.bf16.mxu0 %v14108_v20  ;;  %10914 = vmatprep.subr.bf16.mxu1 %v14110_v51  ;;  %v14002_v20 = vcombine.high %v9266_v58, %v9274_v19  ;;  %v9258_v51 = vld [vmem:[#allocation15 + $0x158] sm:$0xff]  ;;  %v13984_v42 = vcombine.high %v9249_v12, %v9257_v18  ;;  %v13983_v50 = vcombine.low %v9249_v12, %v9257_v18  ;;  %v9393_v19 = vld [vmem:[#allocation15 + $0x590] sm:$0xff] }
 0x911   : > { %v13985_v15 = vcombine.low %v9250_v36, %v9258_v51  ;;  %v9402_v12 = vld [vmem:[#allocation15 + $0x5d8] sm:$0xff] }
 0x913   : > { %10862 = vmatpush2.bf16.msra.mxu0 %v14107_v25  ;;  %10915 = vmatpush2.bf16.msra.mxu1 %v14109_v11  ;;  %v9241_v25 = vld [vmem:[#allocation15 + $0xd0] sm:$0xff]  ;;  %v9234_v11 = vld [vmem:[#allocation15 + $0x98] sm:$0xff] }
 0x914   : > { %10863 = vmatprep.subr.bf16.mxu0 %v14092_v16  ;;  %10916 = vmatprep.subr.bf16.mxu1 %v14094_v22  ;;  %v13986_v16 = vcombine.high %v9250_v36, %v9258_v51  ;;  %v9242_v22 = vld [vmem:[#allocation15 + $0xd8] sm:$0xff]  ;;  %v13968_v37 = vcombine.high %v9233_v57, %v9241_v25  ;;  %v13967_v23 = vcombine.low %v9233_v57, %v9241_v25  ;;  %v9377_v51 = vld [vmem:[#allocation15 + $0x510] sm:$0xff] }
 0x915   : > { %v13969_v56 = vcombine.low %v9234_v11, %v9242_v22  ;;  %v9386_v57 = vld [vmem:[#allocation15 + $0x558] sm:$0xff] }
 0x917   : > { %10864 = vmatpush2.bf16.msra.mxu0 %v14091_v45  ;;  %10917 = vmatpush2.bf16.msra.mxu1 %v14093_v38  ;;  %v9225_v45 = vld [vmem:[#allocation15 + $0x50] sm:$0xff]  ;;  %v9218_v38 = vld [vmem:[#allocation15 + $0x18] sm:$0xff] }
 0x918   : > { %10865 = vmatprep.subr.bf16.mxu0 %v14076_v21  ;;  %10918 = vmatprep.subr.bf16.mxu1 %v14078_v26  ;;  %v13970_v21 = vcombine.high %v9234_v11, %v9242_v22  ;;  %v9226_v26 = vld [vmem:[#allocation15 + $0x58] sm:$0xff]  ;;  %v13952_v4 = vcombine.high %v9217_v54, %v9225_v45  ;;  %v13951_v46 = vcombine.low %v9217_v54, %v9225_v45  ;;  %v9361_v22 = vld [vmem:[#allocation15 + $0x490] sm:$0xff] }
 0x919   : > { %v13953_v63 = vcombine.low %v9218_v38, %v9226_v26  ;;  %v9370_v54 = vld [vmem:[#allocation15 + $0x4d8] sm:$0xff] }
 0x91b   : > { %10866 = vmatpush2.bf16.msra.mxu0 %v14075_v62  ;;  %10919 = vmatpush2.bf16.msra.mxu1 %v14077_v39  ;;  %v9465_v62 = vld [vmem:[#allocation15 + $0x7d0] sm:$0xff]  ;;  %v9458_v39 = vld [vmem:[#allocation15 + $0x798] sm:$0xff] }
 0x91c   : > { %10941 = vmatprep.subr.bf16.mxu0 %v14064_v35  ;;  %10994 = vmatprep.subr.bf16.mxu1 %v14066_v10  ;;  %v13954_v35 = vcombine.high %v9218_v38, %v9226_v26  ;;  %v9466_v10 = vld [vmem:[#allocation15 + $0x7d8] sm:$0xff]  ;;  %v14192_v28 = vcombine.high %v9457_v40, %v9465_v62  ;;  %v14191_v59 = vcombine.low %v9457_v40, %v9465_v62  ;;  %v9345_v26 = vld [vmem:[#allocation15 + $0x410] sm:$0xff] }
 0x91d   : > { %v14193_v24 = vcombine.low %v9458_v39, %v9466_v10  ;;  %v9354_v40 = vld [vmem:[#allocation15 + $0x458] sm:$0xff] }
 0x91e   : > { %10868 = vmatmul.mubr.bf16.vlgmr.msra.gmra.mxu0 %v18768_v2  ;;  %10921 = vmatmul.mubr.bf16.vlgmr.msra.gmra.mxu1 %v18768_v2 }
 0x91f   : > { %10942 = vmatpush1.bf16.msra.mxu0 %v14063_v5  ;;  %10995 = vmatpush1.bf16.msra.mxu1 %v14065_v9  ;;  %v9449_v5 = vld [vmem:[#allocation15 + $0x750] sm:$0xff]  ;;  %v9442_v9 = vld [vmem:[#allocation15 + $0x718] sm:$0xff] }
 0x920   : > { %10943 = vmatprep.subr.bf16.mxu0 %v14048_v7  ;;  %10996 = vmatprep.subr.bf16.mxu1 %v14050_v34  ;;  %v14194_v7 = vcombine.high %v9458_v39, %v9466_v10  ;;  %v14176_v34 = vcombine.high %v9441_v3, %v9449_v5  ;;  %v14175_v0 = vcombine.low %v9441_v3, %v9449_v5  ;;  %v9331_v10 = vld [vmem:[#allocation15 + $0x3a0] sm:$0xff]  ;;  %v9340_v3 = vld [vmem:[#allocation15 + $0x3e8] sm:$0xff] }
 0x921   : > { %10877 = vmatprep.mubr.bf16.mxu0 %v18772_v44  ;;  %10930 = vmatprep.mubr.bf16.mxu1 %v18772_v44  ;;  %v14177_v52 = vcombine.low %v9442_v9, %v9450_v17 }
 0x923   : > { %10944 = vmatpush1.bf16.msra.mxu0 %v14047_v33  ;;  %10997 = vmatpush1.bf16.msra.mxu1 %v14049_v13  ;;  %v9433_v33 = vld [vmem:[#allocation15 + $0x6d0] sm:$0xff]  ;;  %v9426_v13 = vld [vmem:[#allocation15 + $0x698] sm:$0xff] }
 0x924   : > { %10945 = vmatprep.subr.bf16.mxu0 %v14032_v41  ;;  %10998 = vmatprep.subr.bf16.mxu1 %v14034_v61  ;;  %v14178_v41 = vcombine.high %v9442_v9, %v9450_v17  ;;  %v14160_v61 = vcombine.high %v9425_v8, %v9433_v33  ;;  %v14159_v43 = vcombine.low %v9425_v8, %v9433_v33  ;;  %v9315_v17 = vld [vmem:[#allocation15 + $0x320] sm:$0xff]  ;;  %v9324_v8 = vld [vmem:[#allocation15 + $0x368] sm:$0xff] }
 0x925   : > { %v14161_v58 = vcombine.low %v9426_v13, %v9434_v6 }
 0x926   : > { %10878 = vmatmul.mubr.bf16.gmra.mxu0 %v18779_v48  ;;  %10931 = vmatmul.mubr.bf16.gmra.mxu1 %v18779_v48 }
 0x927   : > { %10946 = vmatpush1.bf16.msra.mxu0 %v14031_v49  ;;  %10999 = vmatpush1.bf16.msra.mxu1 %v14033_v27  ;;  %v9417_v49 = vld [vmem:[#allocation15 + $0x650] sm:$0xff]  ;;  %v9410_v27 = vld [vmem:[#allocation15 + $0x618] sm:$0xff] }
 0x928   : > { %10947 = vmatprep.subr.bf16.mxu0 %v14016_v47  ;;  %11000 = vmatprep.subr.bf16.mxu1 %v14018_v60  ;;  %v14162_v47 = vcombine.high %v9426_v13, %v9434_v6  ;;  %v14144_v60 = vcombine.high %v9409_v55, %v9417_v49  ;;  %v14143_v18 = vcombine.low %v9409_v55, %v9417_v49  ;;  %v9308_v55 = vld [vmem:[#allocation15 + $0x2e8] sm:$0xff] }
 0x929   : > { %10973 = vmatprep.mubr.bf16.mxu0 %v18762_v31  ;;  %11026 = vmatprep.mubr.bf16.mxu1 %v18762_v31  ;;  %v14145_v36 = vcombine.low %v9410_v27, %v9418_v29 }
 0x92b   : > { %10948 = vmatpush1.bf16.msra.mxu0 %v14015_v14  ;;  %11001 = vmatpush1.bf16.msra.mxu1 %v14017_v32  ;;  %v9401_v14 = vld [vmem:[#allocation15 + $0x5d0] sm:$0xff]  ;;  %v9394_v32 = vld [vmem:[#allocation15 + $0x598] sm:$0xff] }
 0x92c   : > { %10949 = vmatprep.subr.bf16.mxu0 %v14000_v30  ;;  %11002 = vmatprep.subr.bf16.mxu1 %v14002_v20  ;;  %v14146_v30 = vcombine.high %v9410_v27, %v9418_v29  ;;  %v14128_v20 = vcombine.high %v9393_v19, %v9401_v14  ;;  %v14127_v25 = vcombine.low %v9393_v19, %v9401_v14  ;;  %v9292_v19 = vld [vmem:[#allocation15 + $0x268] sm:$0xff] }
 0x92d   : > { %v14129_v11 = vcombine.low %v9394_v32, %v9402_v12 }
 0x92f   : > { %10950 = vmatpush1.bf16.msra.mxu0 %v13999_v1  ;;  %11003 = vmatpush1.bf16.msra.mxu1 %v14001_v53  ;;  %v9385_v1 = vld [vmem:[#allocation15 + $0x550] sm:$0xff]  ;;  %v9378_v53 = vld [vmem:[#allocation15 + $0x518] sm:$0xff] }
 0x930   : > { %10951 = vmatprep.subr.bf16.mxu0 %v13984_v42  ;;  %11004 = vmatprep.subr.bf16.mxu1 %v13986_v16  ;;  %v14130_v42 = vcombine.high %v9394_v32, %v9402_v12  ;;  %v14112_v16 = vcombine.high %v9377_v51, %v9385_v1  ;;  %v14111_v45 = vcombine.low %v9377_v51, %v9385_v1  ;;  %v9276_v51 = vld [vmem:[#allocation15 + $0x1e8] sm:$0xff] }
 0x931   : > { %v14113_v38 = vcombine.low %v9378_v53, %v9386_v57 }
 0x933   : > { %10952 = vmatpush1.bf16.msra.mxu0 %v13983_v50  ;;  %11005 = vmatpush1.bf16.msra.mxu1 %v13985_v15  ;;  %v9369_v50 = vld [vmem:[#allocation15 + $0x4d0] sm:$0xff]  ;;  %v9362_v15 = vld [vmem:[#allocation15 + $0x498] sm:$0xff] }
 0x934   : > { %10953 = vmatprep.subr.bf16.mxu0 %v13968_v37  ;;  %11006 = vmatprep.subr.bf16.mxu1 %v13970_v21  ;;  %v14114_v37 = vcombine.high %v9378_v53, %v9386_v57  ;;  %v14096_v21 = vcombine.high %v9361_v22, %v9369_v50  ;;  %v14095_v62 = vcombine.low %v9361_v22, %v9369_v50  ;;  %v9260_v22 = vld [vmem:[#allocation15 + $0x168] sm:$0xff] }
 0x935   : > { %v14097_v39 = vcombine.low %v9362_v15, %v9370_v54 }
 0x937   : > { %10954 = vmatpush1.bf16.msra.mxu0 %v13967_v23  ;;  %11007 = vmatpush1.bf16.msra.mxu1 %v13969_v56  ;;  %v9353_v23 = vld [vmem:[#allocation15 + $0x450] sm:$0xff]  ;;  %v9346_v56 = vld [vmem:[#allocation15 + $0x418] sm:$0xff] }
 0x938   : > { %10955 = vmatprep.subr.bf16.mxu0 %v13952_v4  ;;  %11008 = vmatprep.subr.bf16.mxu1 %v13954_v35  ;;  %v14098_v4 = vcombine.high %v9362_v15, %v9370_v54  ;;  %v14080_v35 = vcombine.high %v9345_v26, %v9353_v23  ;;  %v14079_v5 = vcombine.low %v9345_v26, %v9353_v23  ;;  %v9235_v54 = vld [vmem:[#allocation15 + $0xa0] sm:$0xff]  ;;  %v9244_v26 = vld [vmem:[#allocation15 + $0xe8] sm:$0xff] }
 0x939   : > { %v14081_v9 = vcombine.low %v9346_v56, %v9354_v40 }
 0x93b   : > { %10956 = vmatpush1.bf16.msra.mxu0 %v13951_v46  ;;  %11009 = vmatpush1.bf16.msra.mxu1 %v13953_v63  ;;  %v9339_v46 = vld [vmem:[#allocation15 + $0x3e0] sm:$0xff]  ;;  %v9332_v63 = vld [vmem:[#allocation15 + $0x3a8] sm:$0xff] }
 0x93c   : > { %10957 = vmatprep.subr.bf16.mxu0 %v14192_v28  ;;  %11010 = vmatprep.subr.bf16.mxu1 %v14194_v7  ;;  %v14082_v28 = vcombine.high %v9346_v56, %v9354_v40  ;;  %v14068_v7 = vcombine.high %v9331_v10, %v9339_v46  ;;  %v14067_v33 = vcombine.low %v9331_v10, %v9339_v46  ;;  %v9219_v40 = vld [vmem:[#allocation15 + $0x20] sm:$0xff]  ;;  %v9228_v10 = vld [vmem:[#allocation15 + $0x68] sm:$0xff] }
 0x93d   : > { %v14069_v13 = vcombine.low %v9332_v63, %v9340_v3 }
 0x93f   : > { %10958 = vmatpush2.bf16.msra.mxu0 %v14191_v59  ;;  %11011 = vmatpush2.bf16.msra.mxu1 %v14193_v24  ;;  %v9323_v59 = vld [vmem:[#allocation15 + $0x360] sm:$0xff]  ;;  %v9316_v24 = vld [vmem:[#allocation15 + $0x328] sm:$0xff] }
 0x940   : > { %10959 = vmatprep.subr.bf16.mxu0 %v14176_v34  ;;  %11012 = vmatprep.subr.bf16.mxu1 %v14178_v41  ;;  %v14070_v34 = vcombine.high %v9332_v63, %v9340_v3  ;;  %v14052_v41 = vcombine.high %v9315_v17, %v9323_v59  ;;  %v14054_v6 = vcombine.high %v9316_v24, %v9324_v8  ;;  %v9459_v3 = vld [vmem:[#allocation15 + $0x7a0] sm:$0xff] }
 0x941   : > { %v14051_v49 = vcombine.low %v9315_v17, %v9323_v59  ;;  %v14053_v27 = vcombine.low %v9316_v24, %v9324_v8  ;;  %v9468_v17 = vld [vmem:[#allocation15 + $0x7e8] sm:$0xff]  ;;  %v9443_v8 = vld [vmem:[#allocation15 + $0x720] sm:$0xff] }
 0x943   : > { %10960 = vmatpush2.bf16.msra.mxu0 %v14175_v0  ;;  %11013 = vmatpush2.bf16.msra.mxu1 %v14177_v52  ;;  %v9299_v0 = vld [vmem:[#allocation15 + $0x2a0] sm:$0xff] }
 0x944   : > { %10961 = vmatprep.subr.bf16.mxu0 %v14160_v61  ;;  %11014 = vmatprep.subr.bf16.mxu1 %v14162_v47  ;;  %v9307_v52 = vld [vmem:[#allocation15 + $0x2e0] sm:$0xff]  ;;  %v9300_v61 = vld [vmem:[#allocation15 + $0x2a8] sm:$0xff] }
 0x945   : > { %v14036_v47 = vcombine.high %v9299_v0, %v9307_v52  ;;  %v14038_v29 = vcombine.high %v9300_v61, %v9308_v55  ;;  %v14035_v14 = vcombine.low %v9299_v0, %v9307_v52  ;;  %v14037_v32 = vcombine.low %v9300_v61, %v9308_v55  ;;  %v9427_v52 = vld [vmem:[#allocation15 + $0x6a0] sm:$0xff] }
 0x946   : > { %v9435_v61 = vld [vmem:[#allocation15 + $0x6e0] sm:$0xff] }
 0x947   : > { %10962 = vmatpush2.bf16.msra.mxu0 %v14159_v43  ;;  %11015 = vmatpush2.bf16.msra.mxu1 %v14161_v58  ;;  %v9283_v43 = vld [vmem:[#allocation15 + $0x220] sm:$0xff] }
 0x948   : > { %10963 = vmatprep.subr.bf16.mxu0 %v14144_v60  ;;  %11016 = vmatprep.subr.bf16.mxu1 %v14146_v30  ;;  %v9291_v58 = vld [vmem:[#allocation15 + $0x260] sm:$0xff]  ;;  %v9284_v60 = vld [vmem:[#allocation15 + $0x228] sm:$0xff] }
 0x949   : > { %v14020_v30 = vcombine.high %v9283_v43, %v9291_v58  ;;  %v14022_v12 = vcombine.high %v9284_v60, %v9292_v19  ;;  %v14019_v1 = vcombine.low %v9283_v43, %v9291_v58  ;;  %v14021_v53 = vcombine.low %v9284_v60, %v9292_v19  ;;  %v9411_v19 = vld [vmem:[#allocation15 + $0x620] sm:$0xff] }
 0x94a   : > { %v14164_v60 = vcombine.high %v9427_v52, %v9435_v61 }
 0x94b   : > { %10964 = vmatpush2.bf16.msra.mxu0 %v14143_v18  ;;  %11017 = vmatpush2.bf16.msra.mxu1 %v14145_v36  ;;  %v9267_v18 = vld [vmem:[#allocation15 + $0x1a0] sm:$0xff] }
 0x94c   : > { %10965 = vmatprep.subr.bf16.mxu0 %v14128_v20  ;;  %11018 = vmatprep.subr.bf16.mxu1 %v14130_v42  ;;  %v9275_v36 = vld [vmem:[#allocation15 + $0x1e0] sm:$0xff]  ;;  %v9268_v20 = vld [vmem:[#allocation15 + $0x1a8] sm:$0xff] }
 0x94d   : > { %v14004_v42 = vcombine.high %v9267_v18, %v9275_v36  ;;  %v14006_v57 = vcombine.high %v9268_v20, %v9276_v51  ;;  %v14003_v50 = vcombine.low %v9267_v18, %v9275_v36  ;;  %v14005_v15 = vcombine.low %v9268_v20, %v9276_v51  ;;  %v9395_v36 = vld [vmem:[#allocation15 + $0x5a0] sm:$0xff] }
 0x94e   : > { %v14163_v18 = vcombine.low %v9427_v52, %v9435_v61  ;;  %v9325_v52 = vld [vmem:[#allocation15 + $0x370] sm:$0xff]  ;;  %v9318_v61 = vld [vmem:[#allocation15 + $0x338] sm:$0xff] }
 0x94f   : > { %10966 = vmatpush2.bf16.msra.mxu0 %v14127_v25  ;;  %11019 = vmatpush2.bf16.msra.mxu1 %v14129_v11  ;;  %v9251_v25 = vld [vmem:[#allocation15 + $0x120] sm:$0xff] }
 0x950   : > { %10967 = vmatprep.subr.bf16.mxu0 %v14112_v16  ;;  %11020 = vmatprep.subr.bf16.mxu1 %v14114_v37  ;;  %v9259_v11 = vld [vmem:[#allocation15 + $0x160] sm:$0xff]  ;;  %v9252_v16 = vld [vmem:[#allocation15 + $0x128] sm:$0xff] }
 0x951   : > { %v13988_v37 = vcombine.high %v9251_v25, %v9259_v11  ;;  %v13987_v23 = vcombine.low %v9251_v25, %v9259_v11  ;;  %v13989_v56 = vcombine.low %v9252_v16, %v9260_v22  ;;  %v9379_v11 = vld [vmem:[#allocation15 + $0x520] sm:$0xff] }
 0x953   : > { %10968 = vmatpush2.bf16.msra.mxu0 %v14111_v45  ;;  %11021 = vmatpush2.bf16.msra.mxu1 %v14113_v38  ;;  %v13990_v45 = vcombine.high %v9252_v16, %v9260_v22  ;;  %v9243_v38 = vld [vmem:[#allocation15 + $0xe0] sm:$0xff] }
 0x954   : > { %10969 = vmatprep.subr.bf16.mxu0 %v14096_v21  ;;  %11022 = vmatprep.subr.bf16.mxu1 %v14098_v4  ;;  %v9236_v21 = vld [vmem:[#allocation15 + $0xa8] sm:$0xff]  ;;  %v13972_v4 = vcombine.high %v9235_v54, %v9243_v38  ;;  %v13971_v46 = vcombine.low %v9235_v54, %v9243_v38  ;;  %v9363_v38 = vld [vmem:[#allocation15 + $0x4a0] sm:$0xff] }
 0x955   : > { %v13973_v63 = vcombine.low %v9236_v21, %v9244_v26  ;;  %v9388_v54 = vld [vmem:[#allocation15 + $0x568] sm:$0xff] }
 0x957   : > { %10970 = vmatpush2.bf16.msra.mxu0 %v14095_v62  ;;  %11023 = vmatpush2.bf16.msra.mxu1 %v14097_v39  ;;  %v9227_v62 = vld [vmem:[#allocation15 + $0x60] sm:$0xff]  ;;  %v13974_v39 = vcombine.high %v9236_v21, %v9244_v26 }
 0x958   : > { %10971 = vmatprep.subr.bf16.mxu0 %v14080_v35  ;;  %11024 = vmatprep.subr.bf16.mxu1 %v14082_v28  ;;  %v9220_v35 = vld [vmem:[#allocation15 + $0x28] sm:$0xff]  ;;  %v13956_v28 = vcombine.high %v9219_v40, %v9227_v62  ;;  %v13955_v59 = vcombine.low %v9219_v40, %v9227_v62 }
 0x959   : > { %v13957_v24 = vcombine.low %v9220_v35, %v9228_v10  ;;  %v9372_v40 = vld [vmem:[#allocation15 + $0x4e8] sm:$0xff] }
 0x95b   : > { %10972 = vmatpush2.bf16.msra.mxu0 %v14079_v5  ;;  %11025 = vmatpush2.bf16.msra.mxu1 %v14081_v9  ;;  %v9467_v5 = vld [vmem:[#allocation15 + $0x7e0] sm:$0xff]  ;;  %v13958_v9 = vcombine.high %v9220_v35, %v9228_v10 }
 0x95c   : > { %11047 = vmatprep.subr.bf16.mxu0 %v14068_v7  ;;  %11100 = vmatprep.subr.bf16.mxu1 %v14070_v34  ;;  %v9460_v7 = vld [vmem:[#allocation15 + $0x7a8] sm:$0xff]  ;;  %v14196_v34 = vcombine.high %v9459_v3, %v9467_v5  ;;  %v14195_v0 = vcombine.low %v9459_v3, %v9467_v5  ;;  %v9355_v35 = vld [vmem:[#allocation15 + $0x460] sm:$0xff] }
 0x95d   : > { %v14197_v55 = vcombine.low %v9460_v7, %v9468_v17 }
 0x95e   : > { %10974 = vmatmul.mubr.bf16.vlgmr.msra.gmra.mxu0 %v18768_v2  ;;  %11027 = vmatmul.mubr.bf16.vlgmr.msra.gmra.mxu1 %v18768_v2 }
 0x95f   : > { %11048 = vmatpush1.bf16.msra.mxu0 %v14067_v33  ;;  %11101 = vmatpush1.bf16.msra.mxu1 %v14069_v13  ;;  %v9451_v33 = vld [vmem:[#allocation15 + $0x760] sm:$0xff]  ;;  %v14198_v13 = vcombine.high %v9460_v7, %v9468_v17  ;;  %v9341_v7 = vld [vmem:[#allocation15 + $0x3f0] sm:$0xff] }
 0x960   : > { %11049 = vmatprep.subr.bf16.mxu0 %v14052_v41  ;;  %11102 = vmatprep.subr.bf16.mxu1 %v14054_v6  ;;  %v9444_v41 = vld [vmem:[#allocation15 + $0x728] sm:$0xff]  ;;  %v14179_v43 = vcombine.low %v9443_v8, %v9451_v33 }
 0x961   : > { %10983 = vmatprep.mubr.bf16.mxu0 %v18772_v44  ;;  %11036 = vmatprep.mubr.bf16.mxu1 %v18772_v44  ;;  %v9452_v6 = vld [vmem:[#allocation15 + $0x768] sm:$0xff] }
 0x962   : > { %v14181_v58 = vcombine.low %v9444_v41, %v9452_v6 }
 0x963   : > { %11050 = vmatpush1.bf16.msra.mxu0 %v14051_v49  ;;  %11103 = vmatpush1.bf16.msra.mxu1 %v14053_v27  ;;  %v14180_v49 = vcombine.high %v9443_v8, %v9451_v33  ;;  %v9428_v27 = vld [vmem:[#allocation15 + $0x6a8] sm:$0xff] }
 0x964   : > { %11051 = vmatprep.subr.bf16.mxu0 %v14036_v47  ;;  %11104 = vmatprep.subr.bf16.mxu1 %v14038_v29  ;;  %v9436_v47 = vld [vmem:[#allocation15 + $0x6e8] sm:$0xff]  ;;  %v14182_v29 = vcombine.high %v9444_v41, %v9452_v6 }
 0x965   : > { %v14165_v20 = vcombine.low %v9428_v27, %v9436_v47 }
 0x966   : > { %10984 = vmatmul.mubr.bf16.gmra.mxu0 %v18779_v48  ;;  %11037 = vmatmul.mubr.bf16.gmra.mxu1 %v18779_v48 }
 0x967   : > { %11052 = vmatpush1.bf16.msra.mxu0 %v14035_v14  ;;  %11105 = vmatpush1.bf16.msra.mxu1 %v14037_v32  ;;  %v9419_v14 = vld [vmem:[#allocation15 + $0x660] sm:$0xff]  ;;  %v9412_v32 = vld [vmem:[#allocation15 + $0x628] sm:$0xff] }
 0x968   : > { %11053 = vmatprep.subr.bf16.mxu0 %v14020_v30  ;;  %11106 = vmatprep.subr.bf16.mxu1 %v14022_v12  ;;  %v14166_v30 = vcombine.high %v9428_v27, %v9436_v47  ;;  %v9420_v12 = vld [vmem:[#allocation15 + $0x668] sm:$0xff]  ;;  %v14148_v51 = vcombine.high %v9411_v19, %v9419_v14  ;;  %v14147_v25 = vcombine.low %v9411_v19, %v9419_v14  ;;  %v9310_v19 = vld [vmem:[#allocation15 + $0x2f8] sm:$0xff] }
 0x969   : > { %11079 = vmatprep.mubr.bf16.mxu0 %v18762_v31  ;;  %11132 = vmatprep.mubr.bf16.mxu1 %v18762_v31  ;;  %v14149_v16 = vcombine.low %v9412_v32, %v9420_v12 }
 0x96b   : > { %11054 = vmatpush1.bf16.msra.mxu0 %v14019_v1  ;;  %11107 = vmatpush1.bf16.msra.mxu1 %v14021_v53  ;;  %v9403_v1 = vld [vmem:[#allocation15 + $0x5e0] sm:$0xff]  ;;  %v9396_v53 = vld [vmem:[#allocation15 + $0x5a8] sm:$0xff] }
 0x96c   : > { %11055 = vmatprep.subr.bf16.mxu0 %v14004_v42  ;;  %11108 = vmatprep.subr.bf16.mxu1 %v14006_v57  ;;  %v14150_v42 = vcombine.high %v9412_v32, %v9420_v12  ;;  %v9404_v57 = vld [vmem:[#allocation15 + $0x5e8] sm:$0xff]  ;;  %v14132_v22 = vcombine.high %v9395_v36, %v9403_v1 }
 0x96d   : > { %v14133_v21 = vcombine.low %v9396_v53, %v9404_v57 }
 0x96f   : > { %11056 = vmatpush1.bf16.msra.mxu0 %v14003_v50  ;;  %11109 = vmatpush1.bf16.msra.mxu1 %v14005_v15  ;;  %v9387_v50 = vld [vmem:[#allocation15 + $0x560] sm:$0xff]  ;;  %v9380_v15 = vld [vmem:[#allocation15 + $0x528] sm:$0xff] }
 0x970   : > { %11057 = vmatprep.subr.bf16.mxu0 %v13988_v37  ;;  %11110 = vmatprep.subr.bf16.mxu1 %v13990_v45  ;;  %v14134_v37 = vcombine.high %v9396_v53, %v9404_v57  ;;  %v14131_v45 = vcombine.low %v9395_v36, %v9403_v1  ;;  %v14116_v26 = vcombine.high %v9379_v11, %v9387_v50  ;;  %v9293_v36 = vld [vmem:[#allocation15 + $0x270] sm:$0xff] }
 0x971   : > { %v14115_v62 = vcombine.low %v9379_v11, %v9387_v50  ;;  %v14117_v10 = vcombine.low %v9380_v15, %v9388_v54  ;;  %v9277_v11 = vld [vmem:[#allocation15 + $0x1f0] sm:$0xff] }
 0x973   : > { %11058 = vmatpush1.bf16.msra.mxu0 %v13987_v23  ;;  %11111 = vmatpush1.bf16.msra.mxu1 %v13989_v56  ;;  %v9371_v23 = vld [vmem:[#allocation15 + $0x4e0] sm:$0xff]  ;;  %v9364_v56 = vld [vmem:[#allocation15 + $0x4a8] sm:$0xff] }
 0x974   : > { %11059 = vmatprep.subr.bf16.mxu0 %v13972_v4  ;;  %11112 = vmatprep.subr.bf16.mxu1 %v13974_v39  ;;  %v14118_v4 = vcombine.high %v9380_v15, %v9388_v54  ;;  %v9347_v39 = vld [vmem:[#allocation15 + $0x420] sm:$0xff]  ;;  %v14102_v3 = vcombine.high %v9364_v56, %v9372_v40  ;;  %v14099_v5 = vcombine.low %v9363_v38, %v9371_v23 }
 0x975   : > { %v14101_v17 = vcombine.low %v9364_v56, %v9372_v40  ;;  %v14083_v33 = vcombine.low %v9347_v39, %v9355_v35 }
 0x977   : > { %11060 = vmatpush1.bf16.msra.mxu0 %v13971_v46  ;;  %11113 = vmatpush1.bf16.msra.mxu1 %v13973_v63  ;;  %v14100_v46 = vcombine.high %v9363_v38, %v9371_v23  ;;  %v9348_v63 = vld [vmem:[#allocation15 + $0x428] sm:$0xff]  ;;  %v9261_v38 = vld [vmem:[#allocation15 + $0x170] sm:$0xff] }
 0x978   : > { %11061 = vmatprep.subr.bf16.mxu0 %v13956_v28  ;;  %11114 = vmatprep.subr.bf16.mxu1 %v13958_v9  ;;  %v9356_v28 = vld [vmem:[#allocation15 + $0x468] sm:$0xff]  ;;  %v9333_v9 = vld [vmem:[#allocation15 + $0x3b0] sm:$0xff] }
 0x979   : > { %v14086_v8 = vcombine.high %v9348_v63, %v9356_v28  ;;  %v14072_v41 = vcombine.high %v9333_v9, %v9341_v7 }
 0x97b   : > { %11062 = vmatpush1.bf16.msra.mxu0 %v13955_v59  ;;  %11115 = vmatpush1.bf16.msra.mxu1 %v13957_v24  ;;  %v14084_v59 = vcombine.high %v9347_v39, %v9355_v35  ;;  %v9334_v24 = vld [vmem:[#allocation15 + $0x3b8] sm:$0xff]  ;;  %v9245_v39 = vld [vmem:[#allocation15 + $0xf0] sm:$0xff] }
 0x97c   : > { %11063 = vmatprep.subr.bf16.mxu0 %v14196_v34  ;;  %11116 = vmatprep.subr.bf16.mxu1 %v14198_v13  ;;  %v9342_v34 = vld [vmem:[#allocation15 + $0x3f8] sm:$0xff]  ;;  %v14085_v13 = vcombine.low %v9348_v63, %v9356_v28 }
 0x97d   : > { %v14074_v6 = vcombine.high %v9334_v24, %v9342_v34  ;;  %v14073_v27 = vcombine.low %v9334_v24, %v9342_v34  ;;  %v9238_v35 = vld [vmem:[#allocation15 + $0xb8] sm:$0xff] }
 0x97f   : > { %11064 = vmatpush2.bf16.msra.mxu0 %v14195_v0  ;;  %11117 = vmatpush2.bf16.msra.mxu1 %v14197_v55  ;;  %v9317_v0 = vld [vmem:[#allocation15 + $0x330] sm:$0xff]  ;;  %v9326_v55 = vld [vmem:[#allocation15 + $0x378] sm:$0xff] }
 0x980   : > { %11065 = vmatprep.subr.bf16.mxu0 %v14180_v49  ;;  %11118 = vmatprep.subr.bf16.mxu1 %v14182_v29  ;;  %v14071_v49 = vcombine.low %v9333_v9, %v9341_v7  ;;  %v14056_v47 = vcombine.high %v9317_v0, %v9325_v52  ;;  %v14058_v29 = vcombine.high %v9318_v61, %v9326_v55  ;;  %v9222_v9 = vld [vmem:[#allocation15 + $0x38] sm:$0xff] }
 0x981   : > { %v14055_v14 = vcombine.low %v9317_v0, %v9325_v52  ;;  %v14057_v32 = vcombine.low %v9318_v61, %v9326_v55  ;;  %v9230_v7 = vld [vmem:[#allocation15 + $0x78] sm:$0xff]  ;;  %v16399_v0 = vmov 0  }
 0x982   : > { %v13962_v34 = vcombine.high %v9222_v9, %v9230_v7  ;;  %15958 = vset.pattern.permute.xlu0 %v16399_v0  ;;  %v13961_v61 = vcombine.low %v9222_v9, %v9230_v7 }
 0x983   : > { %11066 = vmatpush2.bf16.msra.mxu0 %v14179_v43  ;;  %11119 = vmatpush2.bf16.msra.mxu1 %v14181_v58  ;;  %v9301_v43 = vld [vmem:[#allocation15 + $0x2b0] sm:$0xff] }
 0x984   : > { %11067 = vmatprep.subr.bf16.mxu0 %v14164_v60  ;;  %11120 = vmatprep.subr.bf16.mxu1 %v14166_v30  ;;  %v9309_v58 = vld [vmem:[#allocation15 + $0x2f0] sm:$0xff]  ;;  %v9302_v60 = vld [vmem:[#allocation15 + $0x2b8] sm:$0xff] }
 0x985   : > { %v14040_v30 = vcombine.high %v9301_v43, %v9309_v58  ;;  %v14042_v12 = vcombine.high %v9302_v60, %v9310_v19  ;;  %v14039_v1 = vcombine.low %v9301_v43, %v9309_v58  ;;  %v14041_v53 = vcombine.low %v9302_v60, %v9310_v19  ;;  %v9454_v43 = vld [vmem:[#allocation15 + $0x778] sm:$0xff] }
 0x987   : > { %11068 = vmatpush2.bf16.msra.mxu0 %v14163_v18  ;;  %11121 = vmatpush2.bf16.msra.mxu1 %v14165_v20  ;;  %v9285_v18 = vld [vmem:[#allocation15 + $0x230] sm:$0xff]  ;;  %v9286_v20 = vld [vmem:[#allocation15 + $0x238] sm:$0xff] }
 0x988   : > { %11069 = vmatprep.subr.bf16.mxu0 %v14148_v51  ;;  %11122 = vmatprep.subr.bf16.mxu1 %v14150_v42  ;;  %v9294_v51 = vld [vmem:[#allocation15 + $0x278] sm:$0xff]  ;;  %v14024_v42 = vcombine.high %v9285_v18, %v9293_v36  ;;  %v14023_v50 = vcombine.low %v9285_v18, %v9293_v36 }
 0x989   : > { %v14026_v57 = vcombine.high %v9286_v20, %v9294_v51  ;;  %v14025_v15 = vcombine.low %v9286_v20, %v9294_v51  ;;  %v9438_v18 = vld [vmem:[#allocation15 + $0x6f8] sm:$0xff] }
 0x98b   : > { %11070 = vmatpush2.bf16.msra.mxu0 %v14147_v25  ;;  %11123 = vmatpush2.bf16.msra.mxu1 %v14149_v16  ;;  %v9269_v25 = vld [vmem:[#allocation15 + $0x1b0] sm:$0xff]  ;;  %v9270_v16 = vld [vmem:[#allocation15 + $0x1b8] sm:$0xff] }
 0x98c   : > { %11071 = vmatprep.subr.bf16.mxu0 %v14132_v22  ;;  %11124 = vmatprep.subr.bf16.mxu1 %v14134_v37  ;;  %v9278_v22 = vld [vmem:[#allocation15 + $0x1f8] sm:$0xff]  ;;  %v14008_v37 = vcombine.high %v9269_v25, %v9277_v11  ;;  %v14007_v23 = vcombine.low %v9269_v25, %v9277_v11 }
 0x98d   : > { %v14010_v54 = vcombine.high %v9270_v16, %v9278_v22  ;;  %v14009_v56 = vcombine.low %v9270_v16, %v9278_v22  ;;  %v9422_v25 = vld [vmem:[#allocation15 + $0x678] sm:$0xff] }
 0x98f   : > { %11072 = vmatpush2.bf16.msra.mxu0 %v14131_v45  ;;  %11125 = vmatpush2.bf16.msra.mxu1 %v14133_v21  ;;  %v9253_v45 = vld [vmem:[#allocation15 + $0x130] sm:$0xff]  ;;  %v9254_v21 = vld [vmem:[#allocation15 + $0x138] sm:$0xff] }
 0x990   : > { %11073 = vmatprep.subr.bf16.mxu0 %v14116_v26  ;;  %11126 = vmatprep.subr.bf16.mxu1 %v14118_v4  ;;  %v9262_v26 = vld [vmem:[#allocation15 + $0x178] sm:$0xff]  ;;  %v13992_v4 = vcombine.high %v9253_v45, %v9261_v38 }
 0x991   : > { %v13994_v40 = vcombine.high %v9254_v21, %v9262_v26  ;;  %v13993_v63 = vcombine.low %v9254_v21, %v9262_v26 }
 0x993   : > { %11074 = vmatpush2.bf16.msra.mxu0 %v14115_v62  ;;  %11127 = vmatpush2.bf16.msra.mxu1 %v14117_v10  ;;  %v9237_v62 = vld [vmem:[#allocation15 + $0xb0] sm:$0xff]  ;;  %v9246_v10 = vld [vmem:[#allocation15 + $0xf8] sm:$0xff] }
 0x994   : > { %11075 = vmatprep.subr.bf16.mxu0 %v14100_v46  ;;  %11128 = vmatprep.subr.bf16.mxu1 %v14102_v3  ;;  %v13991_v46 = vcombine.low %v9253_v45, %v9261_v38  ;;  %v13976_v28 = vcombine.high %v9237_v62, %v9245_v39  ;;  %v9221_v3 = vld [vmem:[#allocation15 + $0x30] sm:$0xff]  ;;  %v9406_v45 = vld [vmem:[#allocation15 + $0x5f8] sm:$0xff] }
 0x997   : > { %11076 = vmatpush2.bf16.msra.mxu0 %v14099_v5  ;;  %11129 = vmatpush2.bf16.msra.mxu1 %v14101_v17  ;;  %v9229_v5 = vld [vmem:[#allocation15 + $0x70] sm:$0xff]  ;;  %v13975_v17 = vcombine.low %v9237_v62, %v9245_v39  ;;  %v9390_v62 = vld [vmem:[#allocation15 + $0x578] sm:$0xff] }
 0x998   : > { %11077 = vmatprep.subr.bf16.mxu0 %v14084_v59  ;;  %11130 = vmatprep.subr.bf16.mxu1 %v14086_v8  ;;  %v13977_v59 = vcombine.low %v9238_v35, %v9246_v10  ;;  %v13960_v24 = vcombine.high %v9221_v3, %v9229_v5  ;;  %v9461_v8 = vld [vmem:[#allocation15 + $0x7b0] sm:$0xff]  ;;  %v13959_v52 = vcombine.low %v9221_v3, %v9229_v5  ;;  %v9374_v3 = vld [vmem:[#allocation15 + $0x4f8] sm:$0xff] }
 0x99b   : > { %11078 = vmatpush2.bf16.msra.mxu0 %v14083_v33  ;;  %11131 = vmatpush2.bf16.msra.mxu1 %v14085_v13  ;;  %v9469_v33 = vld [vmem:[#allocation15 + $0x7f0] sm:$0xff]  ;;  %v14203_v13 = vld [vmem:[#allocation5] ss:$0 sm:$0xff] }
 0x99c   : > { %11153 = vmatprep.subr.bf16.mxu0 %v14072_v41  ;;  %11206 = vmatprep.subr.bf16.mxu1 %v14074_v6  ;;  %v9462_v41 = vld [vmem:[#allocation15 + $0x7b8] sm:$0xff]  ;;  %v14200_v55 = vcombine.high %v9461_v8, %v9469_v33  ;;  %v14199_v58 = vcombine.low %v9461_v8, %v9469_v33 }
 0x99d   : > { %v9470_v6 = vld [vmem:[#allocation15 + $0x7f8] sm:$0xff]  ;;  %11618 = vperm.xlu0 %15958, %v14203_v13  }
 0x99e   : > { %11080 = vmatmul.mubr.bf16.vlgmr.msra.gmra.mxu0 %v18768_v2  ;;  %11133 = vmatmul.mubr.bf16.vlgmr.msra.gmra.mxu1 %v18768_v2  ;;  %v14201_v60 = vcombine.low %v9462_v41, %v9470_v6  ;;  %v9358_v8 = vld [vmem:[#allocation15 + $0x478] sm:$0xff] }
 0x99f   : > { %11154 = vmatpush1.bf16.msra.mxu0 %v14071_v49  ;;  %11207 = vmatpush1.bf16.msra.mxu1 %v14073_v27  ;;  %v14202_v49 = vcombine.high %v9462_v41, %v9470_v6  ;;  %v9445_v27 = vld [vmem:[#allocation15 + $0x730] sm:$0xff] }
 0x9a0   : > { %11155 = vmatprep.subr.bf16.mxu0 %v14056_v47  ;;  %11208 = vmatprep.subr.bf16.mxu1 %v14058_v29  ;;  %v9453_v47 = vld [vmem:[#allocation15 + $0x770] sm:$0xff]  ;;  %v9446_v29 = vld [vmem:[#allocation15 + $0x738] sm:$0xff] }
 0x9a1   : > { %11089 = vmatprep.mubr.bf16.mxu0 %v18772_v44  ;;  %11142 = vmatprep.mubr.bf16.mxu1 %v18772_v44  ;;  %v14184_v19 = vcombine.high %v9445_v27, %v9453_v47  ;;  %v14183_v36 = vcombine.low %v9445_v27, %v9453_v47  ;;  %v14185_v20 = vcombine.low %v9446_v29, %v9454_v43  ;;  %v18811_v27 = vld [vmem:[#allocation16] sm:$0xff] }
 0x9a2   : > { %v15962_v47 = vld [vmem:[%s19419_s12 + $0xb8] sm:$0xff]  }
 0x9a3   : > { %11156 = vmatpush1.bf16.msra.mxu0 %v14055_v14  ;;  %11209 = vmatpush1.bf16.msra.mxu1 %v14057_v32  ;;  %v14186_v14 = vcombine.high %v9446_v29, %v9454_v43  ;;  %v9429_v32 = vld [vmem:[#allocation15 + $0x6b0] sm:$0xff] }
 0x9a4   : > { %11157 = vmatprep.subr.bf16.mxu0 %v14040_v30  ;;  %11210 = vmatprep.subr.bf16.mxu1 %v14042_v12  ;;  %v9437_v30 = vld [vmem:[#allocation15 + $0x6f0] sm:$0xff]  ;;  %v9430_v12 = vld [vmem:[#allocation15 + $0x6b8] sm:$0xff] }
 0x9a5   : > { %v14168_v51 = vcombine.high %v9429_v32, %v9437_v30  ;;  %v14167_v11 = vcombine.low %v9429_v32, %v9437_v30  ;;  %v14169_v16 = vcombine.low %v9430_v12, %v9438_v18  ;;  %v19420_v29 = vld [vmem:[#allocation28_spill] sm:$0xff]  ;;  %v19421_v32 = vld [vmem:[#allocation30_spill] sm:$0xff] }
 0x9a6   : > { %11090 = vmatmul.mubr.bf16.gmra.mxu0 %v18779_v48  ;;  %11143 = vmatmul.mubr.bf16.gmra.mxu1 %v18779_v48  ;;  %v9489_v43 = vsub.s32 3, %v19420_v29  ;;  %v18831_v30 = vrot.slane %v18811_v27, %v19421_v32 }
 0x9a7   : > { %11158 = vmatpush1.bf16.msra.mxu0 %v14039_v1  ;;  %11211 = vmatpush1.bf16.msra.mxu1 %v14041_v53  ;;  %v14170_v1 = vcombine.high %v9430_v12, %v9438_v18  ;;  %v9413_v53 = vld [vmem:[#allocation15 + $0x630] sm:$0xff] }
 0x9a8   : > { %11159 = vmatprep.subr.bf16.mxu0 %v14024_v42  ;;  %11212 = vmatprep.subr.bf16.mxu1 %v14026_v57  ;;  %v9421_v42 = vld [vmem:[#allocation15 + $0x670] sm:$0xff]  ;;  %v9414_v57 = vld [vmem:[#allocation15 + $0x638] sm:$0xff] }
 0x9a9   : > { %11185 = vmatprep.mubr.bf16.mxu0 %v18762_v31  ;;  %11238 = vmatprep.mubr.bf16.mxu1 %v18762_v31  ;;  %v13978_v31 = vcombine.high %v9238_v35, %v9246_v10  ;;  %v14152_v22 = vcombine.high %v9413_v53, %v9421_v42  ;;  %v14151_v38 = vcombine.low %v9413_v53, %v9421_v42  ;;  %v15965_v12 = vld [vmem:[%s19419_s12 + $0x30] sm:$0xff]  }
 0x9aa   : > { %v14153_v21 = vcombine.low %v9414_v57, %v9422_v25 }
 0x9ab   : > { %11160 = vmatpush1.bf16.msra.mxu0 %v14023_v50  ;;  %11213 = vmatpush1.bf16.msra.mxu1 %v14025_v15  ;;  %v14154_v50 = vcombine.high %v9414_v57, %v9422_v25  ;;  %v9397_v15 = vld [vmem:[#allocation15 + $0x5b0] sm:$0xff] }
 0x9ac   : > { %11161 = vmatprep.subr.bf16.mxu0 %v14008_v37  ;;  %11214 = vmatprep.subr.bf16.mxu1 %v14010_v54  ;;  %v9405_v37 = vld [vmem:[#allocation15 + $0x5f0] sm:$0xff]  ;;  %v9398_v54 = vld [vmem:[#allocation15 + $0x5b8] sm:$0xff] }
 0x9ad   : > { %v14136_v26 = vcombine.high %v9397_v15, %v9405_v37  ;;  %v14135_v39 = vcombine.low %v9397_v15, %v9405_v37  ;;  %v14137_v35 = vcombine.low %v9398_v54, %v9406_v45  ;;  %v15969_v25 = vld [vmem:[%s19419_s12 + $0x28] sm:$0xff]   ;;  %v15972_v37 = vld [vmem:[%s19419_s12 + $0xe0] sm:$0xff]  }
 0x9af   : > { %11162 = vmatpush1.bf16.msra.mxu0 %v14007_v23  ;;  %11215 = vmatpush1.bf16.msra.mxu1 %v14009_v56  ;;  %v14138_v23 = vcombine.high %v9398_v54, %v9406_v45  ;;  %v9381_v56 = vld [vmem:[#allocation15 + $0x530] sm:$0xff] }
 0x9b0   : > { %11163 = vmatprep.subr.bf16.mxu0 %v13992_v4  ;;  %11216 = vmatprep.subr.bf16.mxu1 %v13994_v40  ;;  %v9389_v4 = vld [vmem:[#allocation15 + $0x570] sm:$0xff]  ;;  %v9382_v40 = vld [vmem:[#allocation15 + $0x538] sm:$0xff] }
 0x9b1   : > { %v14120_v10 = vcombine.high %v9381_v56, %v9389_v4  ;;  %v14119_v5 = vcombine.low %v9381_v56, %v9389_v4  ;;  %v14121_v9 = vcombine.low %v9382_v40, %v9390_v62 }
 0x9b3   : > { %11164 = vmatpush1.bf16.msra.mxu0 %v13991_v46  ;;  %11217 = vmatpush1.bf16.msra.mxu1 %v13993_v63  ;;  %v14122_v46 = vcombine.high %v9382_v40, %v9390_v62  ;;  %v9365_v63 = vld [vmem:[#allocation15 + $0x4b0] sm:$0xff]  ;;  %v15974_v40 = vld [vmem:[%s19419_s12 + $0xa0] sm:$0xff]  }
 0x9b4   : > { %11165 = vmatprep.subr.bf16.mxu0 %v13976_v28  ;;  %11218 = vmatprep.subr.bf16.mxu1 %v13978_v31  ;;  %v9373_v28 = vld [vmem:[#allocation15 + $0x4f0] sm:$0xff]  ;;  %v9366_v31 = vld [vmem:[#allocation15 + $0x4b8] sm:$0xff] }
 0x9b5   : > { %v14104_v7 = vcombine.high %v9365_v63, %v9373_v28  ;;  %v14103_v33 = vcombine.low %v9365_v63, %v9373_v28  ;;  %v14105_v13 = vcombine.low %v9366_v31, %v9374_v3  ;;  %v15978_v28 = vld [vmem:[%s19419_s12 + $0x98] sm:$0xff]  }
 0x9b7   : > { %11166 = vmatpush1.bf16.msra.mxu0 %v13975_v17  ;;  %11219 = vmatpush1.bf16.msra.mxu1 %v13977_v59  ;;  %v14106_v17 = vcombine.high %v9366_v31, %v9374_v3  ;;  %v9349_v59 = vld [vmem:[#allocation15 + $0x430] sm:$0xff]  ;;  %v9485_v3 = vsub.s32 2, %v19420_v29 }
 0x9b8   : > { %11167 = vmatprep.subr.bf16.mxu0 %v13960_v24  ;;  %11220 = vmatprep.subr.bf16.mxu1 %v13962_v34  ;;  %v9357_v24 = vld [vmem:[#allocation15 + $0x470] sm:$0xff]  ;;  %v9350_v34 = vld [vmem:[#allocation15 + $0x438] sm:$0xff] }
 0x9b9   : > { %v14088_v41 = vcombine.high %v9349_v59, %v9357_v24  ;;  %v14090_v6 = vcombine.high %v9350_v34, %v9358_v8  ;;  %v14087_v0 = vcombine.low %v9349_v59, %v9357_v24  ;;  %v15979_v31 = vld [vmem:[%s19419_s12 + $0x50] sm:$0xff]  }
 0x9ba   : > { %v19422_v59 = vld [vmem:[#allocation29_spill] sm:$0xff] }
 0x9bb   : > { %11168 = vmatpush1.bf16.msra.mxu0 %v13959_v52  ;;  %11221 = vmatpush1.bf16.msra.mxu1 %v13961_v61  ;;  %v14089_v52 = vcombine.low %v9350_v34, %v9358_v8  ;;  %v15959_v61 = vld [vmem:[%s19419_s12 + $0x78] sm:$0xff]   ;;  %v9478_v24 = vrot.slane %v18811_v27, %v19422_v59  ;;  %v15982_v34 = vld [vmem:[%s19419_s12 + $0x90] sm:$0xff]   ;;  %v15983_v8 = vld [vmem:[%s19419_s12 + $0x48] sm:$0xff]  }
 0x9bc   : > { %11169 = vmatprep.subr.bf16.mxu0 %v14200_v55  ;;  %11222 = vmatprep.subr.bf16.mxu1 %v14202_v49  ;;  %v15960_v55 = vld [vmem:[%s19419_s12 + $0xf8] sm:$0xff]  }
 0x9bd   : > { %v15961_v49 = vld [vmem:[%s19419_s12 + $0x38] sm:$0xff]  }
 0x9bf   : > { %11170 = vmatpush2.bf16.msra.mxu0 %v14199_v58  ;;  %11223 = vmatpush2.bf16.msra.mxu1 %v14201_v60  ;;  %v15963_v58 = vld [vmem:[%s19419_s12 + $0x70] sm:$0xff]  }
 0x9c0   : > { %11171 = vmatprep.subr.bf16.mxu0 %v14184_v19  ;;  %11224 = vmatprep.subr.bf16.mxu1 %v14186_v14  ;;  %v15964_v60 = vld [vmem:[%s19419_s12 + $0xf0] sm:$0xff]  }
 0x9c3   : > { %11172 = vmatpush2.bf16.msra.mxu0 %v14183_v36  ;;  %11225 = vmatpush2.bf16.msra.mxu1 %v14185_v20  ;;  %v18839_v36 = vrot.slane %v18811_v27, %v9489_v43  ;;  %v15967_v20 = vld [vmem:[%s19419_s12 + $0x68] sm:$0xff]  }
 0x9c4   : > { %11173 = vmatprep.subr.bf16.mxu0 %v14168_v51  ;;  %11226 = vmatprep.subr.bf16.mxu1 %v14170_v1  ;;  %v15968_v1 = vld [vmem:[%s19419_s12 + $0xe8] sm:$0xff]  }
 0x9c7   : > { %11174 = vmatpush2.bf16.msra.mxu0 %v14167_v11  ;;  %11227 = vmatpush2.bf16.msra.mxu1 %v14169_v16 }
 0x9c8   : > { %11175 = vmatprep.subr.bf16.mxu0 %v14152_v22  ;;  %11228 = vmatprep.subr.bf16.mxu1 %v14154_v50  ;;  %v15970_v22 = vld [vmem:[%s19419_s12 + $0xa8] sm:$0xff]  }
 0x9cb   : > { %11176 = vmatpush2.bf16.msra.mxu0 %v14151_v38  ;;  %11229 = vmatpush2.bf16.msra.mxu1 %v14153_v21 }
 0x9cc   : > { %11177 = vmatprep.subr.bf16.mxu0 %v14136_v26  ;;  %11230 = vmatprep.subr.bf16.mxu1 %v14138_v23  ;;  %v15973_v26 = vld [vmem:[%s19419_s12 + $0x20] sm:$0xff]  }
 0x9cf   : > { %11178 = vmatpush2.bf16.msra.mxu0 %v14135_v39  ;;  %11231 = vmatpush2.bf16.msra.mxu1 %v14137_v35  ;;  %v15976_v39 = vld [vmem:[%s19419_s12 + $0xd8] sm:$0xff]  }
 0x9d0   : > { %11179 = vmatprep.subr.bf16.mxu0 %v14120_v10  ;;  %11232 = vmatprep.subr.bf16.mxu1 %v14122_v46  ;;  %v15977_v46 = vld [vmem:[%s19419_s12 + $0x18] sm:$0xff]  }
 0x9d3   : > { %11180 = vmatpush2.bf16.msra.mxu0 %v14119_v5  ;;  %11233 = vmatpush2.bf16.msra.mxu1 %v14121_v9  ;;  %v15980_v5 = vld [vmem:[%s19419_s12 + $0xd0] sm:$0xff]  }
 0x9d4   : > { %11181 = vmatprep.subr.bf16.mxu0 %v14104_v7  ;;  %11234 = vmatprep.subr.bf16.mxu1 %v14106_v17  ;;  %v15981_v7 = vld [vmem:[%s19419_s12 + $0x10] sm:$0xff]  }
 0x9d7   : > { %11182 = vmatpush2.bf16.msra.mxu0 %v14103_v33  ;;  %11235 = vmatpush2.bf16.msra.mxu1 %v14105_v13  ;;  %v9486_v33 = vrot.slane %v18811_v27, %v9485_v3  ;;  %v15984_v13 = vld [vmem:[%s19419_s12 + $0xc8] sm:$0xff]  }
 0x9d8   : > { %11183 = vmatprep.subr.bf16.mxu0 %v14088_v41  ;;  %11236 = vmatprep.subr.bf16.mxu1 %v14090_v6  ;;  %v15985_v6 = vld [vmem:[%s19419_s12 + $0x8] sm:$0xff]  }
 0x9db   : > { %11184 = vmatpush2.bf16.msra.mxu0 %v14087_v0  ;;  %11237 = vmatpush2.bf16.msra.mxu1 %v14089_v52 }
 0x9dc   : > { %14343 = vmatprep.subr.bf16.mxu0 %v15959_v61  ;;  %14371 = vmatprep.subr.bf16.mxu1 %v15960_v55  ;;  %v15986_v55 = vld [vmem:[%s19419_s12 + $0x88] sm:$0xff]  }
 0x9de   : > { %v18823_v19 = vpop.f32.mrf.mxu0  ;;  %11186 = vmatmul.mubr.bf16.vlgmr.msra.gmra.mxu0 %v18768_v2  ;;  %v18826_v14 = vpop.f32.mrf.mxu1  ;;  %11239 = vmatmul.mubr.bf16.vlgmr.msra.gmra.mxu1 %v18768_v2  ;;  %v15966_v2 = vld [vmem:[%s19419_s12 + $0xb0] sm:$0xff]  }
 0x9df   : > { %14344 = vmatpush3.bf16.msra.mxu0 %v15961_v49  ;;  %14372 = vmatpush3.bf16.msra.mxu1 %v15962_v47  ;;  %v10870_v52 = vadd.f32 %v18823_v19, %v9478_v24  ;;  %v15987_v49 = vld [vmem:[%s19419_s12 + $0x40] sm:$0xff]   ;;  %v10923_v47 = vadd.f32 %v18826_v14, %v9486_v33 }
 0x9e0   : > { %v10871_v18 = vpop.f32.mrf.mxu0  ;;  %14345 = vmatprep.subr.bf16.mxu0 %v15963_v58  ;;  %v10924_v51 = vpop.f32.mrf.mxu1  ;;  %14373 = vmatprep.subr.bf16.mxu1 %v15964_v60  ;;  %v15988_v60 = vld [vmem:[%s19419_s12 + $0xc0] sm:$0xff]  }
 0x9e1   : > { %11195 = vmatprep.mubr.bf16.mxu0 %v18772_v44  ;;  %11248 = vmatprep.mubr.bf16.mxu1 %v18772_v44  ;;  %v10872_v42 = vadd.f32 %v10871_v18, %v18831_v30  ;;  %v10925_v11 = vadd.f32 %v10924_v51, %v18839_v36  ;;  %v15971_v44 = vld [vmem:[%s19419_s12 + $0x60] sm:$0xff]  }
 0x9e2   : > { %v18851_v53 = vpop.f32.mrf.mxu0  ;;  %v18855_v57 = vpop.f32.mrf.mxu1  ;;  %v15989_v14 = vld [vmem:[%s19419_s12] sm:$0xff]  }
 0x9e3   : > { %14346 = vmatpush3.bf16.msra.mxu0 %v15965_v12  ;;  %14374 = vmatpush3.bf16.msra.mxu1 %v15966_v2  ;;  %v11260_v38 = vmax.f32 %v10872_v42, 0.0  ;;  %v11262_v56 = vmax.f32 %v10925_v11, 0.0  ;;  %v10874_v61 = vadd.f32 %v18851_v53, %v9478_v24  ;;  %v10927_v58 = vadd.f32 %v18855_v57, %v9486_v33  ;;  %v15992_v57 = vld [vmem:[%s19419_s12 + $0x1f8] sm:$0xff]  }
 0x9e4   : > { %v10875_v16 = vpop.f32.mrf.mxu0  ;;  %14347 = vmatprep.subr.bf16.mxu0 %v15967_v20  ;;  %v10928_v15 = vpop.f32.mrf.mxu1  ;;  %14375 = vmatprep.subr.bf16.mxu1 %v15968_v1  ;;  %v11259_v20 = vmax.f32 %v10870_v52, 0.0  ;;  %v15990_v1 = vld [vmem:[%s19419_s12 + $0x80] sm:$0xff]   ;;  %v11261_v53 = vmax.f32 %v10923_v47, 0.0  ;;  %v16014_v52 = vld [vmem:[%s19419_s12 + $0x190] sm:$0xff]   ;;  %v16018_v47 = vld [vmem:[%s19419_s12 + $0x188] sm:$0xff]  }
 0x9e5   : > { %v10876_v50 = vadd.f32 %v10875_v16, %v18831_v30  ;;  %v10929_v54 = vadd.f32 %v10928_v15, %v18839_v36  ;;  %v11275_v51 = vmax.f32 %v10874_v61, 0.0  ;;  %v11277_v42 = vmax.f32 %v10927_v58, 0.0  ;;  %v15993_v15 = vld [vmem:[%s19419_s12 + $0x138] sm:$0xff]   ;;  %v16015_v61 = vld [vmem:[%s19419_s12 + $0x148] sm:$0xff]   ;;  %v16019_v58 = vld [vmem:[%s19419_s12 + $0x140] sm:$0xff]  }
 0x9e6   : > { %11196 = vmatmul.mubr.bf16.gmra.mxu0 %v18779_v48  ;;  %v18873_v45 = vpop.f32.mrf.mxu0  ;;  %11249 = vmatmul.mubr.bf16.gmra.mxu1 %v18779_v48  ;;  %v18879_v23 = vpop.f32.mrf.mxu1  ;;  %v15975_v48 = vld [vmem:[%s19419_s12 + $0x58] sm:$0xff]  }
 0x9e7   : > { %v11276_v21 = vmax.f32 %v10876_v50, 0.0  ;;  %14348 = vmatpush3.bf16.msra.mxu0 %v15969_v25  ;;  %v11278_v4 = vmax.f32 %v10929_v54, 0.0  ;;  %14376 = vmatpush3.bf16.msra.mxu1 %v15970_v22  ;;  %v10880_v11 = vadd.f32 %v18873_v45, %v9478_v24  ;;  %v10933_v50 = vadd.f32 %v18879_v23, %v9486_v33  ;;  %v15995_v45 = vld [vmem:[%s19419_s12 + $0x170] sm:$0xff]  }
 0x9e8   : > { %14349 = vmatprep.subr.bf16.mxu0 %v15971_v44  ;;  %14377 = vmatprep.subr.bf16.mxu1 %v15972_v37  ;;  %v10881_v10 = vpop.f32.mrf.mxu0  ;;  %v10934_v63 = vpop.f32.mrf.mxu1  ;;  %v11323_v54 = vpack.c.bf16 %v11275_v51, %v11259_v20  ;;  %v15996_v23 = vld [vmem:[%s19419_s12 + $0x1f0] sm:$0xff]   ;;  %v9497_v20 = vsub.s32 5, %v19420_v29  ;;  %v9493_v51 = vsub.s32 4, %v19420_v29 }
 0x9e9   : > { %v11324_v62 = vpack.c.bf16 %v11276_v21, %v11260_v38  ;;  %v11326_v35 = vpack.c.bf16 %v11278_v4, %v11262_v56  ;;  %v10882_v19 = vadd.f32 %v10881_v10, %v18831_v30  ;;  %v10935_v18 = vadd.f32 %v10934_v63, %v18839_v36  ;;  %v15994_v38 = vld [vmem:[%s19419_s12 + $0x1b8] sm:$0xff]   ;;  %v15999_v10 = vld [vmem:[%s19419_s12 + $0x168] sm:$0xff]  }
 0x9ea   : > { %v10883_v9 = vpop.f32.mrf.mxu0  ;;  %v10936_v17 = vpop.f32.mrf.mxu1  ;;  %v11325_v21 = vpack.c.bf16 %v11277_v42, %v11261_v53  ;;  %v11291_v56 = vmax.f32 %v10880_v11, 0.0 }
 0x9eb   : > { %14350 = vmatpush3.bf16.msra.mxu0 %v15973_v26  ;;  %12421 = vmatprep.mubr.bf16.mxu0 %v11324_v62  ;;  %v10884_v16 = vadd.f32 %v10883_v9, %v9478_v24  ;;  %v11294_v22 = vmax.f32 %v10935_v18, 0.0  ;;  %v10937_v37 = vadd.f32 %v10936_v17, %v9486_v33  ;;  %v11293_v62 = vmax.f32 %v10933_v50, 0.0  ;;  %v16003_v9 = vld [vmem:[%s19419_s12 + $0x160] sm:$0xff]   ;;  %v16009_v33 = vld [vmem:[%s19419_s12 + $0x118] sm:$0xff]  }
 0x9ec   : > { %14378 = vmatpush3.bf16.msra.mxu1 %v15974_v40  ;;  %12470 = vmatprep.mubr.bf16.mxu1 %v11326_v35  ;;  %v10885_v41 = vpop.f32.mrf.mxu0  ;;  %v10938_v0 = vpop.f32.mrf.mxu1  ;;  %v15998_v35 = vld [vmem:[%s19419_s12 + $0x1b0] sm:$0xff]   ;;  %v16005_v17 = vld [vmem:[%s19419_s12 + $0x120] sm:$0xff]   ;;  %v16023_v18 = vld [vmem:[%s19419_s12 + $0x278] sm:$0xff]  }
 0x9ed   : > { %14351 = vmatprep.subr.bf16.mxu0 %v15975_v48  ;;  %14379 = vmatprep.subr.bf16.mxu1 %v15976_v39  ;;  %v10886_v12 = vadd.f32 %v10885_v41, %v18831_v30  ;;  %v10939_v2 = vadd.f32 %v10938_v0, %v18839_v36  ;;  %v15991_v30 = vld [vmem:[%s19419_s12 + $0x178] sm:$0xff]   ;;  %v11292_v36 = vmax.f32 %v10882_v19, 0.0  ;;  %v11307_v4 = vmax.f32 %v10884_v16, 0.0  ;;  %v15997_v39 = vld [vmem:[%s19419_s12 + $0x130] sm:$0xff]   ;;  %v16006_v24 = vld [vmem:[%s19419_s12 + $0x1a0] sm:$0xff]  }
 0x9ee   : > { %v11309_v48 = vmax.f32 %v10937_v37, 0.0  ;;  %v16011_v41 = vld [vmem:[%s19419_s12 + $0x150] sm:$0xff]   ;;  %v16021_v19 = vld [vmem:[%s19419_s12 + $0x100] sm:$0xff]  }
 0x9ef   : > { %14352 = vmatpush3.bf16.msra.mxu0 %v15977_v46  ;;  %v11308_v25 = vmax.f32 %v10886_v12, 0.0  ;;  %v11310_v44 = vmax.f32 %v10939_v2, 0.0  ;;  %v16000_v46 = vld [vmem:[%s19419_s12 + $0x1e8] sm:$0xff]   ;;  %v11339_v63 = vpack.c.bf16 %v11307_v4, %v11291_v56  ;;  %v16013_v0 = vld [vmem:[%s19419_s12 + $0x110] sm:$0xff]   ;;  %v16022_v12 = vld [vmem:[%s19419_s12 + $0x180] sm:$0xff]  }
 0x9f0   : > { %14380 = vmatpush3.bf16.msra.mxu1 %v15978_v28  ;;  %14353 = vmatprep.subr.bf16.mxu0 %v15979_v31  ;;  %v11341_v28 = vpack.c.bf16 %v11309_v48, %v11293_v62  ;;  %v16001_v31 = vld [vmem:[%s19419_s12 + $0x128] sm:$0xff]   ;;  %v16024_v2 = vld [vmem:[%s19419_s12 + $0x2f8] sm:$0xff]  }
 0x9f1   : > { %14381 = vmatprep.subr.bf16.mxu1 %v15980_v5  ;;  %v11340_v26 = vpack.c.bf16 %v11308_v25, %v11292_v36  ;;  %v11342_v40 = vpack.c.bf16 %v11310_v44, %v11294_v22  ;;  %v16002_v5 = vld [vmem:[%s19419_s12 + $0x1a8] sm:$0xff]   ;;  %v9498_v36 = vrot.slane %v18811_v27, %v9497_v20 }
 0x9f3   : > { %14354 = vmatpush3.bf16.msra.mxu0 %v15981_v7  ;;  %v16004_v7 = vld [vmem:[%s19419_s12 + $0x1e0] sm:$0xff]  }
 0x9f4   : > { %14382 = vmatpush3.bf16.msra.mxu1 %v15982_v34  ;;  %14355 = vmatprep.subr.bf16.mxu0 %v15983_v8  ;;  %v16007_v34 = vld [vmem:[%s19419_s12 + $0x158] sm:$0xff]  }
 0x9f5   : > { %14383 = vmatprep.subr.bf16.mxu1 %v15984_v13  ;;  %v16008_v8 = vld [vmem:[%s19419_s12 + $0x1d8] sm:$0xff]  }
 0x9f6   : > { %v16010_v13 = vld [vmem:[%s19419_s12 + $0x198] sm:$0xff]  }
 0x9f7   : > { %14356 = vmatpush3.bf16.msra.mxu0 %v15985_v6  ;;  %v16012_v6 = vld [vmem:[%s19419_s12 + $0x1d0] sm:$0xff]  }
 0x9f8   : > { %14384 = vmatpush3.bf16.msra.mxu1 %v15986_v55  ;;  %14357 = vmatprep.subr.bf16.mxu0 %v15987_v49  ;;  %v16016_v55 = vld [vmem:[%s19419_s12 + $0x1c8] sm:$0xff]  }
 0x9f9   : > { %14385 = vmatprep.subr.bf16.mxu1 %v15988_v60  ;;  %v16017_v49 = vld [vmem:[%s19419_s12 + $0x108] sm:$0xff]   ;;  %v16020_v60 = vld [vmem:[%s19419_s12 + $0x1c0] sm:$0xff]  }
 0x9fb   : > { %14358 = vmatpush3.bf16.msra.mxu0 %v15989_v14  ;;  %v9501_v14 = vsub.s32 6, %v19420_v29 }
 0x9fc   : > { %14386 = vmatpush3.bf16.msra.mxu1 %v15990_v1  ;;  %14399 = vmatprep.subr.bf16.mxu0 %v15991_v30  ;;  %v9505_v1 = vsub.s32 7, %v19420_v29 }
 0x9fd   : > { %14427 = vmatprep.subr.bf16.mxu1 %v15992_v57  ;;  %v9502_v53 = vrot.slane %v18811_v27, %v9501_v14  ;;  %v9494_v57 = vrot.slane %v18811_v27, %v9493_v51 }
 0x9fe   : > { %12422 = vmatmul.mubr.bf16.vlgmr.msra.gmra.mxu0 %v11323_v54  ;;  %v9506_v11 = vrot.slane %v18811_v27, %v9505_v1 }
 0x9ff   : > { %12471 = vmatmul.mubr.bf16.vlgmr.msra.gmra.mxu1 %v11325_v21  ;;  %14400 = vmatpush3.bf16.msra.mxu0 %v15993_v15 }
 0xa00   : > { %14428 = vmatpush3.bf16.msra.mxu1 %v15994_v38  ;;  %14401 = vmatprep.subr.bf16.mxu0 %v15995_v45 }
 0xa01   : > { %14429 = vmatprep.subr.bf16.mxu1 %v15996_v23  ;;  %12429 = vmatprep.mubr.bf16.mxu0 %v11340_v26 }
 0xa02   : > { %12478 = vmatprep.mubr.bf16.mxu1 %v11342_v40 }
 0xa03   : > { %14402 = vmatpush3.bf16.msra.mxu0 %v15997_v39 }
 0xa04   : > { %14430 = vmatpush3.bf16.msra.mxu1 %v15998_v35  ;;  %14403 = vmatprep.subr.bf16.mxu0 %v15999_v10 }
 0xa05   : > { %14431 = vmatprep.subr.bf16.mxu1 %v16000_v46 }
 0xa06   : > { %12430 = vmatmul.mubr.bf16.gmra.mxu0 %v11339_v63 }
 0xa07   : > { %14404 = vmatpush3.bf16.msra.mxu0 %v16001_v31  ;;  %12479 = vmatmul.mubr.bf16.gmra.mxu1 %v11341_v28 }
 0xa08   : > { %14432 = vmatpush3.bf16.msra.mxu1 %v16002_v5  ;;  %14405 = vmatprep.subr.bf16.mxu0 %v16003_v9 }
 0xa09   : > { %14433 = vmatprep.subr.bf16.mxu1 %v16004_v7 }
 0xa0b   : > { %14406 = vmatpush3.bf16.msra.mxu0 %v16005_v17 }
 0xa0c   : > { %14434 = vmatpush3.bf16.msra.mxu1 %v16006_v24  ;;  %14407 = vmatprep.subr.bf16.mxu0 %v16007_v34  ;;  %v16025_v24 = vld [vmem:[%s19419_s12 + $0x238] sm:$0xff]  }
 0xa0d   : > { %14435 = vmatprep.subr.bf16.mxu1 %v16008_v8 }
 0xa0f   : > { %14408 = vmatpush3.bf16.msra.mxu0 %v16009_v33 }
 0xa10   : > { %14436 = vmatpush3.bf16.msra.mxu1 %v16010_v13  ;;  %14409 = vmatprep.subr.bf16.mxu0 %v16011_v41  ;;  %v16026_v41 = vld [vmem:[%s19419_s12 + $0x2b8] sm:$0xff]  }
 0xa11   : > { %14437 = vmatprep.subr.bf16.mxu1 %v16012_v6  ;;  %v16027_v6 = vld [vmem:[%s19419_s12 + $0x270] sm:$0xff]  }
 0xa13   : > { %14410 = vmatpush3.bf16.msra.mxu0 %v16013_v0 }
 0xa14   : > { %14438 = vmatpush3.bf16.msra.mxu1 %v16014_v52  ;;  %14411 = vmatprep.subr.bf16.mxu0 %v16015_v61 }
 0xa15   : > { %14439 = vmatprep.subr.bf16.mxu1 %v16016_v55  ;;  %v16028_v55 = vld [vmem:[%s19419_s12 + $0x2f0] sm:$0xff]  }
 0xa17   : > { %14412 = vmatpush3.bf16.msra.mxu0 %v16017_v49 }
 0xa18   : > { %14440 = vmatpush3.bf16.msra.mxu1 %v16018_v47  ;;  %14413 = vmatprep.subr.bf16.mxu0 %v16019_v58 }
 0xa19   : > { %14441 = vmatprep.subr.bf16.mxu1 %v16020_v60 }
 0xa1b   : > { %14414 = vmatpush3.bf16.msra.mxu0 %v16021_v19 }
 0xa1c   : > { %14442 = vmatpush3.bf16.msra.mxu1 %v16022_v12  ;;  %14455 = vmatprep.subr.bf16.mxu0 %v16023_v18 }
 0xa1d   : > { %14483 = vmatprep.subr.bf16.mxu1 %v16024_v2 }
 0xa1e   : > { %v10975_v30 = vpop.f32.mrf.mxu0  ;;  %v11028_v42 = vpop.f32.mrf.mxu1 }
 0xa1f   : > { %v11029_v44 = vadd.f32 %v11028_v42, %v9502_v53  ;;  %v10976_v54 = vadd.f32 %v10975_v30, %v9494_v57  ;;  %v16029_v30 = vld [vmem:[%s19419_s12 + $0x230] sm:$0xff]  }
 0xa20   : > { %v10977_v25 = vpop.f32.mrf.mxu0  ;;  %v11030_v16 = vpop.f32.mrf.mxu1 }
 0xa21   : > { %v10978_v50 = vadd.f32 %v10977_v25, %v9498_v36  ;;  %v11031_v38 = vadd.f32 %v11030_v16, %v9506_v11  ;;  %v11265_v62 = vmax.f32 %v11029_v44, 0.0  ;;  %v11263_v10 = vmax.f32 %v10976_v54, 0.0 }
 0xa22   : > { %v10979_v22 = vpop.f32.mrf.mxu0  ;;  %v11032_v37 = vpop.f32.mrf.mxu1 }
 0xa23   : > { %v10980_v15 = vadd.f32 %v10979_v22, %v9494_v57  ;;  %v11033_v45 = vadd.f32 %v11032_v37, %v9502_v53  ;;  %v11264_v48 = vmax.f32 %v10978_v50, 0.0  ;;  %v11266_v46 = vmax.f32 %v11031_v38, 0.0  ;;  %v16032_v22 = vld [vmem:[%s19419_s12 + $0x2e8] sm:$0xff]  }
 0xa24   : > { %v10981_v21 = vpop.f32.mrf.mxu0  ;;  %v11034_v23 = vpop.f32.mrf.mxu1  ;;  %v16033_v37 = vld [vmem:[%s19419_s12 + $0x228] sm:$0xff]  }
 0xa25   : > { %v10982_v26 = vadd.f32 %v10981_v21, %v9498_v36  ;;  %v11279_v56 = vmax.f32 %v10980_v15, 0.0  ;;  %v11035_v4 = vadd.f32 %v11034_v23, %v9506_v11  ;;  %v11281_v39 = vmax.f32 %v11033_v45, 0.0  ;;  %v16034_v38 = vld [vmem:[%s19419_s12 + $0x2a8] sm:$0xff]   ;;  %v16035_v45 = vld [vmem:[%s19419_s12 + $0x260] sm:$0xff]  }
 0xa26   : > { %v10985_v40 = vpop.f32.mrf.mxu0  ;;  %v11038_v27 = vpop.f32.mrf.mxu1  ;;  %v16036_v21 = vld [vmem:[%s19419_s12 + $0x2e0] sm:$0xff]  }
 0xa27   : > { %v11280_v35 = vmax.f32 %v10982_v26, 0.0  ;;  %v11282_v63 = vmax.f32 %v11035_v4, 0.0  ;;  %v10986_v28 = vadd.f32 %v10985_v40, %v9494_v57  ;;  %v11039_v7 = vadd.f32 %v11038_v27, %v9502_v53  ;;  %v16037_v26 = vld [vmem:[%s19419_s12 + $0x220] sm:$0xff]   ;;  %v16040_v4 = vld [vmem:[%s19419_s12 + $0x2d8] sm:$0xff]   ;;  %v16046_v27 = vld [vmem:[%s19419_s12 + $0x290] sm:$0xff]  }
 0xa28   : > { %v10987_v31 = vpop.f32.mrf.mxu0  ;;  %v11040_v17 = vpop.f32.mrf.mxu1  ;;  %v11327_v34 = vpack.c.bf16 %v11279_v56, %v11263_v10  ;;  %v11329_v0 = vpack.c.bf16 %v11281_v39, %v11265_v62  ;;  %v16038_v23 = vld [vmem:[%s19419_s12 + $0x2a0] sm:$0xff]   ;;  %v16039_v56 = vld [vmem:[%s19419_s12 + $0x258] sm:$0xff]   ;;  %v16044_v39 = vld [vmem:[%s19419_s12 + $0x2d0] sm:$0xff]  }
 0xa29   : > { %v11328_v5 = vpack.c.bf16 %v11280_v35, %v11264_v48  ;;  %v10988_v9 = vadd.f32 %v10987_v31, %v9498_v36  ;;  %v11330_v8 = vpack.c.bf16 %v11282_v63, %v11266_v46  ;;  %v11041_v13 = vadd.f32 %v11040_v17, %v9506_v11  ;;  %v16041_v40 = vld [vmem:[%s19419_s12 + $0x218] sm:$0xff]   ;;  %v16043_v48 = vld [vmem:[%s19419_s12 + $0x250] sm:$0xff]   ;;  %v16047_v10 = vld [vmem:[%s19419_s12 + $0x248] sm:$0xff]  }
 0xa2a   : > { %v10989_v33 = vpop.f32.mrf.mxu0  ;;  %v11042_v61 = vpop.f32.mrf.mxu1  ;;  %v11295_v49 = vmax.f32 %v10986_v28, 0.0  ;;  %v11297_v19 = vmax.f32 %v11039_v7, 0.0  ;;  %v16042_v62 = vld [vmem:[%s19419_s12 + $0x298] sm:$0xff]   ;;  %v16045_v35 = vld [vmem:[%s19419_s12 + $0x210] sm:$0xff]   ;;  %v16048_v46 = vld [vmem:[%s19419_s12 + $0x2c8] sm:$0xff]  }
 0xa2b   : > { %v10990_v52 = vadd.f32 %v10989_v33, %v9494_v57  ;;  %12519 = vmatprep.mubr.bf16.mxu0 %v11328_v5  ;;  %12568 = vmatprep.mubr.bf16.mxu1 %v11330_v8  ;;  %v11043_v58 = vadd.f32 %v11042_v61, %v9502_v53  ;;  %v11296_v60 = vmax.f32 %v10988_v9, 0.0  ;;  %v11298_v42 = vmax.f32 %v11041_v13, 0.0  ;;  %v16030_v53 = vld [vmem:[%s19419_s12 + $0x2b0] sm:$0xff]   ;;  %v16049_v63 = vld [vmem:[%s19419_s12 + $0x208] sm:$0xff]   ;;  %v16051_v31 = vld [vmem:[%s19419_s12 + $0x240] sm:$0xff]  }
 0xa2c   : > { %v10991_v47 = vpop.f32.mrf.mxu0  ;;  %12520 = vmatmul.mubr.bf16.vlgmr.msra.gmra.mxu0 %v11327_v34  ;;  %12569 = vmatmul.mubr.bf16.vlgmr.msra.gmra.mxu1 %v11329_v0  ;;  %v11044_v2 = vpop.f32.mrf.mxu1  ;;  %v16050_v28 = vld [vmem:[%s19419_s12 + $0x288] sm:$0xff]   ;;  %v16052_v5 = vld [vmem:[%s19419_s12 + $0x2c0] sm:$0xff]   ;;  %v16055_v17 = vld [vmem:[%s19419_s12 + $0x378] sm:$0xff]  }
 0xa2d   : > { %v11311_v12 = vmax.f32 %v10990_v52, 0.0  ;;  %v10992_v18 = vadd.f32 %v10991_v47, %v9498_v36  ;;  %14456 = vmatpush3.bf16.msra.mxu0 %v16025_v24  ;;  %v11313_v57 = vmax.f32 %v11043_v58, 0.0  ;;  %v11045_v25 = vadd.f32 %v11044_v2, %v9506_v11  ;;  %14484 = vmatpush3.bf16.msra.mxu1 %v16026_v41  ;;  %v16031_v36 = vld [vmem:[%s19419_s12 + $0x268] sm:$0xff]   ;;  %v16053_v9 = vld [vmem:[%s19419_s12 + $0x200] sm:$0xff]   ;;  %v16056_v24 = vld [vmem:[%s19419_s12 + $0x3f8] sm:$0xff]  }
 0xa2e   : > { %14457 = vmatprep.subr.bf16.mxu0 %v16027_v6  ;;  %14485 = vmatprep.subr.bf16.mxu1 %v16028_v55  ;;  %v16054_v7 = vld [vmem:[%s19419_s12 + $0x280] sm:$0xff]  }
 0xa2f   : > { %v11312_v16 = vmax.f32 %v10992_v18, 0.0  ;;  %v11343_v44 = vpack.c.bf16 %v11311_v12, %v11295_v49  ;;  %v11314_v50 = vmax.f32 %v11045_v25, 0.0  ;;  %v11345_v11 = vpack.c.bf16 %v11313_v57, %v11297_v19  ;;  %v19162_v34 = vld [vmem:[#allocation16 + $0x8] sm:$0xff] }
 0xa30   : > { %v9518_v33 = vrot.slane %v19162_v34, %v9485_v3  ;;  %v9514_v41 = vrot.slane %v19162_v34, %v19421_v32  ;;  %v9510_v6 = vrot.slane %v19162_v34, %v19422_v59  ;;  %v9522_v52 = vrot.slane %v19162_v34, %v9489_v43 }
 0xa31   : > { %v11344_v15 = vpack.c.bf16 %v11312_v16, %v11296_v60  ;;  %14458 = vmatpush3.bf16.msra.mxu0 %v16029_v30  ;;  %v11346_v54 = vpack.c.bf16 %v11314_v50, %v11298_v42  ;;  %14486 = vmatpush3.bf16.msra.mxu1 %v16030_v53 }
 0xa32   : > { %14459 = vmatprep.subr.bf16.mxu0 %v16031_v36  ;;  %14487 = vmatprep.subr.bf16.mxu1 %v16032_v22 }
 0xa33   : > { %12527 = vmatprep.mubr.bf16.mxu0 %v11344_v15  ;;  %12576 = vmatprep.mubr.bf16.mxu1 %v11346_v54 }
 0xa34   : > { %12528 = vmatmul.mubr.bf16.gmra.mxu0 %v11343_v44  ;;  %12577 = vmatmul.mubr.bf16.gmra.mxu1 %v11345_v11 }
 0xa35   : > { %14460 = vmatpush3.bf16.msra.mxu0 %v16033_v37  ;;  %14488 = vmatpush3.bf16.msra.mxu1 %v16034_v38 }
 0xa36   : > { %14461 = vmatprep.subr.bf16.mxu0 %v16035_v45  ;;  %14489 = vmatprep.subr.bf16.mxu1 %v16036_v21  ;;  %v16057_v45 = vld [vmem:[%s19419_s12 + $0x338] sm:$0xff]  }
 0xa39   : > { %14462 = vmatpush3.bf16.msra.mxu0 %v16037_v26  ;;  %14490 = vmatpush3.bf16.msra.mxu1 %v16038_v23 }
 0xa3a   : > { %14463 = vmatprep.subr.bf16.mxu0 %v16039_v56  ;;  %14491 = vmatprep.subr.bf16.mxu1 %v16040_v4  ;;  %v16058_v4 = vld [vmem:[%s19419_s12 + $0x3b8] sm:$0xff]  }
 0xa3d   : > { %14464 = vmatpush3.bf16.msra.mxu0 %v16041_v40  ;;  %14492 = vmatpush3.bf16.msra.mxu1 %v16042_v62  ;;  %v16059_v40 = vld [vmem:[%s19419_s12 + $0x370] sm:$0xff]  }
 0xa3e   : > { %14465 = vmatprep.subr.bf16.mxu0 %v16043_v48  ;;  %14493 = vmatprep.subr.bf16.mxu1 %v16044_v39 }
 0xa41   : > { %14466 = vmatpush3.bf16.msra.mxu0 %v16045_v35  ;;  %14494 = vmatpush3.bf16.msra.mxu1 %v16046_v27  ;;  %v16060_v35 = vld [vmem:[%s19419_s12 + $0x3f0] sm:$0xff]  }
 0xa42   : > { %14467 = vmatprep.subr.bf16.mxu0 %v16047_v10  ;;  %14495 = vmatprep.subr.bf16.mxu1 %v16048_v46 }
 0xa45   : > { %14468 = vmatpush3.bf16.msra.mxu0 %v16049_v63  ;;  %14496 = vmatpush3.bf16.msra.mxu1 %v16050_v28 }
 0xa46   : > { %14469 = vmatprep.subr.bf16.mxu0 %v16051_v31  ;;  %14497 = vmatprep.subr.bf16.mxu1 %v16052_v5 }
 0xa49   : > { %14470 = vmatpush3.bf16.msra.mxu0 %v16053_v9  ;;  %14498 = vmatpush3.bf16.msra.mxu1 %v16054_v7  ;;  %v16061_v7 = vld [vmem:[%s19419_s12 + $0x330] sm:$0xff]  }
 0xa4a   : > { %14511 = vmatprep.subr.bf16.mxu0 %v16055_v17  ;;  %14539 = vmatprep.subr.bf16.mxu1 %v16056_v24 }
 0xa5e   : > { %v11081_v8 = vpop.f32.mrf.mxu0  ;;  %v11134_v13 = vpop.f32.mrf.mxu1 }
 0xa5f   : > { %v11135_v49 = vadd.f32 %v11134_v13, %v9518_v33  ;;  %v11082_v19 = vadd.f32 %v11081_v8, %v9510_v6  ;;  %v16063_v13 = vld [vmem:[%s19419_s12 + $0x368] sm:$0xff]  }
 0xa60   : > { %v11083_v0 = vpop.f32.mrf.mxu0  ;;  %v11136_v61 = vpop.f32.mrf.mxu1 }
 0xa61   : > { %v11084_v47 = vadd.f32 %v11083_v0, %v9514_v41  ;;  %v11137_v3 = vadd.f32 %v11136_v61, %v9522_v52  ;;  %v11269_v57 = vmax.f32 %v11135_v49, 0.0  ;;  %v11267_v16 = vmax.f32 %v11082_v19, 0.0  ;;  %v16065_v49 = vld [vmem:[%s19419_s12 + $0x328] sm:$0xff]   ;;  %v16068_v19 = vld [vmem:[%s19419_s12 + $0x3e0] sm:$0xff]  }
 0xa62   : > { %v11085_v55 = vpop.f32.mrf.mxu0  ;;  %v11138_v60 = vpop.f32.mrf.mxu1 }
 0xa63   : > { %v11086_v58 = vadd.f32 %v11085_v55, %v9510_v6  ;;  %v11139_v12 = vadd.f32 %v11138_v60, %v9518_v33  ;;  %v11268_v25 = vmax.f32 %v11084_v47, 0.0  ;;  %v11270_v22 = vmax.f32 %v11137_v3, 0.0  ;;  %v16067_v60 = vld [vmem:[%s19419_s12 + $0x360] sm:$0xff]  }
 0xa64   : > { %v11087_v18 = vpop.f32.mrf.mxu0  ;;  %v11140_v32 = vpop.f32.mrf.mxu1  ;;  %v16069_v3 = vld [vmem:[%s19419_s12 + $0x320] sm:$0xff]  }
 0xa65   : > { %v11088_v2 = vadd.f32 %v11087_v18, %v9514_v41  ;;  %v11283_v30 = vmax.f32 %v11086_v58, 0.0  ;;  %v11141_v42 = vadd.f32 %v11140_v32, %v9522_v52  ;;  %v11285_v53 = vmax.f32 %v11139_v12, 0.0  ;;  %v16066_v58 = vld [vmem:[%s19419_s12 + $0x3a8] sm:$0xff]   ;;  %v16070_v12 = vld [vmem:[%s19419_s12 + $0x3a0] sm:$0xff]   ;;  %v16071_v18 = vld [vmem:[%s19419_s12 + $0x358] sm:$0xff]  }
 0xa66   : > { %v11091_v59 = vpop.f32.mrf.mxu0  ;;  %v11144_v43 = vpop.f32.mrf.mxu1  ;;  %v16073_v32 = vld [vmem:[%s19419_s12 + $0x318] sm:$0xff]  }
 0xa67   : > { %v11284_v36 = vmax.f32 %v11088_v2, 0.0  ;;  %v11286_v44 = vmax.f32 %v11141_v42, 0.0  ;;  %v11092_v50 = vadd.f32 %v11091_v59, %v9510_v6  ;;  %v11145_v54 = vadd.f32 %v11144_v43, %v9518_v33  ;;  %v16072_v2 = vld [vmem:[%s19419_s12 + $0x3d8] sm:$0xff]   ;;  %v16075_v42 = vld [vmem:[%s19419_s12 + $0x350] sm:$0xff]   ;;  %v16081_v43 = vld [vmem:[%s19419_s12 + $0x308] sm:$0xff]  }
 0xa68   : > { %v11093_v15 = vpop.f32.mrf.mxu0  ;;  %v11146_v38 = vpop.f32.mrf.mxu1  ;;  %v11331_v21 = vpack.c.bf16 %v11283_v30, %v11267_v16  ;;  %v11333_v62 = vpack.c.bf16 %v11285_v53, %v11269_v57  ;;  %v16074_v30 = vld [vmem:[%s19419_s12 + $0x398] sm:$0xff]   ;;  %v16076_v59 = vld [vmem:[%s19419_s12 + $0x3d0] sm:$0xff]   ;;  %v16079_v53 = vld [vmem:[%s19419_s12 + $0x348] sm:$0xff]  }
 0xa69   : > { %v11332_v11 = vpack.c.bf16 %v11284_v36, %v11268_v25  ;;  %v11094_v37 = vadd.f32 %v11093_v15, %v9514_v41  ;;  %v11334_v26 = vpack.c.bf16 %v11286_v44, %v11270_v22  ;;  %v11147_v56 = vadd.f32 %v11146_v38, %v9522_v52  ;;  %v16077_v57 = vld [vmem:[%s19419_s12 + $0x310] sm:$0xff]   ;;  %v16080_v36 = vld [vmem:[%s19419_s12 + $0x3c8] sm:$0xff]   ;;  %v16083_v22 = vld [vmem:[%s19419_s12 + $0x340] sm:$0xff]  }
 0xa6a   : > { %v11095_v23 = vpop.f32.mrf.mxu0  ;;  %v11148_v39 = vpop.f32.mrf.mxu1  ;;  %v11299_v27 = vmax.f32 %v11092_v50, 0.0  ;;  %v11301_v28 = vmax.f32 %v11145_v54, 0.0  ;;  %v16078_v25 = vld [vmem:[%s19419_s12 + $0x390] sm:$0xff]   ;;  %v16082_v16 = vld [vmem:[%s19419_s12 + $0x388] sm:$0xff]   ;;  %v16084_v44 = vld [vmem:[%s19419_s12 + $0x3c0] sm:$0xff]   ;;  %v9530_v54 = vrot.slane %v19162_v34, %v9497_v20  ;;  %v9526_v38 = vrot.slane %v19162_v34, %v9493_v51 }
 0xa6b   : > { %v11096_v48 = vadd.f32 %v11095_v23, %v9510_v6  ;;  %12617 = vmatprep.mubr.bf16.mxu0 %v11332_v11  ;;  %12666 = vmatprep.mubr.bf16.mxu1 %v11334_v26  ;;  %v11149_v46 = vadd.f32 %v11148_v39, %v9518_v33  ;;  %v11300_v63 = vmax.f32 %v11094_v37, 0.0  ;;  %v11302_v17 = vmax.f32 %v11147_v56, 0.0  ;;  %v16062_v33 = vld [vmem:[%s19419_s12 + $0x3b0] sm:$0xff]   ;;  %v16064_v6 = vld [vmem:[%s19419_s12 + $0x3e8] sm:$0xff]   ;;  %v16085_v50 = vld [vmem:[%s19419_s12 + $0x300] sm:$0xff]  }
 0xa6c   : > { %v11097_v10 = vpop.f32.mrf.mxu0  ;;  %12618 = vmatmul.mubr.bf16.vlgmr.msra.gmra.mxu0 %v11331_v21  ;;  %12667 = vmatmul.mubr.bf16.vlgmr.msra.gmra.mxu1 %v11333_v62  ;;  %v11150_v9 = vpop.f32.mrf.mxu1  ;;  %v16086_v15 = vld [vmem:[%s19419_s12 + $0x380] sm:$0xff]   ;;  %v9538_v21 = vrot.slane %v19162_v34, %v9505_v1  ;;  %v9534_v26 = vrot.slane %v19162_v34, %v9501_v14 }
 0xa6d   : > { %v11315_v31 = vmax.f32 %v11096_v48, 0.0  ;;  %v11098_v5 = vadd.f32 %v11097_v10, %v9514_v41  ;;  %14512 = vmatpush3.bf16.msra.mxu0 %v16057_v45  ;;  %v11317_v24 = vmax.f32 %v11149_v46, 0.0  ;;  %v11151_v8 = vadd.f32 %v11150_v9, %v9522_v52  ;;  %14540 = vmatpush3.bf16.msra.mxu1 %v16058_v4 }
 0xa6e   : > { %14513 = vmatprep.subr.bf16.mxu0 %v16059_v40  ;;  %14541 = vmatprep.subr.bf16.mxu1 %v16060_v35 }
 0xa6f   : > { %v11316_v41 = vmax.f32 %v11098_v5, 0.0  ;;  %v11347_v0 = vpack.c.bf16 %v11315_v31, %v11299_v27  ;;  %v11318_v61 = vmax.f32 %v11151_v8, 0.0  ;;  %v11349_v52 = vpack.c.bf16 %v11317_v24, %v11301_v28 }
 0xa71   : > { %v11348_v55 = vpack.c.bf16 %v11316_v41, %v11300_v63  ;;  %14514 = vmatpush3.bf16.msra.mxu0 %v16061_v7  ;;  %v11350_v47 = vpack.c.bf16 %v11318_v61, %v11302_v17  ;;  %14542 = vmatpush3.bf16.msra.mxu1 %v16062_v33 }
 0xa72   : > { %14515 = vmatprep.subr.bf16.mxu0 %v16063_v13  ;;  %14543 = vmatprep.subr.bf16.mxu1 %v16064_v6 }
 0xa73   : > { %12625 = vmatprep.mubr.bf16.mxu0 %v11348_v55  ;;  %12674 = vmatprep.mubr.bf16.mxu1 %v11350_v47 }
 0xa74   : > { %12626 = vmatmul.mubr.bf16.gmra.mxu0 %v11347_v0  ;;  %12675 = vmatmul.mubr.bf16.gmra.mxu1 %v11349_v52 }
 0xa75   : > { %14516 = vmatpush3.bf16.msra.mxu0 %v16065_v49  ;;  %14544 = vmatpush3.bf16.msra.mxu1 %v16066_v58 }
 0xa76   : > { %14517 = vmatprep.subr.bf16.mxu0 %v16067_v60  ;;  %14545 = vmatprep.subr.bf16.mxu1 %v16068_v19 }
 0xa79   : > { %14518 = vmatpush3.bf16.msra.mxu0 %v16069_v3  ;;  %14546 = vmatpush3.bf16.msra.mxu1 %v16070_v12 }
 0xa7a   : > { %14519 = vmatprep.subr.bf16.mxu0 %v16071_v18  ;;  %14547 = vmatprep.subr.bf16.mxu1 %v16072_v2 }
 0xa7d   : > { %14520 = vmatpush3.bf16.msra.mxu0 %v16073_v32  ;;  %14548 = vmatpush3.bf16.msra.mxu1 %v16074_v30 }
 0xa7e   : > { %14521 = vmatprep.subr.bf16.mxu0 %v16075_v42  ;;  %14549 = vmatprep.subr.bf16.mxu1 %v16076_v59 }
 0xa81   : > { %14522 = vmatpush3.bf16.msra.mxu0 %v16077_v57  ;;  %14550 = vmatpush3.bf16.msra.mxu1 %v16078_v25 }
 0xa82   : > { %14523 = vmatprep.subr.bf16.mxu0 %v16079_v53  ;;  %14551 = vmatprep.subr.bf16.mxu1 %v16080_v36 }
 0xa85   : > { %14524 = vmatpush3.bf16.msra.mxu0 %v16081_v43  ;;  %14552 = vmatpush3.bf16.msra.mxu1 %v16082_v16 }
 0xa86   : > { %14525 = vmatprep.subr.bf16.mxu0 %v16083_v22  ;;  %14553 = vmatprep.subr.bf16.mxu1 %v16084_v44 }
 0xa89   : > { %14526 = vmatpush3.bf16.msra.mxu0 %v16085_v50  ;;  %14554 = vmatpush3.bf16.msra.mxu1 %v16086_v15 }
 0xa9e   : > { %v11187_v11 = vpop.f32.mrf.mxu0  ;;  %v11240_v37 = vpop.f32.mrf.mxu1 }
 0xa9f   : > { %v11188_v48 = vadd.f32 %v11187_v11, %v9526_v38  ;;  %v11241_v27 = vadd.f32 %v11240_v37, %v9534_v26 }
 0xaa0   : > { %v11189_v45 = vpop.f32.mrf.mxu0  ;;  %v11242_v23 = vpop.f32.mrf.mxu1 }
 0xaa1   : > { %v11190_v4 = vadd.f32 %v11189_v45, %v9530_v54  ;;  %v11243_v20 = vadd.f32 %v11242_v23, %v9538_v21  ;;  %v11271_v14 = vmax.f32 %v11188_v48, 0.0  ;;  %v11273_v17 = vmax.f32 %v11241_v27, 0.0 }
 0xaa2   : > { %v11191_v56 = vpop.f32.mrf.mxu0  ;;  %v11244_v62 = vpop.f32.mrf.mxu1 }
 0xaa3   : > { %v11192_v40 = vadd.f32 %v11191_v56, %v9526_v38  ;;  %v11245_v39 = vadd.f32 %v11244_v62, %v9534_v26  ;;  %v11272_v1 = vmax.f32 %v11190_v4, 0.0  ;;  %v11274_v34 = vmax.f32 %v11243_v20, 0.0 }
 0xaa4   : > { %v11193_v35 = vpop.f32.mrf.mxu0  ;;  %v11246_v10 = vpop.f32.mrf.mxu1 }
 0xaa5   : > { %v11194_v51 = vadd.f32 %v11193_v35, %v9530_v54  ;;  %v11287_v46 = vmax.f32 %v11192_v40, 0.0  ;;  %v11247_v63 = vadd.f32 %v11246_v10, %v9538_v21  ;;  %v11289_v31 = vmax.f32 %v11245_v39, 0.0 }
 0xaa6   : > { %v11197_v28 = vpop.f32.mrf.mxu0  ;;  %v11250_v5 = vpop.f32.mrf.mxu1 }
 0xaa7   : > { %v11288_v29 = vmax.f32 %v11194_v51, 0.0  ;;  %v11290_v9 = vmax.f32 %v11247_v63, 0.0  ;;  %v11335_v33 = vpack.c.bf16 %v11287_v46, %v11271_v14  ;;  %v11337_v6 = vpack.c.bf16 %v11289_v31, %v11273_v17 }
 0xaa8   : > { %v11199_v7 = vpop.f32.mrf.mxu0  ;;  %v11252_v8 = vpop.f32.mrf.mxu1  ;;  %v11198_v52 = vadd.f32 %v11197_v28, %v9526_v38  ;;  %v11251_v60 = vadd.f32 %v11250_v5, %v9534_v26 }
 0xaa9   : > { %v11336_v24 = vpack.c.bf16 %v11288_v29, %v11272_v1  ;;  %v11338_v13 = vpack.c.bf16 %v11290_v9, %v11274_v34  ;;  %v11200_v0 = vadd.f32 %v11199_v7, %v9530_v54  ;;  %v11253_v49 = vadd.f32 %v11252_v8, %v9538_v21 }
 0xaaa   : > { %v11201_v41 = vpop.f32.mrf.mxu0  ;;  %v11254_v55 = vpop.f32.mrf.mxu1  ;;  %v11303_v42 = vmax.f32 %v11198_v52, 0.0  ;;  %v11305_v25 = vmax.f32 %v11251_v60, 0.0 }
 0xaab   : > { %v11202_v61 = vadd.f32 %v11201_v41, %v9526_v38  ;;  %12715 = vmatprep.mubr.bf16.mxu0 %v11336_v24  ;;  %v11255_v47 = vadd.f32 %v11254_v55, %v9534_v26  ;;  %12764 = vmatprep.mubr.bf16.mxu1 %v11338_v13  ;;  %v11304_v2 = vmax.f32 %v11200_v0, 0.0  ;;  %v11306_v59 = vmax.f32 %v11253_v49, 0.0 }
 0xaac   : > { %v11203_v58 = vpop.f32.mrf.mxu0  ;;  %12716 = vmatmul.mubr.bf16.vlgmr.msra.gmra.mxu0 %v11335_v33  ;;  %v11256_v3 = vpop.f32.mrf.mxu1  ;;  %12765 = vmatmul.mubr.bf16.vlgmr.msra.gmra.mxu1 %v11337_v6 }
 0xaad   : > { %v11204_v19 = vadd.f32 %v11203_v58, %v9530_v54  ;;  %v11319_v12 = vmax.f32 %v11202_v61, 0.0  ;;  %v11257_v18 = vadd.f32 %v11256_v3, %v9538_v21  ;;  %v11321_v32 = vmax.f32 %v11255_v47, 0.0  ;;  %v11619_v6 = vpop.permute.xlu0 %11618 }
 0xaaf   : > { %v11320_v30 = vmax.f32 %v11204_v19, 0.0  ;;  %v11322_v57 = vmax.f32 %v11257_v18, 0.0  ;;  %v11351_v36 = vpack.c.bf16 %v11319_v12, %v11303_v42  ;;  %v11353_v16 = vpack.c.bf16 %v11321_v32, %v11305_v25 }
 0xab1   : > { %v11352_v53 = vpack.c.bf16 %v11320_v30, %v11304_v2  ;;  %v11354_v43 = vpack.c.bf16 %v11322_v57, %v11306_v59 }
 0xab3   : > { %12723 = vmatprep.mubr.bf16.mxu0 %v11352_v53  ;;  %12772 = vmatprep.mubr.bf16.mxu1 %v11354_v43 }
 0xab4   : > { %12724 = vmatmul.mubr.bf16.gmra.mxu0 %v11351_v36  ;;  %12773 = vmatmul.mubr.bf16.gmra.mxu1 %v11353_v16 }
 0xabe   : > { %v14359_v22 = vpop.f32.mrf.mxu0 }
 0xabf   : > { %v14387_v50 = vpop.f32.mrf.mxu1 }
 0xac0   : > { %v14360_v44 = vpop.f32.mrf.mxu0 }
 0xac1   : > { %v14388_v11 = vpop.f32.mrf.mxu1  ;;  %v14361_v41 = vadd.f32 %v14360_v44, %v14359_v22 }
 0xac2   : > { %v14362_v15 = vpop.f32.mrf.mxu0  ;;  %v14389_v47 = vadd.f32 %v14388_v11, %v14387_v50 }
 0xac3   : > { %v14390_v54 = vpop.f32.mrf.mxu1  ;;  %v12424_v55 = vadd.f32 %v14361_v41, %v11619_v6 }
 0xac4   : > { %v14363_v37 = vpop.f32.mrf.mxu0 }
 0xac5   : > { %v14391_v45 = vpop.f32.mrf.mxu1  ;;  %v14364_v52 = vadd.f32 %v14363_v37, %v14362_v15  ;;  %v12473_v12 = vadd.f32 %v14389_v47, %v12424_v55 }
 0xac6   : > { %v14365_v38 = vpop.f32.mrf.mxu0  ;;  %v14392_v2 = vadd.f32 %v14391_v45, %v14390_v54 }
 0xac7   : > { %v14393_v26 = vpop.f32.mrf.mxu1  ;;  %v12427_v3 = vadd.f32 %v14364_v52, %v11619_v6 }
 0xac8   : > { %v14366_v21 = vpop.f32.mrf.mxu0 }
 0xac9   : > { %v14394_v56 = vpop.f32.mrf.mxu1  ;;  %v14367_v60 = vadd.f32 %v14366_v21, %v14365_v38  ;;  %v12476_v25 = vadd.f32 %v14392_v2, %v12427_v3 }
 0xaca   : > { %v14368_v23 = vpop.f32.mrf.mxu0  ;;  %v14395_v59 = vadd.f32 %v14394_v56, %v14393_v26 }
 0xacb   : > { %v14396_v40 = vpop.f32.mrf.mxu1  ;;  %v12432_v42 = vadd.f32 %v14367_v60, %v11619_v6 }
 0xacc   : > { %v14369_v4 = vpop.f32.mrf.mxu0 }
 0xacd   : > { %v14397_v48 = vpop.f32.mrf.mxu1  ;;  %v14370_v53 = vadd.f32 %v14369_v4, %v14368_v23  ;;  %v12481_v15 = vadd.f32 %v14395_v59, %v12432_v42 }
 0xace   : > { %v14398_v11 = vadd.f32 %v14397_v48, %v14396_v40 }
 0xacf   : > { %v12435_v38 = vadd.f32 %v14370_v53, %v11619_v6 }
 0xaec   : > { %v14415_v62 = vpop.f32.mrf.mxu0  ;;  %v14443_v39 = vpop.f32.mrf.mxu1 }
 0xaee   : > { %v14416_v20 = vpop.f32.mrf.mxu0  ;;  %v14444_v27 = vpop.f32.mrf.mxu1 }
 0xaef   : > { %v14417_v58 = vadd.f32 %v14416_v20, %v14415_v62  ;;  %v14445_v36 = vadd.f32 %v14444_v27, %v14443_v39 }
 0xaf0   : > { %v14418_v35 = vpop.f32.mrf.mxu0  ;;  %v14446_v10 = vpop.f32.mrf.mxu1 }
 0xaf1   : > { %v12522_v32 = vadd.f32 %v14417_v58, %v12473_v12 }
 0xaf2   : > { %v14419_v51 = vpop.f32.mrf.mxu0  ;;  %v14447_v63 = vpop.f32.mrf.mxu1 }
 0xaf3   : > { %v14420_v30 = vadd.f32 %v14419_v51, %v14418_v35  ;;  %v12571_v44 = vadd.f32 %v14445_v36, %v12522_v32  ;;  %v14448_v21 = vadd.f32 %v14447_v63, %v14446_v10 }
 0xaf4   : > { %v14421_v46 = vpop.f32.mrf.mxu0  ;;  %v14449_v28 = vpop.f32.mrf.mxu1 }
 0xaf5   : > { %v12525_v50 = vadd.f32 %v14420_v30, %v12476_v25 }
 0xaf6   : > { %v14422_v1 = vpop.f32.mrf.mxu0  ;;  %v14450_v31 = vpop.f32.mrf.mxu1 }
 0xaf7   : > { %v14423_v22 = vadd.f32 %v14422_v1, %v14421_v46  ;;  %v14451_v35 = vadd.f32 %v14450_v31, %v14449_v28  ;;  %v12574_v56 = vadd.f32 %v14448_v21, %v12525_v50  ;;  %v12484_v46 = vadd.f32 %v14398_v11, %v12435_v38 }
 0xaf8   : > { %v14424_v29 = vpop.f32.mrf.mxu0  ;;  %v14452_v5 = vpop.f32.mrf.mxu1 }
 0xaf9   : > { %v12530_v20 = vadd.f32 %v14423_v22, %v12481_v15 }
 0xafa   : > { %v14425_v14 = vpop.f32.mrf.mxu0  ;;  %v14453_v9 = vpop.f32.mrf.mxu1 }
 0xafb   : > { %v14426_v51 = vadd.f32 %v14425_v14, %v14424_v29  ;;  %v12579_v48 = vadd.f32 %v14451_v35, %v12530_v20  ;;  %v14454_v41 = vadd.f32 %v14453_v9, %v14452_v5 }
 0xafd   : > { %v12533_v63 = vadd.f32 %v14426_v51, %v12484_v46 }
 0xaff   : > { %v12582_v58 = vadd.f32 %v14454_v41, %v12533_v63 }
 0xb2c   : > { %v14471_v34 = vpop.f32.mrf.mxu0  ;;  %v14499_v7 = vpop.f32.mrf.mxu1 }
 0xb2e   : > { %v14472_v17 = vpop.f32.mrf.mxu0  ;;  %v14500_v24 = vpop.f32.mrf.mxu1 }
 0xb2f   : > { %v14473_v43 = vadd.f32 %v14472_v17, %v14471_v34  ;;  %v14501_v23 = vadd.f32 %v14500_v24, %v14499_v7 }
 0xb30   : > { %v14474_v8 = vpop.f32.mrf.mxu0  ;;  %v14502_v33 = vpop.f32.mrf.mxu1 }
 0xb31   : > { %v12620_v62 = vadd.f32 %v14473_v43, %v12571_v44 }
 0xb32   : > { %v14475_v13 = vpop.f32.mrf.mxu0  ;;  %v14503_v0 = vpop.f32.mrf.mxu1 }
 0xb33   : > { %v14476_v54 = vadd.f32 %v14475_v13, %v14474_v8  ;;  %v12669_v1 = vadd.f32 %v14501_v23, %v12620_v62  ;;  %v14504_v8 = vadd.f32 %v14503_v0, %v14502_v33 }
 0xb34   : > { %v14477_v61 = vpop.f32.mrf.mxu0  ;;  %v14505_v49 = vpop.f32.mrf.mxu1 }
 0xb35   : > { %v12623_v34 = vadd.f32 %v14476_v54, %v12574_v56 }
 0xb36   : > { %v14478_v19 = vpop.f32.mrf.mxu0  ;;  %v14506_v18 = vpop.f32.mrf.mxu1 }
 0xb37   : > { %v14479_v39 = vadd.f32 %v14478_v19, %v14477_v61  ;;  %v14507_v55 = vadd.f32 %v14506_v18, %v14505_v49  ;;  %v12672_v14 = vadd.f32 %v14504_v8, %v12623_v34 }
 0xb38   : > { %v14480_v57 = vpop.f32.mrf.mxu0  ;;  %v14508_v16 = vpop.f32.mrf.mxu1 }
 0xb39   : > { %v12628_v31 = vadd.f32 %v14479_v39, %v12579_v48 }
 0xb3a   : > { %v14481_v37 = vpop.f32.mrf.mxu0  ;;  %v14509_v45 = vpop.f32.mrf.mxu1 }
 0xb3b   : > { %v14482_v7 = vadd.f32 %v14481_v37, %v14480_v57  ;;  %v12677_v33 = vadd.f32 %v14507_v55, %v12628_v31  ;;  %v14510_v3 = vadd.f32 %v14509_v45, %v14508_v16 }
 0xb3d   : > { %v12631_v19 = vadd.f32 %v14482_v7, %v12582_v58 }
 0xb3f   : > { %v12680_v57 = vadd.f32 %v14510_v3, %v12631_v19 }
 0xb6c   : > { %v14527_v26 = vpop.f32.mrf.mxu0  ;;  %v14555_v4 = vpop.f32.mrf.mxu1 }
 0xb6e   : > { %v14528_v27 = vpop.f32.mrf.mxu0  ;;  %v14556_v40 = vpop.f32.mrf.mxu1 }
 0xb6f   : > { %v14529_v17 = vadd.f32 %v14528_v27, %v14527_v26  ;;  %v14557_v6 = vadd.f32 %v14556_v40, %v14555_v4 }
 0xb70   : > { %v14530_v10 = vpop.f32.mrf.mxu0  ;;  %v14558_v28 = vpop.f32.mrf.mxu1 }
 0xb71   : > { %v12718_v13 = vadd.f32 %v14529_v17, %v12669_v1 }
 0xb72   : > { %v14531_v29 = vpop.f32.mrf.mxu0  ;;  %v14559_v52 = vpop.f32.mrf.mxu1 }
 0xb73   : > { %v12767_v24 = vadd.f32 %v14557_v6, %v12718_v13  ;;  %v14532_v61 = vadd.f32 %v14531_v29, %v14530_v10  ;;  %v14560_v9 = vadd.f32 %v14559_v52, %v14558_v28 }
 0xb74   : > { %v14533_v47 = vpop.f32.mrf.mxu0  ;;  %v14561_v60 = vpop.f32.mrf.mxu1 }
 0xb75   : > { %12782 = vst.msk [vmem:[#allocation18] sm:$0xff] %vm12781_vm11, %v12767_v24  ;;  %v12721_v5 = vadd.f32 %v14532_v61, %v12672_v14 }
 0xb76   : > { %v14534_v0 = vpop.f32.mrf.mxu0  ;;  %v14562_v18 = vpop.f32.mrf.mxu1 }
 0xb77   : > { %v12770_v12 = vadd.f32 %v14560_v9, %v12721_v5  ;;  %v14535_v49 = vadd.f32 %v14534_v0, %v14533_v47  ;;  %v14563_v30 = vadd.f32 %v14562_v18, %v14561_v60 }
 0xb78   : > { %v14536_v2 = vpop.f32.mrf.mxu0  ;;  %v14564_v42 = vpop.f32.mrf.mxu1 }
 0xb79   : > { %12783 = vst.msk [vmem:[#allocation18 + $0x8] sm:$0xff] %vm12781_vm11, %v12770_v12  ;;  %v12726_v32 = vadd.f32 %v14535_v49, %v12677_v33 }
 0xb7a   : > { %v14537_v59 = vpop.f32.mrf.mxu0  ;;  %v14565_v36 = vpop.f32.mrf.mxu1 }
 0xb7b   : > { %v12775_v25 = vadd.f32 %v14563_v30, %v12726_v32  ;;  %v14538_v53 = vadd.f32 %v14537_v59, %v14536_v2  ;;  %v14566_v22 = vadd.f32 %v14565_v36, %v14564_v42 }
 0xb7d   : > { %12784 = vst.msk [vmem:[#allocation18 + $0x10] sm:$0xff] %vm12781_vm11, %v12775_v25  ;;  %v12729_v43 = vadd.f32 %v14538_v53, %v12680_v57 }
 0xb7f   : > { %v12778_v44 = vadd.f32 %v14566_v22, %v12729_v43 }
 0xb81   : > { %12785 = vst.msk [vmem:[#allocation18 + $0x18] sm:$0xff] %vm12781_vm11, %v12778_v44 }
 0xb82 PF: > { %p14639_p2 = scmp.eq.s32.totalorder %s16485_s10, 3  ;;  %s16400_s24 = smov [#allocation18]  }
 0xb83   : > { %s12792_s17 = sshll.u32 %s16400_s24, 4  ;;  %s12793_s17 = int_to_ptr.vmem [resolvable:$true] %s12792_s17 }
 0xb84   : > { %s16303_s9 = scalar_lea.vmem %s12793_s17, 512  ;;  %p16310_p7 = scmp.lt.s32.totalorder %s12793_s17, %s12793_s17 }
 0xb85   : > { %p16304_p13 = scmp.ne.s32.totalorder %s12793_s17, %s16303_s9  ;;  %p16311_p1 = scmp.lt.s32.totalorder %s16303_s9, %s16303_s9 }
 0xb87   : > { %p16305_p3 = pnand %p16304_p13, %p14639_p2  ;;  %p16312_p0 = por %p16311_p1, %p16310_p7 }
 0xb89   : > { %p16306_p6 = pneg %p16305_p3 }
 0xb8b   : > { %p16313_p4 = pnand %p16312_p0, %p16306_p6 }
 0xb8d   : > { %16316 = shalt.err (!%p16313_p4)
}
 0xb8e   : > { %s16401_s28 = smov 128   ;;  %s16402_s22 = smov 8  }
 0xb8f   : > { %s19423_s15 = sld [smem:[#allocation48_spill]] }
 0xb95   : > { %14601 = dma.vmem_to_hbm [thread:$0]  (%p14639_p2), %s12793_s17, 512, %s19423_s15, [#allocation8], %s16401_s28, %s16401_s28, %s16402_s22  }
 0xb96   : > { %16364 = dma.done.wait (%p14639_p2), [#allocation8], 512  }
 0xb97   : > { %16366 = vsyncadd (%p14639_p2), [#allocation8], 4294966784 }
 0xb98 PF: > { %s19424_s22 = sld [smem:[#allocation26_spill]]  ;;  %s19427_s19 = smov %s16373_s20 }
 0xb99   : > { %s19425_s16 = sld [smem:[#allocation25_spill]] }
 0xb9a   : > { %s19426_s21 = sld [smem:[#allocation27_spill]] }
 0xb9e   : > { %p24_p5 = scmp.ge.s32.totalorder %s19424_s22, 6  }
 0xb9f   : > { %s19428_s20 = smov %s19425_s16 }
 0xba0   :  { %26 = sbr.rel (!%p24_p5) target bundleno = 10 (0xa), region = 161 }
 0xba5   :  { %12808 = vsyncpa [#allocation7], 1 }
 0xba6   :  { %12810 = vsyncpa [#allocation7 + $0x1], 1 }
 0xba7   :  { %12811 = vsyncpa [#allocation10], 1 }
 0xba8   :  { %12812 = vsyncpa [#allocation17], 1 }
 0xba9   :  { %12813 = vsyncpa [#allocation8], 1 }
 0xbaa   :  { %12815 = vsyncpa [#allocation8 + $0x1], 1 }

</bundles_post_ra>
